<compile_context>
chip_gen: v7x
topology: tpu7x:2x2x1
jax: 0.10.0
libtpu: 0.0.40
codegen_flags: <defaults>
</compile_context>

<pallas_src>
import numpy as np

import jax
import jax.numpy as jnp
from jax.experimental import pallas as pl
from jax.experimental.pallas import tpu as pltpu

NEG_SLOPE = 0.01   # nn.LeakyReLU default
BN_EPS = 1e-5      # nn.BatchNorm1d default

EMBEDDING_DIM = 4
OUTPUT_DIM = 3755
SEQ_LEN = 320      # 320 -> 160 -> 80 -> 40 -> 20 -> 10 -> 5 ; 16*5 = 80 = fc1 in
CONV_CHANNELS = [EMBEDDING_DIM, 32, 64, 128, 64, 32, 16]
N_LAYERS = 6
KSIZE, STRIDE, PAD = 7, 2, 3
SEQ_LENS = [SEQ_LEN // (2 ** i) for i in range(N_LAYERS + 1)]  # [320,160,...,5]


# -----------------------------------------------------------------------------
# Fused kernel: all 6 conv layers + flatten + fc1 + fc2 in one pallas_call.
# -----------------------------------------------------------------------------
def _fused_cnn_kernel(*refs):
    # Inputs (all full VMEM blocks):
    #   refs[0]      : xcat1  (B*L1, 7*C0)      layer-1 im2col (built in wrapper)
    #   refs[1:7]    : wcat_i (7*C_in, C_out)   per-layer im2col weights
    #   refs[7:13]   : sc_i   (1, C_out)        folded BN scale
    #   refs[13:19]  : sh_i   (1, C_out)        folded BN shift (incl. conv bias)
    #   refs[19:24]  : g_i    (7, B*L_i, B*L_{i-1})  one-hot shift/stride selectors
    #   refs[24]     : smat   (5, B, B*5)       one-hot flatten selectors
    #   refs[25]     : w1     (80, 40)          fc1 weight (rows permuted to l-major)
    #   refs[26]     : b1     (1, 40)
    #   refs[27]     : w2     (40, 3840)        fc2 weight, lane-padded
    #   refs[28]     : b2     (1, 3840)
    #   refs[29]     : o_ref  (B, 3840)         output
    xcat1_ref = refs[0]
    wcat_refs = refs[1:7]
    sc_refs = refs[7:13]
    sh_refs = refs[13:19]
    g_refs = refs[19:24]
    smat_ref = refs[24]
    w1_ref = refs[25]
    b1_ref = refs[26]
    w2_ref = refs[27]
    b2_ref = refs[28]
    o_ref = refs[29]

    def bn_lrelu(acc, i):
        y = acc * sc_refs[i][...] + sh_refs[i][...]
        return jnp.where(y > 0, y, NEG_SLOPE * y)

    # ---- conv1: wrapper-built im2col -> one wide-K matmul ----
    y = jnp.dot(xcat1_ref[...], wcat_refs[0][...],
                preferred_element_type=jnp.float32)
    y = bn_lrelu(y, 0)                                   # (B*160, 32)

    # ---- conv2..conv6: in-VMEM im2col via one-hot selection matmuls ----
    # col_k[r, c] = y_prev[2l + k - 3, c] (zero outside range), r = b*L_i + l.
    for i in range(1, N_LAYERS):
        g = g_refs[i - 1]
        cols = [jnp.dot(g[k], y, preferred_element_type=jnp.float32)
                for k in range(KSIZE)]
        xcat = jnp.concatenate(cols, axis=-1)            # (B*L_i, 7*C_{i-1})
        y = jnp.dot(xcat, wcat_refs[i][...],
                    preferred_element_type=jnp.float32)  # (B*L_i, C_i)
        y = bn_lrelu(y, i)

    # ---- flatten (PyTorch channel-major order folded into w1) + fc1 + fc2 ----
    # feat[b, l*16 + c] = y6[b*5 + l, c]; w1 rows are permuted to match.
    feat = jnp.concatenate(
        [jnp.dot(smat_ref[l], y, preferred_element_type=jnp.float32)
         for l in range(SEQ_LENS[-1])], axis=-1)         # (B, 80)
    h = jnp.dot(feat, w1_ref[...], preferred_element_type=jnp.float32) + b1_ref[...]
    logits = jnp.dot(h, w2_ref[...], preferred_element_type=jnp.float32) + b2_ref[...]
    o_ref[...] = logits.astype(o_ref.dtype)              # (B, 3840) lane-dense store


# -----------------------------------------------------------------------------
# One-hot selector construction (static, built once at init).
# -----------------------------------------------------------------------------
def _make_shift_mats(l_in, l_out, batch):
    """(7, B*l_out, B*l_in); mats[k] @ y picks y[b, 2l+k-3] (0 when out of range)."""
    mats = np.zeros((KSIZE, batch * l_out, batch * l_in), np.float32)
    for k in range(KSIZE):
        for b in range(batch):
            for l in range(l_out):
                src = STRIDE * l + k - PAD
                if 0 <= src < l_in:
                    mats[k, b * l_out + l, b * l_in + src] = 1.0
    return jnp.asarray(mats)


def _make_flatten_mats(batch, l_last):
    """(l_last, B, B*l_last); mats[l] @ y6 picks row b*l_last + l for each b."""
    mats = np.zeros((l_last, batch, batch * l_last), np.float32)
    for l in range(l_last):
        for b in range(batch):
            mats[l, b, b * l_last + l] = 1.0
    return jnp.asarray(mats)


# -----------------------------------------------------------------------------
# Parameters (deterministic, synthetic — no checkpoint loading)
# -----------------------------------------------------------------------------
def init_params(key, output_dim=OUTPUT_DIM, embedding_dim=EMBEDDING_DIM):
    chans = CONV_CHANNELS
    params = {"convs": []}
    for i in range(N_LAYERS):
        key, kw, kb = jax.random.split(key, 3)
        c_in, c_out = chans[i], chans[i + 1]
        bound = 1.0 / float(c_in * KSIZE) ** 0.5
        w = jax.random.uniform(kw, (c_out, c_in, KSIZE), jnp.float32, -bound, bound)
        b = jax.random.uniform(kb, (c_out,), jnp.float32, -bound, bound)
        gamma = jnp.ones((c_out,), jnp.float32)
        beta = jnp.zeros((c_out,), jnp.float32)
        rmean = jnp.zeros((c_out,), jnp.float32)
        rvar = jnp.ones((c_out,), jnp.float32)
        scale = gamma / jnp.sqrt(rvar + BN_EPS)
        shift = beta + (b - rmean) * scale
        params["convs"].append((w, scale, shift))

    key, k1w, k1b, k2w, k2b = jax.random.split(key, 5)
    b1_bound = 1.0 / float(80) ** 0.5
    b2_bound = 1.0 / float(40) ** 0.5
    params["w1"] = jax.random.uniform(k1w, (80, 40), jnp.float32, -b1_bound, b1_bound)
    params["b1"] = jax.random.uniform(k1b, (40,), jnp.float32, -b1_bound, b1_bound)
    params["w2"] = jax.random.uniform(k2w, (40, output_dim), jnp.float32, -b2_bound, b2_bound)
    params["b2"] = jax.random.uniform(k2b, (output_dim,), jnp.float32, -b2_bound, b2_bound)
    return params


def pack_params(params, batch):
    """Pre-pack all constants the fused kernel consumes (done once, not per call)."""
    packed = {"wcat": [], "scale": [], "shift": []}
    for (w, scale, shift) in params["convs"]:
        c_out, c_in, ksz = w.shape
        # wcat[k*C_in + c, o] = w[o, c, k]  (matches the im2col column ordering)
        packed["wcat"].append(jnp.transpose(w, (2, 1, 0)).reshape(ksz * c_in, c_out))
        packed["scale"].append(scale.reshape(1, c_out))
        packed["shift"].append(shift.reshape(1, c_out))

    packed["gmats"] = [_make_shift_mats(SEQ_LENS[i], SEQ_LENS[i + 1], batch)
                       for i in range(1, N_LAYERS)]
    packed["smat"] = _make_flatten_mats(batch, SEQ_LENS[-1])

    # fc1: kernel builds features in (l-major, c-minor) order; PyTorch flattens
    # (C, L) channel-major -> permute fc1 rows so the result is identical.
    c_last, l_last = CONV_CHANNELS[-1], SEQ_LENS[-1]
    perm = np.asarray([c * l_last + l for l in range(l_last) for c in range(c_last)])
    packed["w1"] = params["w1"][perm, :]
    packed["b1"] = params["b1"].reshape(1, -1)

    # fc2: pad N from 3755 to 3840 (next multiple of 128) for lane-dense stores.
    out_dim = params["w2"].shape[1]
    n_pad = ((out_dim + 127) // 128) * 128
    packed["w2"] = jnp.pad(params["w2"], ((0, 0), (0, n_pad - out_dim)))
    packed["b2"] = jnp.pad(params["b2"], (0, n_pad - out_dim)).reshape(1, -1)
    return packed


# -----------------------------------------------------------------------------
# Forward pass: one fused pallas_call.
# -----------------------------------------------------------------------------
@jax.jit
def cnn_forward(x_ncl, packed):
    """x_ncl: (B, embedding_dim, L) in PyTorch NCL layout."""
    B, c0, L0 = x_ncl.shape
    assert c0 == CONV_CHANNELS[0] and L0 == SEQ_LEN
    assert packed["smat"].shape[1] == B
    L1 = L0 // 2

    # Layer-1 im2col (tiny, a handful of XLA glue ops on the raw input):
    # xcat1[b*L1 + l, k*c0 + c] = x[b, c, 2l + k - 3]  (zero padded).
    x_nlc = jnp.transpose(x_ncl, (0, 2, 1))                     # (B, L, C)
    x_pad = jnp.pad(x_nlc, ((0, 0), (PAD, PAD), (0, 0)))        # (B, L+6, C)
    cols = [x_pad[:, k:k + STRIDE * L1:STRIDE, :] for k in range(KSIZE)]
    xcat1 = jnp.concatenate(cols, axis=-1).reshape(B * L1, KSIZE * c0)

    inputs = ([xcat1] + packed["wcat"] + packed["scale"] + packed["shift"]
              + packed["gmats"]
              + [packed["smat"], packed["w1"], packed["b1"],
                 packed["w2"], packed["b2"]])

    n_pad = packed["w2"].shape[1]
    in_specs = [pl.BlockSpec(a.shape, lambda i, nd=a.ndim: (0,) * nd) for a in inputs]

    out = pl.pallas_call(
        _fused_cnn_kernel,
        out_shape=jax.ShapeDtypeStruct((B, n_pad), jnp.float32),
        grid=(1,),
        in_specs=in_specs,
        out_specs=pl.BlockSpec((B, n_pad), lambda i: (0, 0)),
        compiler_params=pltpu.CompilerParams(dimension_semantics=("arbitrary",)),
    )(*inputs)
    return out[:, :OUTPUT_DIM]


# -----------------------------------------------------------------------------
# Pure-JAX reference (for a correctness sanity check)
# -----------------------------------------------------------------------------
@jax.jit
def cnn_reference(x_ncl, params):
    x = x_ncl
    for (w, scale, shift) in params["convs"]:
        y = jax.lax.conv_general_dilated(
            x, w, window_strides=(STRIDE,), padding=[(PAD, PAD)],
            dimension_numbers=("NCH", "OIH", "NCH"))
        y = y * scale[None, :, None] + shift[None, :, None]
        x = jnp.where(y > 0, y, NEG_SLOPE * y)
    B = x.shape[0]
    feat = x.reshape(B, -1)
    h = feat @ params["w1"] + params["b1"]
    return h @ params["w2"] + params["b2"]


if __name__ == "__main__":
    key = jax.random.PRNGKey(0)
    key, kx, kp = jax.random.split(key, 3)

    batch = 2
    params = init_params(kp)
    packed = pack_params(params, batch)

    # Input (NCL, like PyTorch): batch=2, channels=embedding_dim=4, seq=320.
    x = jax.random.normal(kx, (batch, EMBEDDING_DIM, SEQ_LEN), jnp.float32)

    out = jax.block_until_ready(cnn_forward(x, packed))
    assert out.shape == (batch, OUTPUT_DIM), out.shape

    ref = jax.block_until_ready(cnn_reference(x, params))
    err = float(jnp.max(jnp.abs(out - ref)))
    assert jnp.allclose(out, ref, rtol=1e-2, atol=1e-2), err

    print("KERNEL_OK")
</pallas_src>

<mosaic_0001>
module attributes {stable_mosaic.version = 11 : i64} {
  func.func @_fused_cnn_kernel(%arg0: i32, %arg1: memref<320x28xf32, #tpu.memory_space<vmem>>, %arg2: memref<28x32xf32, #tpu.memory_space<vmem>>, %arg3: memref<224x64xf32, #tpu.memory_space<vmem>>, %arg4: memref<448x128xf32, #tpu.memory_space<vmem>>, %arg5: memref<896x64xf32, #tpu.memory_space<vmem>>, %arg6: memref<448x32xf32, #tpu.memory_space<vmem>>, %arg7: memref<224x16xf32, #tpu.memory_space<vmem>>, %arg8: memref<1x32xf32, #tpu.memory_space<vmem>>, %arg9: memref<1x64xf32, #tpu.memory_space<vmem>>, %arg10: memref<1x128xf32, #tpu.memory_space<vmem>>, %arg11: memref<1x64xf32, #tpu.memory_space<vmem>>, %arg12: memref<1x32xf32, #tpu.memory_space<vmem>>, %arg13: memref<1x16xf32, #tpu.memory_space<vmem>>, %arg14: memref<1x32xf32, #tpu.memory_space<vmem>>, %arg15: memref<1x64xf32, #tpu.memory_space<vmem>>, %arg16: memref<1x128xf32, #tpu.memory_space<vmem>>, %arg17: memref<1x64xf32, #tpu.memory_space<vmem>>, %arg18: memref<1x32xf32, #tpu.memory_space<vmem>>, %arg19: memref<1x16xf32, #tpu.memory_space<vmem>>, %arg20: memref<7x160x320xf32, #tpu.memory_space<vmem>>, %arg21: memref<7x80x160xf32, #tpu.memory_space<vmem>>, %arg22: memref<7x40x80xf32, #tpu.memory_space<vmem>>, %arg23: memref<7x20x40xf32, #tpu.memory_space<vmem>>, %arg24: memref<7x10x20xf32, #tpu.memory_space<vmem>>, %arg25: memref<5x2x10xf32, #tpu.memory_space<vmem>>, %arg26: memref<80x40xf32, #tpu.memory_space<vmem>>, %arg27: memref<1x40xf32, #tpu.memory_space<vmem>>, %arg28: memref<40x3840xf32, #tpu.memory_space<vmem>>, %arg29: memref<1x3840xf32, #tpu.memory_space<vmem>>, %arg30: memref<2x3840xf32, #tpu.memory_space<vmem>>) attributes {dimension_semantics = [#tpu.dimension_semantics<arbitrary>], iteration_bounds = array<i64: 1>, scalar_prefetch = 0 : i64, scratch_operands = 0 : i64, tpu.core_type = #tpu.core_type<tc>, window_params = [{pipeline_mode = #tpu.pipeline_mode<synchronous>, transform_indices = @transform_0, window_bounds = array<i64: 320, 28>}, {pipeline_mode = #tpu.pipeline_mode<synchronous>, transform_indices = @transform_1, window_bounds = array<i64: 28, 32>}, {pipeline_mode = #tpu.pipeline_mode<synchronous>, transform_indices = @transform_2, window_bounds = array<i64: 224, 64>}, {pipeline_mode = #tpu.pipeline_mode<synchronous>, transform_indices = @transform_3, window_bounds = array<i64: 448, 128>}, {pipeline_mode = #tpu.pipeline_mode<synchronous>, transform_indices = @transform_4, window_bounds = array<i64: 896, 64>}, {pipeline_mode = #tpu.pipeline_mode<synchronous>, transform_indices = @transform_5, window_bounds = array<i64: 448, 32>}, {pipeline_mode = #tpu.pipeline_mode<synchronous>, transform_indices = @transform_6, window_bounds = array<i64: 224, 16>}, {pipeline_mode = #tpu.pipeline_mode<synchronous>, transform_indices = @transform_7, window_bounds = array<i64: 1, 32>}, {pipeline_mode = #tpu.pipeline_mode<synchronous>, transform_indices = @transform_8, window_bounds = array<i64: 1, 64>}, {pipeline_mode = #tpu.pipeline_mode<synchronous>, transform_indices = @transform_9, window_bounds = array<i64: 1, 128>}, {pipeline_mode = #tpu.pipeline_mode<synchronous>, transform_indices = @transform_10, window_bounds = array<i64: 1, 64>}, {pipeline_mode = #tpu.pipeline_mode<synchronous>, transform_indices = @transform_11, window_bounds = array<i64: 1, 32>}, {pipeline_mode = #tpu.pipeline_mode<synchronous>, transform_indices = @transform_12, window_bounds = array<i64: 1, 16>}, {pipeline_mode = #tpu.pipeline_mode<synchronous>, transform_indices = @transform_13, window_bounds = array<i64: 1, 32>}, {pipeline_mode = #tpu.pipeline_mode<synchronous>, transform_indices = @transform_14, window_bounds = array<i64: 1, 64>}, {pipeline_mode = #tpu.pipeline_mode<synchronous>, transform_indices = @transform_15, window_bounds = array<i64: 1, 128>}, {pipeline_mode = #tpu.pipeline_mode<synchronous>, transform_indices = @transform_16, window_bounds = array<i64: 1, 64>}, {pipeline_mode = #tpu.pipeline_mode<synchronous>, transform_indices = @transform_17, window_bounds = array<i64: 1, 32>}, {pipeline_mode = #tpu.pipeline_mode<synchronous>, transform_indices = @transform_18, window_bounds = array<i64: 1, 16>}, {pipeline_mode = #tpu.pipeline_mode<synchronous>, transform_indices = @transform_19, window_bounds = array<i64: 7, 160, 320>}, {pipeline_mode = #tpu.pipeline_mode<synchronous>, transform_indices = @transform_20, window_bounds = array<i64: 7, 80, 160>}, {pipeline_mode = #tpu.pipeline_mode<synchronous>, transform_indices = @transform_21, window_bounds = array<i64: 7, 40, 80>}, {pipeline_mode = #tpu.pipeline_mode<synchronous>, transform_indices = @transform_22, window_bounds = array<i64: 7, 20, 40>}, {pipeline_mode = #tpu.pipeline_mode<synchronous>, transform_indices = @transform_23, window_bounds = array<i64: 7, 10, 20>}, {pipeline_mode = #tpu.pipeline_mode<synchronous>, transform_indices = @transform_24, window_bounds = array<i64: 5, 2, 10>}, {pipeline_mode = #tpu.pipeline_mode<synchronous>, transform_indices = @transform_25, window_bounds = array<i64: 80, 40>}, {pipeline_mode = #tpu.pipeline_mode<synchronous>, transform_indices = @transform_26, window_bounds = array<i64: 1, 40>}, {pipeline_mode = #tpu.pipeline_mode<synchronous>, transform_indices = @transform_27, window_bounds = array<i64: 40, 3840>}, {pipeline_mode = #tpu.pipeline_mode<synchronous>, transform_indices = @transform_28, window_bounds = array<i64: 1, 3840>}, {pipeline_mode = #tpu.pipeline_mode<synchronous>, transform_indices = @transform_29, window_bounds = array<i64: 2, 3840>}]} {
    %c0 = arith.constant 0 : index
    %c0_0 = arith.constant 0 : index
    %0 = vector.load %arg1[%c0, %c0_0] : memref<320x28xf32, #tpu.memory_space<vmem>>, vector<320x28xf32>
    %c0_1 = arith.constant 0 : index
    %c0_2 = arith.constant 0 : index
    %1 = vector.load %arg2[%c0_1, %c0_2] : memref<28x32xf32, #tpu.memory_space<vmem>>, vector<28x32xf32>
    %cst = arith.constant dense<0.000000e+00> : vector<320x32xf32>
    %2 = tpu.matmul %0, %1, %cst {dimension_numbers = #tpu.dot_dimension_numbers<[1], [0], [0], [1], [0, 0, 1, 1], [], []>} : vector<320x28xf32>, vector<28x32xf32>, vector<320x32xf32> -> vector<320x32xf32>
    %c0_3 = arith.constant 0 : index
    %c0_4 = arith.constant 0 : index
    %3 = vector.load %arg8[%c0_3, %c0_4] : memref<1x32xf32, #tpu.memory_space<vmem>>, vector<1x32xf32>
    %4 = vector.broadcast %3 : vector<1x32xf32> to vector<320x32xf32>
    %5 = arith.mulf %2, %4 : vector<320x32xf32>
    %c0_5 = arith.constant 0 : index
    %c0_6 = arith.constant 0 : index
    %6 = vector.load %arg14[%c0_5, %c0_6] : memref<1x32xf32, #tpu.memory_space<vmem>>, vector<1x32xf32>
    %7 = vector.broadcast %6 : vector<1x32xf32> to vector<320x32xf32>
    %8 = arith.addf %5, %7 : vector<320x32xf32>
    %cst_7 = arith.constant 0.000000e+00 : f32
    %9 = vector.broadcast %cst_7 : f32 to vector<320x32xf32>
    %10 = arith.cmpf ogt, %8, %9 : vector<320x32xf32>
    %cst_8 = arith.constant 0.00999999977 : f32
    %11 = vector.broadcast %cst_8 : f32 to vector<320x32xf32>
    %12 = arith.mulf %11, %8 : vector<320x32xf32>
    %13 = arith.select %10, %8, %12 : vector<320x32xi1>, vector<320x32xf32>
    %c0_9 = arith.constant 0 : index
    %c0_10 = arith.constant 0 : index
    %c0_11 = arith.constant 0 : index
    %14 = vector.load %arg20[%c0_9, %c0_10, %c0_11] : memref<7x160x320xf32, #tpu.memory_space<vmem>>, vector<1x160x320xf32>
    %15 = vector.shape_cast %14 : vector<1x160x320xf32> to vector<160x320xf32>
    %cst_12 = arith.constant dense<0.000000e+00> : vector<160x32xf32>
    %16 = tpu.matmul %15, %13, %cst_12 {dimension_numbers = #tpu.dot_dimension_numbers<[1], [0], [0], [1], [0, 0, 1, 1], [], []>} : vector<160x320xf32>, vector<320x32xf32>, vector<160x32xf32> -> vector<160x32xf32>
    %c1 = arith.constant 1 : index
    %c0_13 = arith.constant 0 : index
    %c0_14 = arith.constant 0 : index
    %17 = vector.load %arg20[%c1, %c0_13, %c0_14] : memref<7x160x320xf32, #tpu.memory_space<vmem>>, vector<1x160x320xf32>
    %18 = vector.shape_cast %17 : vector<1x160x320xf32> to vector<160x320xf32>
    %cst_15 = arith.constant dense<0.000000e+00> : vector<160x32xf32>
    %19 = tpu.matmul %18, %13, %cst_15 {dimension_numbers = #tpu.dot_dimension_numbers<[1], [0], [0], [1], [0, 0, 1, 1], [], []>} : vector<160x320xf32>, vector<320x32xf32>, vector<160x32xf32> -> vector<160x32xf32>
    %c2 = arith.constant 2 : index
    %c0_16 = arith.constant 0 : index
    %c0_17 = arith.constant 0 : index
    %20 = vector.load %arg20[%c2, %c0_16, %c0_17] : memref<7x160x320xf32, #tpu.memory_space<vmem>>, vector<1x160x320xf32>
    %21 = vector.shape_cast %20 : vector<1x160x320xf32> to vector<160x320xf32>
    %cst_18 = arith.constant dense<0.000000e+00> : vector<160x32xf32>
    %22 = tpu.matmul %21, %13, %cst_18 {dimension_numbers = #tpu.dot_dimension_numbers<[1], [0], [0], [1], [0, 0, 1, 1], [], []>} : vector<160x320xf32>, vector<320x32xf32>, vector<160x32xf32> -> vector<160x32xf32>
    %c3 = arith.constant 3 : index
    %c0_19 = arith.constant 0 : index
    %c0_20 = arith.constant 0 : index
    %23 = vector.load %arg20[%c3, %c0_19, %c0_20] : memref<7x160x320xf32, #tpu.memory_space<vmem>>, vector<1x160x320xf32>
    %24 = vector.shape_cast %23 : vector<1x160x320xf32> to vector<160x320xf32>
    %cst_21 = arith.constant dense<0.000000e+00> : vector<160x32xf32>
    %25 = tpu.matmul %24, %13, %cst_21 {dimension_numbers = #tpu.dot_dimension_numbers<[1], [0], [0], [1], [0, 0, 1, 1], [], []>} : vector<160x320xf32>, vector<320x32xf32>, vector<160x32xf32> -> vector<160x32xf32>
    %c4 = arith.constant 4 : index
    %c0_22 = arith.constant 0 : index
    %c0_23 = arith.constant 0 : index
    %26 = vector.load %arg20[%c4, %c0_22, %c0_23] : memref<7x160x320xf32, #tpu.memory_space<vmem>>, vector<1x160x320xf32>
    %27 = vector.shape_cast %26 : vector<1x160x320xf32> to vector<160x320xf32>
    %cst_24 = arith.constant dense<0.000000e+00> : vector<160x32xf32>
    %28 = tpu.matmul %27, %13, %cst_24 {dimension_numbers = #tpu.dot_dimension_numbers<[1], [0], [0], [1], [0, 0, 1, 1], [], []>} : vector<160x320xf32>, vector<320x32xf32>, vector<160x32xf32> -> vector<160x32xf32>
    %c5 = arith.constant 5 : index
    %c0_25 = arith.constant 0 : index
    %c0_26 = arith.constant 0 : index
    %29 = vector.load %arg20[%c5, %c0_25, %c0_26] : memref<7x160x320xf32, #tpu.memory_space<vmem>>, vector<1x160x320xf32>
    %30 = vector.shape_cast %29 : vector<1x160x320xf32> to vector<160x320xf32>
    %cst_27 = arith.constant dense<0.000000e+00> : vector<160x32xf32>
    %31 = tpu.matmul %30, %13, %cst_27 {dimension_numbers = #tpu.dot_dimension_numbers<[1], [0], [0], [1], [0, 0, 1, 1], [], []>} : vector<160x320xf32>, vector<320x32xf32>, vector<160x32xf32> -> vector<160x32xf32>
    %c6 = arith.constant 6 : index
    %c0_28 = arith.constant 0 : index
    %c0_29 = arith.constant 0 : index
    %32 = vector.load %arg20[%c6, %c0_28, %c0_29] : memref<7x160x320xf32, #tpu.memory_space<vmem>>, vector<1x160x320xf32>
    %33 = vector.shape_cast %32 : vector<1x160x320xf32> to vector<160x320xf32>
    %cst_30 = arith.constant dense<0.000000e+00> : vector<160x32xf32>
    %34 = tpu.matmul %33, %13, %cst_30 {dimension_numbers = #tpu.dot_dimension_numbers<[1], [0], [0], [1], [0, 0, 1, 1], [], []>} : vector<160x320xf32>, vector<320x32xf32>, vector<160x32xf32> -> vector<160x32xf32>
    %35 = tpu.concatenate %16, %19, %22, %25, %28, %31, %34 in 1 : vector<160x32xf32>, vector<160x32xf32>, vector<160x32xf32>, vector<160x32xf32>, vector<160x32xf32>, vector<160x32xf32>, vector<160x32xf32> -> vector<160x224xf32>
    %c0_31 = arith.constant 0 : index
    %c0_32 = arith.constant 0 : index
    %36 = vector.load %arg3[%c0_31, %c0_32] : memref<224x64xf32, #tpu.memory_space<vmem>>, vector<224x64xf32>
    %cst_33 = arith.constant dense<0.000000e+00> : vector<160x64xf32>
    %37 = tpu.matmul %35, %36, %cst_33 {dimension_numbers = #tpu.dot_dimension_numbers<[1], [0], [0], [1], [0, 0, 1, 1], [], []>} : vector<160x224xf32>, vector<224x64xf32>, vector<160x64xf32> -> vector<160x64xf32>
    %c0_34 = arith.constant 0 : index
    %c0_35 = arith.constant 0 : index
    %38 = vector.load %arg9[%c0_34, %c0_35] : memref<1x64xf32, #tpu.memory_space<vmem>>, vector<1x64xf32>
    %39 = vector.broadcast %38 : vector<1x64xf32> to vector<160x64xf32>
    %40 = arith.mulf %37, %39 : vector<160x64xf32>
    %c0_36 = arith.constant 0 : index
    %c0_37 = arith.constant 0 : index
    %41 = vector.load %arg15[%c0_36, %c0_37] : memref<1x64xf32, #tpu.memory_space<vmem>>, vector<1x64xf32>
    %42 = vector.broadcast %41 : vector<1x64xf32> to vector<160x64xf32>
    %43 = arith.addf %40, %42 : vector<160x64xf32>
    %cst_38 = arith.constant 0.000000e+00 : f32
    %44 = vector.broadcast %cst_38 : f32 to vector<160x64xf32>
    %45 = arith.cmpf ogt, %43, %44 : vector<160x64xf32>
    %cst_39 = arith.constant 0.00999999977 : f32
    %46 = vector.broadcast %cst_39 : f32 to vector<160x64xf32>
    %47 = arith.mulf %46, %43 : vector<160x64xf32>
    %48 = arith.select %45, %43, %47 : vector<160x64xi1>, vector<160x64xf32>
    %c0_40 = arith.constant 0 : index
    %c0_41 = arith.constant 0 : index
    %c0_42 = arith.constant 0 : index
    %49 = vector.load %arg21[%c0_40, %c0_41, %c0_42] : memref<7x80x160xf32, #tpu.memory_space<vmem>>, vector<1x80x160xf32>
    %50 = vector.shape_cast %49 : vector<1x80x160xf32> to vector<80x160xf32>
    %cst_43 = arith.constant dense<0.000000e+00> : vector<80x64xf32>
    %51 = tpu.matmul %50, %48, %cst_43 {dimension_numbers = #tpu.dot_dimension_numbers<[1], [0], [0], [1], [0, 0, 1, 1], [], []>} : vector<80x160xf32>, vector<160x64xf32>, vector<80x64xf32> -> vector<80x64xf32>
    %c1_44 = arith.constant 1 : index
    %c0_45 = arith.constant 0 : index
    %c0_46 = arith.constant 0 : index
    %52 = vector.load %arg21[%c1_44, %c0_45, %c0_46] : memref<7x80x160xf32, #tpu.memory_space<vmem>>, vector<1x80x160xf32>
    %53 = vector.shape_cast %52 : vector<1x80x160xf32> to vector<80x160xf32>
    %cst_47 = arith.constant dense<0.000000e+00> : vector<80x64xf32>
    %54 = tpu.matmul %53, %48, %cst_47 {dimension_numbers = #tpu.dot_dimension_numbers<[1], [0], [0], [1], [0, 0, 1, 1], [], []>} : vector<80x160xf32>, vector<160x64xf32>, vector<80x64xf32> -> vector<80x64xf32>
    %c2_48 = arith.constant 2 : index
    %c0_49 = arith.constant 0 : index
    %c0_50 = arith.constant 0 : index
    %55 = vector.load %arg21[%c2_48, %c0_49, %c0_50] : memref<7x80x160xf32, #tpu.memory_space<vmem>>, vector<1x80x160xf32>
    %56 = vector.shape_cast %55 : vector<1x80x160xf32> to vector<80x160xf32>
    %cst_51 = arith.constant dense<0.000000e+00> : vector<80x64xf32>
    %57 = tpu.matmul %56, %48, %cst_51 {dimension_numbers = #tpu.dot_dimension_numbers<[1], [0], [0], [1], [0, 0, 1, 1], [], []>} : vector<80x160xf32>, vector<160x64xf32>, vector<80x64xf32> -> vector<80x64xf32>
    %c3_52 = arith.constant 3 : index
    %c0_53 = arith.constant 0 : index
    %c0_54 = arith.constant 0 : index
    %58 = vector.load %arg21[%c3_52, %c0_53, %c0_54] : memref<7x80x160xf32, #tpu.memory_space<vmem>>, vector<1x80x160xf32>
    %59 = vector.shape_cast %58 : vector<1x80x160xf32> to vector<80x160xf32>
    %cst_55 = arith.constant dense<0.000000e+00> : vector<80x64xf32>
    %60 = tpu.matmul %59, %48, %cst_55 {dimension_numbers = #tpu.dot_dimension_numbers<[1], [0], [0], [1], [0, 0, 1, 1], [], []>} : vector<80x160xf32>, vector<160x64xf32>, vector<80x64xf32> -> vector<80x64xf32>
    %c4_56 = arith.constant 4 : index
    %c0_57 = arith.constant 0 : index
    %c0_58 = arith.constant 0 : index
    %61 = vector.load %arg21[%c4_56, %c0_57, %c0_58] : memref<7x80x160xf32, #tpu.memory_space<vmem>>, vector<1x80x160xf32>
    %62 = vector.shape_cast %61 : vector<1x80x160xf32> to vector<80x160xf32>
    %cst_59 = arith.constant dense<0.000000e+00> : vector<80x64xf32>
    %63 = tpu.matmul %62, %48, %cst_59 {dimension_numbers = #tpu.dot_dimension_numbers<[1], [0], [0], [1], [0, 0, 1, 1], [], []>} : vector<80x160xf32>, vector<160x64xf32>, vector<80x64xf32> -> vector<80x64xf32>
    %c5_60 = arith.constant 5 : index
    %c0_61 = arith.constant 0 : index
    %c0_62 = arith.constant 0 : index
    %64 = vector.load %arg21[%c5_60, %c0_61, %c0_62] : memref<7x80x160xf32, #tpu.memory_space<vmem>>, vector<1x80x160xf32>
    %65 = vector.shape_cast %64 : vector<1x80x160xf32> to vector<80x160xf32>
    %cst_63 = arith.constant dense<0.000000e+00> : vector<80x64xf32>
    %66 = tpu.matmul %65, %48, %cst_63 {dimension_numbers = #tpu.dot_dimension_numbers<[1], [0], [0], [1], [0, 0, 1, 1], [], []>} : vector<80x160xf32>, vector<160x64xf32>, vector<80x64xf32> -> vector<80x64xf32>
    %c6_64 = arith.constant 6 : index
    %c0_65 = arith.constant 0 : index
    %c0_66 = arith.constant 0 : index
    %67 = vector.load %arg21[%c6_64, %c0_65, %c0_66] : memref<7x80x160xf32, #tpu.memory_space<vmem>>, vector<1x80x160xf32>
    %68 = vector.shape_cast %67 : vector<1x80x160xf32> to vector<80x160xf32>
    %cst_67 = arith.constant dense<0.000000e+00> : vector<80x64xf32>
    %69 = tpu.matmul %68, %48, %cst_67 {dimension_numbers = #tpu.dot_dimension_numbers<[1], [0], [0], [1], [0, 0, 1, 1], [], []>} : vector<80x160xf32>, vector<160x64xf32>, vector<80x64xf32> -> vector<80x64xf32>
    %70 = tpu.concatenate %51, %54, %57, %60, %63, %66, %69 in 1 : vector<80x64xf32>, vector<80x64xf32>, vector<80x64xf32>, vector<80x64xf32>, vector<80x64xf32>, vector<80x64xf32>, vector<80x64xf32> -> vector<80x448xf32>
    %c0_68 = arith.constant 0 : index
    %c0_69 = arith.constant 0 : index
    %71 = vector.load %arg4[%c0_68, %c0_69] : memref<448x128xf32, #tpu.memory_space<vmem>>, vector<448x128xf32>
    %cst_70 = arith.constant dense<0.000000e+00> : vector<80x128xf32>
    %72 = tpu.matmul %70, %71, %cst_70 {dimension_numbers = #tpu.dot_dimension_numbers<[1], [0], [0], [1], [0, 0, 1, 1], [], []>} : vector<80x448xf32>, vector<448x128xf32>, vector<80x128xf32> -> vector<80x128xf32>
    %c0_71 = arith.constant 0 : index
    %c0_72 = arith.constant 0 : index
    %73 = vector.load %arg10[%c0_71, %c0_72] : memref<1x128xf32, #tpu.memory_space<vmem>>, vector<1x128xf32>
    %74 = vector.broadcast %73 : vector<1x128xf32> to vector<80x128xf32>
    %75 = arith.mulf %72, %74 : vector<80x128xf32>
    %c0_73 = arith.constant 0 : index
    %c0_74 = arith.constant 0 : index
    %76 = vector.load %arg16[%c0_73, %c0_74] : memref<1x128xf32, #tpu.memory_space<vmem>>, vector<1x128xf32>
    %77 = vector.broadcast %76 : vector<1x128xf32> to vector<80x128xf32>
    %78 = arith.addf %75, %77 : vector<80x128xf32>
    %cst_75 = arith.constant 0.000000e+00 : f32
    %79 = vector.broadcast %cst_75 : f32 to vector<80x128xf32>
    %80 = arith.cmpf ogt, %78, %79 : vector<80x128xf32>
    %cst_76 = arith.constant 0.00999999977 : f32
    %81 = vector.broadcast %cst_76 : f32 to vector<80x128xf32>
    %82 = arith.mulf %81, %78 : vector<80x128xf32>
    %83 = arith.select %80, %78, %82 : vector<80x128xi1>, vector<80x128xf32>
    %c0_77 = arith.constant 0 : index
    %c0_78 = arith.constant 0 : index
    %c0_79 = arith.constant 0 : index
    %84 = vector.load %arg22[%c0_77, %c0_78, %c0_79] : memref<7x40x80xf32, #tpu.memory_space<vmem>>, vector<1x40x80xf32>
    %85 = vector.shape_cast %84 : vector<1x40x80xf32> to vector<40x80xf32>
    %cst_80 = arith.constant dense<0.000000e+00> : vector<40x128xf32>
    %86 = tpu.matmul %85, %83, %cst_80 {dimension_numbers = #tpu.dot_dimension_numbers<[1], [0], [0], [1], [0, 0, 1, 1], [], []>} : vector<40x80xf32>, vector<80x128xf32>, vector<40x128xf32> -> vector<40x128xf32>
    %c1_81 = arith.constant 1 : index
    %c0_82 = arith.constant 0 : index
    %c0_83 = arith.constant 0 : index
    %87 = vector.load %arg22[%c1_81, %c0_82, %c0_83] : memref<7x40x80xf32, #tpu.memory_space<vmem>>, vector<1x40x80xf32>
    %88 = vector.shape_cast %87 : vector<1x40x80xf32> to vector<40x80xf32>
    %cst_84 = arith.constant dense<0.000000e+00> : vector<40x128xf32>
    %89 = tpu.matmul %88, %83, %cst_84 {dimension_numbers = #tpu.dot_dimension_numbers<[1], [0], [0], [1], [0, 0, 1, 1], [], []>} : vector<40x80xf32>, vector<80x128xf32>, vector<40x128xf32> -> vector<40x128xf32>
    %c2_85 = arith.constant 2 : index
    %c0_86 = arith.constant 0 : index
    %c0_87 = arith.constant 0 : index
    %90 = vector.load %arg22[%c2_85, %c0_86, %c0_87] : memref<7x40x80xf32, #tpu.memory_space<vmem>>, vector<1x40x80xf32>
    %91 = vector.shape_cast %90 : vector<1x40x80xf32> to vector<40x80xf32>
    %cst_88 = arith.constant dense<0.000000e+00> : vector<40x128xf32>
    %92 = tpu.matmul %91, %83, %cst_88 {dimension_numbers = #tpu.dot_dimension_numbers<[1], [0], [0], [1], [0, 0, 1, 1], [], []>} : vector<40x80xf32>, vector<80x128xf32>, vector<40x128xf32> -> vector<40x128xf32>
    %c3_89 = arith.constant 3 : index
    %c0_90 = arith.constant 0 : index
    %c0_91 = arith.constant 0 : index
    %93 = vector.load %arg22[%c3_89, %c0_90, %c0_91] : memref<7x40x80xf32, #tpu.memory_space<vmem>>, vector<1x40x80xf32>
    %94 = vector.shape_cast %93 : vector<1x40x80xf32> to vector<40x80xf32>
    %cst_92 = arith.constant dense<0.000000e+00> : vector<40x128xf32>
    %95 = tpu.matmul %94, %83, %cst_92 {dimension_numbers = #tpu.dot_dimension_numbers<[1], [0], [0], [1], [0, 0, 1, 1], [], []>} : vector<40x80xf32>, vector<80x128xf32>, vector<40x128xf32> -> vector<40x128xf32>
    %c4_93 = arith.constant 4 : index
    %c0_94 = arith.constant 0 : index
    %c0_95 = arith.constant 0 : index
    %96 = vector.load %arg22[%c4_93, %c0_94, %c0_95] : memref<7x40x80xf32, #tpu.memory_space<vmem>>, vector<1x40x80xf32>
    %97 = vector.shape_cast %96 : vector<1x40x80xf32> to vector<40x80xf32>
    %cst_96 = arith.constant dense<0.000000e+00> : vector<40x128xf32>
    %98 = tpu.matmul %97, %83, %cst_96 {dimension_numbers = #tpu.dot_dimension_numbers<[1], [0], [0], [1], [0, 0, 1, 1], [], []>} : vector<40x80xf32>, vector<80x128xf32>, vector<40x128xf32> -> vector<40x128xf32>
    %c5_97 = arith.constant 5 : index
    %c0_98 = arith.constant 0 : index
    %c0_99 = arith.constant 0 : index
    %99 = vector.load %arg22[%c5_97, %c0_98, %c0_99] : memref<7x40x80xf32, #tpu.memory_space<vmem>>, vector<1x40x80xf32>
    %100 = vector.shape_cast %99 : vector<1x40x80xf32> to vector<40x80xf32>
    %cst_100 = arith.constant dense<0.000000e+00> : vector<40x128xf32>
    %101 = tpu.matmul %100, %83, %cst_100 {dimension_numbers = #tpu.dot_dimension_numbers<[1], [0], [0], [1], [0, 0, 1, 1], [], []>} : vector<40x80xf32>, vector<80x128xf32>, vector<40x128xf32> -> vector<40x128xf32>
    %c6_101 = arith.constant 6 : index
    %c0_102 = arith.constant 0 : index
    %c0_103 = arith.constant 0 : index
    %102 = vector.load %arg22[%c6_101, %c0_102, %c0_103] : memref<7x40x80xf32, #tpu.memory_space<vmem>>, vector<1x40x80xf32>
    %103 = vector.shape_cast %102 : vector<1x40x80xf32> to vector<40x80xf32>
    %cst_104 = arith.constant dense<0.000000e+00> : vector<40x128xf32>
    %104 = tpu.matmul %103, %83, %cst_104 {dimension_numbers = #tpu.dot_dimension_numbers<[1], [0], [0], [1], [0, 0, 1, 1], [], []>} : vector<40x80xf32>, vector<80x128xf32>, vector<40x128xf32> -> vector<40x128xf32>
    %105 = tpu.concatenate %86, %89, %92, %95, %98, %101, %104 in 1 : vector<40x128xf32>, vector<40x128xf32>, vector<40x128xf32>, vector<40x128xf32>, vector<40x128xf32>, vector<40x128xf32>, vector<40x128xf32> -> vector<40x896xf32>
    %c0_105 = arith.constant 0 : index
    %c0_106 = arith.constant 0 : index
    %106 = vector.load %arg5[%c0_105, %c0_106] : memref<896x64xf32, #tpu.memory_space<vmem>>, vector<896x64xf32>
    %cst_107 = arith.constant dense<0.000000e+00> : vector<40x64xf32>
    %107 = tpu.matmul %105, %106, %cst_107 {dimension_numbers = #tpu.dot_dimension_numbers<[1], [0], [0], [1], [0, 0, 1, 1], [], []>} : vector<40x896xf32>, vector<896x64xf32>, vector<40x64xf32> -> vector<40x64xf32>
    %c0_108 = arith.constant 0 : index
    %c0_109 = arith.constant 0 : index
    %108 = vector.load %arg11[%c0_108, %c0_109] : memref<1x64xf32, #tpu.memory_space<vmem>>, vector<1x64xf32>
    %109 = vector.broadcast %108 : vector<1x64xf32> to vector<40x64xf32>
    %110 = arith.mulf %107, %109 : vector<40x64xf32>
    %c0_110 = arith.constant 0 : index
    %c0_111 = arith.constant 0 : index
    %111 = vector.load %arg17[%c0_110, %c0_111] : memref<1x64xf32, #tpu.memory_space<vmem>>, vector<1x64xf32>
    %112 = vector.broadcast %111 : vector<1x64xf32> to vector<40x64xf32>
    %113 = arith.addf %110, %112 : vector<40x64xf32>
    %cst_112 = arith.constant 0.000000e+00 : f32
    %114 = vector.broadcast %cst_112 : f32 to vector<40x64xf32>
    %115 = arith.cmpf ogt, %113, %114 : vector<40x64xf32>
    %cst_113 = arith.constant 0.00999999977 : f32
    %116 = vector.broadcast %cst_113 : f32 to vector<40x64xf32>
    %117 = arith.mulf %116, %113 : vector<40x64xf32>
    %118 = arith.select %115, %113, %117 : vector<40x64xi1>, vector<40x64xf32>
    %c0_114 = arith.constant 0 : index
    %c0_115 = arith.constant 0 : index
    %c0_116 = arith.constant 0 : index
    %119 = vector.load %arg23[%c0_114, %c0_115, %c0_116] : memref<7x20x40xf32, #tpu.memory_space<vmem>>, vector<1x20x40xf32>
    %120 = vector.shape_cast %119 : vector<1x20x40xf32> to vector<20x40xf32>
    %cst_117 = arith.constant dense<0.000000e+00> : vector<20x64xf32>
    %121 = tpu.matmul %120, %118, %cst_117 {dimension_numbers = #tpu.dot_dimension_numbers<[1], [0], [0], [1], [0, 0, 1, 1], [], []>} : vector<20x40xf32>, vector<40x64xf32>, vector<20x64xf32> -> vector<20x64xf32>
    %c1_118 = arith.constant 1 : index
    %c0_119 = arith.constant 0 : index
    %c0_120 = arith.constant 0 : index
    %122 = vector.load %arg23[%c1_118, %c0_119, %c0_120] : memref<7x20x40xf32, #tpu.memory_space<vmem>>, vector<1x20x40xf32>
    %123 = vector.shape_cast %122 : vector<1x20x40xf32> to vector<20x40xf32>
    %cst_121 = arith.constant dense<0.000000e+00> : vector<20x64xf32>
    %124 = tpu.matmul %123, %118, %cst_121 {dimension_numbers = #tpu.dot_dimension_numbers<[1], [0], [0], [1], [0, 0, 1, 1], [], []>} : vector<20x40xf32>, vector<40x64xf32>, vector<20x64xf32> -> vector<20x64xf32>
    %c2_122 = arith.constant 2 : index
    %c0_123 = arith.constant 0 : index
    %c0_124 = arith.constant 0 : index
    %125 = vector.load %arg23[%c2_122, %c0_123, %c0_124] : memref<7x20x40xf32, #tpu.memory_space<vmem>>, vector<1x20x40xf32>
    %126 = vector.shape_cast %125 : vector<1x20x40xf32> to vector<20x40xf32>
    %cst_125 = arith.constant dense<0.000000e+00> : vector<20x64xf32>
    %127 = tpu.matmul %126, %118, %cst_125 {dimension_numbers = #tpu.dot_dimension_numbers<[1], [0], [0], [1], [0, 0, 1, 1], [], []>} : vector<20x40xf32>, vector<40x64xf32>, vector<20x64xf32> -> vector<20x64xf32>
    %c3_126 = arith.constant 3 : index
    %c0_127 = arith.constant 0 : index
    %c0_128 = arith.constant 0 : index
    %128 = vector.load %arg23[%c3_126, %c0_127, %c0_128] : memref<7x20x40xf32, #tpu.memory_space<vmem>>, vector<1x20x40xf32>
    %129 = vector.shape_cast %128 : vector<1x20x40xf32> to vector<20x40xf32>
    %cst_129 = arith.constant dense<0.000000e+00> : vector<20x64xf32>
    %130 = tpu.matmul %129, %118, %cst_129 {dimension_numbers = #tpu.dot_dimension_numbers<[1], [0], [0], [1], [0, 0, 1, 1], [], []>} : vector<20x40xf32>, vector<40x64xf32>, vector<20x64xf32> -> vector<20x64xf32>
    %c4_130 = arith.constant 4 : index
    %c0_131 = arith.constant 0 : index
    %c0_132 = arith.constant 0 : index
    %131 = vector.load %arg23[%c4_130, %c0_131, %c0_132] : memref<7x20x40xf32, #tpu.memory_space<vmem>>, vector<1x20x40xf32>
    %132 = vector.shape_cast %131 : vector<1x20x40xf32> to vector<20x40xf32>
    %cst_133 = arith.constant dense<0.000000e+00> : vector<20x64xf32>
    %133 = tpu.matmul %132, %118, %cst_133 {dimension_numbers = #tpu.dot_dimension_numbers<[1], [0], [0], [1], [0, 0, 1, 1], [], []>} : vector<20x40xf32>, vector<40x64xf32>, vector<20x64xf32> -> vector<20x64xf32>
    %c5_134 = arith.constant 5 : index
    %c0_135 = arith.constant 0 : index
    %c0_136 = arith.constant 0 : index
    %134 = vector.load %arg23[%c5_134, %c0_135, %c0_136] : memref<7x20x40xf32, #tpu.memory_space<vmem>>, vector<1x20x40xf32>
    %135 = vector.shape_cast %134 : vector<1x20x40xf32> to vector<20x40xf32>
    %cst_137 = arith.constant dense<0.000000e+00> : vector<20x64xf32>
    %136 = tpu.matmul %135, %118, %cst_137 {dimension_numbers = #tpu.dot_dimension_numbers<[1], [0], [0], [1], [0, 0, 1, 1], [], []>} : vector<20x40xf32>, vector<40x64xf32>, vector<20x64xf32> -> vector<20x64xf32>
    %c6_138 = arith.constant 6 : index
    %c0_139 = arith.constant 0 : index
    %c0_140 = arith.constant 0 : index
    %137 = vector.load %arg23[%c6_138, %c0_139, %c0_140] : memref<7x20x40xf32, #tpu.memory_space<vmem>>, vector<1x20x40xf32>
    %138 = vector.shape_cast %137 : vector<1x20x40xf32> to vector<20x40xf32>
    %cst_141 = arith.constant dense<0.000000e+00> : vector<20x64xf32>
    %139 = tpu.matmul %138, %118, %cst_141 {dimension_numbers = #tpu.dot_dimension_numbers<[1], [0], [0], [1], [0, 0, 1, 1], [], []>} : vector<20x40xf32>, vector<40x64xf32>, vector<20x64xf32> -> vector<20x64xf32>
    %140 = tpu.concatenate %121, %124, %127, %130, %133, %136, %139 in 1 : vector<20x64xf32>, vector<20x64xf32>, vector<20x64xf32>, vector<20x64xf32>, vector<20x64xf32>, vector<20x64xf32>, vector<20x64xf32> -> vector<20x448xf32>
    %c0_142 = arith.constant 0 : index
    %c0_143 = arith.constant 0 : index
    %141 = vector.load %arg6[%c0_142, %c0_143] : memref<448x32xf32, #tpu.memory_space<vmem>>, vector<448x32xf32>
    %cst_144 = arith.constant dense<0.000000e+00> : vector<20x32xf32>
    %142 = tpu.matmul %140, %141, %cst_144 {dimension_numbers = #tpu.dot_dimension_numbers<[1], [0], [0], [1], [0, 0, 1, 1], [], []>} : vector<20x448xf32>, vector<448x32xf32>, vector<20x32xf32> -> vector<20x32xf32>
    %c0_145 = arith.constant 0 : index
    %c0_146 = arith.constant 0 : index
    %143 = vector.load %arg12[%c0_145, %c0_146] : memref<1x32xf32, #tpu.memory_space<vmem>>, vector<1x32xf32>
    %144 = vector.broadcast %143 : vector<1x32xf32> to vector<20x32xf32>
    %145 = arith.mulf %142, %144 : vector<20x32xf32>
    %c0_147 = arith.constant 0 : index
    %c0_148 = arith.constant 0 : index
    %146 = vector.load %arg18[%c0_147, %c0_148] : memref<1x32xf32, #tpu.memory_space<vmem>>, vector<1x32xf32>
    %147 = vector.broadcast %146 : vector<1x32xf32> to vector<20x32xf32>
    %148 = arith.addf %145, %147 : vector<20x32xf32>
    %cst_149 = arith.constant 0.000000e+00 : f32
    %149 = vector.broadcast %cst_149 : f32 to vector<20x32xf32>
    %150 = arith.cmpf ogt, %148, %149 : vector<20x32xf32>
    %cst_150 = arith.constant 0.00999999977 : f32
    %151 = vector.broadcast %cst_150 : f32 to vector<20x32xf32>
    %152 = arith.mulf %151, %148 : vector<20x32xf32>
    %153 = arith.select %150, %148, %152 : vector<20x32xi1>, vector<20x32xf32>
    %c0_151 = arith.constant 0 : index
    %c0_152 = arith.constant 0 : index
    %c0_153 = arith.constant 0 : index
    %154 = vector.load %arg24[%c0_151, %c0_152, %c0_153] : memref<7x10x20xf32, #tpu.memory_space<vmem>>, vector<1x10x20xf32>
    %155 = vector.shape_cast %154 : vector<1x10x20xf32> to vector<10x20xf32>
    %cst_154 = arith.constant dense<0.000000e+00> : vector<10x32xf32>
    %156 = tpu.matmul %155, %153, %cst_154 {dimension_numbers = #tpu.dot_dimension_numbers<[1], [0], [0], [1], [0, 0, 1, 1], [], []>} : vector<10x20xf32>, vector<20x32xf32>, vector<10x32xf32> -> vector<10x32xf32>
    %c1_155 = arith.constant 1 : index
    %c0_156 = arith.constant 0 : index
    %c0_157 = arith.constant 0 : index
    %157 = vector.load %arg24[%c1_155, %c0_156, %c0_157] : memref<7x10x20xf32, #tpu.memory_space<vmem>>, vector<1x10x20xf32>
    %158 = vector.shape_cast %157 : vector<1x10x20xf32> to vector<10x20xf32>
    %cst_158 = arith.constant dense<0.000000e+00> : vector<10x32xf32>
    %159 = tpu.matmul %158, %153, %cst_158 {dimension_numbers = #tpu.dot_dimension_numbers<[1], [0], [0], [1], [0, 0, 1, 1], [], []>} : vector<10x20xf32>, vector<20x32xf32>, vector<10x32xf32> -> vector<10x32xf32>
    %c2_159 = arith.constant 2 : index
    %c0_160 = arith.constant 0 : index
    %c0_161 = arith.constant 0 : index
    %160 = vector.load %arg24[%c2_159, %c0_160, %c0_161] : memref<7x10x20xf32, #tpu.memory_space<vmem>>, vector<1x10x20xf32>
    %161 = vector.shape_cast %160 : vector<1x10x20xf32> to vector<10x20xf32>
    %cst_162 = arith.constant dense<0.000000e+00> : vector<10x32xf32>
    %162 = tpu.matmul %161, %153, %cst_162 {dimension_numbers = #tpu.dot_dimension_numbers<[1], [0], [0], [1], [0, 0, 1, 1], [], []>} : vector<10x20xf32>, vector<20x32xf32>, vector<10x32xf32> -> vector<10x32xf32>
    %c3_163 = arith.constant 3 : index
    %c0_164 = arith.constant 0 : index
    %c0_165 = arith.constant 0 : index
    %163 = vector.load %arg24[%c3_163, %c0_164, %c0_165] : memref<7x10x20xf32, #tpu.memory_space<vmem>>, vector<1x10x20xf32>
    %164 = vector.shape_cast %163 : vector<1x10x20xf32> to vector<10x20xf32>
    %cst_166 = arith.constant dense<0.000000e+00> : vector<10x32xf32>
    %165 = tpu.matmul %164, %153, %cst_166 {dimension_numbers = #tpu.dot_dimension_numbers<[1], [0], [0], [1], [0, 0, 1, 1], [], []>} : vector<10x20xf32>, vector<20x32xf32>, vector<10x32xf32> -> vector<10x32xf32>
    %c4_167 = arith.constant 4 : index
    %c0_168 = arith.constant 0 : index
    %c0_169 = arith.constant 0 : index
    %166 = vector.load %arg24[%c4_167, %c0_168, %c0_169] : memref<7x10x20xf32, #tpu.memory_space<vmem>>, vector<1x10x20xf32>
    %167 = vector.shape_cast %166 : vector<1x10x20xf32> to vector<10x20xf32>
    %cst_170 = arith.constant dense<0.000000e+00> : vector<10x32xf32>
    %168 = tpu.matmul %167, %153, %cst_170 {dimension_numbers = #tpu.dot_dimension_numbers<[1], [0], [0], [1], [0, 0, 1, 1], [], []>} : vector<10x20xf32>, vector<20x32xf32>, vector<10x32xf32> -> vector<10x32xf32>
    %c5_171 = arith.constant 5 : index
    %c0_172 = arith.constant 0 : index
    %c0_173 = arith.constant 0 : index
    %169 = vector.load %arg24[%c5_171, %c0_172, %c0_173] : memref<7x10x20xf32, #tpu.memory_space<vmem>>, vector<1x10x20xf32>
    %170 = vector.shape_cast %169 : vector<1x10x20xf32> to vector<10x20xf32>
    %cst_174 = arith.constant dense<0.000000e+00> : vector<10x32xf32>
    %171 = tpu.matmul %170, %153, %cst_174 {dimension_numbers = #tpu.dot_dimension_numbers<[1], [0], [0], [1], [0, 0, 1, 1], [], []>} : vector<10x20xf32>, vector<20x32xf32>, vector<10x32xf32> -> vector<10x32xf32>
    %c6_175 = arith.constant 6 : index
    %c0_176 = arith.constant 0 : index
    %c0_177 = arith.constant 0 : index
    %172 = vector.load %arg24[%c6_175, %c0_176, %c0_177] : memref<7x10x20xf32, #tpu.memory_space<vmem>>, vector<1x10x20xf32>
    %173 = vector.shape_cast %172 : vector<1x10x20xf32> to vector<10x20xf32>
    %cst_178 = arith.constant dense<0.000000e+00> : vector<10x32xf32>
    %174 = tpu.matmul %173, %153, %cst_178 {dimension_numbers = #tpu.dot_dimension_numbers<[1], [0], [0], [1], [0, 0, 1, 1], [], []>} : vector<10x20xf32>, vector<20x32xf32>, vector<10x32xf32> -> vector<10x32xf32>
    %175 = tpu.concatenate %156, %159, %162, %165, %168, %171, %174 in 1 : vector<10x32xf32>, vector<10x32xf32>, vector<10x32xf32>, vector<10x32xf32>, vector<10x32xf32>, vector<10x32xf32>, vector<10x32xf32> -> vector<10x224xf32>
    %c0_179 = arith.constant 0 : index
    %c0_180 = arith.constant 0 : index
    %176 = vector.load %arg7[%c0_179, %c0_180] : memref<224x16xf32, #tpu.memory_space<vmem>>, vector<224x16xf32>
    %cst_181 = arith.constant dense<0.000000e+00> : vector<10x16xf32>
    %177 = tpu.matmul %175, %176, %cst_181 {dimension_numbers = #tpu.dot_dimension_numbers<[1], [0], [0], [1], [0, 0, 1, 1], [], []>} : vector<10x224xf32>, vector<224x16xf32>, vector<10x16xf32> -> vector<10x16xf32>
    %c0_182 = arith.constant 0 : index
    %c0_183 = arith.constant 0 : index
    %178 = vector.load %arg13[%c0_182, %c0_183] : memref<1x16xf32, #tpu.memory_space<vmem>>, vector<1x16xf32>
    %179 = vector.broadcast %178 : vector<1x16xf32> to vector<10x16xf32>
    %180 = arith.mulf %177, %179 : vector<10x16xf32>
    %c0_184 = arith.constant 0 : index
    %c0_185 = arith.constant 0 : index
    %181 = vector.load %arg19[%c0_184, %c0_185] : memref<1x16xf32, #tpu.memory_space<vmem>>, vector<1x16xf32>
    %182 = vector.broadcast %181 : vector<1x16xf32> to vector<10x16xf32>
    %183 = arith.addf %180, %182 : vector<10x16xf32>
    %cst_186 = arith.constant 0.000000e+00 : f32
    %184 = vector.broadcast %cst_186 : f32 to vector<10x16xf32>
    %185 = arith.cmpf ogt, %183, %184 : vector<10x16xf32>
    %cst_187 = arith.constant 0.00999999977 : f32
    %186 = vector.broadcast %cst_187 : f32 to vector<10x16xf32>
    %187 = arith.mulf %186, %183 : vector<10x16xf32>
    %188 = arith.select %185, %183, %187 : vector<10x16xi1>, vector<10x16xf32>
    %c0_188 = arith.constant 0 : index
    %c0_189 = arith.constant 0 : index
    %c0_190 = arith.constant 0 : index
    %189 = vector.load %arg25[%c0_188, %c0_189, %c0_190] : memref<5x2x10xf32, #tpu.memory_space<vmem>>, vector<1x2x10xf32>
    %190 = vector.shape_cast %189 : vector<1x2x10xf32> to vector<2x10xf32>
    %cst_191 = arith.constant dense<0.000000e+00> : vector<2x16xf32>
    %191 = tpu.matmul %190, %188, %cst_191 {dimension_numbers = #tpu.dot_dimension_numbers<[1], [0], [0], [1], [0, 0, 1, 1], [], []>} : vector<2x10xf32>, vector<10x16xf32>, vector<2x16xf32> -> vector<2x16xf32>
    %c1_192 = arith.constant 1 : index
    %c0_193 = arith.constant 0 : index
    %c0_194 = arith.constant 0 : index
    %192 = vector.load %arg25[%c1_192, %c0_193, %c0_194] : memref<5x2x10xf32, #tpu.memory_space<vmem>>, vector<1x2x10xf32>
    %193 = vector.shape_cast %192 : vector<1x2x10xf32> to vector<2x10xf32>
    %cst_195 = arith.constant dense<0.000000e+00> : vector<2x16xf32>
    %194 = tpu.matmul %193, %188, %cst_195 {dimension_numbers = #tpu.dot_dimension_numbers<[1], [0], [0], [1], [0, 0, 1, 1], [], []>} : vector<2x10xf32>, vector<10x16xf32>, vector<2x16xf32> -> vector<2x16xf32>
    %c2_196 = arith.constant 2 : index
    %c0_197 = arith.constant 0 : index
    %c0_198 = arith.constant 0 : index
    %195 = vector.load %arg25[%c2_196, %c0_197, %c0_198] : memref<5x2x10xf32, #tpu.memory_space<vmem>>, vector<1x2x10xf32>
    %196 = vector.shape_cast %195 : vector<1x2x10xf32> to vector<2x10xf32>
    %cst_199 = arith.constant dense<0.000000e+00> : vector<2x16xf32>
    %197 = tpu.matmul %196, %188, %cst_199 {dimension_numbers = #tpu.dot_dimension_numbers<[1], [0], [0], [1], [0, 0, 1, 1], [], []>} : vector<2x10xf32>, vector<10x16xf32>, vector<2x16xf32> -> vector<2x16xf32>
    %c3_200 = arith.constant 3 : index
    %c0_201 = arith.constant 0 : index
    %c0_202 = arith.constant 0 : index
    %198 = vector.load %arg25[%c3_200, %c0_201, %c0_202] : memref<5x2x10xf32, #tpu.memory_space<vmem>>, vector<1x2x10xf32>
    %199 = vector.shape_cast %198 : vector<1x2x10xf32> to vector<2x10xf32>
    %cst_203 = arith.constant dense<0.000000e+00> : vector<2x16xf32>
    %200 = tpu.matmul %199, %188, %cst_203 {dimension_numbers = #tpu.dot_dimension_numbers<[1], [0], [0], [1], [0, 0, 1, 1], [], []>} : vector<2x10xf32>, vector<10x16xf32>, vector<2x16xf32> -> vector<2x16xf32>
    %c4_204 = arith.constant 4 : index
    %c0_205 = arith.constant 0 : index
    %c0_206 = arith.constant 0 : index
    %201 = vector.load %arg25[%c4_204, %c0_205, %c0_206] : memref<5x2x10xf32, #tpu.memory_space<vmem>>, vector<1x2x10xf32>
    %202 = vector.shape_cast %201 : vector<1x2x10xf32> to vector<2x10xf32>
    %cst_207 = arith.constant dense<0.000000e+00> : vector<2x16xf32>
    %203 = tpu.matmul %202, %188, %cst_207 {dimension_numbers = #tpu.dot_dimension_numbers<[1], [0], [0], [1], [0, 0, 1, 1], [], []>} : vector<2x10xf32>, vector<10x16xf32>, vector<2x16xf32> -> vector<2x16xf32>
    %204 = tpu.concatenate %191, %194, %197, %200, %203 in 1 : vector<2x16xf32>, vector<2x16xf32>, vector<2x16xf32>, vector<2x16xf32>, vector<2x16xf32> -> vector<2x80xf32>
    %c0_208 = arith.constant 0 : index
    %c0_209 = arith.constant 0 : index
    %205 = vector.load %arg26[%c0_208, %c0_209] : memref<80x40xf32, #tpu.memory_space<vmem>>, vector<80x40xf32>
    %cst_210 = arith.constant dense<0.000000e+00> : vector<2x40xf32>
    %206 = tpu.matmul %204, %205, %cst_210 {dimension_numbers = #tpu.dot_dimension_numbers<[1], [0], [0], [1], [0, 0, 1, 1], [], []>} : vector<2x80xf32>, vector<80x40xf32>, vector<2x40xf32> -> vector<2x40xf32>
    %c0_211 = arith.constant 0 : index
    %c0_212 = arith.constant 0 : index
    %207 = vector.load %arg27[%c0_211, %c0_212] : memref<1x40xf32, #tpu.memory_space<vmem>>, vector<1x40xf32>
    %208 = vector.broadcast %207 : vector<1x40xf32> to vector<2x40xf32>
    %209 = arith.addf %206, %208 : vector<2x40xf32>
    %c0_213 = arith.constant 0 : index
    %c0_214 = arith.constant 0 : index
    %210 = vector.load %arg28[%c0_213, %c0_214] : memref<40x3840xf32, #tpu.memory_space<vmem>>, vector<40x3840xf32>
    %cst_215 = arith.constant dense<0.000000e+00> : vector<2x3840xf32>
    %211 = tpu.matmul %209, %210, %cst_215 {dimension_numbers = #tpu.dot_dimension_numbers<[1], [0], [0], [1], [0, 0, 1, 1], [], []>} : vector<2x40xf32>, vector<40x3840xf32>, vector<2x3840xf32> -> vector<2x3840xf32>
    %c0_216 = arith.constant 0 : index
    %c0_217 = arith.constant 0 : index
    %212 = vector.load %arg29[%c0_216, %c0_217] : memref<1x3840xf32, #tpu.memory_space<vmem>>, vector<1x3840xf32>
    %213 = vector.broadcast %212 : vector<1x3840xf32> to vector<2x3840xf32>
    %214 = arith.addf %211, %213 : vector<2x3840xf32>
    %c0_218 = arith.constant 0 : index
    %c0_219 = arith.constant 0 : index
    %215 = vector.load %arg30[%c0_218, %c0_219] : memref<2x3840xf32, #tpu.memory_space<vmem>>, vector<2x3840xf32>
    tpu.vector_store %arg30[%c0_218, %c0_219], %214 {strides = array<i32>} : memref<2x3840xf32, #tpu.memory_space<vmem>>, vector<2x3840xf32>,
    return
  }
  func.func @transform_0(%arg0: i32) -> (i32, i32) {
    %c0_i32 = arith.constant 0 : i32
    %c0_i32_0 = arith.constant 0 : i32
    %c0_i32_1 = arith.constant 0 : i32
    return %c0_i32, %c0_i32_0 : i32, i32
  }
  func.func @transform_1(%arg0: i32) -> (i32, i32) {
    %c0_i32 = arith.constant 0 : i32
    %c0_i32_0 = arith.constant 0 : i32
    %c0_i32_1 = arith.constant 0 : i32
    return %c0_i32, %c0_i32_0 : i32, i32
  }
  func.func @transform_2(%arg0: i32) -> (i32, i32) {
    %c0_i32 = arith.constant 0 : i32
    %c0_i32_0 = arith.constant 0 : i32
    %c0_i32_1 = arith.constant 0 : i32
    return %c0_i32, %c0_i32_0 : i32, i32
  }
  func.func @transform_3(%arg0: i32) -> (i32, i32) {
    %c0_i32 = arith.constant 0 : i32
    %c0_i32_0 = arith.constant 0 : i32
    %c0_i32_1 = arith.constant 0 : i32
    return %c0_i32, %c0_i32_0 : i32, i32
  }
  func.func @transform_4(%arg0: i32) -> (i32, i32) {
    %c0_i32 = arith.constant 0 : i32
    %c0_i32_0 = arith.constant 0 : i32
    %c0_i32_1 = arith.constant 0 : i32
    return %c0_i32, %c0_i32_0 : i32, i32
  }
  func.func @transform_5(%arg0: i32) -> (i32, i32) {
    %c0_i32 = arith.constant 0 : i32
    %c0_i32_0 = arith.constant 0 : i32
    %c0_i32_1 = arith.constant 0 : i32
    return %c0_i32, %c0_i32_0 : i32, i32
  }
  func.func @transform_6(%arg0: i32) -> (i32, i32) {
    %c0_i32 = arith.constant 0 : i32
    %c0_i32_0 = arith.constant 0 : i32
    %c0_i32_1 = arith.constant 0 : i32
    return %c0_i32, %c0_i32_0 : i32, i32
  }
  func.func @transform_7(%arg0: i32) -> (i32, i32) {
    %c0_i32 = arith.constant 0 : i32
    %c0_i32_0 = arith.constant 0 : i32
    %c0_i32_1 = arith.constant 0 : i32
    return %c0_i32, %c0_i32_0 : i32, i32
  }
  func.func @transform_8(%arg0: i32) -> (i32, i32) {
    %c0_i32 = arith.constant 0 : i32
    %c0_i32_0 = arith.constant 0 : i32
    %c0_i32_1 = arith.constant 0 : i32
    return %c0_i32, %c0_i32_0 : i32, i32
  }
  func.func @transform_9(%arg0: i32) -> (i32, i32) {
    %c0_i32 = arith.constant 0 : i32
    %c0_i32_0 = arith.constant 0 : i32
    %c0_i32_1 = arith.constant 0 : i32
    return %c0_i32, %c0_i32_0 : i32, i32
  }
  func.func @transform_10(%arg0: i32) -> (i32, i32) {
    %c0_i32 = arith.constant 0 : i32
    %c0_i32_0 = arith.constant 0 : i32
    %c0_i32_1 = arith.constant 0 : i32
    return %c0_i32, %c0_i32_0 : i32, i32
  }
  func.func @transform_11(%arg0: i32) -> (i32, i32) {
    %c0_i32 = arith.constant 0 : i32
    %c0_i32_0 = arith.constant 0 : i32
    %c0_i32_1 = arith.constant 0 : i32
    return %c0_i32, %c0_i32_0 : i32, i32
  }
  func.func @transform_12(%arg0: i32) -> (i32, i32) {
    %c0_i32 = arith.constant 0 : i32
    %c0_i32_0 = arith.constant 0 : i32
    %c0_i32_1 = arith.constant 0 : i32
    return %c0_i32, %c0_i32_0 : i32, i32
  }
  func.func @transform_13(%arg0: i32) -> (i32, i32) {
    %c0_i32 = arith.constant 0 : i32
    %c0_i32_0 = arith.constant 0 : i32
    %c0_i32_1 = arith.constant 0 : i32
    return %c0_i32, %c0_i32_0 : i32, i32
  }
  func.func @transform_14(%arg0: i32) -> (i32, i32) {
    %c0_i32 = arith.constant 0 : i32
    %c0_i32_0 = arith.constant 0 : i32
    %c0_i32_1 = arith.constant 0 : i32
    return %c0_i32, %c0_i32_0 : i32, i32
  }
  func.func @transform_15(%arg0: i32) -> (i32, i32) {
    %c0_i32 = arith.constant 0 : i32
    %c0_i32_0 = arith.constant 0 : i32
    %c0_i32_1 = arith.constant 0 : i32
    return %c0_i32, %c0_i32_0 : i32, i32
  }
  func.func @transform_16(%arg0: i32) -> (i32, i32) {
    %c0_i32 = arith.constant 0 : i32
    %c0_i32_0 = arith.constant 0 : i32
    %c0_i32_1 = arith.constant 0 : i32
    return %c0_i32, %c0_i32_0 : i32, i32
  }
  func.func @transform_17(%arg0: i32) -> (i32, i32) {
    %c0_i32 = arith.constant 0 : i32
    %c0_i32_0 = arith.constant 0 : i32
    %c0_i32_1 = arith.constant 0 : i32
    return %c0_i32, %c0_i32_0 : i32, i32
  }
  func.func @transform_18(%arg0: i32) -> (i32, i32) {
    %c0_i32 = arith.constant 0 : i32
    %c0_i32_0 = arith.constant 0 : i32
    %c0_i32_1 = arith.constant 0 : i32
    return %c0_i32, %c0_i32_0 : i32, i32
  }
  func.func @transform_19(%arg0: i32) -> (i32, i32, i32) {
    %c0_i32 = arith.constant 0 : i32
    %c0_i32_0 = arith.constant 0 : i32
    %c0_i32_1 = arith.constant 0 : i32
    %c0_i32_2 = arith.constant 0 : i32
    return %c0_i32, %c0_i32_0, %c0_i32_1 : i32, i32, i32
  }
  func.func @transform_20(%arg0: i32) -> (i32, i32, i32) {
    %c0_i32 = arith.constant 0 : i32
    %c0_i32_0 = arith.constant 0 : i32
    %c0_i32_1 = arith.constant 0 : i32
    %c0_i32_2 = arith.constant 0 : i32
    return %c0_i32, %c0_i32_0, %c0_i32_1 : i32, i32, i32
  }
  func.func @transform_21(%arg0: i32) -> (i32, i32, i32) {
    %c0_i32 = arith.constant 0 : i32
    %c0_i32_0 = arith.constant 0 : i32
    %c0_i32_1 = arith.constant 0 : i32
    %c0_i32_2 = arith.constant 0 : i32
    return %c0_i32, %c0_i32_0, %c0_i32_1 : i32, i32, i32
  }
  func.func @transform_22(%arg0: i32) -> (i32, i32, i32) {
    %c0_i32 = arith.constant 0 : i32
    %c0_i32_0 = arith.constant 0 : i32
    %c0_i32_1 = arith.constant 0 : i32
    %c0_i32_2 = arith.constant 0 : i32
    return %c0_i32, %c0_i32_0, %c0_i32_1 : i32, i32, i32
  }
  func.func @transform_23(%arg0: i32) -> (i32, i32, i32) {
    %c0_i32 = arith.constant 0 : i32
    %c0_i32_0 = arith.constant 0 : i32
    %c0_i32_1 = arith.constant 0 : i32
    %c0_i32_2 = arith.constant 0 : i32
    return %c0_i32, %c0_i32_0, %c0_i32_1 : i32, i32, i32
  }
  func.func @transform_24(%arg0: i32) -> (i32, i32, i32) {
    %c0_i32 = arith.constant 0 : i32
    %c0_i32_0 = arith.constant 0 : i32
    %c0_i32_1 = arith.constant 0 : i32
    %c0_i32_2 = arith.constant 0 : i32
    return %c0_i32, %c0_i32_0, %c0_i32_1 : i32, i32, i32
  }
  func.func @transform_25(%arg0: i32) -> (i32, i32) {
    %c0_i32 = arith.constant 0 : i32
    %c0_i32_0 = arith.constant 0 : i32
    %c0_i32_1 = arith.constant 0 : i32
    return %c0_i32, %c0_i32_0 : i32, i32
  }
  func.func @transform_26(%arg0: i32) -> (i32, i32) {
    %c0_i32 = arith.constant 0 : i32
    %c0_i32_0 = arith.constant 0 : i32
    %c0_i32_1 = arith.constant 0 : i32
    return %c0_i32, %c0_i32_0 : i32, i32
  }
  func.func @transform_27(%arg0: i32) -> (i32, i32) {
    %c0_i32 = arith.constant 0 : i32
    %c0_i32_0 = arith.constant 0 : i32
    %c0_i32_1 = arith.constant 0 : i32
    return %c0_i32, %c0_i32_0 : i32, i32
  }
  func.func @transform_28(%arg0: i32) -> (i32, i32) {
    %c0_i32 = arith.constant 0 : i32
    %c0_i32_0 = arith.constant 0 : i32
    %c0_i32_1 = arith.constant 0 : i32
    return %c0_i32, %c0_i32_0 : i32, i32
  }
  func.func @transform_29(%arg0: i32) -> (i32, i32) {
    %c0_i32 = arith.constant 0 : i32
    %c0_i32_0 = arith.constant 0 : i32
    %c0_i32_1 = arith.constant 0 : i32
    return %c0_i32, %c0_i32_0 : i32, i32
  }
}

</mosaic_0001>

<bundles_post_ra>
// kernel: cnn_forward.1
= control target key start
LH: loop header
LB: loop body
LE: loop exit
PB: predicated region body
PF: predicated region fallthrough
CT: control target
= control target key end

     0   :  { %s15798_s6 = smov 1   ;;  %s15799_s10 = smov 2   ;;  %s19307_s0 = inlined_call_operand.smem [shape: u32[30], index: -1, kind: input, shape index: {}] }
   0x1   :  { %s15851_s5 = sld [smem:[%s19307_s0]]   ;;  %s15800_s14 = smov 3  }
   0x2   :  { %s15856_s9 = sld [smem:[%s19307_s0 + %s15798_s6]]   ;;  %s15801_s18 = smov 4  }
   0x3   :  { %s15861_s13 = sld [smem:[%s19307_s0 + %s15799_s10]]   ;;  %s15802_s22 = smov 5  }
   0x4   :  { %s15866_s17 = sld [smem:[%s19307_s0 + %s15800_s14]]   ;;  %s15803_s26 = smov 6  }
   0x5   :  { %s15871_s21 = sld [smem:[%s19307_s0 + %s15801_s18]]   ;;  %s15804_s30 = smov 7  }
   0x6   :  { %s15876_s25 = sld [smem:[%s19307_s0 + %s15802_s22]]   ;;  %s15805_s4 = smov 8  }
   0x7   :  { %s15881_s29 = sld [smem:[%s19307_s0 + %s15803_s26]]   ;;  %s15806_s10 = smov 9  }
   0x8   :  { %s15886_s3 = sld [smem:[%s19307_s0 + %s15804_s30]]   ;;  %s15807_s15 = smov 10  }
   0x9   :  { %s15891_s8 = sld [smem:[%s19307_s0 + %s15805_s4]]   ;;  %s15808_s20 = smov 11  }
   0xa   :  { %s15896_s14 = sld [smem:[%s19307_s0 + %s15806_s10]]   ;;  %s15809_s26 = smov 12  }
   0xb   :  { %s15901_s19 = sld [smem:[%s19307_s0 + %s15807_s15]]   ;;  %s15810_s1 = smov 13  }
   0xc   :  { %19326 = sst [smem:[#allocation11_spill]] %s15876_s25  ;;  %s15811_s7 = smov 14  }
   0xd   :  { %19327 = sst [smem:[#allocation12_spill]] %s15881_s29  ;;  %s15812_s15 = smov 15  }
   0xe   :  { %s15906_s24 = sld [smem:[%s19307_s0 + %s15808_s20]]   ;;  %s15813_s22 = smov 16  }
   0xf   :  { %s15911_s30 = sld [smem:[%s19307_s0 + %s15809_s26]]   ;;  %s15814_s28 = smov 17  }
  0x10   :  { %s15916_s6 = sld [smem:[%s19307_s0 + %s15810_s1]]  }
  0x11   :  { %19328 = sst [smem:[#allocation13_spill]] %s15901_s19 }
  0x12   :  { %s15921_s12 = sld [smem:[%s19307_s0 + %s15811_s7]]   ;;  %s15815_s7 = smov 18  }
  0x13   :  { %s15926_s20 = sld [smem:[%s19307_s0 + %s15812_s15]]   ;;  %s15816_s15 = smov 19  }
  0x14   :  { %19329 = sst [smem:[#allocation14_spill]] %s15906_s24 }
  0x15   :  { %19330 = sst [smem:[#allocation15_spill]] %s15911_s30 }
  0x16   :  { %s15931_s27 = sld [smem:[%s19307_s0 + %s15813_s22]]   ;;  %s15817_s22 = smov 20  }
  0x17   :  { %s15936_s4 = sld [smem:[%s19307_s0 + %s15814_s28]]   ;;  %s15818_s28 = smov 21  }
  0x18   :  { %s15941_s30 = sld [smem:[%s19307_s0 + %s15815_s7]]   ;;  %s15819_s7 = smov 22  }
  0x19   :  { %s15946_s29 = sld [smem:[%s19307_s0 + %s15816_s15]]   ;;  %s15820_s15 = smov 23  }
  0x1a   :  { %s15951_s24 = sld [smem:[%s19307_s0 + %s15817_s22]]   ;;  %s15821_s22 = smov 24  }
  0x1b   :  { %s15966_s25 = sld [smem:[%s19307_s0 + %s15820_s15]]   ;;  %s15824_s15 = smov 27  }
  0x1c   :  { %19331 = sst [smem:[#allocation16_spill]] %s15931_s27 }
  0x1d   :  { %19332 = sst [smem:[#allocation17_spill]] %s15936_s4 }
  0x1e   :  { %19333 = sst [smem:[#allocation18_spill]] %s15941_s30 }
  0x1f   :  { %s15956_s4 = sld [smem:[%s19307_s0 + %s15818_s28]]   ;;  %s15822_s28 = smov 25  }
  0x20   :  { %s15961_s30 = sld [smem:[%s19307_s0 + %s15819_s7]]   ;;  %s15823_s7 = smov 26  }
  0x21   :  { %19335 = sst [smem:[#allocation20_spill]] %s15966_s25 }
  0x22   :  { %s15971_s27 = sld [smem:[%s19307_s0 + %s15821_s22]]   ;;  %s15825_s22 = smov 28  }
  0x23   :  { %s15976_s19 = sld [smem:[%s19307_s0 + %s15822_s28]]   ;;  %s15826_s28 = smov 29  }
  0x24   :  { %s15986_s25 = sld [smem:[%s19307_s0 + %s15824_s15]]  }
  0x26   :  { %19334 = sst [smem:[#allocation19_spill]] %s15961_s30 }
  0x27   :  { %s15981_s30 = sld [smem:[%s19307_s0 + %s15823_s7]]  }
  0x28   :  { %19336 = sst [smem:[#allocation21_spill]] %s15971_s27 }
  0x29   :  { %19337 = sst [smem:[#allocation22_spill]] %s15976_s19 }
  0x2a   :  { %s15991_s27 = sld [smem:[%s19307_s0 + %s15825_s22]]  }
  0x2b   :  { %s15996_s19 = sld [smem:[%s19307_s0 + %s15826_s28]]  }
  0x2c   :  { %64 = vsyncpa [#allocation3], 0 }
  0x2d   :  { %65 = vsyncpa [#allocation6], 0 }
  0x2e   :  { %66 = vsyncpa [#allocation4], 0  ;;  %s15827_s7 = smov [#allocation2]   ;;  %s15726_s11 = scalar_lea.hbm %s15951_s24, 17920 }
  0x2f   :  { %s112_s10 = sshll.u32 %s15827_s7, 4  ;;  %p15727_p0 = scmp.ne.s32.totalorder %s15951_s24, %s15726_s11  ;;  %s113_s10 = int_to_ptr.vmem [resolvable:$true] %s112_s10 }
  0x30   :  { %p15730_p1 = scmp.lt.u32.totalorder %s15726_s11, %s15951_s24 }
  0x32   :  { %p15732_p2 = pnand %p15730_p1, %p15727_p0 }
  0x34   :  { %15735 = shalt.err (!%p15732_p2)
}
  0x35   :  { %s15736_s15 = scalar_lea.vmem %s113_s10, 17920  ;;  %p15741_p4 = scmp.lt.s32.totalorder %s113_s10, %s113_s10 }
  0x36   :  { %p15737_p3 = scmp.ne.s32.totalorder %s113_s10, %s15736_s15  ;;  %p15742_p5 = scmp.lt.s32.totalorder %s15736_s15, %s15736_s15 }
  0x38   :  { %p15743_p6 = por %p15742_p5, %p15741_p4 }
  0x3a   :  { %p15744_p7 = pnand %p15743_p6, %p15737_p3 }
  0x3c   :  { %15747 = shalt.err (!%p15744_p7)
}
  0x3d   :  { %s15828_s0 = smov 256   ;;  %s15829_s16 = smov 16  }
  0x3e   :  { %118 = dma.hbm_to_vmem [thread:$0]  %s15951_s24, 17920, %s113_s10, [#allocation3], %s15828_s0, %s15828_s0, %s15829_s16  }
  0x3f   :  { %s15830_s18 = smov [#allocation5]   ;;  %s15748_s23 = scalar_lea.hbm %s15986_s25, 19200 }
  0x40   :  { %s136_s22 = sshll.u32 %s15830_s18, 4  ;;  %p15749_p8 = scmp.ne.s32.totalorder %s15986_s25, %s15748_s23  ;;  %s137_s22 = int_to_ptr.vmem [resolvable:$true] %s136_s22 }
  0x41   :  { %p15752_p9 = scmp.lt.u32.totalorder %s15748_s23, %s15986_s25 }
  0x43   :  { %p15754_p10 = pnand %p15752_p9, %p15749_p8 }
  0x45   :  { %15757 = shalt.err (!%p15754_p10)
}
  0x46   :  { %s15758_s26 = scalar_lea.vmem %s137_s22, 19200  ;;  %p15763_p12 = scmp.lt.s32.totalorder %s137_s22, %s137_s22 }
  0x47   :  { %p15759_p11 = scmp.ne.s32.totalorder %s137_s22, %s15758_s26  ;;  %p15764_p13 = scmp.lt.s32.totalorder %s15758_s26, %s15758_s26 }
  0x49   :  { %p15765_p0 = por %p15764_p13, %p15763_p12 }
  0x4b   :  { %p15766_p1 = pnand %p15765_p0, %p15759_p11 }
  0x4d   :  { %15769 = shalt.err (!%p15766_p1)
}
  0x4e   :  { %s15831_s28 = smov 3840   ;;  %s15832_s1 = smov 240  }
  0x4f   :  { %142 = dma.hbm_to_vmem [thread:$0]  %s15986_s25, 19200, %s137_s22, [#allocation6], %s15831_s28, %s15831_s28, %s15832_s1  }
  0x50   :  { %15792 = dma.done.wait [#allocation3], 17920  }
  0x51   :  { %15793 = vsyncadd [#allocation3], 4294949376 }
  0x52   :  { %15794 = dma.done.wait [#allocation6], 19200  }
  0x53   :  { %15795 = vsyncadd [#allocation6], 4294948096  ;;  %vm316_vm0 = vcmask 1043456   ;;  %vm195_vm1 = vcmask 228352   ;;  %v191_v0 = vld [vmem:[%s15856_s9] sm:$0xff]  ;;  %v192_v1 = vld [vmem:[%s15856_s9 + $0x8] sm:$0xff] }
  0x54   :  { %v193_v2 = vld [vmem:[%s15856_s9 + $0x10] sm:$0xff]  ;;  %v14103_v3 = vpack.c.bf16 %v192_v1, %v191_v0  ;;  %v194_v4 = vld [vmem:[%s15856_s9 + $0x18] sm:$0xf]  ;;  %v151_v5 = vld [vmem:[%s15851_s5] sm:$0xff]  ;;  %vm15833_vm2 = vmmov 1   ;;  %v19314_v46 = vmov 0.0|0.0  }
  0x55   :  { %v14107_v6 = vpack.c.bf16 %v194_v4, %v193_v2  ;;  %vm14108_vm3 = vmpackc.low %vm316_vm0, %vm15833_vm2  ;;  %13175 = vmatprep.mubr.msk.f32.mxu0 %vm195_vm1, %v151_v5  ;;  %v152_v7 = vld [vmem:[%s15851_s5 + $0x8] sm:$0xff]  ;;  %v153_v8 = vld [vmem:[%s15851_s5 + $0x10] sm:$0xff]  ;;  %14113 = vmatprep.subr.bf16.mxu1 %v19314_v46  ;;  %vm859_vm4 = vcmask 523264   ;;  %s15836_s9 = smov 64   ;;  %s15837_s25 = smov 96  }
  0x56   :  { %14104 = vmatprep.subr.bf16.mxu0 %v14103_v3  ;;  %v154_v9 = vld [vmem:[%s15851_s5 + $0x18] sm:$0xff]  ;;  %v155_v10 = vld [vmem:[%s15851_s5 + $0x20] sm:$0xff]  ;;  %v156_v11 = vld [vmem:[%s15851_s5 + $0x28] sm:$0xff]  ;;  %s19445_s24 = sld [smem:[#allocation12_spill]]  ;;  %s15840_s2 = smov 48  }
  0x57   :  { %14106 = vmatpush3.bf16.msra.mxu0 %v14103_v3  ;;  %v157_v12 = vld [vmem:[%s15851_s5 + $0x30] sm:$0xff]  ;;  %v158_v13 = vld [vmem:[%s15851_s5 + $0x38] sm:$0xff]  ;;  %v159_v14 = vld [vmem:[%s15851_s5 + $0x40] sm:$0xff] }
  0x58   :  { %14109 = vmatprep.subr.msk.bf16.mxu0 %vm14108_vm3, %v14107_v6  ;;  %v160_v15 = vld [vmem:[%s15851_s5 + $0x48] sm:$0xff]  ;;  %v161_v16 = vld [vmem:[%s15851_s5 + $0x50] sm:$0xff]  ;;  %v162_v17 = vld [vmem:[%s15851_s5 + $0x58] sm:$0xff] }
  0x59   :  { %v163_v18 = vld [vmem:[%s15851_s5 + $0x60] sm:$0xff]  ;;  %v164_v19 = vld [vmem:[%s15851_s5 + $0x68] sm:$0xff]  ;;  %v165_v20 = vld [vmem:[%s15851_s5 + $0x70] sm:$0xff] }
  0x5a   :  { %v166_v21 = vld [vmem:[%s15851_s5 + $0x78] sm:$0xff]  ;;  %v167_v22 = vld [vmem:[%s15851_s5 + $0x80] sm:$0xff]  ;;  %v168_v23 = vld [vmem:[%s15851_s5 + $0x88] sm:$0xff] }
  0x5b   :  { %14112 = vmatpush3.bf16.msk.msra.mxu0 %vm14108_vm3, %v14107_v6  ;;  %v169_v24 = vld [vmem:[%s15851_s5 + $0x90] sm:$0xff]  ;;  %v170_v25 = vld [vmem:[%s15851_s5 + $0x98] sm:$0xff]  ;;  %v171_v26 = vld [vmem:[%s15851_s5 + $0xa0] sm:$0xff] }
  0x5c   :  { %v172_v27 = vld [vmem:[%s15851_s5 + $0xa8] sm:$0xff]  ;;  %v173_v28 = vld [vmem:[%s15851_s5 + $0xb0] sm:$0xff]  ;;  %v174_v29 = vld [vmem:[%s15851_s5 + $0xb8] sm:$0xff] }
  0x5d   :  { %v175_v30 = vld [vmem:[%s15851_s5 + $0xc0] sm:$0xff]  ;;  %v176_v31 = vld [vmem:[%s15851_s5 + $0xc8] sm:$0xff]  ;;  %v177_v32 = vld [vmem:[%s15851_s5 + $0xd0] sm:$0xff] }
  0x5e   :  { %13176 = vmatmul.mubr.msk.f32.vlgmr.msra.gmra.mrb[0].mxu0 %vm195_vm1, %v152_v7  ;;  %v178_v33 = vld [vmem:[%s15851_s5 + $0xd8] sm:$0xff]  ;;  %v179_v34 = vld [vmem:[%s15851_s5 + $0xe0] sm:$0xff]  ;;  %v180_v35 = vld [vmem:[%s15851_s5 + $0xe8] sm:$0xff] }
  0x5f   :  { %13178 = vmatprep.mubr.msk.f32.mxu0 %vm195_vm1, %v153_v8  ;;  %v181_v36 = vld [vmem:[%s15851_s5 + $0xf0] sm:$0xff]  ;;  %v182_v37 = vld [vmem:[%s15851_s5 + $0xf8] sm:$0xff]  ;;  %v183_v38 = vld [vmem:[%s15851_s5 + $0x100] sm:$0xff] }
  0x60   :  { %v184_v39 = vld [vmem:[%s15851_s5 + $0x108] sm:$0xff]  ;;  %v185_v40 = vld [vmem:[%s15851_s5 + $0x110] sm:$0xff]  ;;  %v186_v41 = vld [vmem:[%s15851_s5 + $0x118] sm:$0xff] }
  0x61   :  { %v187_v42 = vld [vmem:[%s15851_s5 + $0x120] sm:$0xff]  ;;  %v188_v43 = vld [vmem:[%s15851_s5 + $0x128] sm:$0xff]  ;;  %v189_v44 = vld [vmem:[%s15851_s5 + $0x130] sm:$0xff] }
  0x62   :  { %13179 = vmatmul.mubr.msk.f32.gmra.mrb[2].mxu0 %vm195_vm1, %v154_v9  ;;  %v190_v45 = vld [vmem:[%s15851_s5 + $0x138] sm:$0xff]  ;;  %v800_v47 = vld [vmem:[%s15946_s29 + $0x8] sm:$0xff]  ;;  %v801_v48 = vld [vmem:[%s15946_s29 + $0x10] sm:$0xff]  ;;  %s15835_s5 = smov 32  }
  0x63   :  { %13181 = vmatprep.mubr.msk.f32.mxu0 %vm195_vm1, %v155_v10  ;;  %984 = vmatprep.mubr.f32.mxu1 %v800_v47  ;;  %v16098_v49 = vld [vmem:[%s15886_s3] ss:$0 sm:$0xff]  ;;  %s19442_s3 = sld [smem:[#allocation20_spill]] }
  0x64   :  { %v16101_v51 = vld [vmem:[%s15916_s6] ss:$0 sm:$0xff]  ;;  %s19446_s6 = sld [smem:[#allocation15_spill]] }
  0x66   :  { %13182 = vmatmul.mubr.msk.f32.gmra.mrb[4].mxu0 %vm195_vm1, %v156_v11 }
  0x67   :  { %13184 = vmatprep.mubr.msk.f32.mxu0 %vm195_vm1, %v157_v12 }
  0x6a   :  { %13185 = vmatmul.mubr.msk.f32.gmra.mrb[6].mxu0 %vm195_vm1, %v158_v13 }
  0x6b   :  { %13187 = vmatprep.mubr.msk.f32.mxu0 %vm195_vm1, %v159_v14 }
  0x6e   :  { %13188 = vmatmul.mubr.msk.f32.gmra.mrb[8].mxu0 %vm195_vm1, %v160_v15 }
  0x6f   :  { %13190 = vmatprep.mubr.msk.f32.mxu0 %vm195_vm1, %v161_v16 }
  0x72   :  { %13191 = vmatmul.mubr.msk.f32.gmra.mrb[10].mxu0 %vm195_vm1, %v162_v17 }
  0x73   :  { %13193 = vmatprep.mubr.msk.f32.mxu0 %vm195_vm1, %v163_v18 }
  0x76   :  { %13194 = vmatmul.mubr.msk.f32.gmra.mrb[12].mxu0 %vm195_vm1, %v164_v19 }
  0x77   :  { %13196 = vmatprep.mubr.msk.f32.mxu0 %vm195_vm1, %v165_v20 }
  0x7a   :  { %13197 = vmatmul.mubr.msk.f32.gmra.mrb[14].mxu0 %vm195_vm1, %v166_v21 }
  0x7b   :  { %13199 = vmatprep.mubr.msk.f32.mxu0 %vm195_vm1, %v167_v22 }
  0x7e   :  { %13200 = vmatmul.mubr.msk.f32.gmra.mrb[16].mxu0 %vm195_vm1, %v168_v23 }
  0x7f   :  { %13202 = vmatprep.mubr.msk.f32.mxu0 %vm195_vm1, %v169_v24 }
  0x82   :  { %13203 = vmatmul.mubr.msk.f32.gmra.mrb[18].mxu0 %vm195_vm1, %v170_v25 }
  0x83   :  { %13205 = vmatprep.mubr.msk.f32.mxu0 %vm195_vm1, %v171_v26 }
  0x86   :  { %13206 = vmatmul.mubr.msk.f32.gmra.mrb[20].mxu0 %vm195_vm1, %v172_v27 }
  0x87   :  { %13208 = vmatprep.mubr.msk.f32.mxu0 %vm195_vm1, %v173_v28 }
  0x8a   :  { %13209 = vmatmul.mubr.msk.f32.gmra.mrb[22].mxu0 %vm195_vm1, %v174_v29 }
  0x8b   :  { %13211 = vmatprep.mubr.msk.f32.mxu0 %vm195_vm1, %v175_v30 }
  0x8e   :  { %13212 = vmatmul.mubr.msk.f32.gmra.mrb[24].mxu0 %vm195_vm1, %v176_v31 }
  0x8f   :  { %13214 = vmatprep.mubr.msk.f32.mxu0 %vm195_vm1, %v177_v32 }
  0x92   :  { %13215 = vmatmul.mubr.msk.f32.gmra.mrb[26].mxu0 %vm195_vm1, %v178_v33 }
  0x93   :  { %13217 = vmatprep.mubr.msk.f32.mxu0 %vm195_vm1, %v179_v34 }
  0x96   :  { %13218 = vmatmul.mubr.msk.f32.gmra.mrb[28].mxu0 %vm195_vm1, %v180_v35 }
  0x97   :  { %13220 = vmatprep.mubr.msk.f32.mxu0 %vm195_vm1, %v181_v36 }
  0x9a   :  { %13221 = vmatmul.mubr.msk.f32.gmra.mrb[30].mxu0 %vm195_vm1, %v182_v37 }
  0x9b   :  { %13223 = vmatprep.mubr.msk.f32.mxu0 %vm195_vm1, %v183_v38 }
  0x9e   :  { %13224 = vmatmul.mubr.msk.f32.gmra.mrb[32].mxu0 %vm195_vm1, %v184_v39 }
  0x9f   :  { %13226 = vmatprep.mubr.msk.f32.mxu0 %vm195_vm1, %v185_v40 }
  0xa2   :  { %13227 = vmatmul.mubr.msk.f32.gmra.mrb[34].mxu0 %vm195_vm1, %v186_v41 }
  0xa3   :  { %13229 = vmatprep.mubr.msk.f32.mxu0 %vm195_vm1, %v187_v42 }
  0xa6   :  { %13230 = vmatmul.mubr.msk.f32.gmra.mrb[36].mxu0 %vm195_vm1, %v188_v43 }
  0xa7   :  { %13232 = vmatprep.mubr.msk.f32.mxu0 %vm195_vm1, %v189_v44 }
  0xaa   :  { %13233 = vmatmul.mubr.msk.f32.gmra.mrb[38].mxu0 %vm195_vm1, %v190_v45 }
  0xab   :  { %13251 = vmatprep.mubr.msk.f32.mxu0 %vm859_vm4, %v801_v48 }
 0x131   :  { %v13177_v50 = vpop.f32.mrb[0].mxu0 }
 0x132   :  { %v593_v52 = vmul.f32 %v13177_v50, %v16098_v49  ;;  %v386_v53 = vpop.f32.mrb[1].mxu0 }
 0x133   :  { %v592_v54 = vmul.f32 %v16098_v49, %v386_v53 }
 0x134   :  { %v640_v55 = vadd.f32 %v16101_v51, %v593_v52 }
 0x135   :  { %v639_v56 = vadd.f32 %v16101_v51, %v592_v54  ;;  %v13180_v57 = vpop.f32.mrb[2].mxu0 }
 0x136   :  { %vm680_vm5 = vcmp.gt.f32.partialorder %v640_v55, 0.0  ;;  %v720_v58 = vmul.f32 0.01, %v640_v55  ;;  %v595_v59 = vmul.f32 %v13180_v57, %v16098_v49  ;;  %v396_v60 = vpop.f32.mrb[3].mxu0 }
 0x137   :  { %vm679_vm6 = vcmp.gt.f32.partialorder %v639_v56, 0.0  ;;  %v719_v61 = vmul.f32 0.01, %v639_v56  ;;  %v594_v62 = vmul.f32 %v16098_v49, %v396_v60 }
 0x138   :  { %v760_v63 = vsel %vm680_vm5, %v640_v55, %v720_v58  ;;  %v642_v0 = vadd.f32 %v16101_v51, %v595_v59 }
 0x139   :  { %v759_v1 = vsel %vm679_vm6, %v639_v56, %v719_v61  ;;  %v641_v2 = vadd.f32 %v16101_v51, %v594_v62  ;;  %v13183_v3 = vpop.f32.mrb[4].mxu0 }
 0x13a   :  { %v16111_v4 = vpack.c.bf16 %v760_v63, %v759_v1  ;;  %vm682_vm7 = vcmp.gt.f32.partialorder %v642_v0, 0.0  ;;  %v722_v5 = vmul.f32 0.01, %v642_v0  ;;  %v597_v6 = vmul.f32 %v13183_v3, %v16098_v49  ;;  %v406_v7 = vpop.f32.mrb[5].mxu0 }
 0x13b   :  { %vm681_vm8 = vcmp.gt.f32.partialorder %v641_v2, 0.0  ;;  %v721_v8 = vmul.f32 0.01, %v641_v2  ;;  %v596_v9 = vmul.f32 %v16098_v49, %v406_v7 }
 0x13c   :  { %v762_v10 = vsel %vm682_vm7, %v642_v0, %v722_v5  ;;  %v644_v11 = vadd.f32 %v16101_v51, %v597_v6  ;;  %14115 = vmatpush1.bf16.msra.mxu1 %v16111_v4 }
 0x13d   :  { %v761_v12 = vsel %vm681_vm8, %v641_v2, %v721_v8  ;;  %v643_v13 = vadd.f32 %v16101_v51, %v596_v9  ;;  %v13186_v14 = vpop.f32.mrb[6].mxu0  ;;  %14116 = vmatprep.subr.bf16.mxu1 %v19314_v46 }
 0x13e   :  { %v16119_v15 = vpack.c.bf16 %v762_v10, %v761_v12  ;;  %vm684_vm9 = vcmp.gt.f32.partialorder %v644_v11, 0.0  ;;  %v724_v16 = vmul.f32 0.01, %v644_v11  ;;  %v599_v17 = vmul.f32 %v13186_v14, %v16098_v49  ;;  %v416_v18 = vpop.f32.mrb[7].mxu0 }
 0x13f   :  { %vm683_vm10 = vcmp.gt.f32.partialorder %v643_v13, 0.0  ;;  %v723_v19 = vmul.f32 0.01, %v643_v13  ;;  %v598_v20 = vmul.f32 %v16098_v49, %v416_v18 }
 0x140   :  { %v764_v21 = vsel %vm684_vm9, %v644_v11, %v724_v16  ;;  %v646_v22 = vadd.f32 %v16101_v51, %v599_v17  ;;  %14118 = vmatpush1.bf16.msra.mxu1 %v16119_v15 }
 0x141   :  { %v763_v23 = vsel %vm683_vm10, %v643_v13, %v723_v19  ;;  %v645_v24 = vadd.f32 %v16101_v51, %v598_v20  ;;  %v13189_v25 = vpop.f32.mrb[8].mxu0  ;;  %14119 = vmatprep.subr.bf16.mxu1 %v19314_v46 }
 0x142   :  { %v16127_v26 = vpack.c.bf16 %v764_v21, %v763_v23  ;;  %vm686_vm11 = vcmp.gt.f32.partialorder %v646_v22, 0.0  ;;  %v726_v27 = vmul.f32 0.01, %v646_v22  ;;  %v601_v28 = vmul.f32 %v13189_v25, %v16098_v49  ;;  %v426_v29 = vpop.f32.mrb[9].mxu0 }
 0x143   :  { %vm685_vm12 = vcmp.gt.f32.partialorder %v645_v24, 0.0  ;;  %v725_v30 = vmul.f32 0.01, %v645_v24  ;;  %v600_v31 = vmul.f32 %v16098_v49, %v426_v29 }
 0x144   :  { %v766_v32 = vsel %vm686_vm11, %v646_v22, %v726_v27  ;;  %v648_v33 = vadd.f32 %v16101_v51, %v601_v28  ;;  %14121 = vmatpush1.bf16.msra.mxu1 %v16127_v26 }
 0x145   :  { %v765_v34 = vsel %vm685_vm12, %v645_v24, %v725_v30  ;;  %v647_v35 = vadd.f32 %v16101_v51, %v600_v31  ;;  %v13192_v36 = vpop.f32.mrb[10].mxu0  ;;  %14122 = vmatprep.subr.bf16.mxu1 %v19314_v46 }
 0x146   :  { %v16135_v37 = vpack.c.bf16 %v766_v32, %v765_v34  ;;  %vm688_vm13 = vcmp.gt.f32.partialorder %v648_v33, 0.0  ;;  %v728_v38 = vmul.f32 0.01, %v648_v33  ;;  %v603_v39 = vmul.f32 %v13192_v36, %v16098_v49  ;;  %v436_v40 = vpop.f32.mrb[11].mxu0 }
 0x147   :  { %vm687_vm14 = vcmp.gt.f32.partialorder %v647_v35, 0.0  ;;  %v727_v41 = vmul.f32 0.01, %v647_v35  ;;  %v602_v42 = vmul.f32 %v16098_v49, %v436_v40 }
 0x148   :  { %v768_v43 = vsel %vm688_vm13, %v648_v33, %v728_v38  ;;  %v650_v44 = vadd.f32 %v16101_v51, %v603_v39  ;;  %14124 = vmatpush1.bf16.msra.mxu1 %v16135_v37 }
 0x149   :  { %v767_v45 = vsel %vm687_vm14, %v647_v35, %v727_v41  ;;  %v649_v47 = vadd.f32 %v16101_v51, %v602_v42  ;;  %v13195_v48 = vpop.f32.mrb[12].mxu0  ;;  %14125 = vmatprep.subr.bf16.mxu1 %v19314_v46 }
 0x14a   :  { %v16143_v50 = vpack.c.bf16 %v768_v43, %v767_v45  ;;  %vm690_vm15 = vcmp.gt.f32.partialorder %v650_v44, 0.0  ;;  %v730_v52 = vmul.f32 0.01, %v650_v44  ;;  %v605_v53 = vmul.f32 %v13195_v48, %v16098_v49  ;;  %v446_v54 = vpop.f32.mrb[13].mxu0 }
 0x14b   :  { %vm689_vm1 = vcmp.gt.f32.partialorder %v649_v47, 0.0  ;;  %v729_v55 = vmul.f32 0.01, %v649_v47  ;;  %v604_v56 = vmul.f32 %v16098_v49, %v446_v54 }
 0x14c   :  { %v770_v57 = vsel %vm690_vm15, %v650_v44, %v730_v52  ;;  %v652_v58 = vadd.f32 %v16101_v51, %v605_v53  ;;  %14127 = vmatpush1.bf16.msra.mxu1 %v16143_v50 }
 0x14d   :  { %v769_v59 = vsel %vm689_vm1, %v649_v47, %v729_v55  ;;  %v651_v60 = vadd.f32 %v16101_v51, %v604_v56  ;;  %v13198_v61 = vpop.f32.mrb[14].mxu0  ;;  %14128 = vmatprep.subr.bf16.mxu1 %v19314_v46 }
 0x14e   :  { %v16151_v62 = vpack.c.bf16 %v770_v57, %v769_v59  ;;  %vm692_vm3 = vcmp.gt.f32.partialorder %v652_v58, 0.0  ;;  %v732_v63 = vmul.f32 0.01, %v652_v58  ;;  %v607_v0 = vmul.f32 %v13198_v61, %v16098_v49  ;;  %v456_v1 = vpop.f32.mrb[15].mxu0 }
 0x14f   :  { %vm691_vm5 = vcmp.gt.f32.partialorder %v651_v60, 0.0  ;;  %v731_v2 = vmul.f32 0.01, %v651_v60  ;;  %v606_v3 = vmul.f32 %v16098_v49, %v456_v1 }
 0x150   :  { %v772_v5 = vsel %vm692_vm3, %v652_v58, %v732_v63  ;;  %v654_v6 = vadd.f32 %v16101_v51, %v607_v0  ;;  %14130 = vmatpush1.bf16.msra.mxu1 %v16151_v62 }
 0x151   :  { %v771_v7 = vsel %vm691_vm5, %v651_v60, %v731_v2  ;;  %v653_v8 = vadd.f32 %v16101_v51, %v606_v3  ;;  %v13201_v9 = vpop.f32.mrb[16].mxu0  ;;  %14131 = vmatprep.subr.bf16.mxu1 %v19314_v46 }
 0x152   :  { %v16159_v10 = vpack.c.bf16 %v772_v5, %v771_v7  ;;  %vm694_vm6 = vcmp.gt.f32.partialorder %v654_v6, 0.0  ;;  %v734_v11 = vmul.f32 0.01, %v654_v6  ;;  %v609_v12 = vmul.f32 %v13201_v9, %v16098_v49  ;;  %v466_v13 = vpop.f32.mrb[17].mxu0 }
 0x153   :  { %vm693_vm7 = vcmp.gt.f32.partialorder %v653_v8, 0.0  ;;  %v733_v14 = vmul.f32 0.01, %v653_v8  ;;  %v608_v16 = vmul.f32 %v16098_v49, %v466_v13 }
 0x154   :  { %v774_v17 = vsel %vm694_vm6, %v654_v6, %v734_v11  ;;  %v656_v18 = vadd.f32 %v16101_v51, %v609_v12  ;;  %14133 = vmatpush1.bf16.msra.mxu1 %v16159_v10 }
 0x155   :  { %v773_v19 = vsel %vm693_vm7, %v653_v8, %v733_v14  ;;  %v655_v20 = vadd.f32 %v16101_v51, %v608_v16  ;;  %v13204_v21 = vpop.f32.mrb[18].mxu0  ;;  %14134 = vmatprep.subr.bf16.mxu1 %v19314_v46 }
 0x156   :  { %v16167_v22 = vpack.c.bf16 %v774_v17, %v773_v19  ;;  %vm696_vm8 = vcmp.gt.f32.partialorder %v656_v18, 0.0  ;;  %v736_v23 = vmul.f32 0.01, %v656_v18  ;;  %v611_v24 = vmul.f32 %v13204_v21, %v16098_v49  ;;  %v476_v25 = vpop.f32.mrb[19].mxu0 }
 0x157   :  { %vm695_vm9 = vcmp.gt.f32.partialorder %v655_v20, 0.0  ;;  %v735_v27 = vmul.f32 0.01, %v655_v20  ;;  %v610_v28 = vmul.f32 %v16098_v49, %v476_v25 }
 0x158   :  { %v776_v29 = vsel %vm696_vm8, %v656_v18, %v736_v23  ;;  %v658_v30 = vadd.f32 %v16101_v51, %v611_v24  ;;  %14136 = vmatpush1.bf16.msra.mxu1 %v16167_v22 }
 0x159   :  { %v775_v31 = vsel %vm695_vm9, %v655_v20, %v735_v27  ;;  %v657_v32 = vadd.f32 %v16101_v51, %v610_v28  ;;  %v13207_v33 = vpop.f32.mrb[20].mxu0  ;;  %14137 = vmatprep.subr.bf16.mxu1 %v19314_v46 }
 0x15a   :  { %v16175_v34 = vpack.c.bf16 %v776_v29, %v775_v31  ;;  %vm698_vm10 = vcmp.gt.f32.partialorder %v658_v30, 0.0  ;;  %v738_v35 = vmul.f32 0.01, %v658_v30  ;;  %v613_v36 = vmul.f32 %v13207_v33, %v16098_v49  ;;  %v486_v38 = vpop.f32.mrb[21].mxu0 }
 0x15b   :  { %vm697_vm11 = vcmp.gt.f32.partialorder %v657_v32, 0.0  ;;  %v737_v39 = vmul.f32 0.01, %v657_v32  ;;  %v612_v40 = vmul.f32 %v16098_v49, %v486_v38 }
 0x15c   :  { %v778_v41 = vsel %vm698_vm10, %v658_v30, %v738_v35  ;;  %v660_v42 = vadd.f32 %v16101_v51, %v613_v36  ;;  %14139 = vmatpush1.bf16.msra.mxu1 %v16175_v34 }
 0x15d   :  { %v777_v43 = vsel %vm697_vm11, %v657_v32, %v737_v39  ;;  %v659_v44 = vadd.f32 %v16101_v51, %v612_v40  ;;  %v13210_v45 = vpop.f32.mrb[22].mxu0  ;;  %14140 = vmatprep.subr.bf16.mxu1 %v19314_v46 }
 0x15e   :  { %v16183_v47 = vpack.c.bf16 %v778_v41, %v777_v43  ;;  %vm700_vm12 = vcmp.gt.f32.partialorder %v660_v42, 0.0  ;;  %v740_v48 = vmul.f32 0.01, %v660_v42  ;;  %v615_v52 = vmul.f32 %v13210_v45, %v16098_v49  ;;  %v496_v53 = vpop.f32.mrb[23].mxu0 }
 0x15f   :  { %vm699_vm13 = vcmp.gt.f32.partialorder %v659_v44, 0.0  ;;  %v739_v54 = vmul.f32 0.01, %v659_v44  ;;  %v614_v55 = vmul.f32 %v16098_v49, %v496_v53 }
 0x160   :  { %v780_v56 = vsel %vm700_vm12, %v660_v42, %v740_v48  ;;  %v662_v57 = vadd.f32 %v16101_v51, %v615_v52  ;;  %14142 = vmatpush1.bf16.msra.mxu1 %v16183_v47 }
 0x161   :  { %v779_v58 = vsel %vm699_vm13, %v659_v44, %v739_v54  ;;  %v661_v59 = vadd.f32 %v16101_v51, %v614_v55  ;;  %v13213_v60 = vpop.f32.mrb[24].mxu0  ;;  %14143 = vmatprep.subr.bf16.mxu1 %v19314_v46 }
 0x162   :  { %v16191_v61 = vpack.c.bf16 %v780_v56, %v779_v58  ;;  %vm702_vm14 = vcmp.gt.f32.partialorder %v662_v57, 0.0  ;;  %v742_v63 = vmul.f32 0.01, %v662_v57  ;;  %v617_v0 = vmul.f32 %v13213_v60, %v16098_v49  ;;  %v506_v1 = vpop.f32.mrb[25].mxu0 }
 0x163   :  { %vm701_vm15 = vcmp.gt.f32.partialorder %v661_v59, 0.0  ;;  %v741_v2 = vmul.f32 0.01, %v661_v59  ;;  %v616_v3 = vmul.f32 %v16098_v49, %v506_v1 }
 0x164   :  { %v782_v5 = vsel %vm702_vm14, %v662_v57, %v742_v63  ;;  %v664_v6 = vadd.f32 %v16101_v51, %v617_v0  ;;  %14145 = vmatpush1.bf16.msra.mxu1 %v16191_v61 }
 0x165   :  { %v781_v7 = vsel %vm701_vm15, %v661_v59, %v741_v2  ;;  %v663_v8 = vadd.f32 %v16101_v51, %v616_v3  ;;  %v13216_v9 = vpop.f32.mrb[26].mxu0  ;;  %14146 = vmatprep.subr.bf16.mxu1 %v19314_v46 }
 0x166   :  { %v16199_v11 = vpack.c.bf16 %v782_v5, %v781_v7  ;;  %vm704_vm1 = vcmp.gt.f32.partialorder %v664_v6, 0.0  ;;  %v744_v12 = vmul.f32 0.01, %v664_v6  ;;  %v619_v13 = vmul.f32 %v13216_v9, %v16098_v49  ;;  %v516_v14 = vpop.f32.mrb[27].mxu0 }
 0x167   :  { %vm703_vm3 = vcmp.gt.f32.partialorder %v663_v8, 0.0  ;;  %v743_v16 = vmul.f32 0.01, %v663_v8  ;;  %v618_v17 = vmul.f32 %v16098_v49, %v516_v14  ;;  %v799_v14 = vld [vmem:[%s15946_s29] sm:$0xff] }
 0x168   :  { %v784_v18 = vsel %vm704_vm1, %v664_v6, %v744_v12  ;;  %v666_v19 = vadd.f32 %v16101_v51, %v619_v13  ;;  %14148 = vmatpush1.bf16.msra.mxu1 %v16199_v11 }
 0x169   :  { %v783_v20 = vsel %vm703_vm3, %v663_v8, %v743_v16  ;;  %v665_v21 = vadd.f32 %v16101_v51, %v618_v17  ;;  %v13219_v23 = vpop.f32.mrb[28].mxu0  ;;  %14149 = vmatprep.subr.bf16.mxu1 %v19314_v46 }
 0x16a   :  { %v16207_v24 = vpack.c.bf16 %v784_v18, %v783_v20  ;;  %vm706_vm5 = vcmp.gt.f32.partialorder %v666_v19, 0.0  ;;  %v746_v25 = vmul.f32 0.01, %v666_v19  ;;  %v621_v27 = vmul.f32 %v13219_v23, %v16098_v49  ;;  %v526_v28 = vpop.f32.mrb[29].mxu0 }
 0x16b   :  { %vm705_vm6 = vcmp.gt.f32.partialorder %v665_v21, 0.0  ;;  %v745_v29 = vmul.f32 0.01, %v665_v21  ;;  %v620_v30 = vmul.f32 %v16098_v49, %v526_v28 }
 0x16c   :  { %v786_v31 = vsel %vm706_vm5, %v666_v19, %v746_v25  ;;  %v668_v32 = vadd.f32 %v16101_v51, %v621_v27  ;;  %14151 = vmatpush1.bf16.msra.mxu1 %v16207_v24  ;;  %v803_v25 = vld [vmem:[%s15946_s29 + $0x20] sm:$0xff] }
 0x16d   :  { %v785_v33 = vsel %vm705_vm6, %v665_v21, %v745_v29  ;;  %v667_v35 = vadd.f32 %v16101_v51, %v620_v30  ;;  %v13222_v36 = vpop.f32.mrb[30].mxu0  ;;  %14152 = vmatprep.subr.bf16.mxu1 %v19314_v46  ;;  %vm4356_vm6 = vcmask 261120  }
 0x16e   :  { %v16215_v38 = vpack.c.bf16 %v786_v31, %v785_v33  ;;  %vm708_vm7 = vcmp.gt.f32.partialorder %v668_v32, 0.0  ;;  %v748_v39 = vmul.f32 0.01, %v668_v32  ;;  %v623_v40 = vmul.f32 %v13222_v36, %v16098_v49  ;;  %v536_v41 = vpop.f32.mrb[31].mxu0  ;;  %v802_v31 = vld [vmem:[%s15946_s29 + $0x18] sm:$0xff] }
 0x16f   :  { %vm707_vm8 = vcmp.gt.f32.partialorder %v667_v35, 0.0  ;;  %v747_v42 = vmul.f32 0.01, %v667_v35  ;;  %v622_v43 = vmul.f32 %v16098_v49, %v536_v41 }
 0x170   :  { %v788_v44 = vsel %vm708_vm7, %v668_v32, %v748_v39  ;;  %v670_v45 = vadd.f32 %v16101_v51, %v623_v40  ;;  %14154 = vmatpush1.bf16.msra.mxu1 %v16215_v38  ;;  %vm4397_vm7 = vcmask 785408  }
 0x171   :  { %v787_v48 = vsel %vm707_vm8, %v667_v35, %v747_v42  ;;  %v669_v52 = vadd.f32 %v16101_v51, %v622_v43  ;;  %v13225_v53 = vpop.f32.mrb[32].mxu0  ;;  %14155 = vmatprep.subr.bf16.mxu1 %v19314_v46  ;;  %v806_v42 = vld [vmem:[%s15946_s29 + $0x38] sm:$0xff] }
 0x172   :  { %v16223_v54 = vpack.c.bf16 %v788_v44, %v787_v48  ;;  %vm710_vm9 = vcmp.gt.f32.partialorder %v670_v45, 0.0  ;;  %v750_v55 = vmul.f32 0.01, %v670_v45  ;;  %v625_v56 = vmul.f32 %v13225_v53, %v16098_v49  ;;  %v546_v57 = vpop.f32.mrb[33].mxu0 }
 0x173   :  { %vm709_vm10 = vcmp.gt.f32.partialorder %v669_v52, 0.0  ;;  %v749_v58 = vmul.f32 0.01, %v669_v52  ;;  %v624_v59 = vmul.f32 %v16098_v49, %v546_v57  ;;  %v809_v57 = vld [vmem:[%s15946_s29 + $0x50] sm:$0xff] }
 0x174   :  { %v790_v60 = vsel %vm710_vm9, %v670_v45, %v750_v55  ;;  %v672_v63 = vadd.f32 %v16101_v51, %v625_v56  ;;  %14157 = vmatpush1.bf16.msra.mxu1 %v16223_v54 }
 0x175   :  { %v789_v0 = vsel %vm709_vm10, %v669_v52, %v749_v58  ;;  %v671_v1 = vadd.f32 %v16101_v51, %v624_v59  ;;  %v13228_v2 = vpop.f32.mrb[34].mxu0  ;;  %14158 = vmatprep.subr.bf16.mxu1 %v19314_v46  ;;  %v805_v52 = vld [vmem:[%s15946_s29 + $0x30] sm:$0xff] }
 0x176   :  { %v16231_v3 = vpack.c.bf16 %v790_v60, %v789_v0  ;;  %vm712_vm11 = vcmp.gt.f32.partialorder %v672_v63, 0.0  ;;  %v752_v5 = vmul.f32 0.01, %v672_v63  ;;  %v627_v6 = vmul.f32 %v13228_v2, %v16098_v49  ;;  %v556_v7 = vpop.f32.mrb[35].mxu0  ;;  %v812_v0 = vld [vmem:[%s15946_s29 + $0x68] sm:$0xff] }
 0x177   :  { %vm711_vm12 = vcmp.gt.f32.partialorder %v671_v1, 0.0  ;;  %v751_v8 = vmul.f32 0.01, %v671_v1  ;;  %v626_v9 = vmul.f32 %v16098_v49, %v556_v7  ;;  %v804_v2 = vld [vmem:[%s15946_s29 + $0x28] sm:$0xff]  ;;  %v814_v7 = vld [vmem:[%s15946_s29 + $0x78] sm:$0xff] }
 0x178   :  { %v792_v12 = vsel %vm712_vm11, %v672_v63, %v752_v5  ;;  %v674_v13 = vadd.f32 %v16101_v51, %v627_v6  ;;  %14160 = vmatpush1.bf16.msra.mxu1 %v16231_v3  ;;  %v815_v5 = vld [vmem:[%s15946_s29 + $0x80] sm:$0xff] }
 0x179   :  { %v791_v16 = vsel %vm711_vm12, %v671_v1, %v751_v8  ;;  %v673_v17 = vadd.f32 %v16101_v51, %v626_v9  ;;  %v13231_v18 = vpop.f32.mrb[36].mxu0  ;;  %14177 = vmatprep.subr.bf16.mxu1 %v19314_v46  ;;  %v811_v1 = vld [vmem:[%s15946_s29 + $0x60] sm:$0xff]  ;;  %v810_v8 = vld [vmem:[%s15946_s29 + $0x58] sm:$0xff] }
 0x17a   :  { %v16240_v19 = vpack.c.bf16 %v792_v12, %v791_v16  ;;  %vm714_vm13 = vcmp.gt.f32.partialorder %v674_v13, 0.0  ;;  %v754_v20 = vmul.f32 0.01, %v674_v13  ;;  %v629_v21 = vmul.f32 %v13231_v18, %v16098_v49  ;;  %v566_v23 = vpop.f32.mrb[37].mxu0  ;;  %v807_v6 = vld [vmem:[%s15946_s29 + $0x40] sm:$0xff]  ;;  %v818_v9 = vld [vmem:[%s15946_s29 + $0x98] sm:$0xff] }
 0x17b   :  { %vm713_vm14 = vcmp.gt.f32.partialorder %v673_v17, 0.0  ;;  %v753_v27 = vmul.f32 0.01, %v673_v17  ;;  %v628_v28 = vmul.f32 %v16098_v49, %v566_v23  ;;  %985 = vmatmul.mubr.f32.vlgmr.msra.gmra.mrb[0].mxu1 %v799_v14  ;;  %v813_v12 = vld [vmem:[%s15946_s29 + $0x70] sm:$0xff]  ;;  %v816_v14 = vld [vmem:[%s15946_s29 + $0x88] sm:$0xff] }
 0x17c   :  { %v794_v29 = vsel %vm714_vm13, %v674_v13, %v754_v20  ;;  %v676_v30 = vadd.f32 %v16101_v51, %v629_v21  ;;  %14162 = vmatprep.subr.bf16.mxu0 %v16240_v19  ;;  %14179 = vmatpush1.bf16.msra.mxu1 %v16111_v4  ;;  %v817_v13 = vld [vmem:[%s15946_s29 + $0x90] sm:$0xff]  ;;  %v820_v18 = vld [vmem:[%s15946_s29 + $0xa8] sm:$0xff]  ;;  %v822_v20 = vld [vmem:[%s15946_s29 + $0xb8] sm:$0xff] }
 0x17d   :  { %v793_v32 = vsel %vm713_vm14, %v673_v17, %v753_v27  ;;  %v675_v33 = vadd.f32 %v16101_v51, %v628_v28  ;;  %v13234_v35 = vpop.f32.mrb[38].mxu0  ;;  %14164 = vmatpush3.bf16.msra.mxu0 %v16240_v19  ;;  %989 = vmatprep.mubr.f32.mxu1 %v803_v25  ;;  %v821_v16 = vld [vmem:[%s15946_s29 + $0xb0] sm:$0xff]  ;;  %v819_v17 = vld [vmem:[%s15946_s29 + $0xa0] sm:$0xff]  ;;  %v824_v21 = vld [vmem:[%s15946_s29 + $0xc8] sm:$0xff] }
 0x17e   :  { %v16251_v36 = vpack.c.bf16 %v794_v29, %v793_v32  ;;  %vm716_vm15 = vcmp.gt.f32.partialorder %v676_v30, 0.0  ;;  %v756_v39 = vmul.f32 0.01, %v676_v30  ;;  %v631_v40 = vmul.f32 %v13234_v35, %v16098_v49  ;;  %v576_v41 = vpop.f32.mrb[39].mxu0  ;;  %14180 = vmatprep.subr.bf16.mxu1 %v19314_v46  ;;  %v825_v23 = vld [vmem:[%s15946_s29 + $0xd0] sm:$0xff]  ;;  %v823_v25 = vld [vmem:[%s15946_s29 + $0xc0] sm:$0xff] }
 0x17f   :  { %vm715_vm1 = vcmp.gt.f32.partialorder %v675_v33, 0.0  ;;  %v755_v43 = vmul.f32 0.01, %v675_v33  ;;  %v630_v44 = vmul.f32 %v16098_v49, %v576_v41  ;;  %990 = vmatmul.mubr.f32.gmra.mrb[2].mxu1 %v802_v31  ;;  %v828_v27 = vld [vmem:[%s15946_s29 + $0xe8] sm:$0xff]  ;;  %v827_v28 = vld [vmem:[%s15946_s29 + $0xe0] sm:$0xff]  ;;  %v834_v31 = vld [vmem:[%s15946_s29 + $0x118] sm:$0xff] }
 0x180   :  { %v796_v45 = vsel %vm716_vm15, %v676_v30, %v756_v39  ;;  %v678_v48 = vadd.f32 %v16101_v51, %v631_v40  ;;  %14166 = vmatprep.subr.bf16.mxu0 %v16251_v36  ;;  %14182 = vmatpush1.bf16.msra.mxu1 %v16119_v15  ;;  %v831_v29 = vld [vmem:[%s15946_s29 + $0x100] sm:$0xff]  ;;  %v826_v30 = vld [vmem:[%s15946_s29 + $0xd8] sm:$0xff]  ;;  %v829_v35 = vld [vmem:[%s15946_s29 + $0xf0] sm:$0xff] }
 0x181   :  { %v795_v53 = vsel %vm715_vm1, %v675_v33, %v755_v43  ;;  %v677_v55 = vadd.f32 %v16101_v51, %v630_v44  ;;  %14168 = vmatpush3.bf16.msra.mxu0 %v16251_v36  ;;  %994 = vmatprep.mubr.f32.mxu1 %v806_v42  ;;  %v808_v51 = vld [vmem:[%s15946_s29 + $0x48] sm:$0xff]  ;;  %v830_v32 = vld [vmem:[%s15946_s29 + $0xf8] sm:$0xff]  ;;  %v837_v33 = vld [vmem:[%s15946_s29 + $0x130] sm:$0xff] }
 0x182   :  { %v16263_v56 = vpack.c.bf16 %v796_v45, %v795_v53  ;;  %vm718_vm3 = vcmp.gt.f32.partialorder %v678_v48, 0.0  ;;  %v758_v49 = vmul.f32 0.01, %v678_v48  ;;  %14183 = vmatprep.subr.bf16.mxu1 %v19314_v46  ;;  %v840_v39 = vld [vmem:[%s15946_s29 + $0x148] sm:$0xff]  ;;  %v833_v40 = vld [vmem:[%s15946_s29 + $0x110] sm:$0xff]  ;;  %v843_v41 = vld [vmem:[%s15946_s29 + $0x160] sm:$0xff] }
 0x183   :  { %vm717_vm5 = vcmp.gt.f32.partialorder %v677_v55, 0.0  ;;  %v757_v58 = vmul.f32 0.01, %v677_v55  ;;  %995 = vmatmul.mubr.f32.gmra.mrb[4].mxu1 %v805_v52  ;;  %v832_v42 = vld [vmem:[%s15946_s29 + $0x108] sm:$0xff]  ;;  %v846_v43 = vld [vmem:[%s15946_s29 + $0x178] sm:$0xff]  ;;  %v849_v45 = vld [vmem:[%s15946_s29 + $0x190] sm:$0xff] }
 0x184   :  { %v798_v59 = vsel %vm718_vm3, %v678_v48, %v758_v49  ;;  %14170 = vmatprep.subr.bf16.mxu0 %v16263_v56  ;;  %14185 = vmatpush1.bf16.msra.mxu1 %v16127_v26  ;;  %v836_v44 = vld [vmem:[%s15946_s29 + $0x128] sm:$0xff]  ;;  %v835_v48 = vld [vmem:[%s15946_s29 + $0x120] sm:$0xff]  ;;  %v838_v49 = vld [vmem:[%s15946_s29 + $0x138] sm:$0xff] }
 0x185   :  { %v797_v60 = vsel %vm717_vm5, %v677_v55, %v757_v58  ;;  %14172 = vmatpush3.bf16.msra.mxu0 %v16263_v56  ;;  %999 = vmatprep.mubr.f32.mxu1 %v809_v57  ;;  %v852_v52 = vld [vmem:[%s15946_s29 + $0x1a8] sm:$0xff]  ;;  %v839_v53 = vld [vmem:[%s15946_s29 + $0x140] sm:$0xff]  ;;  %v858_v57 = vld [vmem:[%s15946_s29 + $0x1d8] sm:$0xff] }
 0x186   :  { %v16271_v63 = vpack.c.bf16 %v798_v59, %v797_v60  ;;  %14186 = vmatprep.subr.bf16.mxu1 %v19314_v46  ;;  %v855_v55 = vld [vmem:[%s15946_s29 + $0x1c0] sm:$0xff]  ;;  %v842_v58 = vld [vmem:[%s15946_s29 + $0x158] sm:$0xff]  ;;  %v11678_v59 = vld [vmem:[%s15946_s29 + $0x1f0] sm:$0xff] }
 0x187   :  { %1000 = vmatmul.mubr.f32.gmra.mrb[6].mxu1 %v808_v51  ;;  %v841_v51 = vld [vmem:[%s15946_s29 + $0x150] sm:$0xff]  ;;  %v11681_v60 = vld [vmem:[%s15946_s29 + $0x208] sm:$0xff] }
 0x188   :  { %14174 = vmatprep.subr.bf16.mxu0 %v16271_v63  ;;  %14188 = vmatpush1.bf16.msra.mxu1 %v16135_v37 }
 0x189   :  { %14176 = vmatpush3.bf16.msra.mxu0 %v16271_v63  ;;  %1004 = vmatprep.mubr.f32.mxu1 %v812_v0  ;;  %v845_v0 = vld [vmem:[%s15946_s29 + $0x170] sm:$0xff] }
 0x18a   :  { %14226 = vmatprep.subr.bf16.mxu0 %v16240_v19  ;;  %14189 = vmatprep.subr.bf16.mxu1 %v19314_v46 }
 0x18b   :  { %1005 = vmatmul.mubr.f32.gmra.mrb[8].mxu1 %v811_v1  ;;  %v844_v1 = vld [vmem:[%s15946_s29 + $0x168] sm:$0xff] }
 0x18c   :  { %13252 = vmatmul.mubr.msk.f32.vlgmr.msra.gmra.mrb[40].mxu0 %vm859_vm4, %v804_v2  ;;  %14191 = vmatpush1.bf16.msra.mxu1 %v16143_v50  ;;  %v11684_v2 = vld [vmem:[%s15946_s29 + $0x220] sm:$0xff] }
 0x18d   :  { %14228 = vmatpush3.bf16.msra.mxu0 %v16240_v19  ;;  %1009 = vmatprep.mubr.f32.mxu1 %v815_v5  ;;  %v848_v5 = vld [vmem:[%s15946_s29 + $0x188] sm:$0xff] }
 0x18e   :  { %14230 = vmatprep.subr.bf16.mxu0 %v16251_v36  ;;  %13254 = vmatprep.mubr.msk.f32.mxu0 %vm859_vm4, %v807_v6  ;;  %v11687_v6 = vld [vmem:[%s15946_s29 + $0x238] sm:$0xff] }
 0x18f   :  { %1010 = vmatmul.mubr.f32.gmra.mrb[10].mxu1 %v814_v7  ;;  %14192 = vmatprep.subr.bf16.mxu1 %v19314_v46  ;;  %v847_v7 = vld [vmem:[%s15946_s29 + $0x180] sm:$0xff] }
 0x190   :  { %13255 = vmatmul.mubr.msk.f32.gmra.mrb[42].mxu0 %vm859_vm4, %v810_v8  ;;  %14194 = vmatpush1.bf16.msra.mxu1 %v16151_v62  ;;  %v11690_v8 = vld [vmem:[%s15946_s29 + $0x250] sm:$0xff] }
 0x191   :  { %14232 = vmatpush3.bf16.msra.mxu0 %v16251_v36  ;;  %1014 = vmatprep.mubr.f32.mxu1 %v818_v9  ;;  %v851_v9 = vld [vmem:[%s15946_s29 + $0x1a0] sm:$0xff] }
 0x192   :  { %13257 = vmatprep.mubr.msk.f32.mxu0 %vm859_vm4, %v813_v12  ;;  %14195 = vmatprep.subr.bf16.mxu1 %v19314_v46  ;;  %v11693_v12 = vld [vmem:[%s15946_s29 + $0x268] sm:$0xff] }
 0x193   :  { %1015 = vmatmul.mubr.f32.gmra.mrb[12].mxu1 %v817_v13  ;;  %14234 = vmatprep.subr.bf16.mxu0 %v16263_v56  ;;  %v850_v13 = vld [vmem:[%s15946_s29 + $0x198] sm:$0xff] }
 0x194   :  { %13258 = vmatmul.mubr.msk.f32.gmra.mrb[44].mxu0 %vm859_vm4, %v816_v14  ;;  %14197 = vmatpush1.bf16.msra.mxu1 %v16159_v10  ;;  %v11696_v14 = vld [vmem:[%s15946_s29 + $0x280] sm:$0xff] }
 0x195   :  { %1019 = vmatprep.mubr.f32.mxu1 %v821_v16  ;;  %13260 = vmatprep.mubr.msk.f32.mxu0 %vm859_vm4, %v819_v17  ;;  %v854_v16 = vld [vmem:[%s15946_s29 + $0x1b8] sm:$0xff] }
 0x196   :  { %14198 = vmatprep.subr.bf16.mxu1 %v19314_v46  ;;  %14236 = vmatpush3.bf16.msra.mxu0 %v16263_v56  ;;  %v11699_v17 = vld [vmem:[%s15946_s29 + $0x298] sm:$0xff] }
 0x197   :  { %1020 = vmatmul.mubr.f32.gmra.mrb[14].mxu1 %v820_v18  ;;  %14238 = vmatprep.subr.bf16.mxu0 %v16271_v63  ;;  %v853_v18 = vld [vmem:[%s15946_s29 + $0x1b0] sm:$0xff] }
 0x198   :  { %13261 = vmatmul.mubr.msk.f32.gmra.mrb[46].mxu0 %vm859_vm4, %v822_v20  ;;  %14200 = vmatpush1.bf16.msra.mxu1 %v16167_v22  ;;  %v11702_v20 = vld [vmem:[%s15946_s29 + $0x2b0] sm:$0xff] }
 0x199   :  { %1024 = vmatprep.mubr.f32.mxu1 %v824_v21  ;;  %13263 = vmatprep.mubr.msk.f32.mxu0 %vm859_vm4, %v825_v23  ;;  %v857_v21 = vld [vmem:[%s15946_s29 + $0x1d0] sm:$0xff]  ;;  %v11705_v23 = vld [vmem:[%s15946_s29 + $0x2c8] sm:$0xff] }
 0x19a   :  { %14201 = vmatprep.subr.bf16.mxu1 %v19314_v46  ;;  %14240 = vmatpush3.bf16.msra.mxu0 %v16271_v63 }
 0x19b   :  { %1025 = vmatmul.mubr.f32.gmra.mrb[16].mxu1 %v823_v25  ;;  %14241 = vmatprep.subr.bf16.mxu0 %v19314_v46  ;;  %v856_v25 = vld [vmem:[%s15946_s29 + $0x1c8] sm:$0xff] }
 0x19c   :  { %13264 = vmatmul.mubr.msk.f32.gmra.mrb[48].mxu0 %vm859_vm4, %v828_v27  ;;  %14203 = vmatpush1.bf16.msra.mxu1 %v16175_v34  ;;  %v11708_v27 = vld [vmem:[%s15946_s29 + $0x2e0] sm:$0xff] }
 0x19d   :  { %1029 = vmatprep.mubr.f32.mxu1 %v827_v28  ;;  %13266 = vmatprep.mubr.msk.f32.mxu0 %vm859_vm4, %v831_v29  ;;  %v11677_v28 = vld [vmem:[%s15946_s29 + $0x1e8] sm:$0xff]  ;;  %v11711_v29 = vld [vmem:[%s15946_s29 + $0x2f8] sm:$0xff] }
 0x19e   :  { %14204 = vmatprep.subr.bf16.mxu1 %v19314_v46 }
 0x19f   :  { %1030 = vmatmul.mubr.f32.gmra.mrb[18].mxu1 %v826_v30  ;;  %v11676_v30 = vld [vmem:[%s15946_s29 + $0x1e0] sm:$0xff] }
 0x1a0   :  { %13267 = vmatmul.mubr.msk.f32.gmra.mrb[50].mxu0 %vm859_vm4, %v834_v31  ;;  %14206 = vmatpush1.bf16.msra.mxu1 %v16183_v47  ;;  %v11714_v31 = vld [vmem:[%s15946_s29 + $0x310] sm:$0xff] }
 0x1a1   :  { %1034 = vmatprep.mubr.f32.mxu1 %v830_v32  ;;  %13269 = vmatprep.mubr.msk.f32.mxu0 %vm859_vm4, %v837_v33  ;;  %v11680_v32 = vld [vmem:[%s15946_s29 + $0x200] sm:$0xff]  ;;  %v11717_v33 = vld [vmem:[%s15946_s29 + $0x328] sm:$0xff] }
 0x1a2   :  { %14207 = vmatprep.subr.bf16.mxu1 %v19314_v46 }
 0x1a3   :  { %1035 = vmatmul.mubr.f32.gmra.mrb[20].mxu1 %v829_v35  ;;  %v11679_v35 = vld [vmem:[%s15946_s29 + $0x1f8] sm:$0xff] }
 0x1a4   :  { %13270 = vmatmul.mubr.msk.f32.gmra.mrb[52].mxu0 %vm859_vm4, %v840_v39  ;;  %14209 = vmatpush1.bf16.msra.mxu1 %v16191_v61  ;;  %v11720_v39 = vld [vmem:[%s15946_s29 + $0x340] sm:$0xff] }
 0x1a5   :  { %1039 = vmatprep.mubr.f32.mxu1 %v833_v40  ;;  %13272 = vmatprep.mubr.msk.f32.mxu0 %vm859_vm4, %v843_v41  ;;  %v11683_v40 = vld [vmem:[%s15946_s29 + $0x218] sm:$0xff] }
 0x1a6   :  { %14210 = vmatprep.subr.bf16.mxu1 %v19314_v46  ;;  %v11723_v41 = vld [vmem:[%s15946_s29 + $0x358] sm:$0xff] }
 0x1a7   :  { %1040 = vmatmul.mubr.f32.gmra.mrb[22].mxu1 %v832_v42  ;;  %v11682_v42 = vld [vmem:[%s15946_s29 + $0x210] sm:$0xff] }
 0x1a8   :  { %13273 = vmatmul.mubr.msk.f32.gmra.mrb[54].mxu0 %vm859_vm4, %v846_v43  ;;  %14212 = vmatpush1.bf16.msra.mxu1 %v16199_v11  ;;  %v11726_v43 = vld [vmem:[%s15946_s29 + $0x370] sm:$0xff] }
 0x1a9   :  { %1044 = vmatprep.mubr.f32.mxu1 %v836_v44  ;;  %13275 = vmatprep.mubr.msk.f32.mxu0 %vm859_vm4, %v849_v45  ;;  %v11686_v44 = vld [vmem:[%s15946_s29 + $0x230] sm:$0xff]  ;;  %v11729_v45 = vld [vmem:[%s15946_s29 + $0x388] sm:$0xff] }
 0x1aa   :  { %14213 = vmatprep.subr.bf16.mxu1 %v19314_v46 }
 0x1ab   :  { %1045 = vmatmul.mubr.f32.gmra.mrb[24].mxu1 %v835_v48  ;;  %v11685_v48 = vld [vmem:[%s15946_s29 + $0x228] sm:$0xff] }
 0x1ac   :  { %13276 = vmatmul.mubr.msk.f32.gmra.mrb[56].mxu0 %vm859_vm4, %v852_v52  ;;  %14215 = vmatpush1.bf16.msra.mxu1 %v16207_v24  ;;  %v11732_v52 = vld [vmem:[%s15946_s29 + $0x3a0] sm:$0xff] }
 0x1ad   :  { %1049 = vmatprep.mubr.f32.mxu1 %v839_v53  ;;  %13278 = vmatprep.mubr.msk.f32.mxu0 %vm859_vm4, %v855_v55  ;;  %v11689_v53 = vld [vmem:[%s15946_s29 + $0x248] sm:$0xff]  ;;  %v11735_v55 = vld [vmem:[%s15946_s29 + $0x3b8] sm:$0xff] }
 0x1ae   :  { %14216 = vmatprep.subr.bf16.mxu1 %v19314_v46 }
 0x1af   :  { %1050 = vmatmul.mubr.f32.gmra.mrb[26].mxu1 %v838_v49  ;;  %v11688_v49 = vld [vmem:[%s15946_s29 + $0x240] sm:$0xff] }
 0x1b0   :  { %13279 = vmatmul.mubr.msk.f32.gmra.mrb[58].mxu0 %vm859_vm4, %v858_v57  ;;  %14218 = vmatpush1.bf16.msra.mxu1 %v16215_v38  ;;  %v11757_v57 = vld [vmem:[%s15946_s29 + $0x3c8] sm:$0xff] }
 0x1b1   :  { %1054 = vmatprep.mubr.f32.mxu1 %v842_v58  ;;  %14219 = vmatprep.subr.bf16.mxu1 %v19314_v46  ;;  %v11692_v58 = vld [vmem:[%s15946_s29 + $0x260] sm:$0xff] }
 0x1b2   :  { %13297 = vmatprep.mubr.msk.f32.mxu0 %vm859_vm4, %v11678_v59  ;;  %v11691_v59 = vld [vmem:[%s15946_s29 + $0x258] sm:$0xff] }
 0x1b3   :  { %1055 = vmatmul.mubr.f32.gmra.mrb[28].mxu1 %v841_v51  ;;  %v11695_v51 = vld [vmem:[%s15946_s29 + $0x278] sm:$0xff] }
 0x1b4   :  { %14221 = vmatpush1.bf16.msra.mxu1 %v16223_v54  ;;  %13298 = vmatmul.mubr.msk.f32.vlgmr.msra.gmra.mrb[60].mxu0 %vm859_vm4, %v11681_v60  ;;  %v11694_v60 = vld [vmem:[%s15946_s29 + $0x270] sm:$0xff] }
 0x1b5   :  { %14243 = vmatpush1.bf16.msra.mxu0 %v16111_v4  ;;  %1059 = vmatprep.mubr.f32.mxu1 %v845_v0  ;;  %v11698_v0 = vld [vmem:[%s15946_s29 + $0x290] sm:$0xff] }
 0x1b6   :  { %14222 = vmatprep.subr.bf16.mxu1 %v19314_v46  ;;  %14244 = vmatprep.subr.bf16.mxu0 %v19314_v46 }
 0x1b7   :  { %1060 = vmatmul.mubr.f32.gmra.mrb[30].mxu1 %v844_v1  ;;  %13300 = vmatprep.mubr.msk.f32.mxu0 %vm859_vm4, %v11684_v2  ;;  %v11697_v1 = vld [vmem:[%s15946_s29 + $0x288] sm:$0xff] }
 0x1b8   :  { %14224 = vmatpush1.bf16.msra.mxu1 %v16231_v3  ;;  %1064 = vmatprep.mubr.f32.mxu1 %v848_v5  ;;  %v11701_v2 = vld [vmem:[%s15946_s29 + $0x2a8] sm:$0xff]  ;;  %v11700_v5 = vld [vmem:[%s15946_s29 + $0x2a0] sm:$0xff] }
 0x1b9   :  { %14246 = vmatpush1.bf16.msra.mxu0 %v16119_v15  ;;  %14290 = vmatprep.subr.bf16.mxu1 %v16240_v19 }
 0x1ba   :  { %14247 = vmatprep.subr.bf16.mxu0 %v19314_v46  ;;  %13301 = vmatmul.mubr.msk.f32.gmra.mrb[62].mxu0 %vm859_vm4, %v11687_v6  ;;  %v11704_v6 = vld [vmem:[%s15946_s29 + $0x2c0] sm:$0xff] }
 0x1bb   :  { %1065 = vmatmul.mubr.f32.gmra.mrb[32].mxu1 %v847_v7  ;;  %13303 = vmatprep.mubr.msk.f32.mxu0 %vm859_vm4, %v11690_v8  ;;  %v11703_v7 = vld [vmem:[%s15946_s29 + $0x2b8] sm:$0xff] }
 0x1bc   :  { %1069 = vmatprep.mubr.f32.mxu1 %v851_v9  ;;  %v11707_v8 = vld [vmem:[%s15946_s29 + $0x2d8] sm:$0xff]  ;;  %v11706_v9 = vld [vmem:[%s15946_s29 + $0x2d0] sm:$0xff] }
 0x1bd   :  { %14249 = vmatpush1.bf16.msra.mxu0 %v16127_v26 }
 0x1be   :  { %14250 = vmatprep.subr.bf16.mxu0 %v19314_v46  ;;  %13304 = vmatmul.mubr.msk.f32.gmra.mrb[64].mxu0 %vm859_vm4, %v11693_v12  ;;  %v11756_v12 = vld [vmem:[%s15946_s29 + $0x3c0] sm:$0xff] }
 0x1bf   :  { %1070 = vmatmul.mubr.f32.gmra.mrb[34].mxu1 %v850_v13  ;;  %13306 = vmatprep.mubr.msk.f32.mxu0 %vm859_vm4, %v11696_v14  ;;  %v11710_v13 = vld [vmem:[%s15946_s29 + $0x2f0] sm:$0xff]  ;;  %v11760_v14 = vld [vmem:[%s15946_s29 + $0x3e0] sm:$0xff] }
 0x1c0   :  { %1074 = vmatprep.mubr.f32.mxu1 %v854_v16  ;;  %v11709_v16 = vld [vmem:[%s15946_s29 + $0x2e8] sm:$0xff] }
 0x1c1   :  { %14252 = vmatpush1.bf16.msra.mxu0 %v16135_v37 }
 0x1c2   :  { %14253 = vmatprep.subr.bf16.mxu0 %v19314_v46  ;;  %13307 = vmatmul.mubr.msk.f32.gmra.mrb[66].mxu0 %vm859_vm4, %v11699_v17  ;;  %v11759_v17 = vld [vmem:[%s15946_s29 + $0x3d8] sm:$0xff] }
 0x1c3   :  { %1075 = vmatmul.mubr.f32.gmra.mrb[36].mxu1 %v853_v18  ;;  %13309 = vmatprep.mubr.msk.f32.mxu0 %vm859_vm4, %v11702_v20  ;;  %v11713_v18 = vld [vmem:[%s15946_s29 + $0x308] sm:$0xff]  ;;  %v11763_v20 = vld [vmem:[%s15946_s29 + $0x3f8] sm:$0xff] }
 0x1c4   :  { %1079 = vmatprep.mubr.f32.mxu1 %v857_v21  ;;  %v11712_v21 = vld [vmem:[%s15946_s29 + $0x300] sm:$0xff] }
 0x1c5   :  { %14255 = vmatpush1.bf16.msra.mxu0 %v16143_v50 }
 0x1c6   :  { %14256 = vmatprep.subr.bf16.mxu0 %v19314_v46  ;;  %13310 = vmatmul.mubr.msk.f32.gmra.mrb[68].mxu0 %vm859_vm4, %v11705_v23  ;;  %v11762_v23 = vld [vmem:[%s15946_s29 + $0x3f0] sm:$0xff] }
 0x1c7   :  { %1080 = vmatmul.mubr.f32.gmra.mrb[38].mxu1 %v856_v25  ;;  %13312 = vmatprep.mubr.msk.f32.mxu0 %vm859_vm4, %v11708_v27  ;;  %v11716_v25 = vld [vmem:[%s15946_s29 + $0x320] sm:$0xff]  ;;  %v11766_v27 = vld [vmem:[%s15946_s29 + $0x410] sm:$0xff] }
 0x1c8   :  { %1435 = vmatprep.mubr.f32.mxu1 %v11677_v28  ;;  %v11715_v28 = vld [vmem:[%s15946_s29 + $0x318] sm:$0xff] }
 0x1c9   :  { %14258 = vmatpush1.bf16.msra.mxu0 %v16151_v62 }
 0x1ca   :  { %14259 = vmatprep.subr.bf16.mxu0 %v19314_v46  ;;  %13313 = vmatmul.mubr.msk.f32.gmra.mrb[70].mxu0 %vm859_vm4, %v11711_v29  ;;  %v11765_v29 = vld [vmem:[%s15946_s29 + $0x408] sm:$0xff] }
 0x1cb   :  { %1436 = vmatmul.mubr.f32.vlgmr.msra.gmra.mrb[40].mxu1 %v11676_v30  ;;  %13315 = vmatprep.mubr.msk.f32.mxu0 %vm859_vm4, %v11714_v31  ;;  %v11719_v30 = vld [vmem:[%s15946_s29 + $0x338] sm:$0xff]  ;;  %v11769_v31 = vld [vmem:[%s15946_s29 + $0x428] sm:$0xff] }
 0x1cc   :  { %14292 = vmatpush3.bf16.msra.mxu1 %v16240_v19  ;;  %1440 = vmatprep.mubr.f32.mxu1 %v11680_v32  ;;  %v11718_v32 = vld [vmem:[%s15946_s29 + $0x330] sm:$0xff] }
 0x1cd   :  { %14261 = vmatpush1.bf16.msra.mxu0 %v16159_v10  ;;  %14294 = vmatprep.subr.bf16.mxu1 %v16251_v36 }
 0x1ce   :  { %14262 = vmatprep.subr.bf16.mxu0 %v19314_v46  ;;  %13316 = vmatmul.mubr.msk.f32.gmra.mrb[72].mxu0 %vm859_vm4, %v11717_v33  ;;  %v11768_v33 = vld [vmem:[%s15946_s29 + $0x420] sm:$0xff] }
 0x1cf   :  { %1441 = vmatmul.mubr.f32.gmra.mrb[42].mxu1 %v11679_v35  ;;  %13318 = vmatprep.mubr.msk.f32.mxu0 %vm859_vm4, %v11720_v39  ;;  %v11722_v35 = vld [vmem:[%s15946_s29 + $0x350] sm:$0xff]  ;;  %v11772_v39 = vld [vmem:[%s15946_s29 + $0x440] sm:$0xff] }
 0x1d0   :  { %14296 = vmatpush3.bf16.msra.mxu1 %v16251_v36  ;;  %1445 = vmatprep.mubr.f32.mxu1 %v11683_v40  ;;  %v11721_v40 = vld [vmem:[%s15946_s29 + $0x348] sm:$0xff] }
 0x1d1   :  { %14264 = vmatpush1.bf16.msra.mxu0 %v16167_v22  ;;  %14298 = vmatprep.subr.bf16.mxu1 %v16263_v56 }
 0x1d2   :  { %14265 = vmatprep.subr.bf16.mxu0 %v19314_v46  ;;  %13319 = vmatmul.mubr.msk.f32.gmra.mrb[74].mxu0 %vm859_vm4, %v11723_v41  ;;  %v11771_v41 = vld [vmem:[%s15946_s29 + $0x438] sm:$0xff] }
 0x1d3   :  { %1446 = vmatmul.mubr.f32.gmra.mrb[44].mxu1 %v11682_v42  ;;  %13321 = vmatprep.mubr.msk.f32.mxu0 %vm859_vm4, %v11726_v43  ;;  %v11725_v42 = vld [vmem:[%s15946_s29 + $0x368] sm:$0xff]  ;;  %v11775_v43 = vld [vmem:[%s15946_s29 + $0x458] sm:$0xff] }
 0x1d4   :  { %14300 = vmatpush3.bf16.msra.mxu1 %v16263_v56  ;;  %1450 = vmatprep.mubr.f32.mxu1 %v11686_v44  ;;  %v11724_v44 = vld [vmem:[%s15946_s29 + $0x360] sm:$0xff] }
 0x1d5   :  { %14267 = vmatpush1.bf16.msra.mxu0 %v16175_v34  ;;  %14302 = vmatprep.subr.bf16.mxu1 %v16271_v63 }
 0x1d6   :  { %14268 = vmatprep.subr.bf16.mxu0 %v19314_v46  ;;  %13322 = vmatmul.mubr.msk.f32.gmra.mrb[76].mxu0 %vm859_vm4, %v11729_v45  ;;  %v11774_v45 = vld [vmem:[%s15946_s29 + $0x450] sm:$0xff] }
 0x1d7   :  { %1451 = vmatmul.mubr.f32.gmra.mrb[46].mxu1 %v11685_v48  ;;  %13324 = vmatprep.mubr.msk.f32.mxu0 %vm859_vm4, %v11732_v52  ;;  %v11728_v48 = vld [vmem:[%s15946_s29 + $0x380] sm:$0xff]  ;;  %v11778_v52 = vld [vmem:[%s15946_s29 + $0x470] sm:$0xff] }
 0x1d8   :  { %14304 = vmatpush3.bf16.msra.mxu1 %v16271_v63  ;;  %1455 = vmatprep.mubr.f32.mxu1 %v11689_v53  ;;  %v11727_v53 = vld [vmem:[%s15946_s29 + $0x378] sm:$0xff] }
 0x1d9   :  { %14270 = vmatpush1.bf16.msra.mxu0 %v16183_v47  ;;  %14354 = vmatprep.subr.bf16.mxu1 %v16240_v19 }
 0x1da   :  { %14271 = vmatprep.subr.bf16.mxu0 %v19314_v46  ;;  %13325 = vmatmul.mubr.msk.f32.gmra.mrb[78].mxu0 %vm859_vm4, %v11735_v55  ;;  %v11777_v55 = vld [vmem:[%s15946_s29 + $0x468] sm:$0xff] }
 0x1db   :  { %1456 = vmatmul.mubr.f32.gmra.mrb[48].mxu1 %v11688_v49  ;;  %1886 = vmatprep.mubr.f32.mxu0 %v11757_v57  ;;  %v11731_v49 = vld [vmem:[%s15946_s29 + $0x398] sm:$0xff]  ;;  %v11781_v57 = vld [vmem:[%s15946_s29 + $0x488] sm:$0xff] }
 0x1dc   :  { %1460 = vmatprep.mubr.f32.mxu1 %v11692_v58  ;;  %v11730_v58 = vld [vmem:[%s15946_s29 + $0x390] sm:$0xff] }
 0x1dd   :  { %14273 = vmatpush1.bf16.msra.mxu0 %v16191_v61 }
 0x1de   :  { %14274 = vmatprep.subr.bf16.mxu0 %v19314_v46 }
 0x1df   :  { %1461 = vmatmul.mubr.f32.gmra.mrb[50].mxu1 %v11691_v59  ;;  %v11780_v59 = vld [vmem:[%s15946_s29 + $0x480] sm:$0xff] }
 0x1e0   :  { %1465 = vmatprep.mubr.f32.mxu1 %v11695_v51  ;;  %v11734_v51 = vld [vmem:[%s15946_s29 + $0x3b0] sm:$0xff] }
 0x1e1   :  { %14276 = vmatpush1.bf16.msra.mxu0 %v16199_v11 }
 0x1e2   :  { %14277 = vmatprep.subr.bf16.mxu0 %v19314_v46 }
 0x1e3   :  { %1466 = vmatmul.mubr.f32.gmra.mrb[52].mxu1 %v11694_v60  ;;  %v11784_v60 = vld [vmem:[%s15946_s29 + $0x4a0] sm:$0xff] }
 0x1e4   :  { %1470 = vmatprep.mubr.f32.mxu1 %v11698_v0  ;;  %v11733_v0 = vld [vmem:[%s15946_s29 + $0x3a8] sm:$0xff] }
 0x1e5   :  { %14279 = vmatpush1.bf16.msra.mxu0 %v16207_v24 }
 0x1e6   :  { %14280 = vmatprep.subr.bf16.mxu0 %v19314_v46 }
 0x1e7   :  { %1471 = vmatmul.mubr.f32.gmra.mrb[54].mxu1 %v11697_v1  ;;  %v11783_v1 = vld [vmem:[%s15946_s29 + $0x498] sm:$0xff] }
 0x1e8   :  { %1475 = vmatprep.mubr.f32.mxu1 %v11701_v2  ;;  %v11758_v2 = vld [vmem:[%s15946_s29 + $0x3d0] sm:$0xff] }
 0x1e9   :  { %14282 = vmatpush1.bf16.msra.mxu0 %v16215_v38 }
 0x1ea   :  { %14283 = vmatprep.subr.bf16.mxu0 %v19314_v46 }
 0x1eb   :  { %1476 = vmatmul.mubr.f32.gmra.mrb[56].mxu1 %v11700_v5  ;;  %v11787_v5 = vld [vmem:[%s15946_s29 + $0x4b8] sm:$0xff] }
 0x1ec   :  { %1480 = vmatprep.mubr.f32.mxu1 %v11704_v6  ;;  %v11761_v6 = vld [vmem:[%s15946_s29 + $0x3e8] sm:$0xff] }
 0x1ed   :  { %14285 = vmatpush1.bf16.msra.mxu0 %v16223_v54 }
 0x1ee   :  { %14286 = vmatprep.subr.bf16.mxu0 %v19314_v46 }
 0x1ef   :  { %1481 = vmatmul.mubr.f32.gmra.mrb[58].mxu1 %v11703_v7  ;;  %v11786_v7 = vld [vmem:[%s15946_s29 + $0x4b0] sm:$0xff] }
 0x1f0   :  { %1485 = vmatprep.mubr.f32.mxu1 %v11707_v8  ;;  %v11790_v8 = vld [vmem:[%s15946_s29 + $0x4d0] sm:$0xff] }
 0x1f1   :  { %14288 = vmatpush1.bf16.msra.mxu0 %v16231_v3 }
 0x1f2   :  { %14305 = vmatprep.subr.bf16.mxu0 %v19314_v46 }
 0x1f3   :  { %1486 = vmatmul.mubr.f32.gmra.mrb[60].mxu1 %v11706_v9  ;;  %v11764_v9 = vld [vmem:[%s15946_s29 + $0x400] sm:$0xff] }
 0x1f4   :  { %1887 = vmatmul.mubr.f32.vlgmr.msra.gmra.mrb[80].mxu0 %v11756_v12  ;;  %1490 = vmatprep.mubr.f32.mxu1 %v11710_v13  ;;  %v11767_v12 = vld [vmem:[%s15946_s29 + $0x418] sm:$0xff]  ;;  %v11789_v13 = vld [vmem:[%s15946_s29 + $0x4c8] sm:$0xff] }
 0x1f5   :  { %14307 = vmatpush1.bf16.msra.mxu0 %v16111_v4  ;;  %1891 = vmatprep.mubr.f32.mxu0 %v11760_v14  ;;  %v11793_v14 = vld [vmem:[%s15946_s29 + $0x4e8] sm:$0xff] }
 0x1f6   :  { %14308 = vmatprep.subr.bf16.mxu0 %v19314_v46 }
 0x1f7   :  { %1491 = vmatmul.mubr.f32.gmra.mrb[62].mxu1 %v11709_v16  ;;  %v11770_v16 = vld [vmem:[%s15946_s29 + $0x430] sm:$0xff] }
 0x1f8   :  { %1892 = vmatmul.mubr.f32.gmra.mrb[82].mxu0 %v11759_v17  ;;  %1495 = vmatprep.mubr.f32.mxu1 %v11713_v18  ;;  %v11773_v17 = vld [vmem:[%s15946_s29 + $0x448] sm:$0xff]  ;;  %v11792_v18 = vld [vmem:[%s15946_s29 + $0x4e0] sm:$0xff] }
 0x1f9   :  { %14310 = vmatpush1.bf16.msra.mxu0 %v16119_v15  ;;  %1896 = vmatprep.mubr.f32.mxu0 %v11763_v20  ;;  %v11796_v20 = vld [vmem:[%s15946_s29 + $0x500] sm:$0xff] }
 0x1fa   :  { %14311 = vmatprep.subr.bf16.mxu0 %v19314_v46 }
 0x1fb   :  { %1496 = vmatmul.mubr.f32.gmra.mrb[64].mxu1 %v11712_v21  ;;  %v11776_v21 = vld [vmem:[%s15946_s29 + $0x460] sm:$0xff] }
 0x1fc   :  { %1897 = vmatmul.mubr.f32.gmra.mrb[84].mxu0 %v11762_v23  ;;  %1500 = vmatprep.mubr.f32.mxu1 %v11716_v25  ;;  %v11779_v23 = vld [vmem:[%s15946_s29 + $0x478] sm:$0xff] }
 0x1fd   :  { %14313 = vmatpush1.bf16.msra.mxu0 %v16127_v26  ;;  %1901 = vmatprep.mubr.f32.mxu0 %v11766_v27  ;;  %v11795_v25 = vld [vmem:[%s15946_s29 + $0x4f8] sm:$0xff] }
 0x1fe   :  { %14314 = vmatprep.subr.bf16.mxu0 %v19314_v46  ;;  %v11799_v27 = vld [vmem:[%s15946_s29 + $0x518] sm:$0xff] }
 0x1ff   :  { %1501 = vmatmul.mubr.f32.gmra.mrb[66].mxu1 %v11715_v28  ;;  %v11782_v28 = vld [vmem:[%s15946_s29 + $0x490] sm:$0xff] }
 0x200   :  { %1902 = vmatmul.mubr.f32.gmra.mrb[86].mxu0 %v11765_v29  ;;  %1505 = vmatprep.mubr.f32.mxu1 %v11719_v30  ;;  %v11785_v29 = vld [vmem:[%s15946_s29 + $0x4a8] sm:$0xff]  ;;  %v11798_v30 = vld [vmem:[%s15946_s29 + $0x510] sm:$0xff] }
 0x201   :  { %14316 = vmatpush1.bf16.msra.mxu0 %v16135_v37  ;;  %1906 = vmatprep.mubr.f32.mxu0 %v11769_v31  ;;  %v11788_v31 = vld [vmem:[%s15946_s29 + $0x4c0] sm:$0xff] }
 0x202   :  { %14317 = vmatprep.subr.bf16.mxu0 %v19314_v46 }
 0x203   :  { %1506 = vmatmul.mubr.f32.gmra.mrb[68].mxu1 %v11718_v32  ;;  %v11802_v32 = vld [vmem:[%s15946_s29 + $0x530] sm:$0xff] }
 0x204   :  { %1907 = vmatmul.mubr.f32.gmra.mrb[88].mxu0 %v11768_v33  ;;  %1510 = vmatprep.mubr.f32.mxu1 %v11722_v35  ;;  %v11791_v33 = vld [vmem:[%s15946_s29 + $0x4d8] sm:$0xff]  ;;  %v11801_v35 = vld [vmem:[%s15946_s29 + $0x528] sm:$0xff] }
 0x205   :  { %14319 = vmatpush1.bf16.msra.mxu0 %v16143_v50  ;;  %1911 = vmatprep.mubr.f32.mxu0 %v11772_v39  ;;  %v11794_v39 = vld [vmem:[%s15946_s29 + $0x4f0] sm:$0xff] }
 0x206   :  { %14320 = vmatprep.subr.bf16.mxu0 %v19314_v46 }
 0x207   :  { %1511 = vmatmul.mubr.f32.gmra.mrb[70].mxu1 %v11721_v40  ;;  %v11805_v40 = vld [vmem:[%s15946_s29 + $0x548] sm:$0xff] }
 0x208   :  { %1912 = vmatmul.mubr.f32.gmra.mrb[90].mxu0 %v11771_v41  ;;  %1515 = vmatprep.mubr.f32.mxu1 %v11725_v42  ;;  %v11797_v41 = vld [vmem:[%s15946_s29 + $0x508] sm:$0xff]  ;;  %v11804_v42 = vld [vmem:[%s15946_s29 + $0x540] sm:$0xff] }
 0x209   :  { %14322 = vmatpush1.bf16.msra.mxu0 %v16151_v62  ;;  %1916 = vmatprep.mubr.f32.mxu0 %v11775_v43  ;;  %v11800_v43 = vld [vmem:[%s15946_s29 + $0x520] sm:$0xff] }
 0x20a   :  { %14323 = vmatprep.subr.bf16.mxu0 %v19314_v46 }
 0x20b   :  { %1516 = vmatmul.mubr.f32.gmra.mrb[72].mxu1 %v11724_v44  ;;  %v11808_v44 = vld [vmem:[%s15946_s29 + $0x560] sm:$0xff] }
 0x20c   :  { %1917 = vmatmul.mubr.f32.gmra.mrb[92].mxu0 %v11774_v45  ;;  %1520 = vmatprep.mubr.f32.mxu1 %v11728_v48  ;;  %v11803_v45 = vld [vmem:[%s15946_s29 + $0x538] sm:$0xff] }
 0x20d   :  { %14325 = vmatpush1.bf16.msra.mxu0 %v16159_v10  ;;  %1921 = vmatprep.mubr.f32.mxu0 %v11778_v52  ;;  %v11807_v48 = vld [vmem:[%s15946_s29 + $0x558] sm:$0xff]  ;;  %v11806_v52 = vld [vmem:[%s15946_s29 + $0x550] sm:$0xff] }
 0x20e   :  { %14326 = vmatprep.subr.bf16.mxu0 %v19314_v46 }
 0x20f   :  { %1521 = vmatmul.mubr.f32.gmra.mrb[74].mxu1 %v11727_v53  ;;  %v11811_v53 = vld [vmem:[%s15946_s29 + $0x578] sm:$0xff] }
 0x210   :  { %1922 = vmatmul.mubr.f32.gmra.mrb[94].mxu0 %v11777_v55  ;;  %1525 = vmatprep.mubr.f32.mxu1 %v11731_v49  ;;  %v11809_v55 = vld [vmem:[%s15946_s29 + $0x568] sm:$0xff]  ;;  %v11810_v49 = vld [vmem:[%s15946_s29 + $0x570] sm:$0xff] }
 0x211   :  { %14328 = vmatpush1.bf16.msra.mxu0 %v16167_v22  ;;  %1926 = vmatprep.mubr.f32.mxu0 %v11781_v57  ;;  %v11812_v57 = vld [vmem:[%s15946_s29 + $0x580] sm:$0xff] }
 0x212   :  { %14329 = vmatprep.subr.bf16.mxu0 %v19314_v46 }
 0x213   :  { %1526 = vmatmul.mubr.f32.gmra.mrb[76].mxu1 %v11730_v58  ;;  %v11814_v58 = vld [vmem:[%s15946_s29 + $0x590] sm:$0xff] }
 0x214   :  { %1927 = vmatmul.mubr.f32.gmra.mrb[96].mxu0 %v11780_v59  ;;  %1530 = vmatprep.mubr.f32.mxu1 %v11734_v51  ;;  %v11815_v59 = vld [vmem:[%s15946_s29 + $0x598] sm:$0xff]  ;;  %v11813_v51 = vld [vmem:[%s15946_s29 + $0x588] sm:$0xff] }
 0x215   :  { %14331 = vmatpush1.bf16.msra.mxu0 %v16175_v34  ;;  %1931 = vmatprep.mubr.f32.mxu0 %v11784_v60  ;;  %v11838_v60 = vld [vmem:[%s15946_s29 + $0x5b0] sm:$0xff] }
 0x216   :  { %14332 = vmatprep.subr.bf16.mxu0 %v19314_v46 }
 0x217   :  { %1531 = vmatmul.mubr.f32.gmra.mrb[78].mxu1 %v11733_v0  ;;  %v11837_v0 = vld [vmem:[%s15946_s29 + $0x5a8] sm:$0xff] }
 0x218   :  { %1932 = vmatmul.mubr.f32.gmra.mrb[98].mxu0 %v11783_v1  ;;  %13343 = vmatprep.mubr.msk.f32.mxu1 %vm859_vm4, %v11758_v2  ;;  %v11841_v1 = vld [vmem:[%s15946_s29 + $0x5c8] sm:$0xff]  ;;  %v11836_v2 = vld [vmem:[%s15946_s29 + $0x5a0] sm:$0xff] }
 0x219   :  { %14334 = vmatpush1.bf16.msra.mxu0 %v16183_v47  ;;  %1936 = vmatprep.mubr.f32.mxu0 %v11787_v5  ;;  %v11840_v5 = vld [vmem:[%s15946_s29 + $0x5c0] sm:$0xff] }
 0x21a   :  { %14335 = vmatprep.subr.bf16.mxu0 %v19314_v46 }
 0x21b   :  { %13344 = vmatmul.mubr.msk.f32.vlgmr.msra.gmra.mrb[80].mxu1 %vm859_vm4, %v11761_v6  ;;  %v11844_v6 = vld [vmem:[%s15946_s29 + $0x5e0] sm:$0xff] }
 0x21c   :  { %1937 = vmatmul.mubr.f32.gmra.mrb[100].mxu0 %v11786_v7  ;;  %14356 = vmatpush3.bf16.msra.mxu1 %v16240_v19  ;;  %v11839_v7 = vld [vmem:[%s15946_s29 + $0x5b8] sm:$0xff] }
 0x21d   :  { %14337 = vmatpush1.bf16.msra.mxu0 %v16191_v61  ;;  %14358 = vmatprep.subr.bf16.mxu1 %v16251_v36 }
 0x21e   :  { %1941 = vmatprep.mubr.f32.mxu0 %v11790_v8  ;;  %13346 = vmatprep.mubr.msk.f32.mxu1 %vm859_vm4, %v11764_v9  ;;  %v11843_v8 = vld [vmem:[%s15946_s29 + $0x5d8] sm:$0xff] }
 0x21f   :  { %13347 = vmatmul.mubr.msk.f32.gmra.mrb[82].mxu1 %vm859_vm4, %v11767_v12  ;;  %14338 = vmatprep.subr.bf16.mxu0 %v19314_v46  ;;  %v11847_v9 = vld [vmem:[%s15946_s29 + $0x5f8] sm:$0xff]  ;;  %v11842_v12 = vld [vmem:[%s15946_s29 + $0x5d0] sm:$0xff] }
 0x220   :  { %1942 = vmatmul.mubr.f32.gmra.mrb[102].mxu0 %v11789_v13  ;;  %14360 = vmatpush3.bf16.msra.mxu1 %v16251_v36  ;;  %v11846_v13 = vld [vmem:[%s15946_s29 + $0x5f0] sm:$0xff] }
 0x221   :  { %14340 = vmatpush1.bf16.msra.mxu0 %v16199_v11  ;;  %14362 = vmatprep.subr.bf16.mxu1 %v16263_v56 }
 0x222   :  { %1946 = vmatprep.mubr.f32.mxu0 %v11793_v14  ;;  %13349 = vmatprep.mubr.msk.f32.mxu1 %vm859_vm4, %v11770_v16  ;;  %v11850_v14 = vld [vmem:[%s15946_s29 + $0x610] sm:$0xff]  ;;  %v11845_v16 = vld [vmem:[%s15946_s29 + $0x5e8] sm:$0xff] }
 0x223   :  { %13350 = vmatmul.mubr.msk.f32.gmra.mrb[84].mxu1 %vm859_vm4, %v11773_v17  ;;  %14341 = vmatprep.subr.bf16.mxu0 %v19314_v46  ;;  %v11849_v17 = vld [vmem:[%s15946_s29 + $0x608] sm:$0xff] }
 0x224   :  { %1947 = vmatmul.mubr.f32.gmra.mrb[104].mxu0 %v11792_v18  ;;  %14364 = vmatpush3.bf16.msra.mxu1 %v16263_v56 }
 0x225   :  { %14343 = vmatpush1.bf16.msra.mxu0 %v16207_v24  ;;  %14366 = vmatprep.subr.bf16.mxu1 %v16271_v63 }
 0x226   :  { %1951 = vmatprep.mubr.f32.mxu0 %v11796_v20  ;;  %13352 = vmatprep.mubr.msk.f32.mxu1 %vm859_vm4, %v11776_v21  ;;  %v11853_v21 = vld [vmem:[%s15946_s29 + $0x628] sm:$0xff] }
 0x227   :  { %13353 = vmatmul.mubr.msk.f32.gmra.mrb[86].mxu1 %vm859_vm4, %v11779_v23  ;;  %14344 = vmatprep.subr.bf16.mxu0 %v19314_v46  ;;  %v11848_v23 = vld [vmem:[%s15946_s29 + $0x600] sm:$0xff] }
 0x228   :  { %1952 = vmatmul.mubr.f32.gmra.mrb[106].mxu0 %v11795_v25  ;;  %14368 = vmatpush3.bf16.msra.mxu1 %v16271_v63  ;;  %v11852_v25 = vld [vmem:[%s15946_s29 + $0x620] sm:$0xff] }
 0x229   :  { %14346 = vmatpush1.bf16.msra.mxu0 %v16215_v38  ;;  %1956 = vmatprep.mubr.f32.mxu0 %v11799_v27 }
 0x22a   :  { %13355 = vmatprep.mubr.msk.f32.mxu1 %vm859_vm4, %v11782_v28  ;;  %14347 = vmatprep.subr.bf16.mxu0 %v19314_v46  ;;  %v11856_v28 = vld [vmem:[%s15946_s29 + $0x640] sm:$0xff] }
 0x22b   :  { %13356 = vmatmul.mubr.msk.f32.gmra.mrb[88].mxu1 %vm859_vm4, %v11785_v29  ;;  %14369 = vmatprep.subr.bf16.mxu1 %v19314_v46 }
 0x22c   :  { %1957 = vmatmul.mubr.f32.gmra.mrb[108].mxu0 %v11798_v30  ;;  %13358 = vmatprep.mubr.msk.f32.mxu1 %vm859_vm4, %v11788_v31  ;;  %v11859_v30 = vld [vmem:[%s15946_s29 + $0x658] sm:$0xff] }
 0x22d   :  { %14349 = vmatpush1.bf16.msra.mxu0 %v16223_v54  ;;  %1961 = vmatprep.mubr.f32.mxu0 %v11802_v32  ;;  %v11851_v31 = vld [vmem:[%s15946_s29 + $0x618] sm:$0xff] }
 0x22e   :  { %14350 = vmatprep.subr.bf16.mxu0 %v19314_v46  ;;  %v11855_v32 = vld [vmem:[%s15946_s29 + $0x638] sm:$0xff] }
 0x22f   :  { %13359 = vmatmul.mubr.msk.f32.gmra.mrb[90].mxu1 %vm859_vm4, %v11791_v33 }
 0x230   :  { %1962 = vmatmul.mubr.f32.gmra.mrb[110].mxu0 %v11801_v35  ;;  %13361 = vmatprep.mubr.msk.f32.mxu1 %vm859_vm4, %v11794_v39  ;;  %v11862_v35 = vld [vmem:[%s15946_s29 + $0x670] sm:$0xff] }
 0x231   :  { %14352 = vmatpush1.bf16.msra.mxu0 %v16231_v3  ;;  %1966 = vmatprep.mubr.f32.mxu0 %v11805_v40  ;;  %v11865_v40 = vld [vmem:[%s15946_s29 + $0x688] sm:$0xff] }
 0x232   :  { %14418 = vmatprep.subr.bf16.mxu0 %v16240_v19 }
 0x233   :  { %13362 = vmatmul.mubr.msk.f32.gmra.mrb[92].mxu1 %vm859_vm4, %v11797_v41  ;;  %v11854_v41 = vld [vmem:[%s15946_s29 + $0x630] sm:$0xff] }
 0x234   :  { %1967 = vmatmul.mubr.f32.gmra.mrb[112].mxu0 %v11804_v42  ;;  %13364 = vmatprep.mubr.msk.f32.mxu1 %vm859_vm4, %v11800_v43  ;;  %v11858_v42 = vld [vmem:[%s15946_s29 + $0x650] sm:$0xff] }
 0x235   :  { %1971 = vmatprep.mubr.f32.mxu0 %v11808_v44  ;;  %v11868_v44 = vld [vmem:[%s15946_s29 + $0x6a0] sm:$0xff] }
 0x237   :  { %13365 = vmatmul.mubr.msk.f32.gmra.mrb[94].mxu1 %vm859_vm4, %v11803_v45 }
 0x238   :  { %1972 = vmatmul.mubr.f32.gmra.mrb[114].mxu0 %v11807_v48  ;;  %13367 = vmatprep.mubr.msk.f32.mxu1 %vm859_vm4, %v11806_v52  ;;  %v11871_v48 = vld [vmem:[%s15946_s29 + $0x6b8] sm:$0xff]  ;;  %v11857_v52 = vld [vmem:[%s15946_s29 + $0x648] sm:$0xff] }
 0x239   :  { %1976 = vmatprep.mubr.f32.mxu0 %v11811_v53  ;;  %v11861_v53 = vld [vmem:[%s15946_s29 + $0x668] sm:$0xff] }
 0x23b   :  { %13368 = vmatmul.mubr.msk.f32.gmra.mrb[96].mxu1 %vm859_vm4, %v11809_v55 }
 0x23c   :  { %1977 = vmatmul.mubr.f32.gmra.mrb[116].mxu0 %v11810_v49  ;;  %13370 = vmatprep.mubr.msk.f32.mxu1 %vm859_vm4, %v11812_v57  ;;  %v11874_v57 = vld [vmem:[%s15946_s29 + $0x6d0] sm:$0xff] }
 0x23d   :  { %1981 = vmatprep.mubr.f32.mxu0 %v11814_v58 }
 0x23f   :  { %13371 = vmatmul.mubr.msk.f32.gmra.mrb[98].mxu1 %vm859_vm4, %v11815_v59 }
 0x240   :  { %1982 = vmatmul.mubr.f32.gmra.mrb[118].mxu0 %v11813_v51  ;;  %13389 = vmatprep.mubr.msk.f32.mxu1 %vm859_vm4, %v11838_v60  ;;  %v11877_v60 = vld [vmem:[%s15946_s29 + $0x6e8] sm:$0xff] }
 0x241   :  { %2337 = vmatprep.mubr.f32.mxu0 %v11837_v0  ;;  %v11860_v0 = vld [vmem:[%s15946_s29 + $0x660] sm:$0xff] }
 0x243   :  { %13390 = vmatmul.mubr.msk.f32.vlgmr.msra.gmra.mrb[100].mxu1 %vm859_vm4, %v11841_v1 }
 0x244   :  { %2338 = vmatmul.mubr.f32.vlgmr.msra.gmra.mrb[120].mxu0 %v11836_v2  ;;  %14371 = vmatpush1.bf16.msra.mxu1 %v16111_v4  ;;  %v11864_v2 = vld [vmem:[%s15946_s29 + $0x680] sm:$0xff] }
 0x245   :  { %14420 = vmatpush3.bf16.msra.mxu0 %v16240_v19  ;;  %2342 = vmatprep.mubr.f32.mxu0 %v11840_v5 }
 0x246   :  { %14422 = vmatprep.subr.bf16.mxu0 %v16251_v36  ;;  %14372 = vmatprep.subr.bf16.mxu1 %v19314_v46 }
 0x247   :  { %13392 = vmatprep.mubr.msk.f32.mxu1 %vm859_vm4, %v11844_v6 }
 0x248   :  { %2343 = vmatmul.mubr.f32.gmra.mrb[122].mxu0 %v11839_v7  ;;  %14374 = vmatpush1.bf16.msra.mxu1 %v16119_v15  ;;  %v11880_v7 = vld [vmem:[%s15946_s29 + $0x700] sm:$0xff] }
 0x249   :  { %14424 = vmatpush3.bf16.msra.mxu0 %v16251_v36  ;;  %2347 = vmatprep.mubr.f32.mxu0 %v11843_v8 }
 0x24a   :  { %14426 = vmatprep.subr.bf16.mxu0 %v16263_v56  ;;  %14375 = vmatprep.subr.bf16.mxu1 %v19314_v46 }
 0x24b   :  { %13393 = vmatmul.mubr.msk.f32.gmra.mrb[102].mxu1 %vm859_vm4, %v11847_v9 }
 0x24c   :  { %2348 = vmatmul.mubr.f32.gmra.mrb[124].mxu0 %v11842_v12  ;;  %14377 = vmatpush1.bf16.msra.mxu1 %v16127_v26 }
 0x24d   :  { %14428 = vmatpush3.bf16.msra.mxu0 %v16263_v56  ;;  %2352 = vmatprep.mubr.f32.mxu0 %v11846_v13  ;;  %v11883_v13 = vld [vmem:[%s15946_s29 + $0x718] sm:$0xff] }
 0x24e   :  { %14430 = vmatprep.subr.bf16.mxu0 %v16271_v63  ;;  %14378 = vmatprep.subr.bf16.mxu1 %v19314_v46  ;;  %v986_v18 = vpop.f32.mrb[0].mxu1 }
 0x24f   :  { %13395 = vmatprep.mubr.msk.f32.mxu1 %vm859_vm4, %v11850_v14  ;;  %v988_v20 = vpop.f32.mrb[1].mxu1  ;;  %v11863_v14 = vld [vmem:[%s15946_s29 + $0x678] sm:$0xff] }
 0x250   :  { %2353 = vmatmul.mubr.f32.gmra.mrb[126].mxu0 %v11845_v16  ;;  %14380 = vmatpush1.bf16.msra.mxu1 %v16135_v37 }
 0x251   :  { %14432 = vmatpush3.bf16.msra.mxu0 %v16271_v63  ;;  %2357 = vmatprep.mubr.f32.mxu0 %v11849_v17  ;;  %v11867_v17 = vld [vmem:[%s15946_s29 + $0x698] sm:$0xff] }
 0x252   :  { %14482 = vmatprep.subr.bf16.mxu0 %v16240_v19  ;;  %14381 = vmatprep.subr.bf16.mxu1 %v19314_v46  ;;  %v991_v27 = vpop.f32.mrb[2].mxu1 }
 0x253   :  { %13396 = vmatmul.mubr.msk.f32.gmra.mrb[104].mxu1 %vm859_vm4, %v11853_v21  ;;  %v993_v29 = vpop.f32.mrb[3].mxu1  ;;  %v11886_v21 = vld [vmem:[%s15946_s29 + $0x730] sm:$0xff] }
 0x254   :  { %2358 = vmatmul.mubr.f32.gmra.mrb[128].mxu0 %v11848_v23  ;;  %14383 = vmatpush1.bf16.msra.mxu1 %v16143_v50  ;;  %v11866_v29 = vld [vmem:[%s15946_s29 + $0x690] sm:$0xff] }
 0x255   :  { %2362 = vmatprep.mubr.f32.mxu0 %v11852_v25  ;;  %14384 = vmatprep.subr.bf16.mxu1 %v19314_v46 }
 0x256   :  { %13398 = vmatprep.mubr.msk.f32.mxu1 %vm859_vm4, %v11856_v28  ;;  %v996_v33 = vpop.f32.mrb[4].mxu1  ;;  %v11889_v28 = vld [vmem:[%s15946_s29 + $0x748] sm:$0xff] }
 0x257   :  { %13399 = vmatmul.mubr.msk.f32.gmra.mrb[106].mxu1 %vm859_vm4, %v11859_v30  ;;  %v998_v39 = vpop.f32.mrb[5].mxu1 }
 0x258   :  { %2363 = vmatmul.mubr.f32.gmra.mrb[130].mxu0 %v11851_v31  ;;  %14386 = vmatpush1.bf16.msra.mxu1 %v16151_v62  ;;  %v11870_v31 = vld [vmem:[%s15946_s29 + $0x6b0] sm:$0xff] }
 0x259   :  { %2367 = vmatprep.mubr.f32.mxu0 %v11855_v32  ;;  %14387 = vmatprep.subr.bf16.mxu1 %v19314_v46 }
 0x25a   :  { %13401 = vmatprep.mubr.msk.f32.mxu1 %vm859_vm4, %v11862_v35  ;;  %v1001_v43 = vpop.f32.mrb[6].mxu1  ;;  %v11892_v35 = vld [vmem:[%s15946_s29 + $0x760] sm:$0xff] }
 0x25b   :  { %13402 = vmatmul.mubr.msk.f32.gmra.mrb[108].mxu1 %vm859_vm4, %v11865_v40  ;;  %v1003_v45 = vpop.f32.mrb[7].mxu1 }
 0x25c   :  { %2368 = vmatmul.mubr.f32.gmra.mrb[132].mxu0 %v11854_v41  ;;  %14389 = vmatpush1.bf16.msra.mxu1 %v16159_v10  ;;  %v11895_v41 = vld [vmem:[%s15946_s29 + $0x778] sm:$0xff]  ;;  %v11873_v45 = vld [vmem:[%s15946_s29 + $0x6c8] sm:$0xff] }
 0x25d   :  { %2372 = vmatprep.mubr.f32.mxu0 %v11858_v42  ;;  %14390 = vmatprep.subr.bf16.mxu1 %v19314_v46 }
 0x25e   :  { %13404 = vmatprep.mubr.msk.f32.mxu1 %vm859_vm4, %v11868_v44  ;;  %v1006_v55 = vpop.f32.mrb[8].mxu1 }
 0x25f   :  { %v13253_v49 = vpop.f32.mrb[40].mxu0  ;;  %13405 = vmatmul.mubr.msk.f32.gmra.mrb[110].mxu1 %vm859_vm4, %v11871_v48  ;;  %v1008_v58 = vpop.f32.mrb[9].mxu1 }
 0x260   :  { %2373 = vmatmul.mubr.f32.gmra.mrb[134].mxu0 %v11857_v52  ;;  %14392 = vmatpush1.bf16.msra.mxu1 %v16167_v22  ;;  %v1151_v59 = vpop.f32.mrb[41].mxu0  ;;  %v16686_v51 = vadd.f32 %v13253_v49, %v991_v27  ;;  %v11917_v52 = vld [vmem:[%s15946_s29 + $0x788] sm:$0xff] }
 0x261   :  { %2377 = vmatprep.mubr.f32.mxu0 %v11861_v53  ;;  %14393 = vmatprep.subr.bf16.mxu1 %v19314_v46  ;;  %v16691_v1 = vadd.f32 %v1151_v59, %v986_v18  ;;  %v11876_v59 = vld [vmem:[%s15946_s29 + $0x6e0] sm:$0xff] }
 0x262   :  { %13407 = vmatprep.mubr.msk.f32.mxu1 %vm859_vm4, %v11874_v57  ;;  %v1011_v5 = vpop.f32.mrb[10].mxu1  ;;  %v11872_v57 = vld [vmem:[%s15946_s29 + $0x6c0] sm:$0xff] }
 0x263   :  { %v13256_v6 = vpop.f32.mrb[42].mxu0  ;;  %13408 = vmatmul.mubr.msk.f32.gmra.mrb[112].mxu1 %vm859_vm4, %v11877_v60  ;;  %v1013_v8 = vpop.f32.mrb[11].mxu1 }
 0x264   :  { %2378 = vmatmul.mubr.f32.gmra.mrb[136].mxu0 %v11860_v0  ;;  %14395 = vmatpush1.bf16.msra.mxu1 %v16175_v34  ;;  %v1161_v9 = vpop.f32.mrb[43].mxu0  ;;  %v16698_v12 = vadd.f32 %v13256_v6, %v1001_v43  ;;  %v11869_v43 = vld [vmem:[%s15946_s29 + $0x6a8] sm:$0xff]  ;;  %v11879_v8 = vld [vmem:[%s15946_s29 + $0x6f8] sm:$0xff] }
 0x265   :  { %2382 = vmatprep.mubr.f32.mxu0 %v11864_v2  ;;  %14396 = vmatprep.subr.bf16.mxu1 %v19314_v46  ;;  %v16703_v16 = vadd.f32 %v1161_v9, %v996_v33 }
 0x266   :  { %19338 = vst [vmem:[#allocation23_spill] sm:$0xff] %v16698_v12  ;;  %13410 = vmatprep.mubr.msk.f32.mxu1 %vm859_vm4, %v11880_v7  ;;  %v1016_v18 = vpop.f32.mrb[12].mxu1  ;;  %v11875_v7 = vld [vmem:[%s15946_s29 + $0x6d8] sm:$0xff] }
 0x267   :  { %19339 = vst [vmem:[#allocation24_spill] sm:$0xff] %v16703_v16  ;;  %v13259_v20 = vpop.f32.mrb[44].mxu0  ;;  %13411 = vmatmul.mubr.msk.f32.gmra.mrb[114].mxu1 %vm859_vm4, %v11883_v13  ;;  %v1018_v23 = vpop.f32.mrb[13].mxu1 }
 0x268   :  { %2383 = vmatmul.mubr.f32.gmra.mrb[138].mxu0 %v11863_v14  ;;  %14398 = vmatpush1.bf16.msra.mxu1 %v16183_v47  ;;  %v1171_v25 = vpop.f32.mrb[45].mxu0  ;;  %v16710_v27 = vadd.f32 %v13259_v20, %v1011_v5  ;;  %v11878_v20 = vld [vmem:[%s15946_s29 + $0x6f0] sm:$0xff] }
 0x269   :  { %2387 = vmatprep.mubr.f32.mxu0 %v11867_v17  ;;  %14399 = vmatprep.subr.bf16.mxu1 %v19314_v46  ;;  %v16715_v30 = vadd.f32 %v1171_v25, %v1006_v55 }
 0x26a   :  { %13413 = vmatprep.mubr.msk.f32.mxu1 %vm859_vm4, %v11886_v21  ;;  %v1021_v32 = vpop.f32.mrb[14].mxu1  ;;  %v11882_v21 = vld [vmem:[%s15946_s29 + $0x710] sm:$0xff] }
 0x26b   :  { %19340 = vst [vmem:[#allocation25_spill] sm:$0xff] %v16715_v30  ;;  %13414 = vmatmul.mubr.msk.f32.gmra.mrb[116].mxu1 %vm859_vm4, %v11889_v28  ;;  %v13262_v33 = vpop.f32.mrb[46].mxu0  ;;  %v1023_v39 = vpop.f32.mrb[15].mxu1 }
 0x26c   :  { %2388 = vmatmul.mubr.f32.gmra.mrb[140].mxu0 %v11866_v29  ;;  %14401 = vmatpush1.bf16.msra.mxu1 %v16191_v61  ;;  %v1181_v40 = vpop.f32.mrb[47].mxu0  ;;  %v16723_v42 = vadd.f32 %v13262_v33, %v1021_v32  ;;  %v11881_v32 = vld [vmem:[%s15946_s29 + $0x708] sm:$0xff] }
 0x26d   :  { %2392 = vmatprep.mubr.f32.mxu0 %v11870_v31  ;;  %14402 = vmatprep.subr.bf16.mxu1 %v19314_v46  ;;  %v16727_v44 = vadd.f32 %v1181_v40, %v1016_v18  ;;  %v11885_v33 = vld [vmem:[%s15946_s29 + $0x728] sm:$0xff] }
 0x26e   :  { %13416 = vmatprep.mubr.msk.f32.mxu1 %vm859_vm4, %v11892_v35  ;;  %v1026_v48 = vpop.f32.mrb[16].mxu1 }
 0x26f   :  { %19341 = vst [vmem:[#allocation26_spill] sm:$0xff] %v16727_v44  ;;  %13417 = vmatmul.mubr.msk.f32.gmra.mrb[118].mxu1 %vm859_vm4, %v11895_v41  ;;  %v13265_v53 = vpop.f32.mrb[48].mxu0  ;;  %v1028_v55 = vpop.f32.mrb[17].mxu1 }
 0x270   :  { %2393 = vmatmul.mubr.f32.gmra.mrb[142].mxu0 %v11869_v43  ;;  %14404 = vmatpush1.bf16.msra.mxu1 %v16199_v11  ;;  %v1191_v49 = vpop.f32.mrb[49].mxu0  ;;  %v11916_v43 = vld [vmem:[%s15946_s29 + $0x780] sm:$0xff] }
 0x271   :  { %2397 = vmatprep.mubr.f32.mxu0 %v11873_v45  ;;  %14405 = vmatprep.subr.bf16.mxu1 %v19314_v46  ;;  %v16736_v58 = vadd.f32 %v1191_v49, %v1026_v48  ;;  %v11884_v48 = vld [vmem:[%s15946_s29 + $0x720] sm:$0xff] }
 0x272   :  { %2788 = vmatprep.mubr.f32.mxu1 %v11917_v52  ;;  %v1031_v60 = vpop.f32.mrb[18].mxu1  ;;  %v11920_v52 = vld [vmem:[%s15946_s29 + $0x7a0] sm:$0xff] }
 0x273   :  { %v16739_v0 = vadd.f32 %v13265_v53, %v1031_v60  ;;  %v1033_v2 = vpop.f32.mrb[19].mxu1  ;;  %v13268_v5 = vpop.f32.mrb[50].mxu0  ;;  %v11888_v53 = vld [vmem:[%s15946_s29 + $0x740] sm:$0xff]  ;;  %v11919_v60 = vld [vmem:[%s15946_s29 + $0x798] sm:$0xff] }
 0x274   :  { %2398 = vmatmul.mubr.f32.gmra.mrb[144].mxu0 %v11872_v57  ;;  %14407 = vmatpush1.bf16.msra.mxu1 %v16207_v24  ;;  %v1201_v6 = vpop.f32.mrb[51].mxu0 }
 0x275   :  { %2402 = vmatprep.mubr.f32.mxu0 %v11876_v59  ;;  %14408 = vmatprep.subr.bf16.mxu1 %v19314_v46 }
 0x276   :  { %v1036_v9 = vpop.f32.mrb[20].mxu1 }
 0x277   :  { %v1038_v13 = vpop.f32.mrb[21].mxu1  ;;  %v16745_v14 = vadd.f32 %v1201_v6, %v1036_v9  ;;  %v13271_v17 = vpop.f32.mrb[52].mxu0  ;;  %v11923_v6 = vld [vmem:[%s15946_s29 + $0x7b8] sm:$0xff] }
 0x278   :  { %2403 = vmatmul.mubr.f32.gmra.mrb[146].mxu0 %v11875_v7  ;;  %14410 = vmatpush1.bf16.msra.mxu1 %v16215_v38  ;;  %v1211_v18 = vpop.f32.mrb[53].mxu0  ;;  %v11891_v7 = vld [vmem:[%s15946_s29 + $0x758] sm:$0xff] }
 0x279   :  { %2407 = vmatprep.mubr.f32.mxu0 %v11879_v8  ;;  %14411 = vmatprep.subr.bf16.mxu1 %v19314_v46 }
 0x27a   :  { %v1041_v23 = vpop.f32.mrb[22].mxu1 }
 0x27b   :  { %v16751_v25 = vadd.f32 %v13268_v5, %v1041_v23  ;;  %v1043_v28 = vpop.f32.mrb[23].mxu1  ;;  %v13274_v29 = vpop.f32.mrb[54].mxu0  ;;  %v11887_v5 = vld [vmem:[%s15946_s29 + $0x738] sm:$0xff]  ;;  %v11926_v23 = vld [vmem:[%s15946_s29 + $0x7d0] sm:$0xff] }
 0x27c   :  { %2408 = vmatmul.mubr.f32.gmra.mrb[148].mxu0 %v11878_v20  ;;  %14413 = vmatpush1.bf16.msra.mxu1 %v16223_v54  ;;  %v1221_v31 = vpop.f32.mrb[55].mxu0  ;;  %v11894_v28 = vld [vmem:[%s15946_s29 + $0x770] sm:$0xff] }
 0x27d   :  { %2412 = vmatprep.mubr.f32.mxu0 %v11882_v21  ;;  %14414 = vmatprep.subr.bf16.mxu1 %v19314_v46  ;;  %v11890_v21 = vld [vmem:[%s15946_s29 + $0x750] sm:$0xff] }
 0x27e   :  { %v1046_v35 = vpop.f32.mrb[24].mxu1 }
 0x27f   :  { %v1048_v39 = vpop.f32.mrb[25].mxu1  ;;  %v16757_v40 = vadd.f32 %v1211_v18, %v1046_v35  ;;  %v16759_v41 = vpop.f32.mrb[56].mxu0  ;;  %v11922_v18 = vld [vmem:[%s15946_s29 + $0x7b0] sm:$0xff]  ;;  %v11925_v35 = vld [vmem:[%s15946_s29 + $0x7c8] sm:$0xff] }
 0x280   :  { %2413 = vmatmul.mubr.f32.gmra.mrb[150].mxu0 %v11881_v32  ;;  %14416 = vmatpush1.bf16.msra.mxu1 %v16231_v3  ;;  %v1231_v45 = vpop.f32.mrb[57].mxu0  ;;  %v11893_v39 = vld [vmem:[%s15946_s29 + $0x768] sm:$0xff] }
 0x281   :  { %19342 = vst [vmem:[#allocation27_spill] sm:$0xff] %v16757_v40  ;;  %2417 = vmatprep.mubr.f32.mxu0 %v11885_v33  ;;  %14433 = vmatprep.subr.bf16.mxu1 %v19314_v46 }
 0x282   :  { %v1051_v55 = vpop.f32.mrb[26].mxu1 }
 0x283   :  { %2789 = vmatmul.mubr.f32.vlgmr.msra.gmra.mrb[120].mxu1 %v11916_v43  ;;  %v1053_v49 = vpop.f32.mrb[27].mxu1  ;;  %v16767_v57 = vadd.f32 %v13271_v17, %v1051_v55  ;;  %v16769_v59 = vpop.f32.mrb[58].mxu0 }
 0x284   :  { %2418 = vmatmul.mubr.f32.gmra.mrb[152].mxu0 %v11884_v48  ;;  %14435 = vmatpush1.bf16.msra.mxu1 %v16111_v4  ;;  %v16773_v2 = vpop.f32.mrb[59].mxu0  ;;  %v11929_v48 = vld [vmem:[%s15946_s29 + $0x7e8] sm:$0xff] }
 0x285   :  { %19343 = vst [vmem:[#allocation28_spill] sm:$0xff] %v16767_v57  ;;  %2793 = vmatprep.mubr.f32.mxu1 %v11920_v52  ;;  %2422 = vmatprep.mubr.f32.mxu0 %v11888_v53  ;;  %v11918_v52 = vld [vmem:[%s15946_s29 + $0x790] sm:$0xff] }
 0x286   :  { %14436 = vmatprep.subr.bf16.mxu1 %v19314_v46  ;;  %v1056_v8 = vpop.f32.mrb[28].mxu1 }
 0x287   :  { %2794 = vmatmul.mubr.f32.gmra.mrb[122].mxu1 %v11919_v60  ;;  %v1058_v9 = vpop.f32.mrb[29].mxu1  ;;  %v16779_v13 = vadd.f32 %v1221_v31, %v1056_v8  ;;  %v16781_v17 = vpop.f32.mrb[60].mxu0  ;;  %v11928_v60 = vld [vmem:[%s15946_s29 + $0x7e0] sm:$0xff] }
 0x288   :  { %2423 = vmatmul.mubr.f32.gmra.mrb[154].mxu0 %v11887_v5  ;;  %14438 = vmatpush1.bf16.msra.mxu1 %v16119_v15  ;;  %v16785_v20 = vpop.f32.mrb[61].mxu0  ;;  %v11921_v5 = vld [vmem:[%s15946_s29 + $0x7a8] sm:$0xff] }
 0x289   :  { %19344 = vst [vmem:[#allocation29_spill] sm:$0xff] %v16779_v13  ;;  %2798 = vmatprep.mubr.f32.mxu1 %v11923_v6  ;;  %2427 = vmatprep.mubr.f32.mxu0 %v11891_v7  ;;  %v11932_v7 = vld [vmem:[%s15946_s29 + $0x800] sm:$0xff] }
 0x28a   :  { %14439 = vmatprep.subr.bf16.mxu1 %v19314_v46  ;;  %v1061_v31 = vpop.f32.mrb[30].mxu1 }
 0x28b   :  { %2799 = vmatmul.mubr.f32.gmra.mrb[124].mxu1 %v11922_v18  ;;  %v1063_v32 = vpop.f32.mrb[31].mxu1  ;;  %v16791_v33 = vadd.f32 %v13274_v29, %v1061_v31 }
 0x28c   :  { %2428 = vmatmul.mubr.f32.gmra.mrb[156].mxu0 %v11890_v21  ;;  %14441 = vmatpush1.bf16.msra.mxu1 %v16127_v26  ;;  %v11935_v32 = vld [vmem:[%s15946_s29 + $0x818] sm:$0xff] }
 0x28d   :  { %19345 = vst [vmem:[#allocation30_spill] sm:$0xff] %v16791_v33  ;;  %2803 = vmatprep.mubr.f32.mxu1 %v11926_v23  ;;  %2432 = vmatprep.mubr.f32.mxu0 %v11894_v28  ;;  %v16796_v43 = vpop.f32.mrb[62].mxu0  ;;  %v11931_v23 = vld [vmem:[%s15946_s29 + $0x7f8] sm:$0xff] }
 0x28e   :  { %14442 = vmatprep.subr.bf16.mxu1 %v19314_v46  ;;  %v1066_v53 = vpop.f32.mrb[32].mxu1  ;;  %v16801_v55 = vpop.f32.mrb[63].mxu0  ;;  %v11927_v28 = vld [vmem:[%s15946_s29 + $0x7d8] sm:$0xff] }
 0x28f   :  { %2804 = vmatmul.mubr.f32.gmra.mrb[126].mxu1 %v11925_v35  ;;  %v1068_v29 = vpop.f32.mrb[33].mxu1  ;;  %v16803_v49 = vadd.f32 %v1231_v45, %v1066_v53  ;;  %v11924_v45 = vld [vmem:[%s15946_s29 + $0x7c0] sm:$0xff]  ;;  %v11934_v53 = vld [vmem:[%s15946_s29 + $0x810] sm:$0xff] }
 0x290   :  { %2433 = vmatmul.mubr.f32.gmra.mrb[158].mxu0 %v11893_v39  ;;  %14444 = vmatpush1.bf16.msra.mxu1 %v16135_v37  ;;  %v11930_v39 = vld [vmem:[%s15946_s29 + $0x7f0] sm:$0xff]  ;;  %v11933_v29 = vld [vmem:[%s15946_s29 + $0x808] sm:$0xff] }
 0x291   :  { %19346 = vst [vmem:[#allocation31_spill] sm:$0xff] %v16803_v49  ;;  %2808 = vmatprep.mubr.f32.mxu1 %v11929_v48  ;;  %13435 = vmatprep.mubr.msk.f32.mxu0 %vm859_vm4, %v11918_v52  ;;  %v16809_v6 = vpop.f32.mrb[64].mxu0  ;;  %v19350_v49 = vmov 0.0|0.0  }
 0x292   :  { %14445 = vmatprep.subr.bf16.mxu1 %v19314_v46  ;;  %v1071_v8 = vpop.f32.mrb[34].mxu1  ;;  %v16813_v9 = vpop.f32.mrb[65].mxu0 }
 0x293   :  { %2809 = vmatmul.mubr.f32.gmra.mrb[128].mxu1 %v11928_v60  ;;  %v1073_v18 = vpop.f32.mrb[35].mxu1  ;;  %v16817_v21 = vadd.f32 %v16759_v41, %v1071_v8  ;;  %v11936_v8 = vld [vmem:[%s15946_s29 + $0x820] sm:$0xff] }
 0x294   :  { %13436 = vmatmul.mubr.msk.f32.vlgmr.msra.gmra.mrb[160].mxu0 %vm859_vm4, %v11921_v5  ;;  %14447 = vmatpush1.bf16.msra.mxu1 %v16143_v50  ;;  %v11938_v5 = vld [vmem:[%s15946_s29 + $0x830] sm:$0xff] }
 0x295   :  { %19347 = vst [vmem:[#allocation32_spill] sm:$0xff] %v16817_v21  ;;  %14484 = vmatpush3.bf16.msra.mxu0 %v16240_v19  ;;  %2813 = vmatprep.mubr.f32.mxu1 %v11932_v7  ;;  %v16824_v31 = vpop.f32.mrb[66].mxu0 }
 0x296   :  { %14486 = vmatprep.subr.bf16.mxu0 %v16251_v36  ;;  %13438 = vmatprep.mubr.msk.f32.mxu0 %vm859_vm4, %v11924_v45  ;;  %v1076_v41 = vpop.f32.mrb[36].mxu1  ;;  %v16829_v35 = vpop.f32.mrb[67].mxu0 }
 0x297   :  { %2814 = vmatmul.mubr.f32.gmra.mrb[130].mxu1 %v11931_v23  ;;  %14448 = vmatprep.subr.bf16.mxu1 %v19314_v46  ;;  %v1078_v48 = vpop.f32.mrb[37].mxu1  ;;  %v16834_v52 = vadd.f32 %v16773_v2, %v1076_v41  ;;  %v11937_v23 = vld [vmem:[%s15946_s29 + $0x828] sm:$0xff] }
 0x298   :  { %13439 = vmatmul.mubr.msk.f32.gmra.mrb[162].mxu0 %vm859_vm4, %v11927_v28  ;;  %14450 = vmatpush1.bf16.msra.mxu1 %v16151_v62  ;;  %v11939_v28 = vld [vmem:[%s15946_s29 + $0x838] sm:$0xff]  ;;  %v11941_v41 = vld [vmem:[%s15946_s29 + $0x848] sm:$0xff] }
 0x299   :  { %19348 = vst [vmem:[#allocation33_spill] sm:$0xff] %v16834_v52  ;;  %14488 = vmatpush3.bf16.msra.mxu0 %v16251_v36  ;;  %2818 = vmatprep.mubr.f32.mxu1 %v11935_v32  ;;  %v16841_v60 = vpop.f32.mrb[68].mxu0 }
 0x29a   :  { %14490 = vmatprep.subr.bf16.mxu0 %v16263_v56  ;;  %13441 = vmatprep.mubr.msk.f32.mxu0 %vm859_vm4, %v11930_v39  ;;  %v1081_v2 = vpop.f32.mrb[38].mxu1  ;;  %v16846_v7 = vpop.f32.mrb[69].mxu0 }
 0x29b   :  { %2819 = vmatmul.mubr.f32.gmra.mrb[132].mxu1 %v11934_v53  ;;  %14451 = vmatprep.subr.bf16.mxu1 %v19314_v46  ;;  %v1083_v45 = vpop.f32.mrb[39].mxu1  ;;  %v16851_v18 = vadd.f32 %v16769_v59, %v1081_v2  ;;  %v11942_v53 = vld [vmem:[%s15946_s29 + $0x850] sm:$0xff]  ;;  %v11945_v2 = vld [vmem:[%s15946_s29 + $0x868] sm:$0xff] }
 0x29c   :  { %13442 = vmatmul.mubr.msk.f32.gmra.mrb[164].mxu0 %vm859_vm4, %v11933_v29  ;;  %14453 = vmatpush1.bf16.msra.mxu1 %v16159_v10 }
 0x29d   :  { %19349 = vst [vmem:[#allocation34_spill] sm:$0xff] %v16851_v18  ;;  %14492 = vmatpush3.bf16.msra.mxu0 %v16263_v56  ;;  %2823 = vmatprep.mubr.f32.mxu1 %v11938_v5  ;;  %v16858_v32 = vpop.f32.mrb[70].mxu0  ;;  %v11940_v5 = vld [vmem:[%s15946_s29 + $0x840] sm:$0xff] }
 0x29e   :  { %14494 = vmatprep.subr.bf16.mxu0 %v16271_v63  ;;  %13444 = vmatprep.mubr.msk.f32.mxu0 %vm859_vm4, %v11936_v8  ;;  %v1437_v59 = vpop.f32.mrb[40].mxu1  ;;  %v16863_v39 = vpop.f32.mrb[71].mxu0 }
 0x29f   :  { %2824 = vmatmul.mubr.f32.gmra.mrb[134].mxu1 %v11937_v23  ;;  %14454 = vmatprep.subr.bf16.mxu1 %v19314_v46  ;;  %v1439_v48 = vpop.f32.mrb[41].mxu1  ;;  %v1603_v29 = vadd.f32 %v16785_v20, %v1437_v59  ;;  %v11944_v23 = vld [vmem:[%s15946_s29 + $0x860] sm:$0xff] }
 0x2a0   :  { %13445 = vmatmul.mubr.msk.f32.gmra.mrb[166].mxu0 %vm859_vm4, %v11939_v28  ;;  %14456 = vmatpush1.bf16.msra.mxu1 %v16167_v22  ;;  %v11948_v20 = vld [vmem:[%s15946_s29 + $0x880] sm:$0xff] }
 0x2a1   :  { %14496 = vmatpush3.bf16.msra.mxu0 %v16271_v63  ;;  %2828 = vmatprep.mubr.f32.mxu1 %v11941_v41  ;;  %v16873_v8 = vpop.f32.mrb[72].mxu0  ;;  %v11943_v41 = vld [vmem:[%s15946_s29 + $0x858] sm:$0xff] }
 0x2a2   :  { %v1442_v45 = vpop.f32.mrb[42].mxu1  ;;  %13447 = vmatprep.mubr.msk.f32.mxu0 %vm859_vm4, %v11942_v53  ;;  %14457 = vmatprep.subr.bf16.mxu1 %v19314_v46  ;;  %v16879_v28 = vpop.f32.mrb[73].mxu0  ;;  %v11951_v53 = vld [vmem:[%s15946_s29 + $0x898] sm:$0xff] }
 0x2a3   :  { %2829 = vmatmul.mubr.f32.gmra.mrb[136].mxu1 %v11940_v5  ;;  %v1444_v59 = vpop.f32.mrb[43].mxu1  ;;  %v1608_v48 = vadd.f32 %v16781_v17, %v1442_v45  ;;  %14497 = vmatprep.subr.bf16.mxu0 %v19314_v46  ;;  %v11947_v17 = vld [vmem:[%s15946_s29 + $0x878] sm:$0xff]  ;;  %v11954_v45 = vld [vmem:[%s15946_s29 + $0x8b0] sm:$0xff] }
 0x2a4   :  { %13448 = vmatmul.mubr.msk.f32.gmra.mrb[168].mxu0 %vm859_vm4, %v11945_v2  ;;  %14459 = vmatpush1.bf16.msra.mxu1 %v16175_v34 }
 0x2a5   :  { %2833 = vmatprep.mubr.f32.mxu1 %v11944_v23  ;;  %13450 = vmatprep.mubr.msk.f32.mxu0 %vm859_vm4, %v11948_v20  ;;  %v15486_v18 = vpack.i.bf16 %v1608_v48, %v1603_v29  ;;  %v16888_v52 = vpop.f32.mrb[74].mxu0  ;;  %v11946_v29 = vld [vmem:[%s15946_s29 + $0x870] sm:$0xff]  ;;  %v11957_v20 = vld [vmem:[%s15946_s29 + $0x8c8] sm:$0xff] }
 0x2a6   :  { %14460 = vmatprep.subr.bf16.mxu1 %v19314_v46  ;;  %v1447_v5 = vpop.f32.mrb[44].mxu1  ;;  %v16893_v59 = vpop.f32.mrb[75].mxu0 }
 0x2a7   :  { %2834 = vmatmul.mubr.f32.gmra.mrb[138].mxu1 %v11943_v41  ;;  %15487 = vrot.lane.b32.xlu0 %v15486_v18, %s15835_s5  ;;  %v1449_v2 = vpop.f32.mrb[45].mxu1  ;;  %v1613_v23 = vadd.f32 %v16801_v55, %v1447_v5  ;;  %v11950_v18 = vld [vmem:[%s15946_s29 + $0x890] sm:$0xff] }
 0x2a8   :  { %13451 = vmatmul.mubr.msk.f32.gmra.mrb[170].mxu0 %vm859_vm4, %v11951_v53  ;;  %14462 = vmatpush1.bf16.msra.mxu1 %v16183_v47  ;;  %v11960_v2 = vld [vmem:[%s15946_s29 + $0x8e0] sm:$0xff] }
 0x2a9   :  { %2838 = vmatprep.mubr.f32.mxu1 %v11947_v17  ;;  %13453 = vmatprep.mubr.msk.f32.mxu0 %vm859_vm4, %v11954_v45  ;;  %v16902_v48 = vpop.f32.mrb[76].mxu0  ;;  %v11949_v17 = vld [vmem:[%s15946_s29 + $0x888] sm:$0xff]  ;;  %v11963_v45 = vld [vmem:[%s15946_s29 + $0x8f8] sm:$0xff] }
 0x2aa   :  { %v1452_v41 = vpop.f32.mrb[46].mxu1  ;;  %14463 = vmatprep.subr.bf16.mxu1 %v19314_v46  ;;  %v16907_v55 = vpop.f32.mrb[77].mxu0 }
 0x2ab   :  { %2839 = vmatmul.mubr.f32.gmra.mrb[140].mxu1 %v11946_v29  ;;  %v1454_v53 = vpop.f32.mrb[47].mxu1  ;;  %v1618_v5 = vadd.f32 %v16796_v43, %v1452_v41  ;;  %v11966_v43 = vld [vmem:[%s15946_s29 + $0x910] sm:$0xff] }
 0x2ac   :  { %13454 = vmatmul.mubr.msk.f32.gmra.mrb[172].mxu0 %vm859_vm4, %v11957_v20  ;;  %14465 = vmatpush1.bf16.msra.mxu1 %v16191_v61  ;;  %v11953_v53 = vld [vmem:[%s15946_s29 + $0x8a8] sm:$0xff] }
 0x2ad   :  { %2843 = vmatprep.mubr.f32.mxu1 %v11950_v18  ;;  %13456 = vmatprep.mubr.msk.f32.mxu0 %vm859_vm4, %v11960_v2  ;;  %v15491_v46 = vpack.i.bf16 %v1618_v5, %v1613_v23  ;;  %v16915_v21 = vpop.f32.mrb[78].mxu0  ;;  %v11952_v23 = vld [vmem:[%s15946_s29 + $0x8a0] sm:$0xff]  ;;  %v11969_v2 = vld [vmem:[%s15946_s29 + $0x928] sm:$0xff] }
 0x2ae   :  { %14466 = vmatprep.subr.bf16.mxu1 %v19350_v49  ;;  %v1457_v29 = vpop.f32.mrb[48].mxu1  ;;  %v16920_v20 = vpop.f32.mrb[79].mxu0 }
 0x2af   :  { %2844 = vmatmul.mubr.f32.gmra.mrb[142].mxu1 %v11949_v17  ;;  %15492 = vrot.lane.b32.xlu1 %v15491_v46, %s15835_s5  ;;  %v1459_v41 = vpop.f32.mrb[49].mxu1  ;;  %v1623_v18 = vadd.f32 %v16813_v9, %v1457_v29  ;;  %v11956_v17 = vld [vmem:[%s15946_s29 + $0x8c0] sm:$0xff]  ;;  %v11975_v29 = vld [vmem:[%s15946_s29 + $0x958] sm:$0xff] }
 0x2b0   :  { %13457 = vmatmul.mubr.msk.f32.gmra.mrb[174].mxu0 %vm859_vm4, %v11963_v45  ;;  %14468 = vmatpush1.bf16.msra.mxu1 %v16199_v11  ;;  %v11972_v46 = vld [vmem:[%s15946_s29 + $0x940] sm:$0xff]  ;;  %v11955_v45 = vld [vmem:[%s15946_s29 + $0x8b8] sm:$0xff] }
 0x2b1   :  { %2848 = vmatprep.mubr.f32.mxu1 %v11953_v53  ;;  %13459 = vmatprep.mubr.msk.f32.mxu0 %vm859_vm4, %v11966_v43 }
 0x2b2   :  { %v1462_v5 = vpop.f32.mrb[50].mxu1  ;;  %14469 = vmatprep.subr.bf16.mxu1 %v19350_v49 }
 0x2b3   :  { %v1628_v41 = vadd.f32 %v16809_v6, %v1462_v5  ;;  %2849 = vmatmul.mubr.f32.gmra.mrb[144].mxu1 %v11952_v23  ;;  %v1464_v9 = vpop.f32.mrb[51].mxu1  ;;  %v11959_v6 = vld [vmem:[%s15946_s29 + $0x8d8] sm:$0xff]  ;;  %v11998_v5 = vld [vmem:[%s15946_s29 + $0x970] sm:$0xff] }
 0x2b4   :  { %13460 = vmatmul.mubr.msk.f32.gmra.mrb[176].mxu0 %vm859_vm4, %v11969_v2  ;;  %14471 = vmatpush1.bf16.msra.mxu1 %v16207_v24 }
 0x2b5   :  { %2853 = vmatprep.mubr.f32.mxu1 %v11956_v17  ;;  %13462 = vmatprep.mubr.msk.f32.mxu0 %vm859_vm4, %v11972_v46  ;;  %v15496_v53 = vpack.i.bf16 %v1628_v41, %v1623_v18  ;;  %v11958_v17 = vld [vmem:[%s15946_s29 + $0x8d0] sm:$0xff]  ;;  %v12001_v18 = vld [vmem:[%s15946_s29 + $0x988] sm:$0xff] }
 0x2b6   :  { %14472 = vmatprep.subr.bf16.mxu1 %v19350_v49  ;;  %v1467_v43 = vpop.f32.mrb[52].mxu1  ;;  %v11962_v41 = vld [vmem:[%s15946_s29 + $0x8f0] sm:$0xff] }
 0x2b7   :  { %2854 = vmatmul.mubr.f32.gmra.mrb[146].mxu1 %v11955_v45  ;;  %15497 = vrot.lane.b32.xlu0 %v15496_v53, %s15835_s5  ;;  %v1469_v23 = vpop.f32.mrb[53].mxu1  ;;  %v1633_v2 = vadd.f32 %v16829_v35, %v1467_v43  ;;  %v11961_v45 = vld [vmem:[%s15946_s29 + $0x8e8] sm:$0xff] }
 0x2b8   :  { %13463 = vmatmul.mubr.msk.f32.gmra.mrb[178].mxu0 %vm859_vm4, %v11975_v29  ;;  %14474 = vmatpush1.bf16.msra.mxu1 %v16215_v38  ;;  %v11965_v53 = vld [vmem:[%s15946_s29 + $0x908] sm:$0xff]  ;;  %v12004_v23 = vld [vmem:[%s15946_s29 + $0x9a0] sm:$0xff] }
 0x2b9   :  { %2858 = vmatprep.mubr.f32.mxu1 %v11959_v6  ;;  %14475 = vmatprep.subr.bf16.mxu1 %v19350_v49 }
 0x2ba   :  { %v1472_v46 = vpop.f32.mrb[54].mxu1  ;;  %13481 = vmatprep.mubr.msk.f32.mxu0 %vm859_vm4, %v11998_v5  ;;  %v11968_v5 = vld [vmem:[%s15946_s29 + $0x920] sm:$0xff] }
 0x2bb   :  { %v1638_v9 = vadd.f32 %v16824_v31, %v1472_v46  ;;  %2859 = vmatmul.mubr.f32.gmra.mrb[148].mxu1 %v11958_v17  ;;  %v1474_v35 = vpop.f32.mrb[55].mxu1  ;;  %v12010_v17 = vld [vmem:[%s15946_s29 + $0x9d0] sm:$0xff] }
 0x2bc   :  { %14477 = vmatpush1.bf16.msra.mxu1 %v16223_v54  ;;  %13482 = vmatmul.mubr.msk.f32.vlgmr.msra.gmra.mrb[180].mxu0 %vm859_vm4, %v12001_v18  ;;  %v12013_v35 = vld [vmem:[%s15946_s29 + $0x9e8] sm:$0xff] }
 0x2bd   :  { %14499 = vmatpush1.bf16.msra.mxu0 %v16111_v4  ;;  %2863 = vmatprep.mubr.f32.mxu1 %v11962_v41  ;;  %v15501_v29 = vpack.i.bf16 %v1638_v9, %v1633_v2  ;;  %v11964_v4 = vld [vmem:[%s15946_s29 + $0x900] sm:$0xff]  ;;  %v12007_v2 = vld [vmem:[%s15946_s29 + $0x9b8] sm:$0xff] }
 0x2be   :  { %14478 = vmatprep.subr.bf16.mxu1 %v19350_v49  ;;  %14500 = vmatprep.subr.bf16.mxu0 %v19350_v49  ;;  %v1477_v31 = vpop.f32.mrb[56].mxu1  ;;  %v11971_v9 = vld [vmem:[%s15946_s29 + $0x938] sm:$0xff] }
 0x2bf   :  { %2864 = vmatmul.mubr.f32.gmra.mrb[150].mxu1 %v11961_v45  ;;  %15502 = vrot.lane.b32.xlu1 %v15501_v29, %s15835_s5  ;;  %v1479_v43 = vpop.f32.mrb[57].mxu1  ;;  %v1643_v6 = vadd.f32 %v16846_v7, %v1477_v31 }
 0x2c0   :  { %14480 = vmatpush1.bf16.msra.mxu1 %v16231_v3  ;;  %2868 = vmatprep.mubr.f32.mxu1 %v11965_v53 }
 0x2c1   :  { %14502 = vmatpush1.bf16.msra.mxu0 %v16119_v15  ;;  %14546 = vmatprep.subr.bf16.mxu1 %v16240_v19  ;;  %v11967_v15 = vld [vmem:[%s15946_s29 + $0x918] sm:$0xff] }
 0x2c2   :  { %v1482_v18 = vpop.f32.mrb[58].mxu1  ;;  %14503 = vmatprep.subr.bf16.mxu0 %v19350_v49  ;;  %13484 = vmatprep.mubr.msk.f32.mxu0 %vm859_vm4, %v12004_v23  ;;  %v12019_v23 = vld [vmem:[%s15946_s29 + $0xa18] sm:$0xff] }
 0x2c3   :  { %v1648_v7 = vadd.f32 %v16841_v60, %v1482_v18  ;;  %2869 = vmatmul.mubr.f32.gmra.mrb[152].mxu1 %v11964_v4  ;;  %v1484_v46 = vpop.f32.mrb[59].mxu1  ;;  %13485 = vmatmul.mubr.msk.f32.gmra.mrb[182].mxu0 %vm859_vm4, %v12007_v2  ;;  %v12016_v60 = vld [vmem:[%s15946_s29 + $0xa00] sm:$0xff]  ;;  %v11973_v18 = vld [vmem:[%s15946_s29 + $0x948] sm:$0xff] }
 0x2c4   :  { %2873 = vmatprep.mubr.f32.mxu1 %v11968_v5  ;;  %13487 = vmatprep.mubr.msk.f32.mxu0 %vm859_vm4, %v12010_v17  ;;  %v11997_v46 = vld [vmem:[%s15946_s29 + $0x968] sm:$0xff] }
 0x2c5   :  { %14505 = vmatpush1.bf16.msra.mxu0 %v16127_v26  ;;  %v15506_v41 = vpack.i.bf16 %v1648_v7, %v1643_v6  ;;  %v11970_v26 = vld [vmem:[%s15946_s29 + $0x930] sm:$0xff] }
 0x2c6   :  { %14506 = vmatprep.subr.bf16.mxu0 %v19350_v49  ;;  %v1487_v45 = vpop.f32.mrb[60].mxu1  ;;  %v11974_v6 = vld [vmem:[%s15946_s29 + $0x950] sm:$0xff] }
 0x2c7   :  { %2874 = vmatmul.mubr.f32.gmra.mrb[154].mxu1 %v11967_v15  ;;  %15507 = vrot.lane.b32.xlu0 %v15506_v41, %s15835_s5  ;;  %v1489_v29 = vpop.f32.mrb[61].mxu1  ;;  %v1653_v53 = vadd.f32 %v16863_v39, %v1487_v45  ;;  %v16981_v31 = vpop.f32.mrb[80].mxu0  ;;  %v12022_v39 = vld [vmem:[%s15946_s29 + $0xa30] sm:$0xff]  ;;  %v12025_v15 = vld [vmem:[%s15946_s29 + $0xa48] sm:$0xff]  ;;  %v12028_v41 = vld [vmem:[%s15946_s29 + $0xa60] sm:$0xff] }
 0x2c8   :  { %2878 = vmatprep.mubr.f32.mxu1 %v11971_v9  ;;  %13488 = vmatmul.mubr.msk.f32.gmra.mrb[184].mxu0 %vm859_vm4, %v12013_v35  ;;  %v1890_v43 = vpop.f32.mrb[81].mxu0  ;;  %v12000_v29 = vld [vmem:[%s15946_s29 + $0x980] sm:$0xff] }
 0x2c9   :  { %14508 = vmatpush1.bf16.msra.mxu0 %v16135_v37  ;;  %13490 = vmatprep.mubr.msk.f32.mxu0 %vm859_vm4, %v12016_v60 }
 0x2ca   :  { %v1492_v4 = vpop.f32.mrb[62].mxu1  ;;  %14509 = vmatprep.subr.bf16.mxu0 %v19350_v49 }
 0x2cb   :  { %v1658_v2 = vadd.f32 %v16858_v32, %v1492_v4  ;;  %2879 = vmatmul.mubr.f32.gmra.mrb[156].mxu1 %v11970_v26  ;;  %v1494_v5 = vpop.f32.mrb[63].mxu1  ;;  %v16992_v17 = vpop.f32.mrb[82].mxu0 }
 0x2cc   :  { %2883 = vmatprep.mubr.f32.mxu1 %v11974_v6  ;;  %13491 = vmatmul.mubr.msk.f32.gmra.mrb[186].mxu0 %vm859_vm4, %v12019_v23  ;;  %v1895_v37 = vpop.f32.mrb[83].mxu0  ;;  %v12031_v6 = vld [vmem:[%s15946_s29 + $0xa78] sm:$0xff] }
 0x2cd   :  { %14511 = vmatpush1.bf16.msra.mxu0 %v16143_v50  ;;  %v15511_v7 = vpack.i.bf16 %v1658_v2, %v1653_v53  ;;  %13493 = vmatprep.mubr.msk.f32.mxu0 %vm859_vm4, %v12022_v39  ;;  %v11996_v50 = vld [vmem:[%s15946_s29 + $0x960] sm:$0xff]  ;;  %v11999_v23 = vld [vmem:[%s15946_s29 + $0x978] sm:$0xff] }
 0x2ce   :  { %14512 = vmatprep.subr.bf16.mxu0 %v19350_v49  ;;  %v1497_v32 = vpop.f32.mrb[64].mxu1  ;;  %v12003_v39 = vld [vmem:[%s15946_s29 + $0x998] sm:$0xff] }
 0x2cf   :  { %2884 = vmatmul.mubr.f32.gmra.mrb[158].mxu1 %v11973_v18  ;;  %15512 = vrot.lane.b32.xlu1 %v15511_v7, %s15835_s5  ;;  %v1499_v9 = vpop.f32.mrb[65].mxu1  ;;  %v1663_v35 = vadd.f32 %v16879_v28, %v1497_v32  ;;  %v17004_v45 = vpop.f32.mrb[84].mxu0  ;;  %v12002_v18 = vld [vmem:[%s15946_s29 + $0x990] sm:$0xff]  ;;  %v12037_v7 = vld [vmem:[%s15946_s29 + $0xaa8] sm:$0xff] }
 0x2d0   :  { %3239 = vmatprep.mubr.f32.mxu1 %v11997_v46  ;;  %13494 = vmatmul.mubr.msk.f32.gmra.mrb[188].mxu0 %vm859_vm4, %v12025_v15  ;;  %v1900_v60 = vpop.f32.mrb[85].mxu0  ;;  %v12006_v46 = vld [vmem:[%s15946_s29 + $0x9b0] sm:$0xff] }
 0x2d1   :  { %14514 = vmatpush1.bf16.msra.mxu0 %v16151_v62  ;;  %13496 = vmatprep.mubr.msk.f32.mxu0 %vm859_vm4, %v12028_v41  ;;  %v12005_v41 = vld [vmem:[%s15946_s29 + $0x9a8] sm:$0xff] }
 0x2d2   :  { %v1502_v53 = vpop.f32.mrb[66].mxu1  ;;  %14515 = vmatprep.subr.bf16.mxu0 %v19350_v49 }
 0x2d3   :  { %v1668_v26 = vadd.f32 %v16873_v8, %v1502_v53  ;;  %3240 = vmatmul.mubr.f32.vlgmr.msra.gmra.mrb[160].mxu1 %v11996_v50  ;;  %v1504_v28 = vpop.f32.mrb[67].mxu1  ;;  %v17013_v43 = vpop.f32.mrb[86].mxu0 }
 0x2d4   :  { %14548 = vmatpush3.bf16.msra.mxu1 %v16240_v19  ;;  %3244 = vmatprep.mubr.f32.mxu1 %v12000_v29  ;;  %v1905_v62 = vpop.f32.mrb[87].mxu0 }
 0x2d5   :  { %14517 = vmatpush1.bf16.msra.mxu0 %v16159_v10  ;;  %14550 = vmatprep.subr.bf16.mxu1 %v16251_v36  ;;  %v15516_v4 = vpack.i.bf16 %v1668_v26, %v1663_v35  ;;  %v12034_v10 = vld [vmem:[%s15946_s29 + $0xa90] sm:$0xff]  ;;  %v12043_v35 = vld [vmem:[%s15946_s29 + $0xad8] sm:$0xff]  ;;  %v12008_v26 = vld [vmem:[%s15946_s29 + $0x9c0] sm:$0xff] }
 0x2d6   :  { %14518 = vmatprep.subr.bf16.mxu0 %v19350_v49  ;;  %v1507_v8 = vpop.f32.mrb[68].mxu1  ;;  %13497 = vmatmul.mubr.msk.f32.gmra.mrb[190].mxu0 %vm859_vm4, %v12031_v6  ;;  %v12049_v6 = vld [vmem:[%s15946_s29 + $0xb08] sm:$0xff] }
 0x2d7   :  { %3245 = vmatmul.mubr.f32.gmra.mrb[162].mxu1 %v11999_v23  ;;  %15517 = vrot.lane.b32.xlu0 %v15516_v4, %s15835_s5  ;;  %v1509_v19 = vpop.f32.mrb[69].mxu1  ;;  %v17025_v2 = vadd.f32 %v16893_v59, %v1507_v8  ;;  %v17027_v5 = vpop.f32.mrb[88].mxu0  ;;  %v12012_v23 = vld [vmem:[%s15946_s29 + $0x9e0] sm:$0xff] }
 0x2d8   :  { %14552 = vmatpush3.bf16.msra.mxu1 %v16251_v36  ;;  %3249 = vmatprep.mubr.f32.mxu1 %v12003_v39  ;;  %v1910_v37 = vpop.f32.mrb[89].mxu0  ;;  %v12055_v19 = vld [vmem:[%s15946_s29 + $0xb38] sm:$0xff] }
 0x2d9   :  { %14520 = vmatpush1.bf16.msra.mxu0 %v16167_v22  ;;  %14554 = vmatprep.subr.bf16.mxu1 %v16263_v56  ;;  %v12040_v22 = vld [vmem:[%s15946_s29 + $0xac0] sm:$0xff] }
 0x2da   :  { %14521 = vmatprep.subr.bf16.mxu0 %v19350_v49  ;;  %v1512_v59 = vpop.f32.mrb[70].mxu1  ;;  %13499 = vmatprep.mubr.msk.f32.mxu0 %vm859_vm4, %v12034_v10  ;;  %v12015_v10 = vld [vmem:[%s15946_s29 + $0x9f8] sm:$0xff] }
 0x2db   :  { %3250 = vmatmul.mubr.f32.gmra.mrb[164].mxu1 %v12002_v18  ;;  %v1514_v36 = vpop.f32.mrb[71].mxu1  ;;  %v17039_v15 = vadd.f32 %v16888_v52, %v1512_v59  ;;  %v17041_v32 = vpop.f32.mrb[90].mxu0  ;;  %13500 = vmatmul.mubr.msk.f32.gmra.mrb[192].mxu0 %vm859_vm4, %v12037_v7  ;;  %v12009_v52 = vld [vmem:[%s15946_s29 + $0x9c8] sm:$0xff] }
 0x2dc   :  { %14556 = vmatpush3.bf16.msra.mxu1 %v16263_v56  ;;  %3254 = vmatprep.mubr.f32.mxu1 %v12006_v46  ;;  %v1915_v9 = vpop.f32.mrb[91].mxu0  ;;  %v12046_v56 = vld [vmem:[%s15946_s29 + $0xaf0] sm:$0xff]  ;;  %v12077_v18 = vld [vmem:[%s15946_s29 + $0xb48] sm:$0xff] }
 0x2dd   :  { %14523 = vmatpush1.bf16.msra.mxu0 %v16175_v34  ;;  %14558 = vmatprep.subr.bf16.mxu1 %v16271_v63 }
 0x2de   :  { %14524 = vmatprep.subr.bf16.mxu0 %v19350_v49  ;;  %v1517_v60 = vpop.f32.mrb[72].mxu1  ;;  %13502 = vmatprep.mubr.msk.f32.mxu0 %vm859_vm4, %v12040_v22  ;;  %v12018_v22 = vld [vmem:[%s15946_s29 + $0xa10] sm:$0xff] }
 0x2df   :  { %3255 = vmatmul.mubr.f32.gmra.mrb[166].mxu1 %v12005_v41  ;;  %v1519_v29 = vpop.f32.mrb[73].mxu1  ;;  %v17057_v53 = vadd.f32 %v16907_v55, %v1517_v60  ;;  %v17059_v34 = vpop.f32.mrb[92].mxu0  ;;  %13503 = vmatmul.mubr.msk.f32.gmra.mrb[194].mxu0 %vm859_vm4, %v12043_v35  ;;  %v12052_v55 = vld [vmem:[%s15946_s29 + $0xb20] sm:$0xff] }
 0x2e0   :  { %14560 = vmatpush3.bf16.msra.mxu1 %v16271_v63  ;;  %3259 = vmatprep.mubr.f32.mxu1 %v12009_v52  ;;  %v1920_v28 = vpop.f32.mrb[93].mxu0  ;;  %v12017_v52 = vld [vmem:[%s15946_s29 + $0xa08] sm:$0xff] }
 0x2e1   :  { %14526 = vmatpush1.bf16.msra.mxu0 %v16183_v47  ;;  %13505 = vmatprep.mubr.msk.f32.mxu0 %vm859_vm4, %v12046_v56  ;;  %v12011_v47 = vld [vmem:[%s15946_s29 + $0x9d8] sm:$0xff]  ;;  %v12021_v56 = vld [vmem:[%s15946_s29 + $0xa28] sm:$0xff] }
 0x2e2   :  { %14527 = vmatprep.subr.bf16.mxu0 %v19350_v49  ;;  %v1522_v62 = vpop.f32.mrb[74].mxu1  ;;  %14603 = vmatprep.subr.bf16.mxu1 %v19350_v49 }
 0x2e3   :  { %3260 = vmatmul.mubr.f32.gmra.mrb[168].mxu1 %v12008_v26  ;;  %v1524_v63 = vpop.f32.mrb[75].mxu1  ;;  %v17072_v4 = vadd.f32 %v16902_v48, %v1522_v62  ;;  %v17074_v39 = vpop.f32.mrb[94].mxu0  ;;  %13506 = vmatmul.mubr.msk.f32.gmra.mrb[196].mxu0 %vm859_vm4, %v12049_v6 }
 0x2e4   :  { %3264 = vmatprep.mubr.f32.mxu1 %v12012_v23  ;;  %v1925_v8 = vpop.f32.mrb[95].mxu0  ;;  %13508 = vmatprep.mubr.msk.f32.mxu0 %vm859_vm4, %v12052_v55  ;;  %v12020_v23 = vld [vmem:[%s15946_s29 + $0xa20] sm:$0xff] }
 0x2e5   :  { %14529 = vmatpush1.bf16.msra.mxu0 %v16191_v61  ;;  %v12014_v61 = vld [vmem:[%s15946_s29 + $0x9f0] sm:$0xff] }
 0x2e6   :  { %14530 = vmatprep.subr.bf16.mxu0 %v19350_v49  ;;  %v1527_v37 = vpop.f32.mrb[76].mxu1 }
 0x2e7   :  { %3265 = vmatmul.mubr.f32.gmra.mrb[170].mxu1 %v12011_v47  ;;  %v1529_v7 = vpop.f32.mrb[77].mxu1  ;;  %v17087_v46 = vadd.f32 %v16920_v20, %v1527_v37  ;;  %v17089_v59 = vpop.f32.mrb[96].mxu0  ;;  %13509 = vmatmul.mubr.msk.f32.gmra.mrb[198].mxu0 %vm859_vm4, %v12055_v19 }
 0x2e8   :  { %3269 = vmatprep.mubr.f32.mxu1 %v12015_v10  ;;  %v1930_v36 = vpop.f32.mrb[97].mxu0  ;;  %3690 = vmatprep.mubr.f32.mxu0 %v12077_v18  ;;  %v12027_v10 = vld [vmem:[%s15946_s29 + $0xa58] sm:$0xff] }
 0x2e9   :  { %14532 = vmatpush1.bf16.msra.mxu0 %v16199_v11  ;;  %v12026_v36 = vld [vmem:[%s15946_s29 + $0xa50] sm:$0xff] }
 0x2ea   :  { %14533 = vmatprep.subr.bf16.mxu0 %v19350_v49  ;;  %v1532_v41 = vpop.f32.mrb[78].mxu1 }
 0x2eb   :  { %3270 = vmatmul.mubr.f32.gmra.mrb[172].mxu1 %v12014_v61  ;;  %v17097_v20 = vadd.f32 %v16915_v21, %v1532_v41  ;;  %v1534_v9 = vpop.f32.mrb[79].mxu1  ;;  %v17099_v35 = vpop.f32.mrb[98].mxu0 }
 0x2ec   :  { %3274 = vmatprep.mubr.f32.mxu1 %v12018_v22  ;;  %v1935_v60 = vpop.f32.mrb[99].mxu0  ;;  %v12030_v22 = vld [vmem:[%s15946_s29 + $0xa70] sm:$0xff] }
 0x2ed   :  { %14535 = vmatpush1.bf16.msra.mxu0 %v16207_v24  ;;  %v12024_v24 = vld [vmem:[%s15946_s29 + $0xa40] sm:$0xff] }
 0x2ee   :  { %v13345_v29 = vpop.f32.mrb[80].mxu1  ;;  %14536 = vmatprep.subr.bf16.mxu0 %v19350_v49 }
 0x2ef   :  { %3275 = vmatmul.mubr.f32.gmra.mrb[174].mxu1 %v12017_v52  ;;  %v2059_v21 = vadd.f32 %v13345_v29, %v16992_v17  ;;  %v2053_v26 = vpop.f32.mrb[81].mxu1  ;;  %v17108_v28 = vpop.f32.mrb[100].mxu0  ;;  %v12076_v52 = vld [vmem:[%s15946_s29 + $0xb40] sm:$0xff] }
 0x2f0   :  { %v2054_v6 = vadd.f32 %v2053_v26, %v16981_v31  ;;  %3279 = vmatprep.mubr.f32.mxu1 %v12021_v56  ;;  %v1940_v55 = vpop.f32.mrb[101].mxu0  ;;  %v12023_v31 = vld [vmem:[%s15946_s29 + $0xa38] sm:$0xff]  ;;  %v12080_v56 = vld [vmem:[%s15946_s29 + $0xb60] sm:$0xff]  ;;  %v12033_v26 = vld [vmem:[%s15946_s29 + $0xa88] sm:$0xff] }
 0x2f1   :  { %14538 = vmatpush1.bf16.msra.mxu0 %v16215_v38  ;;  %v12079_v55 = vld [vmem:[%s15946_s29 + $0xb58] sm:$0xff] }
 0x2f2   :  { %v13348_v62 = vpop.f32.mrb[82].mxu1  ;;  %14539 = vmatprep.subr.bf16.mxu0 %v19350_v49  ;;  %v15521_v63 = vpack.i.bf16 %v2059_v21, %v2054_v6 }
 0x2f3   :  { %3280 = vmatmul.mubr.f32.gmra.mrb[176].mxu1 %v12020_v23  ;;  %v2069_v17 = vadd.f32 %v13348_v62, %v17013_v43  ;;  %v2063_v47 = vpop.f32.mrb[83].mxu1  ;;  %v1943_v8 = vpop.f32.mrb[102].mxu0 }
 0x2f4   :  { %v2064_v19 = vadd.f32 %v2063_v47, %v17004_v45  ;;  %15522 = vrot.lane.b32.xlu1 %v15521_v63, %s15836_s9  ;;  %3284 = vmatprep.mubr.f32.mxu1 %v12024_v24  ;;  %v1945_v38 = vpop.f32.mrb[103].mxu0 }
 0x2f5   :  { %14541 = vmatpush1.bf16.msra.mxu0 %v16223_v54 }
 0x2f6   :  { %v13351_v18 = vpop.f32.mrb[84].mxu1  ;;  %14542 = vmatprep.subr.bf16.mxu0 %v19350_v49  ;;  %v15526_v43 = vpack.i.bf16 %v2069_v17, %v2064_v19  ;;  %v12032_v17 = vld [vmem:[%s15946_s29 + $0xa80] sm:$0xff] }
 0x2f7   :  { %3285 = vmatmul.mubr.f32.gmra.mrb[178].mxu1 %v12023_v31  ;;  %v2079_v37 = vadd.f32 %v13351_v18, %v17041_v32  ;;  %v2073_v45 = vpop.f32.mrb[85].mxu1  ;;  %v17123_v7 = vpop.f32.mrb[104].mxu0  ;;  %v12036_v19 = vld [vmem:[%s15946_s29 + $0xaa0] sm:$0xff] }
 0x2f8   :  { %v2074_v61 = vadd.f32 %v2073_v45, %v17027_v5  ;;  %15527 = vrot.lane.b32.xlu1 %v15526_v43, %s15836_s9  ;;  %3289 = vmatprep.mubr.f32.mxu1 %v12027_v10  ;;  %v1950_v54 = vpop.f32.mrb[105].mxu0  ;;  %v12082_v10 = vld [vmem:[%s15946_s29 + $0xb70] sm:$0xff]  ;;  %v12035_v45 = vld [vmem:[%s15946_s29 + $0xa98] sm:$0xff] }
 0x2f9   :  { %14544 = vmatpush1.bf16.msra.mxu0 %v16231_v3  ;;  %v12029_v3 = vld [vmem:[%s15946_s29 + $0xa68] sm:$0xff] }
 0x2fa   :  { %v13354_v41 = vpop.f32.mrb[86].mxu1  ;;  %v15531_v9 = vpack.i.bf16 %v2079_v37, %v2074_v61  ;;  %14561 = vmatprep.subr.bf16.mxu0 %v19350_v49  ;;  %v12086_v37 = vld [vmem:[%s15946_s29 + $0xb90] sm:$0xff] }
 0x2fb   :  { %3290 = vmatmul.mubr.f32.gmra.mrb[180].mxu1 %v12026_v36  ;;  %v2089_v32 = vadd.f32 %v13354_v41, %v17074_v39  ;;  %v2083_v5 = vpop.f32.mrb[87].mxu1  ;;  %v1953_v60 = vpop.f32.mrb[106].mxu0  ;;  %v12039_v36 = vld [vmem:[%s15946_s29 + $0xab8] sm:$0xff] }
 0x2fc   :  { %v2084_v29 = vadd.f32 %v2083_v5, %v17059_v34  ;;  %15532 = vrot.lane.b32.xlu0 %v15531_v9, %s15836_s9  ;;  %3294 = vmatprep.mubr.f32.mxu1 %v12030_v22  ;;  %v1955_v21 = vpop.f32.mrb[107].mxu0  ;;  %v12083_v34 = vld [vmem:[%s15946_s29 + $0xb78] sm:$0xff] }
 0x2fd   :  { %3691 = vmatmul.mubr.f32.vlgmr.msra.gmra.mrb[200].mxu0 %v12076_v52 }
 0x2fe   :  { %v13357_v6 = vpop.f32.mrb[88].mxu1  ;;  %v15536_v23 = vpack.i.bf16 %v2089_v32, %v2084_v29  ;;  %3695 = vmatprep.mubr.f32.mxu0 %v12080_v56  ;;  %v12038_v32 = vld [vmem:[%s15946_s29 + $0xab0] sm:$0xff] }
 0x2ff   :  { %3295 = vmatmul.mubr.f32.gmra.mrb[182].mxu1 %v12029_v3  ;;  %v2099_v39 = vadd.f32 %v13357_v6, %v17099_v35  ;;  %v2093_v24 = vpop.f32.mrb[89].mxu1  ;;  %v1958_v62 = vpop.f32.mrb[108].mxu0  ;;  %v12042_v29 = vld [vmem:[%s15946_s29 + $0xad0] sm:$0xff] }
 0x300   :  { %v2094_v63 = vadd.f32 %v2093_v24, %v17089_v59  ;;  %15537 = vrot.lane.b32.xlu1 %v15536_v23, %s15836_s9  ;;  %3299 = vmatprep.mubr.f32.mxu1 %v12033_v26  ;;  %v1960_v47 = vpop.f32.mrb[109].mxu0 }
 0x301   :  { %3696 = vmatmul.mubr.f32.gmra.mrb[202].mxu0 %v12079_v55  ;;  %v12092_v55 = vld [vmem:[%s15946_s29 + $0xbc0] sm:$0xff] }
 0x302   :  { %v13360_v31 = vpop.f32.mrb[90].mxu1  ;;  %v15541_v38 = vpack.i.bf16 %v2099_v39, %v2094_v63  ;;  %3700 = vmatprep.mubr.f32.mxu0 %v12083_v34  ;;  %v12045_v34 = vld [vmem:[%s15946_s29 + $0xae8] sm:$0xff] }
 0x303   :  { %3300 = vmatmul.mubr.f32.gmra.mrb[184].mxu1 %v12032_v17  ;;  %v2109_v35 = vadd.f32 %v13360_v31, %v1943_v8  ;;  %v2103_v18 = vpop.f32.mrb[91].mxu1  ;;  %v1963_v43 = vpop.f32.mrb[110].mxu0  ;;  %v12085_v8 = vld [vmem:[%s15946_s29 + $0xb88] sm:$0xff]  ;;  %v12091_v17 = vld [vmem:[%s15946_s29 + $0xbb8] sm:$0xff] }
 0x304   :  { %v2104_v59 = vadd.f32 %v2103_v18, %v17108_v28  ;;  %15542 = vrot.lane.b32.xlu0 %v15541_v38, %s15836_s9  ;;  %3304 = vmatprep.mubr.f32.mxu1 %v12036_v19  ;;  %v1965_v61 = vpop.f32.mrb[111].mxu0  ;;  %v12089_v28 = vld [vmem:[%s15946_s29 + $0xba8] sm:$0xff] }
 0x305   :  { %3701 = vmatmul.mubr.f32.gmra.mrb[204].mxu0 %v12082_v10  ;;  %v12095_v10 = vld [vmem:[%s15946_s29 + $0xbd8] sm:$0xff] }
 0x306   :  { %v15546_v54 = vpack.i.bf16 %v2109_v35, %v2104_v59  ;;  %v13363_v22 = vpop.f32.mrb[92].mxu1  ;;  %3705 = vmatprep.mubr.f32.mxu0 %v12086_v37  ;;  %v12094_v59 = vld [vmem:[%s15946_s29 + $0xbd0] sm:$0xff] }
 0x307   :  { %3305 = vmatmul.mubr.f32.gmra.mrb[186].mxu1 %v12035_v45  ;;  %v1968_v41 = vpop.f32.mrb[112].mxu0  ;;  %v17152_v9 = vadd.f32 %v13363_v22, %v1953_v60  ;;  %v2113_v52 = vpop.f32.mrb[93].mxu1  ;;  %v12088_v60 = vld [vmem:[%s15946_s29 + $0xba0] sm:$0xff]  ;;  %v12047_v22 = vld [vmem:[%s15946_s29 + $0xaf8] sm:$0xff] }
 0x308   :  { %15547 = vrot.lane.b32.xlu1 %v15546_v54, %s15836_s9  ;;  %3309 = vmatprep.mubr.f32.mxu1 %v12039_v36  ;;  %v1970_v5 = vpop.f32.mrb[113].mxu0  ;;  %v17158_v56 = vadd.f32 %v2113_v52, %v17123_v7  ;;  %v12041_v7 = vld [vmem:[%s15946_s29 + $0xac8] sm:$0xff]  ;;  %v12098_v54 = vld [vmem:[%s15946_s29 + $0xbf0] sm:$0xff] }
 0x309   :  { %3706 = vmatmul.mubr.f32.gmra.mrb[206].mxu0 %v12085_v8  ;;  %v12097_v5 = vld [vmem:[%s15946_s29 + $0xbe8] sm:$0xff] }
 0x30a   :  { %v13366_v3 = vpop.f32.mrb[94].mxu1  ;;  %3710 = vmatprep.mubr.f32.mxu0 %v12089_v28  ;;  %v12051_v28 = vld [vmem:[%s15946_s29 + $0xb18] sm:$0xff] }
 0x30b   :  { %3310 = vmatmul.mubr.f32.gmra.mrb[188].mxu1 %v12038_v32  ;;  %v1973_v26 = vpop.f32.mrb[114].mxu0  ;;  %v17164_v6 = vadd.f32 %v13366_v3, %v1963_v43  ;;  %v2123_v23 = vpop.f32.mrb[95].mxu1  ;;  %v12048_v43 = vld [vmem:[%s15946_s29 + $0xb00] sm:$0xff] }
 0x30c   :  { %3314 = vmatprep.mubr.f32.mxu1 %v12042_v29  ;;  %v1975_v39 = vpop.f32.mrb[115].mxu0  ;;  %v17168_v24 = vadd.f32 %v2123_v23, %v1958_v62  ;;  %v12044_v62 = vld [vmem:[%s15946_s29 + $0xae0] sm:$0xff] }
 0x30d   :  { %3711 = vmatmul.mubr.f32.gmra.mrb[208].mxu0 %v12088_v60  ;;  %v12054_v39 = vld [vmem:[%s15946_s29 + $0xb30] sm:$0xff] }
 0x30e   :  { %v13369_v63 = vpop.f32.mrb[96].mxu1  ;;  %3715 = vmatprep.mubr.f32.mxu0 %v12092_v55 }
 0x30f   :  { %3315 = vmatmul.mubr.f32.gmra.mrb[190].mxu1 %v12041_v7  ;;  %v1978_v19 = vpop.f32.mrb[116].mxu0  ;;  %v17174_v31 = vadd.f32 %v13369_v63, %v1973_v26  ;;  %v2133_v38 = vpop.f32.mrb[97].mxu1  ;;  %v12101_v26 = vld [vmem:[%s15946_s29 + $0xc08] sm:$0xff]  ;;  %v12050_v7 = vld [vmem:[%s15946_s29 + $0xb10] sm:$0xff] }
 0x310   :  { %3319 = vmatprep.mubr.f32.mxu1 %v12045_v34  ;;  %v1980_v35 = vpop.f32.mrb[117].mxu0  ;;  %v17178_v18 = vadd.f32 %v2133_v38, %v1968_v41  ;;  %v12100_v34 = vld [vmem:[%s15946_s29 + $0xc00] sm:$0xff]  ;;  %v12053_v38 = vld [vmem:[%s15946_s29 + $0xb28] sm:$0xff] }
 0x311   :  { %3716 = vmatmul.mubr.f32.gmra.mrb[210].mxu0 %v12091_v17  ;;  %v12104_v17 = vld [vmem:[%s15946_s29 + $0xc20] sm:$0xff] }
 0x312   :  { %v13372_v37 = vpop.f32.mrb[98].mxu1  ;;  %3720 = vmatprep.mubr.f32.mxu0 %v12095_v10 }
 0x313   :  { %3320 = vmatmul.mubr.f32.gmra.mrb[192].mxu1 %v12044_v62  ;;  %v1983_v61 = vpop.f32.mrb[118].mxu0  ;;  %v2143_v36 = vpop.f32.mrb[99].mxu1  ;;  %v12078_v62 = vld [vmem:[%s15946_s29 + $0xb50] sm:$0xff] }
 0x314   :  { %3324 = vmatprep.mubr.f32.mxu1 %v12048_v43  ;;  %v1985_v8 = vpop.f32.mrb[119].mxu0  ;;  %v17186_v41 = vadd.f32 %v13372_v37, %v1983_v61  ;;  %v17188_v52 = vadd.f32 %v2143_v36, %v1978_v19  ;;  %v12103_v37 = vld [vmem:[%s15946_s29 + $0xc18] sm:$0xff] }
 0x315   :  { %3721 = vmatmul.mubr.f32.gmra.mrb[212].mxu0 %v12094_v59  ;;  %v12107_v36 = vld [vmem:[%s15946_s29 + $0xc38] sm:$0xff]  ;;  %v12081_v8 = vld [vmem:[%s15946_s29 + $0xb68] sm:$0xff] }
 0x316   :  { %v13391_v32 = vpop.f32.mrb[100].mxu1  ;;  %3725 = vmatprep.mubr.f32.mxu0 %v12098_v54 }
 0x317   :  { %3325 = vmatmul.mubr.f32.gmra.mrb[194].mxu1 %v12047_v22  ;;  %v2339_v3 = vpop.f32.mrb[120].mxu0  ;;  %v2504_v60 = vpop.f32.mrb[101].mxu1 }
 0x318   :  { %v2341_v23 = vpop.f32.mrb[121].mxu0  ;;  %3329 = vmatprep.mubr.f32.mxu1 %v12051_v28  ;;  %v2505_v55 = vadd.f32 %v2504_v60, %v2339_v3  ;;  %v12084_v28 = vld [vmem:[%s15946_s29 + $0xb80] sm:$0xff]  ;;  %v12110_v3 = vld [vmem:[%s15946_s29 + $0xc50] sm:$0xff] }
 0x319   :  { %3726 = vmatmul.mubr.f32.gmra.mrb[214].mxu0 %v12097_v5 }
 0x31a   :  { %3730 = vmatprep.mubr.f32.mxu0 %v12101_v26  ;;  %v12087_v26 = vld [vmem:[%s15946_s29 + $0xb98] sm:$0xff] }
 0x31b   :  { %v2344_v63 = vpop.f32.mrb[122].mxu0  ;;  %3330 = vmatmul.mubr.f32.gmra.mrb[196].mxu1 %v12050_v7 }
 0x31c   :  { %v2510_v19 = vadd.f32 %v13391_v32, %v2344_v63  ;;  %3334 = vmatprep.mubr.f32.mxu1 %v12054_v39  ;;  %v2346_v10 = vpop.f32.mrb[123].mxu0  ;;  %v12106_v32 = vld [vmem:[%s15946_s29 + $0xc30] sm:$0xff] }
 0x31d   :  { %3731 = vmatmul.mubr.f32.gmra.mrb[216].mxu0 %v12100_v34  ;;  %v12109_v34 = vld [vmem:[%s15946_s29 + $0xc48] sm:$0xff] }
 0x31e   :  { %v15551_v35 = vpack.i.bf16 %v2510_v19, %v2505_v55  ;;  %v13394_v43 = vpop.f32.mrb[102].mxu1  ;;  %3735 = vmatprep.mubr.f32.mxu0 %v12104_v17  ;;  %v12090_v55 = vld [vmem:[%s15946_s29 + $0xbb0] sm:$0xff]  ;;  %v12113_v19 = vld [vmem:[%s15946_s29 + $0xc68] sm:$0xff] }
 0x31f   :  { %3335 = vmatmul.mubr.f32.gmra.mrb[198].mxu1 %v12053_v38  ;;  %v2349_v59 = vpop.f32.mrb[124].mxu0  ;;  %v2514_v61 = vpop.f32.mrb[103].mxu1 }
 0x320   :  { %15552 = vrot.lane.b32.xlu0 %v15551_v35, %s15837_s25  ;;  %v2351_v54 = vpop.f32.mrb[125].mxu0  ;;  %13527 = vmatprep.mubr.msk.f32.mxu1 %vm859_vm4, %v12078_v62  ;;  %v2515_v22 = vadd.f32 %v2514_v61, %v2349_v59  ;;  %v12093_v62 = vld [vmem:[%s15946_s29 + $0xbc8] sm:$0xff]  ;;  %v12096_v35 = vld [vmem:[%s15946_s29 + $0xbe0] sm:$0xff] }
 0x321   :  { %3736 = vmatmul.mubr.f32.gmra.mrb[218].mxu0 %v12103_v37  ;;  %v12112_v37 = vld [vmem:[%s15946_s29 + $0xc60] sm:$0xff] }
 0x322   :  { %3740 = vmatprep.mubr.f32.mxu0 %v12107_v36  ;;  %v12116_v36 = vld [vmem:[%s15946_s29 + $0xc80] sm:$0xff] }
 0x323   :  { %v2354_v5 = vpop.f32.mrb[126].mxu0  ;;  %13528 = vmatmul.mubr.msk.f32.vlgmr.msra.gmra.mrb[200].mxu1 %vm859_vm4, %v12081_v8  ;;  %v12099_v8 = vld [vmem:[%s15946_s29 + $0xbf8] sm:$0xff] }
 0x324   :  { %v2520_v60 = vadd.f32 %v13394_v43, %v2354_v5  ;;  %13530 = vmatprep.mubr.msk.f32.mxu1 %vm859_vm4, %v12084_v28  ;;  %v2356_v23 = vpop.f32.mrb[127].mxu0  ;;  %v12102_v28 = vld [vmem:[%s15946_s29 + $0xc10] sm:$0xff] }
 0x325   :  { %3741 = vmatmul.mubr.f32.gmra.mrb[220].mxu0 %v12106_v32  ;;  %v12119_v23 = vld [vmem:[%s15946_s29 + $0xc98] sm:$0xff] }
 0x326   :  { %v15556_v7 = vpack.i.bf16 %v2520_v60, %v2515_v22  ;;  %v13397_v39 = vpop.f32.mrb[104].mxu1  ;;  %3745 = vmatprep.mubr.f32.mxu0 %v12110_v3  ;;  %v12115_v3 = vld [vmem:[%s15946_s29 + $0xc78] sm:$0xff] }
 0x327   :  { %13531 = vmatmul.mubr.msk.f32.gmra.mrb[202].mxu1 %vm859_vm4, %v12087_v26  ;;  %v2359_v63 = vpop.f32.mrb[128].mxu0  ;;  %v2524_v17 = vpop.f32.mrb[105].mxu1 }
 0x328   :  { %15557 = vrot.lane.b32.xlu1 %v15556_v7, %s15837_s25  ;;  %v2361_v38 = vpop.f32.mrb[129].mxu0  ;;  %v2525_v10 = vadd.f32 %v2524_v17, %v2359_v63  ;;  %13533 = vmatprep.mubr.msk.f32.mxu1 %vm859_vm4, %v12090_v55  ;;  %v12118_v17 = vld [vmem:[%s15946_s29 + $0xc90] sm:$0xff] }
 0x329   :  { %3746 = vmatmul.mubr.f32.gmra.mrb[222].mxu0 %v12109_v34  ;;  %v12108_v34 = vld [vmem:[%s15946_s29 + $0xc40] sm:$0xff] }
 0x32a   :  { %v13400_v43 = vpop.f32.mrb[106].mxu1  ;;  %3750 = vmatprep.mubr.f32.mxu0 %v12113_v19 }
 0x32b   :  { %v2364_v59 = vpop.f32.mrb[130].mxu0  ;;  %v2534_v61 = vpop.f32.mrb[107].mxu1  ;;  %13534 = vmatmul.mubr.msk.f32.gmra.mrb[204].mxu1 %vm859_vm4, %v12093_v62 }
 0x32c   :  { %v2530_v54 = vadd.f32 %v13397_v39, %v2364_v59  ;;  %v2366_v22 = vpop.f32.mrb[131].mxu0  ;;  %13536 = vmatprep.mubr.msk.f32.mxu1 %vm859_vm4, %v12096_v35  ;;  %v12105_v39 = vld [vmem:[%s15946_s29 + $0xc28] sm:$0xff]  ;;  %v12114_v59 = vld [vmem:[%s15946_s29 + $0xc70] sm:$0xff] }
 0x32d   :  { %3751 = vmatmul.mubr.f32.gmra.mrb[224].mxu0 %v12112_v37  ;;  %v12111_v37 = vld [vmem:[%s15946_s29 + $0xc58] sm:$0xff] }
 0x32e   :  { %v15561_v32 = vpack.i.bf16 %v2530_v54, %v2525_v10  ;;  %v13403_v5 = vpop.f32.mrb[108].mxu1  ;;  %3755 = vmatprep.mubr.f32.mxu0 %v12116_v36  ;;  %v12122_v10 = vld [vmem:[%s15946_s29 + $0xcb0] sm:$0xff]  ;;  %v12121_v36 = vld [vmem:[%s15946_s29 + $0xca8] sm:$0xff] }
 0x32f   :  { %v2369_v60 = vpop.f32.mrb[132].mxu0  ;;  %13537 = vmatmul.mubr.msk.f32.gmra.mrb[206].mxu1 %vm859_vm4, %v12099_v8  ;;  %v2544_v26 = vpop.f32.mrb[109].mxu1 }
 0x330   :  { %15562 = vrot.lane.b32.xlu0 %v15561_v32, %s15837_s25  ;;  %v2371_v55 = vpop.f32.mrb[133].mxu0  ;;  %v2535_v7 = vadd.f32 %v2534_v61, %v2369_v60  ;;  %13539 = vmatprep.mubr.msk.f32.mxu1 %vm859_vm4, %v12102_v28  ;;  %v12125_v28 = vld [vmem:[%s15946_s29 + $0xcc8] sm:$0xff]  ;;  %v12120_v60 = vld [vmem:[%s15946_s29 + $0xca0] sm:$0xff] }
 0x331   :  { %3756 = vmatmul.mubr.f32.gmra.mrb[226].mxu0 %v12115_v3  ;;  %v12117_v3 = vld [vmem:[%s15946_s29 + $0xc88] sm:$0xff] }
 0x332   :  { %v17233_v63 = vpop.f32.mrb[110].mxu1  ;;  %3760 = vmatprep.mubr.f32.mxu0 %v12119_v23  ;;  %v12124_v23 = vld [vmem:[%s15946_s29 + $0xcc0] sm:$0xff] }
 0x333   :  { %v2374_v19 = vpop.f32.mrb[134].mxu0  ;;  %13540 = vmatmul.mubr.msk.f32.gmra.mrb[208].mxu1 %vm859_vm4, %v12105_v39  ;;  %v2554_v38 = vpop.f32.mrb[111].mxu1 }
 0x334   :  { %v2540_v62 = vadd.f32 %v13400_v43, %v2374_v19  ;;  %v2376_v35 = vpop.f32.mrb[135].mxu0  ;;  %13542 = vmatprep.mubr.msk.f32.mxu1 %vm859_vm4, %v12108_v34  ;;  %v12128_v34 = vld [vmem:[%s15946_s29 + $0xce0] sm:$0xff] }
 0x335   :  { %3761 = vmatmul.mubr.f32.gmra.mrb[228].mxu0 %v12118_v17  ;;  %v12127_v35 = vld [vmem:[%s15946_s29 + $0xcd8] sm:$0xff] }
 0x336   :  { %v15566_v61 = vpack.i.bf16 %v2540_v62, %v2535_v7  ;;  %3765 = vmatprep.mubr.f32.mxu0 %v12122_v10  ;;  %v13409_v54 = vpop.f32.mrb[112].mxu1  ;;  %v12126_v10 = vld [vmem:[%s15946_s29 + $0xcd0] sm:$0xff] }
 0x337   :  { %v2379_v22 = vpop.f32.mrb[136].mxu0  ;;  %13543 = vmatmul.mubr.msk.f32.gmra.mrb[210].mxu1 %vm859_vm4, %v12111_v37  ;;  %v2564_v8 = vpop.f32.mrb[113].mxu1 }
 0x338   :  { %15567 = vrot.lane.b32.xlu1 %v15566_v61, %s15837_s25  ;;  %v2381_v43 = vpop.f32.mrb[137].mxu0  ;;  %v2545_v32 = vadd.f32 %v2544_v26, %v2379_v22  ;;  %13545 = vmatprep.mubr.msk.f32.mxu1 %vm859_vm4, %v12114_v59  ;;  %v12123_v26 = vld [vmem:[%s15946_s29 + $0xcb8] sm:$0xff] }
 0x339   :  { %3766 = vmatmul.mubr.f32.gmra.mrb[230].mxu0 %v12121_v36  ;;  %v12131_v36 = vld [vmem:[%s15946_s29 + $0xcf8] sm:$0xff]  ;;  %v12132_v43 = vld [vmem:[%s15946_s29 + $0xd00] sm:$0xff] }
 0x33a   :  { %3770 = vmatprep.mubr.f32.mxu0 %v12125_v28  ;;  %v13412_v55 = vpop.f32.mrb[114].mxu1  ;;  %v12129_v28 = vld [vmem:[%s15946_s29 + $0xce8] sm:$0xff] }
 0x33b   :  { %v2384_v7 = vpop.f32.mrb[138].mxu0  ;;  %13546 = vmatmul.mubr.msk.f32.gmra.mrb[212].mxu1 %vm859_vm4, %v12117_v3  ;;  %v2574_v39 = vpop.f32.mrb[115].mxu1 }
 0x33c   :  { %v2550_v17 = vadd.f32 %v13403_v5, %v2384_v7  ;;  %v2386_v19 = vpop.f32.mrb[139].mxu0  ;;  %13548 = vmatprep.mubr.msk.f32.mxu1 %vm859_vm4, %v12120_v60  ;;  %v12134_v7 = vld [vmem:[%s15946_s29 + $0xd10] sm:$0xff] }
 0x33d   :  { %3771 = vmatmul.mubr.f32.gmra.mrb[232].mxu0 %v12124_v23 }
 0x33e   :  { %v15571_v62 = vpack.i.bf16 %v2550_v17, %v2545_v32  ;;  %3775 = vmatprep.mubr.f32.mxu0 %v12128_v34  ;;  %v13415_v37 = vpop.f32.mrb[116].mxu1  ;;  %v12130_v32 = vld [vmem:[%s15946_s29 + $0xcf0] sm:$0xff] }
 0x33f   :  { %v2389_v59 = vpop.f32.mrb[140].mxu0  ;;  %13549 = vmatmul.mubr.msk.f32.gmra.mrb[214].mxu1 %vm859_vm4, %v12123_v26  ;;  %v2584_v61 = vpop.f32.mrb[117].mxu1  ;;  %v12133_v26 = vld [vmem:[%s15946_s29 + $0xd08] sm:$0xff] }
 0x340   :  { %15572 = vrot.lane.b32.xlu0 %v15571_v62, %s15837_s25  ;;  %v2391_v5 = vpop.f32.mrb[141].mxu0  ;;  %v2555_v22 = vadd.f32 %v2554_v38, %v2389_v59  ;;  %13551 = vmatprep.mubr.msk.f32.mxu1 %vm859_vm4, %v12126_v10  ;;  %v12135_v38 = vld [vmem:[%s15946_s29 + $0xd18] sm:$0xff]  ;;  %s19441_s29 = sld [smem:[#allocation11_spill]] }
 0x341   :  { %3776 = vmatmul.mubr.f32.gmra.mrb[234].mxu0 %v12127_v35 }
 0x342   :  { %3780 = vmatprep.mubr.f32.mxu0 %v12131_v36  ;;  %v13418_v3 = vpop.f32.mrb[118].mxu1 }
 0x343   :  { %v2394_v60 = vpop.f32.mrb[142].mxu0  ;;  %13552 = vmatmul.mubr.msk.f32.gmra.mrb[216].mxu1 %vm859_vm4, %v12129_v28  ;;  %v2594_v23 = vpop.f32.mrb[119].mxu1 }
 0x344   :  { %v2560_v34 = vadd.f32 %v17233_v63, %v2394_v60  ;;  %v2396_v17 = vpop.f32.mrb[143].mxu0  ;;  %13554 = vmatprep.mubr.msk.f32.mxu1 %vm859_vm4, %v12132_v43 }
 0x345   :  { %3781 = vmatmul.mubr.f32.gmra.mrb[236].mxu0 %v12130_v32 }
 0x346   :  { %v15576_v19 = vpack.i.bf16 %v2560_v34, %v2555_v22  ;;  %3785 = vmatprep.mubr.f32.mxu0 %v12134_v7 }
 0x347   :  { %v2399_v10 = vpop.f32.mrb[144].mxu0  ;;  %13555 = vmatmul.mubr.msk.f32.gmra.mrb[218].mxu1 %vm859_vm4, %v12135_v38 }
 0x348   :  { %15577 = vrot.lane.b32.xlu1 %v15576_v19, %s15837_s25  ;;  %v2401_v62 = vpop.f32.mrb[145].mxu0  ;;  %v17270_v35 = vadd.f32 %v2564_v8, %v2399_v10 }
 0x349   :  { %3786 = vmatmul.mubr.f32.gmra.mrb[238].mxu0 %v12133_v26  ;;  %v17284_v26 = vpop.permute.xlu1 %15492 }
 0x34b   :  { %v2404_v59 = vpop.f32.mrb[146].mxu0 }
 0x34c   :  { %v17272_v36 = vadd.f32 %v13409_v54, %v2404_v59  ;;  %v2406_v63 = vpop.f32.mrb[147].mxu0 }
 0x34f   :  { %v2409_v28 = vpop.f32.mrb[148].mxu0 }
 0x350   :  { %v2411_v22 = vpop.f32.mrb[149].mxu0  ;;  %v17276_v43 = vadd.f32 %v2574_v39, %v2409_v28  ;;  %v17290_v28 = vpop.permute.xlu1 %15502 }
 0x351   :  { %19351 = vst [vmem:[#allocation35_spill] sm:$0xff] %v17290_v28  ;;  %v15505_v13 = vunpack.i.h.bf16 %v17290_v28 }
 0x353   :  { %v2414_v32 = vpop.f32.mrb[150].mxu0 }
 0x354   :  { %v17278_v60 = vadd.f32 %v13412_v55, %v2414_v32  ;;  %v2416_v7 = vpop.f32.mrb[151].mxu0  ;;  %v17288_v55 = vpop.permute.xlu0 %15487 }
 0x355   :  { %v17298_v29 = vpop.permute.xlu1 %15512 }
 0x356   :  { %v2790_v34 = vpop.f32.mrb[120].mxu1 }
 0x357   :  { %v2419_v17 = vpop.f32.mrb[152].mxu0  ;;  %v2792_v38 = vpop.f32.mrb[121].mxu1 }
 0x358   :  { %v2421_v54 = vpop.f32.mrb[153].mxu0  ;;  %v17282_v19 = vadd.f32 %v2584_v61, %v2419_v17 }
 0x359   :  { %v17296_v54 = vpop.permute.xlu0 %15497 }
 0x35a   :  { %v2795_v10 = vpop.f32.mrb[122].mxu1  ;;  %19352 = vst [vmem:[#allocation36_spill] sm:$0xff] %v17296_v54 }
 0x35b   :  { %v2424_v62 = vpop.f32.mrb[154].mxu0  ;;  %v2797_v59 = vpop.f32.mrb[123].mxu1 }
 0x35c   :  { %v17286_v39 = vadd.f32 %v13415_v37, %v2424_v62  ;;  %v2426_v63 = vpop.f32.mrb[155].mxu0 }
 0x35d   :  { %v15508_v45 = vpop.permute.xlu0 %15507 }
 0x35e   :  { %v2800_v22 = vpop.f32.mrb[124].mxu1  ;;  %v15510_v30 = vunpack.i.h.bf16 %v15508_v45  ;;  %v15509_v28 = vunpack.i.l.bf16 %v15508_v45 }
 0x35f   :  { %v2429_v7 = vpop.f32.mrb[156].mxu0  ;;  %v2802_v38 = vpop.f32.mrb[125].mxu1 }
 0x360   :  { %v2431_v61 = vpop.f32.mrb[157].mxu0  ;;  %v17294_v17 = vadd.f32 %v2594_v23, %v2429_v7  ;;  %v4366_v45 = vsel %vm4356_vm6, %v16739_v0, %v15510_v30 }
 0x361   :  { %v17308_v7 = vpop.permute.xlu0 %15517 }
 0x362   :  { %v2805_v37 = vpop.f32.mrb[126].mxu1  ;;  %19353 = vst [vmem:[#allocation37_spill] sm:$0xff] %v17308_v7 }
 0x363   :  { %v2434_v62 = vpop.f32.mrb[158].mxu0  ;;  %v2807_v59 = vpop.f32.mrb[127].mxu1 }
 0x364   :  { %v17300_v63 = vadd.f32 %v13418_v3, %v2434_v62  ;;  %v2436_v11 = vpop.f32.mrb[159].mxu0  ;;  %v15500_v3 = vunpack.i.h.bf16 %v17296_v54 }
 0x366   :  { %v17302_v48 = vpop.permute.xlu1 %15522  ;;  %v2810_v8 = vpop.f32.mrb[128].mxu1 }
 0x367   :  { %v13437_v32 = vpop.f32.mrb[160].mxu0  ;;  %v2812_v47 = vpop.f32.mrb[129].mxu1 }
 0x368   :  { %v2955_v38 = vpop.f32.mrb[161].mxu0  ;;  %v17304_v61 = vadd.f32 %v13437_v32, %v2795_v10 }
 0x369   :  { %v17306_v23 = vadd.f32 %v2955_v38, %v2790_v34 }
 0x36a   :  { %v2815_v50 = vpop.f32.mrb[130].mxu1  ;;  %v17313_v59 = vpop.permute.xlu1 %15527 }
 0x36b   :  { %v13440_v5 = vpop.f32.mrb[162].mxu0  ;;  %v2817_v21 = vpop.f32.mrb[131].mxu1 }
 0x36c   :  { %v2965_v62 = vpop.f32.mrb[163].mxu0  ;;  %v17311_v11 = vadd.f32 %v13440_v5, %v2805_v37  ;;  %v4362_v5 = vsel %vm4356_vm6, %v16710_v27, %v15500_v3  ;;  %v4364_v27 = vsel %vm4356_vm6, %v16723_v42, %v15505_v13  ;;  %v15514_v42 = vunpack.i.l.bf16 %v17298_v29 }
 0x36d   :  { %v17315_v33 = vadd.f32 %v2965_v62, %v2800_v22 }
 0x36e   :  { %19354 = vst [vmem:[#allocation38_spill] sm:$0xff] %v17311_v11  ;;  %v17317_v47 = vpop.permute.xlu0 %15532  ;;  %v2820_v10 = vpop.f32.mrb[132].mxu1 }
 0x36f   :  { %19355 = vst [vmem:[#allocation39_spill] sm:$0xff] %v17317_v47  ;;  %v15535_v34 = vunpack.i.h.bf16 %v17317_v47  ;;  %v13443_v32 = vpop.f32.mrb[164].mxu0  ;;  %v2822_v38 = vpop.f32.mrb[133].mxu1 }
 0x370   :  { %v2975_v21 = vpop.f32.mrb[165].mxu0  ;;  %v17321_v57 = vadd.f32 %v13443_v32, %v2815_v50 }
 0x371   :  { %v17325_v37 = vadd.f32 %v2975_v21, %v2810_v8  ;;  %v17328_v22 = vsel %vm859_vm4, %v4362_v5, %v15535_v34 }
 0x372   :  { %19356 = vst [vmem:[#allocation40_spill] sm:$0xff] %v17321_v57  ;;  %19358 = vst [vmem:[#allocation42_spill] sm:$0xff] %v17328_v22  ;;  %v17330_v62 = vpop.permute.xlu1 %15537  ;;  %v2825_v40 = vpop.f32.mrb[134].mxu1 }
 0x373   :  { %19357 = vst [vmem:[#allocation41_spill] sm:$0xff] %v17325_v37  ;;  %19359 = vst [vmem:[#allocation43_spill] sm:$0xff] %v17330_v62  ;;  %v15540_v7 = vunpack.i.h.bf16 %v17330_v62  ;;  %v13446_v44 = vpop.f32.mrb[166].mxu0  ;;  %v2827_v38 = vpop.f32.mrb[135].mxu1 }
 0x374   :  { %v2985_v47 = vpop.f32.mrb[167].mxu0  ;;  %v17333_v50 = vadd.f32 %v13446_v44, %v2825_v40  ;;  %v4365_v44 = vsel %vm4356_vm6, %v16736_v58, %v15509_v28  ;;  %v15515_v40 = vunpack.i.h.bf16 %v17298_v29 }
 0x375   :  { %v17337_v8 = vadd.f32 %v2985_v47, %v2820_v10  ;;  %v17340_v3 = vsel %vm859_vm4, %v4364_v27, %v15540_v7 }
 0x376   :  { %19360 = vst [vmem:[#allocation44_spill] sm:$0xff] %v17333_v50  ;;  %19362 = vst [vmem:[#allocation46_spill] sm:$0xff] %v17340_v3  ;;  %v15543_v34 = vpop.permute.xlu0 %15542  ;;  %v2830_v32 = vpop.f32.mrb[136].mxu1  ;;  %v4368_v29 = vsel %vm4356_vm6, %v16751_v25, %v15515_v40 }
 0x377   :  { %19361 = vst [vmem:[#allocation45_spill] sm:$0xff] %v17337_v8  ;;  %v15545_v21 = vunpack.i.h.bf16 %v15543_v34  ;;  %v15544_v5 = vunpack.i.l.bf16 %v15543_v34  ;;  %v13449_v22 = vpop.f32.mrb[168].mxu0  ;;  %v2832_v62 = vpop.f32.mrb[137].mxu1  ;;  %v4367_v34 = vsel %vm4356_vm6, %v16745_v14, %v15514_v42 }
 0x378   :  { %v2995_v13 = vpop.f32.mrb[169].mxu0 }
 0x379   :  { %v17349_v7 = vsel %vm859_vm4, %v4365_v44, %v15544_v5  ;;  %v17352_v47 = vsel %vm859_vm4, %v4366_v45, %v15545_v21  ;;  %v17354_v10 = vadd.f32 %v2995_v13, %v2830_v32 }
 0x37a   :  { %19363 = vst [vmem:[#allocation47_spill] sm:$0xff] %v17349_v7  ;;  %v15548_v62 = vpop.permute.xlu1 %15547  ;;  %v2835_v38 = vpop.f32.mrb[138].mxu1 }
 0x37b   :  { %19364 = vst [vmem:[#allocation48_spill] sm:$0xff] %v17354_v10  ;;  %v15550_v27 = vunpack.i.h.bf16 %v15548_v62  ;;  %v15549_v30 = vunpack.i.l.bf16 %v15548_v62  ;;  %v17356_v0 = vadd.f32 %v13449_v22, %v2835_v38  ;;  %v2837_v58 = vpop.f32.mrb[139].mxu1  ;;  %v13452_v28 = vpop.f32.mrb[170].mxu0 }
 0x37c   :  { %v3005_v5 = vpop.f32.mrb[171].mxu0 }
 0x37d   :  { %19365 = vst [vmem:[#allocation49_spill] sm:$0xff] %v17356_v0  ;;  %v17363_v21 = vsel %vm859_vm4, %v4367_v34, %v15549_v30  ;;  %v17366_v32 = vsel %vm859_vm4, %v4368_v29, %v15550_v27 }
 0x37e   :  { %19366 = vst [vmem:[#allocation50_spill] sm:$0xff] %v17363_v21  ;;  %v2840_v45 = vpop.f32.mrb[140].mxu1 }
 0x37f   :  { %v2842_v44 = vpop.f32.mrb[141].mxu1  ;;  %v17368_v13 = vadd.f32 %v3005_v5, %v2840_v45  ;;  %v13455_v22 = vpop.f32.mrb[172].mxu0 }
 0x380   :  { %v3015_v62 = vpop.f32.mrb[173].mxu0 }
 0x381   :  { %19367 = vst [vmem:[#allocation51_spill] sm:$0xff] %v17368_v13 }
 0x382   :  { %v2845_v38 = vpop.f32.mrb[142].mxu1 }
 0x383   :  { %v2847_v58 = vpop.f32.mrb[143].mxu1  ;;  %v17370_v7 = vadd.f32 %v13452_v28, %v2845_v38  ;;  %v13458_v25 = vpop.f32.mrb[174].mxu0 }
 0x384   :  { %v3025_v40 = vpop.f32.mrb[175].mxu0 }
 0x385   :  { %19368 = vst [vmem:[#allocation52_spill] sm:$0xff] %v17370_v7 }
 0x386   :  { %v2850_v14 = vpop.f32.mrb[144].mxu1 }
 0x387   :  { %v2852_v42 = vpop.f32.mrb[145].mxu1  ;;  %v17372_v0 = vadd.f32 %v3015_v62, %v2850_v14  ;;  %v13461_v30 = vpop.f32.mrb[176].mxu0 }
 0x388   :  { %v3035_v34 = vpop.f32.mrb[177].mxu0 }
 0x389   :  { %19369 = vst [vmem:[#allocation53_spill] sm:$0xff] %v17372_v0 }
 0x38a   :  { %v2855_v27 = vpop.f32.mrb[146].mxu1 }
 0x38b   :  { %v2857_v29 = vpop.f32.mrb[147].mxu1  ;;  %v17374_v21 = vadd.f32 %v13455_v22, %v2855_v27  ;;  %v13464_v5 = vpop.f32.mrb[178].mxu0 }
 0x38c   :  { %v3045_v45 = vpop.f32.mrb[179].mxu0 }
 0x38d   :  { %19370 = vst [vmem:[#allocation54_spill] sm:$0xff] %v17374_v21 }
 0x38e   :  { %v2860_v44 = vpop.f32.mrb[148].mxu1 }
 0x38f   :  { %v2862_v13 = vpop.f32.mrb[149].mxu1  ;;  %v17376_v10 = vadd.f32 %v3025_v40, %v2860_v44  ;;  %v13483_v28 = vpop.f32.mrb[180].mxu0 }
 0x390   :  { %v3406_v38 = vpop.f32.mrb[181].mxu0 }
 0x391   :  { %19371 = vst [vmem:[#allocation55_spill] sm:$0xff] %v17376_v10 }
 0x392   :  { %v2865_v58 = vpop.f32.mrb[150].mxu1 }
 0x393   :  { %v2867_v7 = vpop.f32.mrb[151].mxu1  ;;  %v17378_v3 = vadd.f32 %v13458_v25, %v2865_v58 }
 0x395   :  { %19372 = vst [vmem:[#allocation56_spill] sm:$0xff] %v17378_v3 }
 0x396   :  { %v2870_v62 = vpop.f32.mrb[152].mxu1  ;;  %v13486_v14 = vpop.f32.mrb[182].mxu0 }
 0x397   :  { %v2872_v42 = vpop.f32.mrb[153].mxu1  ;;  %v17380_v0 = vadd.f32 %v3035_v34, %v2870_v62  ;;  %v3416_v29 = vpop.f32.mrb[183].mxu0 }
 0x399   :  { %19373 = vst [vmem:[#allocation57_spill] sm:$0xff] %v17380_v0 }
 0x39a   :  { %v2875_v22 = vpop.f32.mrb[154].mxu1 }
 0x39b   :  { %v2877_v27 = vpop.f32.mrb[155].mxu1  ;;  %v17382_v21 = vadd.f32 %v13461_v30, %v2875_v22  ;;  %v13489_v50 = vpop.f32.mrb[184].mxu0 }
 0x39c   :  { %v3426_v13 = vpop.f32.mrb[185].mxu0 }
 0x39d   :  { %19374 = vst [vmem:[#allocation58_spill] sm:$0xff] %v17382_v21  ;;  %v17396_v21 = vpop.permute.xlu0 %15552 }
 0x39e   :  { %v2880_v40 = vpop.f32.mrb[156].mxu1 }
 0x39f   :  { %v2882_v44 = vpop.f32.mrb[157].mxu1  ;;  %v17384_v10 = vadd.f32 %v3045_v45, %v2880_v40  ;;  %v17386_v8 = vpop.f32.mrb[186].mxu0 }
 0x3a0   :  { %v17388_v7 = vpop.f32.mrb[187].mxu0 }
 0x3a1   :  { %19375 = vst [vmem:[#allocation59_spill] sm:$0xff] %v17384_v10 }
 0x3a2   :  { %v2885_v25 = vpop.f32.mrb[158].mxu1 }
 0x3a3   :  { %v17390_v58 = vadd.f32 %v13464_v5, %v2885_v25  ;;  %v2887_v34 = vpop.f32.mrb[159].mxu1  ;;  %v17392_v62 = vpop.f32.mrb[188].mxu0 }
 0x3a4   :  { %v17394_v42 = vpop.f32.mrb[189].mxu0  ;;  %v17403_v5 = vpop.permute.xlu0 %15562 }
 0x3a5   :  { %19376 = vst [vmem:[#allocation60_spill] sm:$0xff] %v17390_v58  ;;  %19377 = vst [vmem:[#allocation61_spill] sm:$0xff] %v17403_v5 }
 0x3a6   :  { %v3241_v30 = vpop.f32.mrb[160].mxu1 }
 0x3a7   :  { %v3407_v22 = vadd.f32 %v3406_v38, %v3241_v30  ;;  %v3243_v27 = vpop.f32.mrb[161].mxu1 }
 0x3a9   :  { %4216 = vrot.lane.b32.xlu0 %v3407_v22, %s15835_s5  ;;  %v17399_v45 = vpop.f32.mrb[190].mxu0  ;;  %v17410_v22 = vpop.permute.xlu1 %15557 }
 0x3aa   :  { %v3246_v40 = vpop.f32.mrb[162].mxu1  ;;  %v17401_v0 = vpop.f32.mrb[191].mxu0 }
 0x3ab   :  { %v3412_v44 = vadd.f32 %v13483_v28, %v3246_v40  ;;  %v3248_v10 = vpop.f32.mrb[163].mxu1 }
 0x3ad   :  { %4218 = vrot.lane.b32.xlu1 %v3412_v44, %s15835_s5 }
 0x3ae   :  { %v3251_v25 = vpop.f32.mrb[164].mxu1  ;;  %v17406_v34 = vpop.f32.mrb[192].mxu0 }
 0x3af   :  { %v3417_v38 = vadd.f32 %v3416_v29, %v3251_v25  ;;  %v3253_v30 = vpop.f32.mrb[165].mxu1  ;;  %v17408_v27 = vpop.f32.mrb[193].mxu0 }
 0x3b0   :  { %v17420_v29 = vpop.permute.xlu1 %15567  ;;  %v4458_v30 = vld [vmem:[%s15861_s13] sm:$0xff] }
 0x3b1   :  { %4220 = vrot.lane.b32.xlu0 %v3417_v38, %s15835_s5  ;;  %19379 = vst [vmem:[#allocation63_spill] sm:$0xff] %v17420_v29 }
 0x3b2   :  { %v3256_v10 = vpop.f32.mrb[166].mxu1  ;;  %v17413_v28 = vpop.permute.xlu0 %15572 }
 0x3b3   :  { %19378 = vst [vmem:[#allocation62_spill] sm:$0xff] %v17413_v28  ;;  %v3422_v40 = vadd.f32 %v13486_v14, %v3256_v10  ;;  %v15575_v58 = vunpack.i.h.bf16 %v17413_v28  ;;  %v3258_v44 = vpop.f32.mrb[167].mxu1  ;;  %v17416_v3 = vpop.f32.mrb[194].mxu0  ;;  %v4459_v10 = vld [vmem:[%s15861_s13 + $0x8] sm:$0xff] }
 0x3b4   :  { %v17418_v57 = vpop.f32.mrb[195].mxu0  ;;  %v14562_v5 = vpack.c.bf16 %v4459_v10, %v4458_v30 }
 0x3b5   :  { %4222 = vrot.lane.b32.xlu0 %v3422_v40, %s15835_s5  ;;  %v17425_v25 = vsel %vm4397_vm7, %v17352_v47, %v15575_v58  ;;  %v4460_v47 = vld [vmem:[%s15861_s13 + $0x10] sm:$0xff]  ;;  %v4461_v58 = vld [vmem:[%s15861_s13 + $0x18] sm:$0xff] }
 0x3b6   :  { %19380 = vst [vmem:[#allocation64_spill] sm:$0xff] %v17425_v25  ;;  %v3261_v38 = vpop.f32.mrb[168].mxu1  ;;  %v17427_v14 = vpop.f32.mrb[196].mxu0  ;;  %14563 = vmatpush1.bf16.msra.mxu0 %v14562_v5 }
 0x3b7   :  { %v3427_v44 = vadd.f32 %v3426_v13, %v3261_v38  ;;  %v3263_v28 = vpop.f32.mrb[169].mxu1  ;;  %v17431_v37 = vpop.f32.mrb[197].mxu0  ;;  %14564 = vmatprep.subr.bf16.mxu0 %v19350_v49  ;;  %v14565_v38 = vpack.c.bf16 %v4461_v58, %v4460_v47 }
 0x3b9   :  { %4224 = vrot.lane.b32.xlu1 %v3427_v44, %s15835_s5 }
 0x3ba   :  { %v3266_v29 = vpop.f32.mrb[170].mxu1  ;;  %v17434_v40 = vpop.permute.xlu1 %15577  ;;  %14566 = vmatpush1.bf16.msra.mxu0 %v14565_v38 }
 0x3bb   :  { %19381 = vst [vmem:[#allocation65_spill] sm:$0xff] %v17434_v40  ;;  %v3432_v25 = vadd.f32 %v13489_v50, %v3266_v29  ;;  %v15580_v12 = vunpack.i.h.bf16 %v17434_v40  ;;  %v3268_v13 = vpop.f32.mrb[171].mxu1  ;;  %v17440_v28 = vpop.f32.mrb[198].mxu0  ;;  %14567 = vmatprep.subr.bf16.mxu0 %v19350_v49  ;;  %v4462_v50 = vld [vmem:[%s15861_s13 + $0x20] sm:$0xff]  ;;  %v4463_v29 = vld [vmem:[%s15861_s13 + $0x28] sm:$0xff]  ;;  %v4469_v40 = vld [vmem:[%s15861_s13 + $0x58] sm:$0xff] }
 0x3bc   :  { %v17442_v30 = vpop.f32.mrb[199].mxu0  ;;  %v14568_v58 = vpack.c.bf16 %v4463_v29, %v4462_v50  ;;  %v4467_v50 = vld [vmem:[%s15861_s13 + $0x48] sm:$0xff] }
 0x3bd   :  { %4226 = vrot.lane.b32.xlu1 %v3432_v25, %s15835_s5  ;;  %v17447_v5 = vsel %vm4397_vm7, %v17366_v32, %v15580_v12  ;;  %v4464_v12 = vld [vmem:[%s15861_s13 + $0x30] sm:$0xff]  ;;  %v4465_v32 = vld [vmem:[%s15861_s13 + $0x38] sm:$0xff] }
 0x3be   :  { %19382 = vst [vmem:[#allocation66_spill] sm:$0xff] %v17447_v5  ;;  %v3271_v10 = vpop.f32.mrb[172].mxu1  ;;  %14569 = vmatpush1.bf16.msra.mxu0 %v14568_v58  ;;  %v14571_v5 = vpack.c.bf16 %v4465_v32, %v4464_v12  ;;  %v4468_v58 = vld [vmem:[%s15861_s13 + $0x50] sm:$0xff]  ;;  %v4471_v12 = vld [vmem:[%s15861_s13 + $0x68] sm:$0xff] }
 0x3bf   :  { %v3437_v44 = vadd.f32 %v17388_v7, %v3271_v10  ;;  %v3273_v47 = vpop.f32.mrb[173].mxu1  ;;  %14570 = vmatprep.subr.bf16.mxu0 %v19350_v49  ;;  %v4466_v10 = vld [vmem:[%s15861_s13 + $0x40] sm:$0xff] }
 0x3c0   :  { %v14574_v47 = vpack.c.bf16 %v4467_v50, %v4466_v10  ;;  %v4473_v10 = vld [vmem:[%s15861_s13 + $0x78] sm:$0xff] }
 0x3c1   :  { %4228 = vrot.lane.b32.xlu0 %v3437_v44, %s15835_s5 }
 0x3c2   :  { %v3276_v25 = vpop.f32.mrb[174].mxu1  ;;  %14572 = vmatpush1.bf16.msra.mxu0 %v14571_v5  ;;  %v4470_v5 = vld [vmem:[%s15861_s13 + $0x60] sm:$0xff] }
 0x3c3   :  { %v3442_v13 = vadd.f32 %v17386_v8, %v3276_v25  ;;  %v3278_v38 = vpop.f32.mrb[175].mxu1  ;;  %14573 = vmatprep.subr.bf16.mxu0 %v19350_v49  ;;  %v14577_v8 = vpack.c.bf16 %v4469_v40, %v4468_v58  ;;  %v4474_v58 = vld [vmem:[%s15861_s13 + $0x80] sm:$0xff] }
 0x3c5   :  { %4230 = vrot.lane.b32.xlu0 %v3442_v13, %s15835_s5 }
 0x3c6   :  { %v3281_v7 = vpop.f32.mrb[176].mxu1  ;;  %14575 = vmatpush1.bf16.msra.mxu0 %v14574_v47 }
 0x3c7   :  { %v3447_v29 = vadd.f32 %v17394_v42, %v3281_v7  ;;  %v3283_v44 = vpop.f32.mrb[177].mxu1  ;;  %14576 = vmatprep.subr.bf16.mxu0 %v19350_v49  ;;  %v14580_v42 = vpack.c.bf16 %v4471_v12, %v4470_v5  ;;  %v4472_v7 = vld [vmem:[%s15861_s13 + $0x70] sm:$0xff] }
 0x3c8   :  { %v14583_v44 = vpack.c.bf16 %v4473_v10, %v4472_v7 }
 0x3c9   :  { %4232 = vrot.lane.b32.xlu1 %v3447_v29, %s15835_s5 }
 0x3ca   :  { %v3286_v25 = vpop.f32.mrb[178].mxu1  ;;  %14578 = vmatpush1.bf16.msra.mxu0 %v14577_v8  ;;  %v4475_v8 = vld [vmem:[%s15861_s13 + $0x88] sm:$0xff] }
 0x3cb   :  { %v3452_v32 = vadd.f32 %v17392_v62, %v3286_v25  ;;  %v3288_v13 = vpop.f32.mrb[179].mxu1  ;;  %14579 = vmatprep.subr.bf16.mxu0 %v19350_v49 }
 0x3cd   :  { %4234 = vrot.lane.b32.xlu1 %v3452_v32, %s15835_s5  ;;  %v14586_v32 = vpack.c.bf16 %v4475_v8, %v4474_v58 }
 0x3ce   :  { %v3291_v38 = vpop.f32.mrb[180].mxu1  ;;  %14581 = vmatpush1.bf16.msra.mxu0 %v14580_v42  ;;  %v4476_v42 = vld [vmem:[%s15861_s13 + $0x90] sm:$0xff] }
 0x3cf   :  { %v3457_v40 = vadd.f32 %v17401_v0, %v3291_v38  ;;  %v3293_v50 = vpop.f32.mrb[181].mxu1  ;;  %14582 = vmatprep.subr.bf16.mxu0 %v19350_v49  ;;  %v4477_v38 = vld [vmem:[%s15861_s13 + $0x98] sm:$0xff] }
 0x3d0   :  { %v17475_v29 = vpop.f32.mrb[200].mxu0  ;;  %v14589_v50 = vpack.c.bf16 %v4477_v38, %v4476_v42 }
 0x3d1   :  { %4236 = vrot.lane.b32.xlu0 %v3457_v40, %s15835_s5  ;;  %v3694_v62 = vpop.f32.mrb[201].mxu0 }
 0x3d2   :  { %v3296_v47 = vpop.f32.mrb[182].mxu1  ;;  %14584 = vmatpush1.bf16.msra.mxu0 %v14583_v44  ;;  %v4478_v44 = vld [vmem:[%s15861_s13 + $0xa0] sm:$0xff] }
 0x3d3   :  { %v3462_v25 = vadd.f32 %v17399_v45, %v3296_v47  ;;  %v3298_v5 = vpop.f32.mrb[183].mxu1  ;;  %14585 = vmatprep.subr.bf16.mxu0 %v19350_v49  ;;  %v4479_v47 = vld [vmem:[%s15861_s13 + $0xa8] sm:$0xff] }
 0x3d4   :  { %v17482_v12 = vpop.f32.mrb[202].mxu0  ;;  %v14592_v5 = vpack.c.bf16 %v4479_v47, %v4478_v44 }
 0x3d5   :  { %4238 = vrot.lane.b32.xlu0 %v3462_v25, %s15835_s5  ;;  %v3699_v0 = vpop.f32.mrb[203].mxu0 }
 0x3d6   :  { %v3301_v13 = vpop.f32.mrb[184].mxu1  ;;  %14587 = vmatpush1.bf16.msra.mxu0 %v14586_v32  ;;  %v4480_v32 = vld [vmem:[%s15861_s13 + $0xb0] sm:$0xff] }
 0x3d7   :  { %v3303_v7 = vpop.f32.mrb[185].mxu1  ;;  %v17489_v10 = vadd.f32 %v17408_v27, %v3301_v13  ;;  %14588 = vmatprep.subr.bf16.mxu0 %v19350_v49  ;;  %v4481_v13 = vld [vmem:[%s15861_s13 + $0xb8] sm:$0xff] }
 0x3d8   :  { %v17491_v45 = vpop.f32.mrb[204].mxu0 }
 0x3d9   :  { %v3704_v40 = vpop.f32.mrb[205].mxu0 }
 0x3da   :  { %v3306_v62 = vpop.f32.mrb[186].mxu1  ;;  %14590 = vmatpush1.bf16.msra.mxu0 %v14589_v50 }
 0x3db   :  { %v3308_v58 = vpop.f32.mrb[187].mxu1  ;;  %v17497_v8 = vadd.f32 %v17406_v34, %v3306_v62  ;;  %14591 = vmatprep.subr.bf16.mxu0 %v19350_v49  ;;  %v14595_v34 = vpack.c.bf16 %v4481_v13, %v4480_v32 }
 0x3dc   :  { %v3707_v25 = vpop.f32.mrb[206].mxu0  ;;  %v4482_v58 = vld [vmem:[%s15861_s13 + $0xc0] sm:$0xff] }
 0x3dd   :  { %v3709_v27 = vpop.f32.mrb[207].mxu0 }
 0x3de   :  { %v3311_v0 = vpop.f32.mrb[188].mxu1  ;;  %14593 = vmatpush1.bf16.msra.mxu0 %v14592_v5  ;;  %v4483_v27 = vld [vmem:[%s15861_s13 + $0xc8] sm:$0xff] }
 0x3df   :  { %v3313_v42 = vpop.f32.mrb[189].mxu1  ;;  %v17503_v38 = vadd.f32 %v17418_v57, %v3311_v0  ;;  %14594 = vmatprep.subr.bf16.mxu0 %v19350_v49  ;;  %v14598_v57 = vpack.c.bf16 %v4483_v27, %v4482_v58 }
 0x3e0   :  { %v3712_v7 = vpop.f32.mrb[208].mxu0 }
 0x3e1   :  { %v3714_v40 = vpop.f32.mrb[209].mxu0 }
 0x3e2   :  { %v3316_v62 = vpop.f32.mrb[190].mxu1  ;;  %14596 = vmatpush1.bf16.msra.mxu0 %v14595_v34 }
 0x3e3   :  { %v3318_v50 = vpop.f32.mrb[191].mxu1  ;;  %v17509_v44 = vadd.f32 %v17416_v3, %v3316_v62  ;;  %14597 = vmatprep.subr.bf16.mxu0 %v19350_v49  ;;  %v4485_v3 = vld [vmem:[%s15861_s13 + $0xd8] sm:$0xff] }
 0x3e4   :  { %v3717_v47 = vpop.f32.mrb[210].mxu0  ;;  %v4484_v50 = vld [vmem:[%s15861_s13 + $0xd0] sm:$0xff]  ;;  %s19438_s13 = sld [smem:[#allocation13_spill]] }
 0x3e5   :  { %v3719_v42 = vpop.f32.mrb[211].mxu0  ;;  %v14601_v58 = vpack.c.bf16 %v4485_v3, %v4484_v50 }
 0x3e6   :  { %v3321_v0 = vpop.f32.mrb[192].mxu1  ;;  %14599 = vmatpush1.bf16.msra.mxu0 %v14598_v57 }
 0x3e7   :  { %v3323_v5 = vpop.f32.mrb[193].mxu1  ;;  %v17513_v32 = vadd.f32 %v17431_v37, %v3321_v0  ;;  %14600 = vmatprep.subr.bf16.mxu0 %v19350_v49 }
 0x3e8   :  { %v3722_v13 = vpop.f32.mrb[212].mxu0 }
 0x3e9   :  { %v3724_v40 = vpop.f32.mrb[213].mxu0 }
 0x3ea   :  { %v3326_v54 = vpop.f32.mrb[194].mxu1  ;;  %14602 = vmatpush1.bf16.msra.mxu0 %v14601_v58 }
 0x3eb   :  { %v17519_v62 = vadd.f32 %v17427_v14, %v3326_v54  ;;  %v3328_v34 = vpop.f32.mrb[195].mxu1  ;;  %14693 = vmatprep.subr.bf16.mxu0 %v19350_v49 }
 0x3ec   :  { %v3727_v27 = vpop.f32.mrb[214].mxu0 }
 0x3ed   :  { %v3729_v42 = vpop.f32.mrb[215].mxu0 }
 0x3ee   :  { %v3331_v5 = vpop.f32.mrb[196].mxu1 }
 0x3ef   :  { %v3333_v37 = vpop.f32.mrb[197].mxu1  ;;  %v17523_v0 = vadd.f32 %v17442_v30, %v3331_v5 }
 0x3f0   :  { %v3732_v57 = vpop.f32.mrb[216].mxu0 }
 0x3f1   :  { %v3734_v40 = vpop.f32.mrb[217].mxu0 }
 0x3f2   :  { %v3336_v11 = vpop.f32.mrb[198].mxu1 }
 0x3f3   :  { %v17526_v16 = vadd.f32 %v17440_v28, %v3336_v11  ;;  %v3338_v54 = vpop.f32.mrb[199].mxu1 }
 0x3f4   :  { %v3737_v14 = vpop.f32.mrb[218].mxu0 }
 0x3f5   :  { %v3739_v34 = vpop.f32.mrb[219].mxu0 }
 0x3f6   :  { %v13529_v50 = vpop.f32.mrb[200].mxu1 }
 0x3f7   :  { %v3863_v3 = vadd.f32 %v13529_v50, %v17482_v12  ;;  %v3857_v58 = vpop.f32.mrb[201].mxu1 }
 0x3f8   :  { %v3858_v42 = vadd.f32 %v3857_v58, %v17475_v29  ;;  %v3742_v49 = vpop.f32.mrb[220].mxu0 }
 0x3f9   :  { %4298 = vrot.lane.b32.xlu0 %v3863_v3, %s15836_s9  ;;  %v3744_v30 = vpop.f32.mrb[221].mxu0 }
 0x3fa   :  { %v13532_v5 = vpop.f32.mrb[202].mxu1  ;;  %4296 = vrot.lane.b32.xlu1 %v3858_v42, %s15836_s9 }
 0x3fb   :  { %v3867_v37 = vpop.f32.mrb[203].mxu1  ;;  %v3873_v40 = vadd.f32 %v13532_v5, %v3707_v25  ;;  %v19383_v25 = vpack.i.bf16 %v17152_v9, %v17158_v56 }
 0x3fc   :  { %v3868_v11 = vadd.f32 %v3867_v37, %v17491_v45  ;;  %v3747_v28 = vpop.f32.mrb[222].mxu0 }
 0x3fd   :  { %v3749_v54 = vpop.f32.mrb[223].mxu0 }
 0x3fe   :  { %4240 = vrot.lane.b32.xlu1 %v17489_v10, %s15835_s5  ;;  %4300 = vrot.lane.b32.xlu0 %v3868_v11, %s15836_s9  ;;  %v13535_v12 = vpop.f32.mrb[204].mxu1 }
 0x3ff   :  { %v3883_v29 = vadd.f32 %v13535_v12, %v3717_v47  ;;  %v3877_v34 = vpop.f32.mrb[205].mxu1 }
 0x400   :  { %v3878_v50 = vadd.f32 %v3877_v34, %v3712_v7  ;;  %v3752_v3 = vpop.f32.mrb[224].mxu0  ;;  %v19384_v7 = vpack.i.bf16 %v17272_v36, %v17270_v35  ;;  %v19385_v35 = vpack.i.bf16 %v17039_v15, %v17025_v2  ;;  %v19386_v15 = vpack.i.bf16 %v17164_v6, %v17168_v24 }
 0x401   :  { %v3754_v58 = vpop.f32.mrb[225].mxu0  ;;  %v19387_v24 = vpack.i.bf16 %v17278_v60, %v17276_v43 }
 0x402   :  { %4302 = vrot.lane.b32.xlu1 %v3873_v40, %s15836_s9  ;;  %15582 = vrot.lane.b32.xlu0 %v19383_v25, %s15836_s9  ;;  %v13538_v45 = vpop.f32.mrb[206].mxu1 }
 0x403   :  { %v3887_v42 = vpop.f32.mrb[207].mxu1  ;;  %v3893_v30 = vadd.f32 %v13538_v45, %v3727_v27 }
 0x404   :  { %v3888_v5 = vadd.f32 %v3887_v42, %v3722_v13  ;;  %v3757_v10 = vpop.f32.mrb[226].mxu0 }
 0x405   :  { %v3759_v37 = vpop.f32.mrb[227].mxu0 }
 0x406   :  { %4242 = vrot.lane.b32.xlu1 %v17497_v8, %s15835_s5  ;;  %15587 = vrot.lane.b32.xlu0 %v19384_v7, %s15837_s25  ;;  %v13541_v47 = vpop.f32.mrb[208].mxu1 }
 0x407   :  { %v3903_v40 = vadd.f32 %v13541_v47, %v3737_v14  ;;  %v3897_v11 = vpop.f32.mrb[209].mxu1 }
 0x408   :  { %v3898_v54 = vadd.f32 %v3897_v11, %v3732_v57  ;;  %v3762_v9 = vpop.f32.mrb[228].mxu0 }
 0x409   :  { %v3764_v56 = vpop.f32.mrb[229].mxu0 }
 0x40a   :  { %4304 = vrot.lane.b32.xlu1 %v3878_v50, %s15836_s9  ;;  %4306 = vrot.lane.b32.xlu0 %v3883_v29, %s15836_s9  ;;  %v13544_v13 = vpop.f32.mrb[210].mxu1 }
 0x40b   :  { %v3907_v27 = vpop.f32.mrb[211].mxu1  ;;  %v3913_v12 = vadd.f32 %v13544_v13, %v3747_v28 }
 0x40c   :  { %v3908_v34 = vadd.f32 %v3907_v27, %v3742_v49  ;;  %v3767_v8 = vpop.f32.mrb[230].mxu0  ;;  %v15490_v27 = vunpack.i.h.bf16 %v17288_v55 }
 0x40d   :  { %v3769_v58 = vpop.f32.mrb[231].mxu0 }
 0x40e   :  { %15592 = vrot.lane.b32.xlu1 %v19385_v35, %s15835_s5  ;;  %4308 = vrot.lane.b32.xlu0 %v3888_v5, %s15836_s9  ;;  %v13547_v36 = vpop.f32.mrb[212].mxu1  ;;  %v15525_v58 = vunpack.i.h.bf16 %v17302_v48 }
 0x40f   :  { %v3923_v57 = vadd.f32 %v13547_v36, %v3757_v10  ;;  %v3917_v14 = vpop.f32.mrb[213].mxu1 }
 0x410   :  { %v3918_v25 = vadd.f32 %v3917_v14, %v3752_v3  ;;  %v3772_v50 = vpop.f32.mrb[232].mxu0 }
 0x411   :  { %v3774_v45 = vpop.f32.mrb[233].mxu0 }
 0x412   :  { %4310 = vrot.lane.b32.xlu1 %v3893_v30, %s15836_s9  ;;  %4244 = vrot.lane.b32.xlu0 %v17503_v38, %s15835_s5  ;;  %v13550_v49 = vpop.f32.mrb[214].mxu1  ;;  %v15559_v45 = vunpack.i.l.bf16 %v17410_v22 }
 0x413   :  { %v3933_v28 = vadd.f32 %v13550_v49, %v3767_v8  ;;  %v3927_v29 = vpop.f32.mrb[215].mxu1 }
 0x414   :  { %v3928_v42 = vadd.f32 %v3927_v29, %v3762_v9  ;;  %v3777_v37 = vpop.f32.mrb[234].mxu0 }
 0x415   :  { %v3779_v2 = vpop.f32.mrb[235].mxu0 }
 0x416   :  { %15597 = vrot.lane.b32.xlu1 %v19386_v15, %s15836_s9  ;;  %4314 = vrot.lane.b32.xlu0 %v3903_v40, %s15836_s9  ;;  %v13553_v3 = vpop.f32.mrb[216].mxu1  ;;  %v19388_v40 = vpack.i.bf16 %v17072_v4, %v17057_v53  ;;  %v19390_v53 = vpack.i.bf16 %v17286_v39, %v17282_v19  ;;  %v19391_v4 = vpack.i.bf16 %v17097_v20, %v17087_v46 }
 0x417   :  { %v3943_v5 = vadd.f32 %v13553_v3, %v3777_v37  ;;  %v3937_v10 = vpop.f32.mrb[217].mxu1  ;;  %v15530_v3 = vunpack.i.h.bf16 %v17313_v59 }
 0x418   :  { %v3938_v30 = vadd.f32 %v3937_v10, %v3772_v50  ;;  %v3782_v7 = vpop.f32.mrb[236].mxu0  ;;  %v15529_v50 = vunpack.i.l.bf16 %v17313_v59  ;;  %v19394_v10 = vld [vmem:[#allocation38_spill] sm:$0xff]  ;;  %v19396_v59 = vld [vmem:[#allocation23_spill] sm:$0xff] }
 0x419   :  { %v3784_v47 = vpop.f32.mrb[237].mxu0 }
 0x41a   :  { %4312 = vrot.lane.b32.xlu1 %v3898_v54, %s15836_s9  ;;  %4246 = vrot.lane.b32.xlu0 %v17509_v44, %s15835_s5  ;;  %v13556_v38 = vpop.f32.mrb[218].mxu1  ;;  %v19389_v44 = vpack.i.bf16 %v17174_v31, %v17178_v18  ;;  %v19392_v31 = vpack.i.bf16 %v17186_v41, %v17188_v52  ;;  %v19395_v47 = vld [vmem:[#allocation36_spill] sm:$0xff] }
 0x41b   :  { %v3947_v11 = vpop.f32.mrb[219].mxu1  ;;  %v4217_v46 = vpop.permute.xlu0 %4216 }
 0x41c   :  { %v3948_v9 = vadd.f32 %v3947_v11, %v3782_v7  ;;  %v3787_v56 = vpop.f32.mrb[238].mxu0 }
 0x41d   :  { %v3953_v13 = vadd.f32 %v13556_v38, %v3787_v56  ;;  %v3789_v6 = vpop.f32.mrb[239].mxu0  ;;  %v15499_v38 = vunpack.i.l.bf16 %v19395_v47 }
 0x41e   :  { %15602 = vrot.lane.b32.xlu1 %v19387_v24, %s15837_s25  ;;  %4316 = vrot.lane.b32.xlu0 %v3908_v34, %s15836_s9  ;;  %v4418_v34 = vsel %vm4356_vm6, %v17306_v23, %v4217_v46  ;;  %v15494_v23 = vunpack.i.l.bf16 %v17284_v26  ;;  %v19398_v24 = vld [vmem:[#allocation61_spill] sm:$0xff] }
 0x41f   :  { %v4219_v43 = vpop.permute.xlu1 %4218 }
 0x420   :  { %v4419_v14 = vsel %vm4356_vm6, %v17304_v61, %v4219_v43 }
 0x422   :  { %4318 = vrot.lane.b32.xlu1 %v3913_v12, %s15836_s9  ;;  %15607 = vrot.lane.b32.xlu0 %v19388_v40, %s15835_s5  ;;  %v15564_v40 = vunpack.i.l.bf16 %v19398_v24 }
 0x423   :  { %v4221_v20 = vpop.permute.xlu0 %4220 }
 0x424   :  { %v4420_v49 = vsel %vm4356_vm6, %v17315_v33, %v4221_v20  ;;  %v15560_v33 = vunpack.i.h.bf16 %v17410_v22  ;;  %v19397_v22 = vld [vmem:[#allocation39_spill] sm:$0xff]  ;;  %v19400_v20 = vld [vmem:[#allocation25_spill] sm:$0xff] }
 0x426   :  { %4248 = vrot.lane.b32.xlu1 %v17513_v32, %s15835_s5  ;;  %15612 = vrot.lane.b32.xlu0 %v19389_v44, %s15836_s9  ;;  %v15489_v32 = vunpack.i.l.bf16 %v17288_v55 }
 0x427   :  { %v4223_v18 = vpop.permute.xlu0 %4222 }
 0x428   :  { %v4357_v12 = vsel %vm4356_vm6, %v16691_v1, %v15489_v32 }
 0x42a   :  { %4320 = vrot.lane.b32.xlu1 %v3918_v25, %s15836_s9  ;;  %4322 = vrot.lane.b32.xlu0 %v3923_v57, %s15836_s9  ;;  %v15555_v57 = vunpack.i.h.bf16 %v17396_v21 }
 0x42b   :  { %v4225_v41 = vpop.permute.xlu1 %4224 }
 0x42e   :  { %4326 = vrot.lane.b32.xlu1 %v3933_v28, %s15836_s9  ;;  %4324 = vrot.lane.b32.xlu0 %v3928_v42, %s15836_s9  ;;  %v15495_v42 = vunpack.i.h.bf16 %v17284_v26 }
 0x42f   :  { %v17615_v19 = vpop.permute.xlu1 %4226 }
 0x430   :  { %v4360_v56 = vsel %vm4356_vm6, %v19396_v59, %v15495_v42 }
 0x431   :  { %v4380_v6 = vsel %vm859_vm4, %v4360_v56, %v15530_v3  ;;  %v19409_v3 = vld [vmem:[#allocation62_spill] sm:$0xff]  ;;  %v19413_v56 = vld [vmem:[#allocation47_spill] sm:$0xff] }
 0x432   :  { %4250 = vrot.lane.b32.xlu1 %v17519_v62, %s15835_s5  ;;  %15617 = vrot.lane.b32.xlu0 %v19390_v53, %s15837_s25  ;;  %v15524_v62 = vunpack.i.l.bf16 %v17302_v48  ;;  %v4401_v44 = vsel %vm4397_vm7, %v4380_v6, %v15560_v33  ;;  %v19399_v53 = vld [vmem:[#allocation41_spill] sm:$0xff]  ;;  %v19410_v33 = vld [vmem:[#allocation46_spill] sm:$0xff] }
 0x433   :  { %v17611_v60 = vpop.permute.xlu0 %4228 }
 0x434   :  { %v4377_v35 = vsel %vm859_vm4, %v4357_v12, %v15524_v62  ;;  %v15565_v62 = vunpack.i.h.bf16 %v19398_v24  ;;  %v19402_v12 = vld [vmem:[#allocation35_spill] sm:$0xff] }
 0x436   :  { %15622 = vrot.lane.b32.xlu1 %v19391_v4, %s15835_s5  ;;  %4252 = vrot.lane.b32.xlu0 %v17523_v0, %s15835_s5  ;;  %v15554_v0 = vunpack.i.l.bf16 %v17396_v21  ;;  %v4358_v21 = vsel %vm4356_vm6, %v16686_v51, %v15490_v27  ;;  %v19393_v51 = vld [vmem:[#allocation24_spill] sm:$0xff]  ;;  %v4422_v4 = vsel %vm4356_vm6, %v19399_v53, %v4225_v41 }
 0x437   :  { %v17613_v52 = vpop.permute.xlu0 %4230  ;;  %v4378_v61 = vsel %vm859_vm4, %v4358_v21, %v15525_v58  ;;  %v4359_v15 = vsel %vm4356_vm6, %v19393_v51, %v15494_v23 }
 0x438   :  { %v4398_v55 = vsel %vm4397_vm7, %v4377_v35, %v15554_v0  ;;  %v4399_v28 = vsel %vm4397_vm7, %v4378_v61, %v15555_v57  ;;  %v19401_v0 = vld [vmem:[#allocation40_spill] sm:$0xff]  ;;  %v19403_v35 = vld [vmem:[#allocation43_spill] sm:$0xff]  ;;  %v19407_v61 = vld [vmem:[#allocation26_spill] sm:$0xff] }
 0x439   :  { %v19404_v57 = vld [vmem:[#allocation63_spill] sm:$0xff] }
 0x43a   :  { %4328 = vrot.lane.b32.xlu1 %v3938_v30, %s15836_s9  ;;  %4330 = vrot.lane.b32.xlu0 %v3943_v5, %s15836_s9  ;;  %v4379_v5 = vsel %vm859_vm4, %v4359_v15, %v15529_v50  ;;  %v4421_v30 = vsel %vm4356_vm6, %v19394_v10, %v4223_v18  ;;  %v4361_v18 = vsel %vm4356_vm6, %v19400_v20, %v15499_v38  ;;  %v19412_v38 = vld [vmem:[#allocation49_spill] sm:$0xff]  ;;  %v19417_v20 = vld [vmem:[#allocation52_spill] sm:$0xff] }
 0x43b   :  { %v4400_v7 = vsel %vm4397_vm7, %v4379_v5, %v15559_v45  ;;  %v15574_v5 = vunpack.i.l.bf16 %v19409_v3 }
 0x43e   :  { %15627 = vrot.lane.b32.xlu1 %v19392_v31, %s15836_s9  ;;  %4332 = vrot.lane.b32.xlu0 %v3948_v9, %s15836_s9 }
 0x442   :  { %4172 = vrot.lane.b32.xlu1 %v17294_v17, %s15837_s25  ;;  %4254 = vrot.lane.b32.xlu0 %v17526_v16, %s15835_s5  ;;  %v17619_v17 = vpop.permute.xlu1 %4232 }
 0x443   :  { %v17617_v39 = vpop.permute.xlu0 %4236 }
 0x446   :  { %4334 = vrot.lane.b32.xlu1 %v3953_v13, %s15836_s9  ;;  %4174 = vrot.lane.b32.xlu0 %v17300_v63, %s15837_s25  ;;  %v17624_v63 = vpop.permute.xlu1 %4234  ;;  %v15534_v13 = vunpack.i.l.bf16 %v19397_v22  ;;  %v4406_v22 = vsel %vm4397_vm7, %v19413_v56, %v15574_v5 }
 0x447   :  { %v17621_v16 = vpop.permute.xlu0 %4238  ;;  %v4427_v59 = vsel %vm4356_vm6, %v19412_v38, %v17624_v63  ;;  %v19427_v38 = vld [vmem:[#allocation56_spill] sm:$0xff] }
 0x448   :  { %v4381_v32 = vsel %vm859_vm4, %v4361_v18, %v15534_v13  ;;  %v4429_v18 = vsel %vm4356_vm6, %v19417_v20, %v17621_v16  ;;  %v19430_v20 = vld [vmem:[#allocation57_spill] sm:$0xff] }
 0x449   :  { %v4402_v27 = vsel %vm4397_vm7, %v4381_v32, %v15564_v40 }
 0x46b   :  { %v4299_v54 = vpop.permute.xlu0 %4298 }
 0x46c   :  { %v4297_v8 = vpop.permute.xlu1 %4296  ;;  %v4439_v1 = vsel %vm859_vm4, %v4419_v14, %v4299_v54  ;;  %v4423_v54 = vsel %vm4356_vm6, %v19401_v0, %v17615_v19  ;;  %v15569_v14 = vunpack.i.l.bf16 %v19404_v57  ;;  %v19405_v19 = vld [vmem:[#allocation45_spill] sm:$0xff] }
 0x46d   :  { %v4438_v36 = vsel %vm859_vm4, %v4418_v34, %v4297_v8  ;;  %v15504_v34 = vunpack.i.l.bf16 %v19402_v12 }
 0x46e   :  { %12156 = vmatprep.mubr.msk.f32.mxu0 %vm4397_vm7, %v4438_v36  ;;  %v15539_v36 = vunpack.i.l.bf16 %v19403_v35 }
 0x46f   :  { %4611 = vmatmul.mubr.f32.vlgmr.msra.gmra.mrb[240].mxu0 %v4398_v55  ;;  %v4424_v55 = vsel %vm4356_vm6, %v19405_v19, %v17611_v60  ;;  %v4363_v45 = vsel %vm4356_vm6, %v19407_v61, %v15504_v34  ;;  %v19408_v60 = vld [vmem:[#allocation44_spill] sm:$0xff]  ;;  %v19420_v34 = vld [vmem:[#allocation66_spill] sm:$0xff] }
 0x470   :  { %v17643_v25 = vpop.permute.xlu1 %4240  ;;  %v4301_v48 = vpop.permute.xlu0 %4300  ;;  %12157 = vmatprep.mubr.msk.f32.mxu0 %vm4397_vm7, %v4439_v1  ;;  %v19406_v1 = vld [vmem:[#allocation42_spill] sm:$0xff] }
 0x471   :  { %v4440_v29 = vsel %vm859_vm4, %v4420_v49, %v4301_v48  ;;  %v4403_v23 = vsel %vm4397_vm7, %v19406_v1, %v15565_v62  ;;  %v4383_v49 = vsel %vm859_vm4, %v4363_v45, %v15539_v36  ;;  %v19422_v36 = vld [vmem:[#allocation53_spill] sm:$0xff] }
 0x472   :  { %v4404_v42 = vsel %vm4397_vm7, %v4383_v49, %v15569_v14  ;;  %v19424_v49 = vld [vmem:[#allocation28_spill] sm:$0xff] }
 0x473   :  { %4616 = vmatmul.mubr.f32.gmra.mrb[242].mxu0 %v4399_v28  ;;  %v15570_v28 = vunpack.i.h.bf16 %v19404_v57  ;;  %v4430_v57 = vsel %vm4356_vm6, %v19422_v36, %v17643_v25 }
 0x474   :  { %v4303_v37 = vpop.permute.xlu1 %4302  ;;  %v17656_v2 = vpop.permute.xlu0 %15582  ;;  %12158 = vmatprep.mubr.msk.f32.mxu0 %vm4397_vm7, %v4440_v29  ;;  %v4425_v29 = vsel %vm4356_vm6, %v19408_v60, %v17613_v52 }
 0x475   :  { %v4441_v26 = vsel %vm859_vm4, %v4421_v30, %v4303_v37  ;;  %v4405_v10 = vsel %vm4397_vm7, %v19410_v33, %v15570_v28  ;;  %v19411_v30 = vld [vmem:[#allocation48_spill] sm:$0xff] }
 0x476   :  { %v4426_v52 = vsel %vm4356_vm6, %v19411_v30, %v17619_v17  ;;  %v19414_v17 = vld [vmem:[#allocation65_spill] sm:$0xff] }
 0x477   :  { %4621 = vmatmul.mubr.f32.gmra.mrb[244].mxu0 %v4400_v7  ;;  %v15579_v40 = vunpack.i.l.bf16 %v19414_v17 }
 0x478   :  { %v17669_v11 = vpop.permute.xlu1 %4242  ;;  %v17671_v9 = vpop.permute.xlu0 %15587  ;;  %12159 = vmatprep.mubr.msk.f32.mxu0 %vm4397_vm7, %v4441_v26 }
 0x479   :  { %v15589_v12 = vunpack.i.l.bf16 %v17671_v9  ;;  %v15590_v61 = vunpack.i.h.bf16 %v17671_v9 }
 0x47b   :  { %4626 = vmatmul.mubr.f32.gmra.mrb[246].mxu0 %v4401_v44  ;;  %v19415_v44 = vld [vmem:[#allocation51_spill] sm:$0xff] }
 0x47c   :  { %v4305_v31 = vpop.permute.xlu1 %4304  ;;  %v4307_v46 = vpop.permute.xlu0 %4306  ;;  %v4428_v53 = vsel %vm4356_vm6, %v19415_v44, %v17617_v39  ;;  %v19419_v39 = vld [vmem:[#allocation37_spill] sm:$0xff] }
 0x47d   :  { %v4442_v43 = vsel %vm859_vm4, %v4422_v4, %v4305_v31  ;;  %v4443_v41 = vsel %vm859_vm4, %v4423_v54, %v4307_v46  ;;  %v19416_v4 = vld [vmem:[#allocation64_spill] sm:$0xff]  ;;  %v15519_v0 = vunpack.i.l.bf16 %v19419_v39  ;;  %v15520_v16 = vunpack.i.h.bf16 %v19419_v39 }
 0x47e   :  { %12160 = vmatprep.mubr.msk.f32.mxu0 %vm4397_vm7, %v4442_v43  ;;  %v19418_v43 = vld [vmem:[#allocation50_spill] sm:$0xff] }
 0x47f   :  { %4631 = vmatmul.mubr.f32.gmra.mrb[248].mxu0 %v4402_v27  ;;  %v4408_v32 = vsel %vm4397_vm7, %v19418_v43, %v15579_v40 }
 0x480   :  { %v17694_v8 = vpop.permute.xlu1 %15592  ;;  %v4309_v58 = vpop.permute.xlu0 %4308  ;;  %12161 = vmatprep.mubr.msk.f32.mxu0 %vm4397_vm7, %v4443_v41  ;;  %v15584_v41 = vunpack.i.l.bf16 %v17656_v2 }
 0x481   :  { %v4444_v48 = vsel %vm859_vm4, %v4424_v55, %v4309_v58  ;;  %v19421_v58 = vld [vmem:[#allocation27_spill] sm:$0xff]  ;;  %v15585_v55 = vunpack.i.h.bf16 %v17656_v2  ;;  %v4370_v2 = vsel %vm4356_vm6, %v19424_v49, %v15520_v16  ;;  %v15594_v28 = vunpack.i.l.bf16 %v17694_v8 }
 0x482   :  { %v4369_v35 = vsel %vm4356_vm6, %v19421_v58, %v15519_v0  ;;  %v15595_v33 = vunpack.i.h.bf16 %v17694_v8 }
 0x483   :  { %4636 = vmatmul.mubr.f32.gmra.mrb[250].mxu0 %v4403_v23  ;;  %v4389_v1 = vsel %vm859_vm4, %v4369_v35, %v15584_v41  ;;  %v19431_v41 = vld [vmem:[#allocation58_spill] sm:$0xff] }
 0x484   :  { %v4311_v21 = vpop.permute.xlu1 %4310  ;;  %v17705_v50 = vpop.permute.xlu0 %4244  ;;  %12162 = vmatprep.mubr.msk.f32.mxu0 %vm4397_vm7, %v4444_v48  ;;  %v19423_v48 = vld [vmem:[#allocation54_spill] sm:$0xff]  ;;  %v4410_v45 = vsel %vm4397_vm7, %v4389_v1, %v15589_v12 }
 0x485   :  { %v4445_v37 = vsel %vm859_vm4, %v4425_v29, %v4311_v21  ;;  %v4431_v21 = vsel %vm4356_vm6, %v19423_v48, %v17669_v11  ;;  %v4390_v11 = vsel %vm859_vm4, %v4370_v2, %v15585_v55 }
 0x486   :  { %v4411_v3 = vsel %vm4397_vm7, %v4390_v11, %v15590_v61  ;;  %v19436_v11 = vld [vmem:[#allocation60_spill] sm:$0xff] }
 0x487   :  { %4641 = vmatmul.mubr.f32.gmra.mrb[252].mxu0 %v4404_v42  ;;  %v19425_v42 = vld [vmem:[#allocation55_spill] sm:$0xff] }
 0x488   :  { %v17717_v51 = vpop.permute.xlu1 %15597  ;;  %v4315_v15 = vpop.permute.xlu0 %4314  ;;  %12163 = vmatprep.mubr.msk.f32.mxu0 %vm4397_vm7, %v4445_v37  ;;  %v4432_v37 = vsel %vm4356_vm6, %v19425_v42, %v17705_v50 }
 0x489   :  { %v4447_v13 = vsel %vm859_vm4, %v4427_v59, %v4315_v15  ;;  %v15599_v9 = vunpack.i.l.bf16 %v17717_v51 }
 0x48b   :  { %4646 = vmatmul.mubr.f32.gmra.mrb[254].mxu0 %v4405_v10  ;;  %v19426_v10 = vld [vmem:[#allocation29_spill] sm:$0xff] }
 0x48c   :  { %v4313_v7 = vpop.permute.xlu1 %4312  ;;  %v4247_v26 = vpop.permute.xlu0 %4246  ;;  %v4371_v30 = vsel %vm4356_vm6, %v19426_v10, %v15594_v28  ;;  %v5324_v10 = vld [vmem:[#allocation2 + $0x1e8] sm:$0xff] }
 0x48d   :  { %v4446_v47 = vsel %vm859_vm4, %v4426_v52, %v4313_v7  ;;  %v4391_v50 = vsel %vm859_vm4, %v4371_v30, %v15599_v9  ;;  %v4433_v59 = vsel %vm4356_vm6, %v19427_v38, %v4247_v26  ;;  %v17842_v30 = vld [vmem:[%s15891_s8] ss:$0 sm:$0xff]  ;;  %s19443_s8 = sld [smem:[#allocation14_spill]] }
 0x48e   :  { %12164 = vmatprep.mubr.msk.f32.mxu0 %vm4397_vm7, %v4446_v47  ;;  %v15600_v47 = vunpack.i.h.bf16 %v17717_v51 }
 0x48f   :  { %4651 = vmatmul.mubr.f32.gmra.mrb[0].mxu0 %v4406_v22 }
 0x490   :  { %v17734_v6 = vpop.permute.xlu1 %15602  ;;  %v4317_v24 = vpop.permute.xlu0 %4316  ;;  %12165 = vmatprep.mubr.msk.f32.mxu0 %vm4397_vm7, %v4447_v13  ;;  %v19428_v13 = vld [vmem:[#allocation30_spill] sm:$0xff] }
 0x491   :  { %v4448_v63 = vsel %vm859_vm4, %v4428_v53, %v4317_v24  ;;  %v15604_v15 = vunpack.i.l.bf16 %v17734_v6  ;;  %v15605_v56 = vunpack.i.h.bf16 %v17734_v6  ;;  %v4372_v24 = vsel %vm4356_vm6, %v19428_v13, %v15595_v33  ;;  %v4826_v33 = vld [vmem:[#allocation2 + $0x8] sm:$0xff] }
 0x492   :  { %v4392_v51 = vsel %vm859_vm4, %v4372_v24, %v15600_v47  ;;  %12178 = vmatprep.mubr.msk.f32.mxu1 %vm4356_vm6, %v4826_v33 }
 0x493   :  { %4656 = vmatmul.mubr.f32.gmra.mrb[2].mxu0 %v19416_v4  ;;  %v4412_v22 = vsel %vm4397_vm7, %v4391_v50, %v15604_v15  ;;  %v4413_v6 = vsel %vm4397_vm7, %v4392_v51, %v15605_v56  ;;  %v19429_v4 = vld [vmem:[#allocation31_spill] sm:$0xff] }
 0x494   :  { %v4319_v31 = vpop.permute.xlu1 %4318  ;;  %v17743_v46 = vpop.permute.xlu0 %15607  ;;  %12166 = vmatprep.mubr.msk.f32.mxu0 %vm4397_vm7, %v4448_v63 }
 0x495   :  { %v4449_v62 = vsel %vm859_vm4, %v4429_v18, %v4319_v31  ;;  %v15609_v17 = vunpack.i.l.bf16 %v17743_v46  ;;  %v15610_v63 = vunpack.i.h.bf16 %v17743_v46 }
 0x497   :  { %4661 = vmatmul.mubr.f32.gmra.mrb[4].mxu0 %v4408_v32  ;;  %v4373_v31 = vsel %vm4356_vm6, %v19429_v4, %v15609_v17 }
 0x498   :  { %v4249_v54 = vpop.permute.xlu1 %4248  ;;  %v17753_v27 = vpop.permute.xlu0 %15612  ;;  %12167 = vmatprep.mubr.msk.f32.mxu0 %vm4397_vm7, %v4449_v62 }
 0x499   :  { %v15614_v26 = vunpack.i.l.bf16 %v17753_v27  ;;  %v4434_v18 = vsel %vm4356_vm6, %v19430_v20, %v4249_v54  ;;  %v15615_v62 = vunpack.i.h.bf16 %v17753_v27  ;;  %v19432_v54 = vld [vmem:[#allocation32_spill] sm:$0xff] }
 0x49a   :  { %v4374_v35 = vsel %vm4356_vm6, %v19432_v54, %v15610_v63 }
 0x49b   :  { %4666 = vmatmul.mubr.f32.gmra.mrb[6].mxu0 %v19420_v34  ;;  %v4393_v39 = vsel %vm859_vm4, %v4373_v31, %v15614_v26 }
 0x49c   :  { %v4321_v14 = vpop.permute.xlu1 %4320  ;;  %v4323_v19 = vpop.permute.xlu0 %4322 }
 0x49d   :  { %v4450_v23 = vsel %vm859_vm4, %v4430_v57, %v4321_v14  ;;  %v4451_v25 = vsel %vm859_vm4, %v4431_v21, %v4323_v19  ;;  %v4394_v57 = vsel %vm859_vm4, %v4374_v35, %v15615_v62  ;;  %v19433_v19 = vld [vmem:[#allocation59_spill] sm:$0xff] }
 0x49e   :  { %12168 = vmatprep.mubr.msk.f32.mxu0 %vm4397_vm7, %v4450_v23  ;;  %v19434_v23 = vld [vmem:[#allocation33_spill] sm:$0xff] }
 0x49f   :  { %4671 = vmatmul.mubr.f32.gmra.mrb[8].mxu0 %v4410_v45 }
 0x4a0   :  { %v4327_v60 = vpop.permute.xlu1 %4326  ;;  %v4325_v29 = vpop.permute.xlu0 %4324  ;;  %12169 = vmatprep.mubr.msk.f32.mxu0 %vm4397_vm7, %v4451_v25 }
 0x4a1   :  { %v4452_v5 = vsel %vm859_vm4, %v4432_v37, %v4325_v29  ;;  %v4453_v8 = vsel %vm859_vm4, %v4433_v59, %v4327_v60  ;;  %v19435_v60 = vld [vmem:[#allocation34_spill] sm:$0xff] }
 0x4a3   :  { %4676 = vmatmul.mubr.f32.gmra.mrb[10].mxu0 %v4411_v3 }
 0x4a4   :  { %v4251_v52 = vpop.permute.xlu1 %4250  ;;  %v15618_v7 = vpop.permute.xlu0 %15617  ;;  %12170 = vmatprep.mubr.msk.f32.mxu0 %vm4397_vm7, %v4452_v5 }
 0x4a5   :  { %v15619_v53 = vunpack.i.l.bf16 %v15618_v7  ;;  %v4435_v12 = vsel %vm4356_vm6, %v19431_v41, %v4251_v52  ;;  %v15620_v34 = vunpack.i.h.bf16 %v15618_v7  ;;  %v17845_v7 = vld [vmem:[%s15921_s12] ss:$0 sm:$0xff]  ;;  %s19447_s12 = sld [smem:[#allocation18_spill]] }
 0x4a7   :  { %4681 = vmatmul.mubr.f32.gmra.mrb[12].mxu0 %v4412_v22  ;;  %v4414_v46 = vsel %vm4397_vm7, %v4393_v39, %v15619_v53  ;;  %v4415_v1 = vsel %vm4397_vm7, %v4394_v57, %v15620_v34 }
 0x4a8   :  { %v15623_v40 = vpop.permute.xlu1 %15622  ;;  %v4253_v44 = vpop.permute.xlu0 %4252  ;;  %12171 = vmatprep.mubr.msk.f32.mxu0 %vm4397_vm7, %v4453_v8 }
 0x4a9   :  { %v15624_v16 = vunpack.i.l.bf16 %v15623_v40  ;;  %v4436_v55 = vsel %vm4356_vm6, %v19433_v19, %v4253_v44  ;;  %v15625_v21 = vunpack.i.h.bf16 %v15623_v40 }
 0x4ab   :  { %4686 = vmatmul.mubr.f32.gmra.mrb[14].mxu0 %v4413_v6  ;;  %v4375_v48 = vsel %vm4356_vm6, %v19434_v23, %v15624_v16  ;;  %v4376_v29 = vsel %vm4356_vm6, %v19435_v60, %v15625_v21 }
 0x4ac   :  { %v4329_v43 = vpop.permute.xlu1 %4328  ;;  %v4331_v32 = vpop.permute.xlu0 %4330 }
 0x4ad   :  { %v4454_v0 = vsel %vm859_vm4, %v4434_v18, %v4329_v43  ;;  %v4455_v58 = vsel %vm859_vm4, %v4435_v12, %v4331_v32  ;;  %v19437_v43 = vmov 0.0|0.0  }
 0x4ae   :  { %12172 = vmatprep.mubr.msk.f32.mxu0 %vm4397_vm7, %v4454_v0 }
 0x4af   :  { %4691 = vmatmul.mubr.f32.gmra.mrb[16].mxu0 %v4414_v46 }
 0x4b0   :  { %v15628_v27 = vpop.permute.xlu1 %15627  ;;  %v4333_v36 = vpop.permute.xlu0 %4332  ;;  %12173 = vmatprep.mubr.msk.f32.mxu0 %vm4397_vm7, %v4455_v58 }
 0x4b1   :  { %v15629_v14 = vunpack.i.l.bf16 %v15628_v27  ;;  %v4456_v61 = vsel %vm859_vm4, %v4436_v55, %v4333_v36  ;;  %v15630_v25 = vunpack.i.h.bf16 %v15628_v27 }
 0x4b3   :  { %4696 = vmatmul.mubr.f32.gmra.mrb[18].mxu0 %v4415_v1  ;;  %v4395_v45 = vsel %vm859_vm4, %v4375_v48, %v15629_v14  ;;  %v4396_v37 = vsel %vm859_vm4, %v4376_v29, %v15630_v25 }
 0x4b4   :  { %v4173_v49 = vpop.permute.xlu1 %4172  ;;  %v4255_v2 = vpop.permute.xlu0 %4254  ;;  %12174 = vmatprep.mubr.msk.f32.mxu0 %vm4397_vm7, %v4456_v61 }
 0x4b5   :  { %v4416_v28 = vsel %vm4397_vm7, %v4395_v45, %v4173_v49  ;;  %v4437_v9 = vsel %vm4356_vm6, %v19436_v11, %v4255_v2 }
 0x4b7   :  { %4701 = vmatmul.mubr.f32.gmra.mrb[20].mxu0 %v4416_v28 }
 0x4b8   :  { %v4335_v42 = vpop.permute.xlu1 %4334  ;;  %v4175_v15 = vpop.permute.xlu0 %4174 }
 0x4b9   :  { %v4457_v3 = vsel %vm859_vm4, %v4437_v9, %v4335_v42  ;;  %v4417_v5 = vsel %vm4397_vm7, %v4396_v37, %v4175_v15 }
 0x4ba   :  { %12175 = vmatprep.mubr.msk.f32.mxu0 %vm4397_vm7, %v4457_v3 }
 0x4bb   :  { %4706 = vmatmul.mubr.f32.gmra.mrb[22].mxu0 %v4417_v5 }
 0x4bc   :  { %12208 = vmatprep.mubr.msk.f32.mxu0 %vm4356_vm6, %v5324_v10 }
 0x542   :  { %v4612_v52 = vpop.f32.mrb[240].mxu0 }
 0x543   :  { %v4718_v47 = vmul.f32 %v17842_v30, %v4612_v52  ;;  %v4614_v50 = vpop.f32.mrb[241].mxu0 }
 0x545   :  { %v4745_v38 = vadd.f32 %v17845_v7, %v4718_v47 }
 0x546   :  { %v4617_v59 = vpop.f32.mrb[242].mxu0 }
 0x547   :  { %v4719_v56 = vmul.f32 %v17842_v30, %v4617_v59  ;;  %v4619_v22 = vpop.f32.mrb[243].mxu0  ;;  %v4785_v8 = vmul.f32 0.01, %v4745_v38  ;;  %vm4765_vm8 = vcmp.gt.f32.partialorder %v4745_v38, 0.0 }
 0x549   :  { %v4746_v13 = vadd.f32 %v17845_v7, %v4719_v56  ;;  %v4805_v51 = vsel %vm4765_vm8, %v4745_v38, %v4785_v8 }
 0x54a   :  { %v4622_v24 = vpop.f32.mrb[244].mxu0 }
 0x54b   :  { %vm4766_vm9 = vcmp.gt.f32.partialorder %v4746_v13, 0.0  ;;  %v4786_v17 = vmul.f32 0.01, %v4746_v13  ;;  %v4720_v40 = vmul.f32 %v17842_v30, %v4622_v24  ;;  %v4624_v44 = vpop.f32.mrb[245].mxu0 }
 0x54d   :  { %v4806_v26 = vsel %vm4766_vm9, %v4746_v13, %v4786_v17  ;;  %v4747_v53 = vadd.f32 %v17845_v7, %v4720_v40 }
 0x54e   :  { %v17853_v6 = vpack.c.bf16 %v4806_v26, %v4805_v51  ;;  %v4627_v63 = vpop.f32.mrb[246].mxu0 }
 0x54f   :  { %v4721_v4 = vmul.f32 %v17842_v30, %v4627_v63  ;;  %v4629_v31 = vpop.f32.mrb[247].mxu0  ;;  %v4787_v20 = vmul.f32 0.01, %v4747_v53  ;;  %vm4767_vm10 = vcmp.gt.f32.partialorder %v4747_v53, 0.0 }
 0x550   :  { %14605 = vmatpush1.bf16.msra.mxu1 %v17853_v6  ;;  %14695 = vmatpush1.bf16.msra.mxu0 %v17853_v6 }
 0x551   :  { %v4748_v18 = vadd.f32 %v17845_v7, %v4721_v4  ;;  %14606 = vmatprep.subr.bf16.mxu1 %v19437_v43  ;;  %14696 = vmatprep.subr.bf16.mxu0 %v19437_v43  ;;  %v4807_v41 = vsel %vm4767_vm10, %v4747_v53, %v4787_v20 }
 0x552   :  { %v4632_v32 = vpop.f32.mrb[248].mxu0 }
 0x553   :  { %vm4768_vm11 = vcmp.gt.f32.partialorder %v4748_v18, 0.0  ;;  %v4788_v62 = vmul.f32 0.01, %v4748_v18  ;;  %v4722_v39 = vmul.f32 %v17842_v30, %v4632_v32  ;;  %v4634_v0 = vpop.f32.mrb[249].mxu0 }
 0x555   :  { %v4808_v12 = vsel %vm4768_vm11, %v4748_v18, %v4788_v62  ;;  %v4749_v34 = vadd.f32 %v17845_v7, %v4722_v39 }
 0x556   :  { %v17863_v16 = vpack.c.bf16 %v4808_v12, %v4807_v41  ;;  %v4637_v46 = vpop.f32.mrb[250].mxu0 }
 0x557   :  { %v4723_v58 = vmul.f32 %v17842_v30, %v4637_v46  ;;  %v4639_v54 = vpop.f32.mrb[251].mxu0  ;;  %v4789_v35 = vmul.f32 0.01, %v4749_v34  ;;  %vm4769_vm12 = vcmp.gt.f32.partialorder %v4749_v34, 0.0 }
 0x558   :  { %14608 = vmatpush1.bf16.msra.mxu1 %v17863_v16  ;;  %14698 = vmatpush1.bf16.msra.mxu0 %v17863_v16 }
 0x559   :  { %v4750_v27 = vadd.f32 %v17845_v7, %v4723_v58  ;;  %14609 = vmatprep.subr.bf16.mxu1 %v19437_v43  ;;  %14699 = vmatprep.subr.bf16.mxu0 %v19437_v43  ;;  %v4809_v55 = vsel %vm4769_vm12, %v4749_v34, %v4789_v35 }
 0x55a   :  { %v4642_v36 = vpop.f32.mrb[252].mxu0 }
 0x55b   :  { %vm4770_vm13 = vcmp.gt.f32.partialorder %v4750_v27, 0.0  ;;  %v4790_v57 = vmul.f32 0.01, %v4750_v27  ;;  %v4724_v14 = vmul.f32 %v17842_v30, %v4642_v36  ;;  %v4644_v19 = vpop.f32.mrb[253].mxu0 }
 0x55d   :  { %v4810_v1 = vsel %vm4770_vm13, %v4750_v27, %v4790_v57  ;;  %v4751_v23 = vadd.f32 %v17845_v7, %v4724_v14 }
 0x55e   :  { %v17873_v48 = vpack.c.bf16 %v4810_v1, %v4809_v55  ;;  %v4647_v21 = vpop.f32.mrb[254].mxu0 }
 0x55f   :  { %v4725_v61 = vmul.f32 %v17842_v30, %v4647_v21  ;;  %v4649_v45 = vpop.f32.mrb[255].mxu0  ;;  %v4791_v25 = vmul.f32 0.01, %v4751_v23  ;;  %vm4771_vm14 = vcmp.gt.f32.partialorder %v4751_v23, 0.0 }
 0x560   :  { %14611 = vmatpush1.bf16.msra.mxu1 %v17873_v48  ;;  %14701 = vmatpush1.bf16.msra.mxu0 %v17873_v48 }
 0x561   :  { %v4752_v49 = vadd.f32 %v17845_v7, %v4725_v61  ;;  %14612 = vmatprep.subr.bf16.mxu1 %v19437_v43  ;;  %14702 = vmatprep.subr.bf16.mxu0 %v19437_v43  ;;  %v4811_v11 = vsel %vm4771_vm14, %v4751_v23, %v4791_v25 }
 0x562   :  { %v4652_v2 = vpop.f32.mrb[0].mxu0 }
 0x563   :  { %vm4772_vm15 = vcmp.gt.f32.partialorder %v4752_v49, 0.0  ;;  %v4792_v28 = vmul.f32 0.01, %v4752_v49  ;;  %v4726_v60 = vmul.f32 %v17842_v30, %v4652_v2  ;;  %v4654_v29 = vpop.f32.mrb[1].mxu0 }
 0x565   :  { %v4812_v9 = vsel %vm4772_vm15, %v4752_v49, %v4792_v28  ;;  %v4753_v42 = vadd.f32 %v17845_v7, %v4726_v60 }
 0x566   :  { %v17883_v37 = vpack.c.bf16 %v4812_v9, %v4811_v11  ;;  %v4657_v15 = vpop.f32.mrb[2].mxu0 }
 0x567   :  { %v4727_v3 = vmul.f32 %v17842_v30, %v4657_v15  ;;  %v4659_v5 = vpop.f32.mrb[3].mxu0  ;;  %v4793_v33 = vmul.f32 0.01, %v4753_v42  ;;  %vm4773_vm1 = vcmp.gt.f32.partialorder %v4753_v42, 0.0 }
 0x568   :  { %14614 = vmatpush1.bf16.msra.mxu1 %v17883_v37  ;;  %14704 = vmatpush1.bf16.msra.mxu0 %v17883_v37 }
 0x569   :  { %v4754_v10 = vadd.f32 %v17845_v7, %v4727_v3  ;;  %14615 = vmatprep.subr.bf16.mxu1 %v19437_v43  ;;  %14705 = vmatprep.subr.bf16.mxu0 %v19437_v43  ;;  %v4813_v59 = vsel %vm4773_vm1, %v4753_v42, %v4793_v33 }
 0x56a   :  { %v4662_v52 = vpop.f32.mrb[4].mxu0 }
 0x56b   :  { %vm4774_vm3 = vcmp.gt.f32.partialorder %v4754_v10, 0.0  ;;  %v4794_v47 = vmul.f32 0.01, %v4754_v10  ;;  %v4728_v50 = vmul.f32 %v17842_v30, %v4662_v52  ;;  %v4664_v38 = vpop.f32.mrb[5].mxu0 }
 0x56d   :  { %v4814_v56 = vsel %vm4774_vm3, %v4754_v10, %v4794_v47  ;;  %v4755_v22 = vadd.f32 %v17845_v7, %v4728_v50  ;;  %vm15838_vm3 = vmmov 0  }
 0x56e   :  { %v17893_v8 = vpack.c.bf16 %v4814_v56, %v4813_v59  ;;  %v4667_v13 = vpop.f32.mrb[6].mxu0 }
 0x56f   :  { %v4729_v24 = vmul.f32 %v17842_v30, %v4667_v13  ;;  %v4669_v17 = vpop.f32.mrb[7].mxu0  ;;  %v4795_v40 = vmul.f32 0.01, %v4755_v22  ;;  %vm4775_vm5 = vcmp.gt.f32.partialorder %v4755_v22, 0.0 }
 0x570   :  { %14617 = vmatpush1.bf16.msra.mxu1 %v17893_v8  ;;  %14707 = vmatpush1.bf16.msra.mxu0 %v17893_v8 }
 0x571   :  { %v4756_v44 = vadd.f32 %v17845_v7, %v4729_v24  ;;  %14618 = vmatprep.subr.bf16.mxu1 %v19437_v43  ;;  %14708 = vmatprep.subr.bf16.mxu0 %v19437_v43  ;;  %v4815_v4 = vsel %vm4775_vm5, %v4755_v22, %v4795_v40 }
 0x572   :  { %v4672_v51 = vpop.f32.mrb[8].mxu0 }
 0x573   :  { %vm4776_vm8 = vcmp.gt.f32.partialorder %v4756_v44, 0.0  ;;  %v4796_v26 = vmul.f32 0.01, %v4756_v44  ;;  %v4730_v53 = vmul.f32 %v17842_v30, %v4672_v51  ;;  %v4674_v63 = vpop.f32.mrb[9].mxu0  ;;  %v5323_v51 = vld [vmem:[#allocation2 + $0x1e0] sm:$0xff] }
 0x574   :  { %v5325_v63 = vld [vmem:[#allocation2 + $0x1f0] sm:$0xff] }
 0x575   :  { %v4816_v31 = vsel %vm4776_vm8, %v4756_v44, %v4796_v26  ;;  %v4757_v20 = vadd.f32 %v17845_v7, %v4730_v53  ;;  %v5326_v26 = vld [vmem:[#allocation2 + $0x1f8] sm:$0xff]  ;;  %v4827_v53 = vld [vmem:[#allocation2 + $0x10] sm:$0xff] }
 0x576   :  { %v17903_v18 = vpack.c.bf16 %v4816_v31, %v4815_v4  ;;  %v4677_v32 = vpop.f32.mrb[10].mxu0  ;;  %v4830_v4 = vld [vmem:[#allocation2 + $0x28] sm:$0xff] }
 0x577   :  { %v4731_v62 = vmul.f32 %v17842_v30, %v4677_v32  ;;  %v4679_v39 = vpop.f32.mrb[11].mxu0  ;;  %v4797_v0 = vmul.f32 0.01, %v4757_v20  ;;  %vm4777_vm9 = vcmp.gt.f32.partialorder %v4757_v20, 0.0  ;;  %v5328_v31 = vld [vmem:[#allocation2 + $0x208] sm:$0xff]  ;;  %v5327_v32 = vld [vmem:[#allocation2 + $0x200] sm:$0xff] }
 0x578   :  { %14620 = vmatpush1.bf16.msra.mxu1 %v17903_v18  ;;  %14710 = vmatpush1.bf16.msra.mxu0 %v17903_v18  ;;  %v5330_v39 = vld [vmem:[#allocation2 + $0x218] sm:$0xff] }
 0x579   :  { %v4758_v41 = vadd.f32 %v17845_v7, %v4731_v62  ;;  %14621 = vmatprep.subr.bf16.mxu1 %v19437_v43  ;;  %14711 = vmatprep.subr.bf16.mxu0 %v19437_v43  ;;  %v4817_v54 = vsel %vm4777_vm9, %v4757_v20, %v4797_v0  ;;  %v4829_v20 = vld [vmem:[#allocation2 + $0x20] sm:$0xff]  ;;  %v4832_v62 = vld [vmem:[#allocation2 + $0x38] sm:$0xff]  ;;  %v4831_v0 = vld [vmem:[#allocation2 + $0x30] sm:$0xff] }
 0x57a   :  { %v4682_v12 = vpop.f32.mrb[12].mxu0 }
 0x57b   :  { %vm4778_vm10 = vcmp.gt.f32.partialorder %v4758_v41, 0.0  ;;  %v4798_v34 = vmul.f32 0.01, %v4758_v41  ;;  %v4732_v46 = vmul.f32 %v17842_v30, %v4682_v12  ;;  %v4684_v58 = vpop.f32.mrb[13].mxu0  ;;  %v4834_v12 = vld [vmem:[#allocation2 + $0x48] sm:$0xff] }
 0x57c   :  { %v5331_v58 = vld [vmem:[#allocation2 + $0x220] sm:$0xff] }
 0x57d   :  { %v4818_v35 = vsel %vm4778_vm10, %v4758_v41, %v4798_v34  ;;  %v4759_v27 = vadd.f32 %v17845_v7, %v4732_v46  ;;  %v5329_v41 = vld [vmem:[#allocation2 + $0x210] sm:$0xff]  ;;  %v5332_v34 = vld [vmem:[#allocation2 + $0x228] sm:$0xff]  ;;  %v4833_v46 = vld [vmem:[#allocation2 + $0x40] sm:$0xff] }
 0x57e   :  { %v17913_v36 = vpack.c.bf16 %v4818_v35, %v4817_v54  ;;  %v4687_v57 = vpop.f32.mrb[14].mxu0  ;;  %v4836_v54 = vld [vmem:[#allocation2 + $0x58] sm:$0xff] }
 0x57f   :  { %v4733_v14 = vmul.f32 %v17842_v30, %v4687_v57  ;;  %v4689_v19 = vpop.f32.mrb[15].mxu0  ;;  %v4799_v55 = vmul.f32 0.01, %v4759_v27  ;;  %vm4779_vm11 = vcmp.gt.f32.partialorder %v4759_v27, 0.0  ;;  %v5334_v35 = vld [vmem:[#allocation2 + $0x238] sm:$0xff]  ;;  %v5333_v57 = vld [vmem:[#allocation2 + $0x230] sm:$0xff] }
 0x580   :  { %14623 = vmatpush1.bf16.msra.mxu1 %v17913_v36  ;;  %14713 = vmatpush1.bf16.msra.mxu0 %v17913_v36  ;;  %v5336_v19 = vld [vmem:[#allocation2 + $0x248] sm:$0xff] }
 0x581   :  { %v4760_v1 = vadd.f32 %v17845_v7, %v4733_v14  ;;  %14624 = vmatprep.subr.bf16.mxu1 %v19437_v43  ;;  %14714 = vmatprep.subr.bf16.mxu0 %v19437_v43  ;;  %v4819_v25 = vsel %vm4779_vm11, %v4759_v27, %v4799_v55  ;;  %v4835_v27 = vld [vmem:[#allocation2 + $0x50] sm:$0xff]  ;;  %v4838_v14 = vld [vmem:[#allocation2 + $0x68] sm:$0xff]  ;;  %v4837_v55 = vld [vmem:[#allocation2 + $0x60] sm:$0xff] }
 0x582   :  { %v4692_v23 = vpop.f32.mrb[16].mxu0 }
 0x583   :  { %vm4780_vm12 = vcmp.gt.f32.partialorder %v4760_v1, 0.0  ;;  %v4800_v21 = vmul.f32 0.01, %v4760_v1  ;;  %v4734_v61 = vmul.f32 %v17842_v30, %v4692_v23  ;;  %v4694_v45 = vpop.f32.mrb[17].mxu0  ;;  %v4840_v23 = vld [vmem:[#allocation2 + $0x78] sm:$0xff] }
 0x584   :  { %v5337_v45 = vld [vmem:[#allocation2 + $0x250] sm:$0xff] }
 0x585   :  { %v4820_v49 = vsel %vm4780_vm12, %v4760_v1, %v4800_v21  ;;  %v4761_v2 = vadd.f32 %v17845_v7, %v4734_v61  ;;  %v5335_v1 = vld [vmem:[#allocation2 + $0x240] sm:$0xff]  ;;  %v5338_v21 = vld [vmem:[#allocation2 + $0x258] sm:$0xff]  ;;  %v4839_v61 = vld [vmem:[#allocation2 + $0x70] sm:$0xff] }
 0x586   :  { %v17923_v28 = vpack.c.bf16 %v4820_v49, %v4819_v25  ;;  %v4697_v60 = vpop.f32.mrb[18].mxu0  ;;  %v4842_v25 = vld [vmem:[#allocation2 + $0x88] sm:$0xff] }
 0x587   :  { %v4735_v29 = vmul.f32 %v17842_v30, %v4697_v60  ;;  %v4699_v11 = vpop.f32.mrb[19].mxu0  ;;  %v4801_v9 = vmul.f32 0.01, %v4761_v2  ;;  %vm4781_vm13 = vcmp.gt.f32.partialorder %v4761_v2, 0.0  ;;  %v5340_v49 = vld [vmem:[#allocation2 + $0x268] sm:$0xff]  ;;  %v5339_v60 = vld [vmem:[#allocation2 + $0x260] sm:$0xff] }
 0x588   :  { %14626 = vmatpush1.bf16.msra.mxu1 %v17923_v28  ;;  %14716 = vmatpush1.bf16.msra.mxu0 %v17923_v28  ;;  %v5342_v11 = vld [vmem:[#allocation2 + $0x278] sm:$0xff] }
 0x589   :  { %v4762_v42 = vadd.f32 %v17845_v7, %v4735_v29  ;;  %14627 = vmatprep.subr.bf16.mxu1 %v19437_v43  ;;  %14717 = vmatprep.subr.bf16.mxu0 %v19437_v43  ;;  %v4821_v10 = vsel %vm4781_vm13, %v4761_v2, %v4801_v9  ;;  %v4841_v2 = vld [vmem:[#allocation2 + $0x80] sm:$0xff]  ;;  %v4844_v29 = vld [vmem:[#allocation2 + $0x98] sm:$0xff]  ;;  %v4843_v9 = vld [vmem:[#allocation2 + $0x90] sm:$0xff] }
 0x58a   :  { %v4702_v15 = vpop.f32.mrb[20].mxu0 }
 0x58b   :  { %vm4782_vm14 = vcmp.gt.f32.partialorder %v4762_v42, 0.0  ;;  %v4802_v3 = vmul.f32 0.01, %v4762_v42  ;;  %v4736_v5 = vmul.f32 %v17842_v30, %v4702_v15  ;;  %v4704_v33 = vpop.f32.mrb[21].mxu0  ;;  %v4992_v15 = vld [vmem:[#allocation2 + $0xa8] sm:$0xff] }
 0x58c   :  { %v5655_v33 = vld [vmem:[#allocation2 + $0x320] sm:$0xff] }
 0x58d   :  { %v4822_v52 = vsel %vm4782_vm14, %v4762_v42, %v4802_v3  ;;  %v4763_v47 = vadd.f32 %v17845_v7, %v4736_v5  ;;  %v5341_v42 = vld [vmem:[#allocation2 + $0x270] sm:$0xff]  ;;  %v5656_v3 = vld [vmem:[#allocation2 + $0x328] sm:$0xff]  ;;  %v4991_v5 = vld [vmem:[#allocation2 + $0xa0] sm:$0xff] }
 0x58e   :  { %v17933_v50 = vpack.c.bf16 %v4822_v52, %v4821_v10  ;;  %v4707_v38 = vpop.f32.mrb[22].mxu0  ;;  %v4994_v10 = vld [vmem:[#allocation2 + $0xb8] sm:$0xff] }
 0x58f   :  { %v4737_v59 = vmul.f32 %v17842_v30, %v4707_v38  ;;  %v4709_v56 = vpop.f32.mrb[23].mxu0  ;;  %v4803_v22 = vmul.f32 0.01, %v4763_v47  ;;  %vm4783_vm15 = vcmp.gt.f32.partialorder %v4763_v47, 0.0  ;;  %v4825_v30 = vld [vmem:[#allocation2] sm:$0xff]  ;;  %v5658_v52 = vld [vmem:[#allocation2 + $0x338] sm:$0xff] }
 0x590   :  { %14629 = vmatpush1.bf16.msra.mxu1 %v17933_v50  ;;  %14719 = vmatpush1.bf16.msra.mxu0 %v17933_v50  ;;  %v5657_v38 = vld [vmem:[#allocation2 + $0x330] sm:$0xff]  ;;  %v5660_v56 = vld [vmem:[#allocation2 + $0x348] sm:$0xff] }
 0x591   :  { %v4764_v13 = vadd.f32 %v17845_v7, %v4737_v59  ;;  %14630 = vmatprep.subr.bf16.mxu1 %v19437_v43  ;;  %14720 = vmatprep.subr.bf16.mxu0 %v19437_v43  ;;  %v4823_v17 = vsel %vm4783_vm15, %v4763_v47, %v4803_v22  ;;  %v4828_v7 = vld [vmem:[#allocation2 + $0x18] sm:$0xff]  ;;  %v4993_v47 = vld [vmem:[#allocation2 + $0xb0] sm:$0xff]  ;;  %v4996_v59 = vld [vmem:[#allocation2 + $0xc8] sm:$0xff] }
 0x592   :  { %v4995_v22 = vld [vmem:[#allocation2 + $0xc0] sm:$0xff] }
 0x593   :  { %vm4784_vm1 = vcmp.gt.f32.partialorder %v4764_v13, 0.0  ;;  %v4804_v24 = vmul.f32 0.01, %v4764_v13 }
 0x595   :  { %v4824_v40 = vsel %vm4784_vm1, %v4764_v13, %v4804_v24  ;;  %v5659_v13 = vld [vmem:[#allocation2 + $0x340] sm:$0xff]  ;;  %v4998_v24 = vld [vmem:[#allocation2 + $0xd8] sm:$0xff] }
 0x596   :  { %v17941_v44 = vpack.c.bf16 %v4824_v40, %v4823_v17  ;;  %v5662_v17 = vld [vmem:[#allocation2 + $0x358] sm:$0xff]  ;;  %v4997_v40 = vld [vmem:[#allocation2 + $0xd0] sm:$0xff] }
 0x598   :  { %14632 = vmatpush1.bf16.msra.mxu1 %v17941_v44  ;;  %14722 = vmatpush1.bf16.msra.mxu0 %v17941_v44 }
 0x599   :  { %14633 = vmatprep.subr.bf16.mxu1 %v19437_v43  ;;  %14753 = vmatprep.subr.bf16.mxu0 %v19437_v43 }
 0x59b   :  { %4940 = vmatmul.mubr.f32.vlgmr.msra.gmra.mrb[220].mxu1 %v4825_v30  ;;  %5438 = vmatmul.mubr.f32.vlgmr.msra.gmra.mrb[24].mxu0 %v5323_v51  ;;  %v5661_v30 = vld [vmem:[#allocation2 + $0x350] sm:$0xff]  ;;  %v5000_v51 = vld [vmem:[#allocation2 + $0xe8] sm:$0xff] }
 0x59c   :  { %14635 = vmatpush1.bf16.msra.mxu1 %v17853_v6  ;;  %14755 = vmatpush1.bf16.msra.mxu0 %v17853_v6 }
 0x59d   :  { %12179 = vmatprep.mubr.msk.f32.mxu1 %vm4356_vm6, %v4828_v7  ;;  %12209 = vmatprep.mubr.msk.f32.mxu0 %vm4356_vm6, %v5326_v26  ;;  %v5664_v7 = vld [vmem:[#allocation2 + $0x368] sm:$0xff]  ;;  %v4999_v26 = vld [vmem:[#allocation2 + $0xe0] sm:$0xff] }
 0x59e   :  { %14636 = vmatprep.subr.bf16.mxu1 %v19437_v43  ;;  %14756 = vmatprep.subr.bf16.mxu0 %v19437_v43 }
 0x59f   :  { %4945 = vmatmul.mubr.f32.gmra.mrb[222].mxu1 %v4827_v53  ;;  %5443 = vmatmul.mubr.f32.gmra.mrb[26].mxu0 %v5325_v63  ;;  %v5663_v53 = vld [vmem:[#allocation2 + $0x360] sm:$0xff]  ;;  %v5002_v63 = vld [vmem:[#allocation2 + $0xf8] sm:$0xff] }
 0x5a0   :  { %14638 = vmatpush1.bf16.msra.mxu1 %v17863_v16  ;;  %14758 = vmatpush1.bf16.msra.mxu0 %v17863_v16 }
 0x5a1   :  { %12180 = vmatprep.mubr.msk.f32.mxu1 %vm4356_vm6, %v4830_v4  ;;  %12210 = vmatprep.mubr.msk.f32.mxu0 %vm4356_vm6, %v5328_v31  ;;  %v5666_v4 = vld [vmem:[#allocation2 + $0x378] sm:$0xff]  ;;  %v5001_v31 = vld [vmem:[#allocation2 + $0xf0] sm:$0xff] }
 0x5a2   :  { %14639 = vmatprep.subr.bf16.mxu1 %v19437_v43  ;;  %14759 = vmatprep.subr.bf16.mxu0 %v19437_v43 }
 0x5a3   :  { %4950 = vmatmul.mubr.f32.gmra.mrb[224].mxu1 %v4829_v20  ;;  %5448 = vmatmul.mubr.f32.gmra.mrb[28].mxu0 %v5327_v32  ;;  %v5665_v20 = vld [vmem:[#allocation2 + $0x370] sm:$0xff]  ;;  %v5004_v32 = vld [vmem:[#allocation2 + $0x108] sm:$0xff] }
 0x5a4   :  { %14641 = vmatpush1.bf16.msra.mxu1 %v17873_v48  ;;  %14761 = vmatpush1.bf16.msra.mxu0 %v17873_v48 }
 0x5a5   :  { %12181 = vmatprep.mubr.msk.f32.mxu1 %vm4356_vm6, %v4832_v62  ;;  %12211 = vmatprep.mubr.msk.f32.mxu0 %vm4356_vm6, %v5330_v39  ;;  %v5668_v62 = vld [vmem:[#allocation2 + $0x388] sm:$0xff]  ;;  %v5003_v39 = vld [vmem:[#allocation2 + $0x100] sm:$0xff] }
 0x5a6   :  { %14642 = vmatprep.subr.bf16.mxu1 %v19437_v43  ;;  %14762 = vmatprep.subr.bf16.mxu0 %v19437_v43 }
 0x5a7   :  { %4955 = vmatmul.mubr.f32.gmra.mrb[226].mxu1 %v4831_v0  ;;  %5453 = vmatmul.mubr.f32.gmra.mrb[30].mxu0 %v5329_v41  ;;  %v5667_v0 = vld [vmem:[#allocation2 + $0x380] sm:$0xff]  ;;  %v5006_v41 = vld [vmem:[#allocation2 + $0x118] sm:$0xff] }
 0x5a8   :  { %14644 = vmatpush1.bf16.msra.mxu1 %v17883_v37  ;;  %14764 = vmatpush1.bf16.msra.mxu0 %v17883_v37 }
 0x5a9   :  { %12182 = vmatprep.mubr.msk.f32.mxu1 %vm4356_vm6, %v4834_v12  ;;  %12212 = vmatprep.mubr.msk.f32.mxu0 %vm4356_vm6, %v5332_v34  ;;  %v5670_v12 = vld [vmem:[#allocation2 + $0x398] sm:$0xff]  ;;  %v5005_v34 = vld [vmem:[#allocation2 + $0x110] sm:$0xff] }
 0x5aa   :  { %14645 = vmatprep.subr.bf16.mxu1 %v19437_v43  ;;  %14765 = vmatprep.subr.bf16.mxu0 %v19437_v43 }
 0x5ab   :  { %4960 = vmatmul.mubr.f32.gmra.mrb[228].mxu1 %v4833_v46  ;;  %5458 = vmatmul.mubr.f32.gmra.mrb[32].mxu0 %v5331_v58  ;;  %v5669_v46 = vld [vmem:[#allocation2 + $0x390] sm:$0xff]  ;;  %v5008_v58 = vld [vmem:[#allocation2 + $0x128] sm:$0xff] }
 0x5ac   :  { %14647 = vmatpush1.bf16.msra.mxu1 %v17893_v8  ;;  %14767 = vmatpush1.bf16.msra.mxu0 %v17893_v8 }
 0x5ad   :  { %12183 = vmatprep.mubr.msk.f32.mxu1 %vm4356_vm6, %v4836_v54  ;;  %12213 = vmatprep.mubr.msk.f32.mxu0 %vm4356_vm6, %v5334_v35  ;;  %v5672_v54 = vld [vmem:[#allocation2 + $0x3a8] sm:$0xff]  ;;  %v5007_v35 = vld [vmem:[#allocation2 + $0x120] sm:$0xff] }
 0x5ae   :  { %14648 = vmatprep.subr.bf16.mxu1 %v19437_v43  ;;  %14768 = vmatprep.subr.bf16.mxu0 %v19437_v43 }
 0x5af   :  { %4965 = vmatmul.mubr.f32.gmra.mrb[230].mxu1 %v4835_v27  ;;  %5463 = vmatmul.mubr.f32.gmra.mrb[34].mxu0 %v5333_v57  ;;  %v5671_v27 = vld [vmem:[#allocation2 + $0x3a0] sm:$0xff]  ;;  %v5010_v57 = vld [vmem:[#allocation2 + $0x138] sm:$0xff] }
 0x5b0   :  { %14650 = vmatpush1.bf16.msra.mxu1 %v17903_v18  ;;  %14770 = vmatpush1.bf16.msra.mxu0 %v17903_v18 }
 0x5b1   :  { %12184 = vmatprep.mubr.msk.f32.mxu1 %vm4356_vm6, %v4838_v14  ;;  %12214 = vmatprep.mubr.msk.f32.mxu0 %vm4356_vm6, %v5336_v19  ;;  %v5674_v14 = vld [vmem:[#allocation2 + $0x3b8] sm:$0xff]  ;;  %v5009_v19 = vld [vmem:[#allocation2 + $0x130] sm:$0xff] }
 0x5b2   :  { %14651 = vmatprep.subr.bf16.mxu1 %v19437_v43  ;;  %14771 = vmatprep.subr.bf16.mxu0 %v19437_v43 }
 0x5b3   :  { %4970 = vmatmul.mubr.f32.gmra.mrb[232].mxu1 %v4837_v55  ;;  %5468 = vmatmul.mubr.f32.gmra.mrb[36].mxu0 %v5335_v1  ;;  %v5673_v55 = vld [vmem:[#allocation2 + $0x3b0] sm:$0xff]  ;;  %v5158_v1 = vld [vmem:[#allocation2 + $0x148] sm:$0xff] }
 0x5b4   :  { %14653 = vmatpush1.bf16.msra.mxu1 %v17913_v36  ;;  %14773 = vmatpush1.bf16.msra.mxu0 %v17913_v36 }
 0x5b5   :  { %12185 = vmatprep.mubr.msk.f32.mxu1 %vm4356_vm6, %v4840_v23  ;;  %12215 = vmatprep.mubr.msk.f32.mxu0 %vm4356_vm6, %v5338_v21  ;;  %v5157_v23 = vld [vmem:[#allocation2 + $0x140] sm:$0xff]  ;;  %v5160_v21 = vld [vmem:[#allocation2 + $0x158] sm:$0xff] }
 0x5b6   :  { %14654 = vmatprep.subr.bf16.mxu1 %v19437_v43  ;;  %14774 = vmatprep.subr.bf16.mxu0 %v19437_v43 }
 0x5b7   :  { %4975 = vmatmul.mubr.f32.gmra.mrb[234].mxu1 %v4839_v61  ;;  %5473 = vmatmul.mubr.f32.gmra.mrb[38].mxu0 %v5337_v45  ;;  %v5159_v61 = vld [vmem:[#allocation2 + $0x150] sm:$0xff]  ;;  %v5162_v45 = vld [vmem:[#allocation2 + $0x168] sm:$0xff] }
 0x5b8   :  { %14656 = vmatpush1.bf16.msra.mxu1 %v17923_v28  ;;  %14776 = vmatpush1.bf16.msra.mxu0 %v17923_v28 }
 0x5b9   :  { %12186 = vmatprep.mubr.msk.f32.mxu1 %vm4356_vm6, %v4842_v25  ;;  %12216 = vmatprep.mubr.msk.f32.mxu0 %vm4356_vm6, %v5340_v49  ;;  %v5161_v25 = vld [vmem:[#allocation2 + $0x160] sm:$0xff]  ;;  %v5164_v49 = vld [vmem:[#allocation2 + $0x178] sm:$0xff] }
 0x5ba   :  { %14657 = vmatprep.subr.bf16.mxu1 %v19437_v43  ;;  %14777 = vmatprep.subr.bf16.mxu0 %v19437_v43 }
 0x5bb   :  { %4980 = vmatmul.mubr.f32.gmra.mrb[236].mxu1 %v4841_v2  ;;  %5478 = vmatmul.mubr.f32.gmra.mrb[40].mxu0 %v5339_v60  ;;  %v5163_v2 = vld [vmem:[#allocation2 + $0x170] sm:$0xff]  ;;  %v5166_v60 = vld [vmem:[#allocation2 + $0x188] sm:$0xff] }
 0x5bc   :  { %14659 = vmatpush1.bf16.msra.mxu1 %v17933_v50  ;;  %14779 = vmatpush1.bf16.msra.mxu0 %v17933_v50 }
 0x5bd   :  { %12187 = vmatprep.mubr.msk.f32.mxu1 %vm4356_vm6, %v4844_v29  ;;  %12217 = vmatprep.mubr.msk.f32.mxu0 %vm4356_vm6, %v5342_v11  ;;  %v5165_v29 = vld [vmem:[#allocation2 + $0x180] sm:$0xff]  ;;  %v5168_v11 = vld [vmem:[#allocation2 + $0x198] sm:$0xff] }
 0x5be   :  { %14660 = vmatprep.subr.bf16.mxu1 %v19437_v43  ;;  %14780 = vmatprep.subr.bf16.mxu0 %v19437_v43 }
 0x5bf   :  { %4985 = vmatmul.mubr.f32.gmra.mrb[238].mxu1 %v4843_v9  ;;  %5483 = vmatmul.mubr.f32.gmra.mrb[42].mxu0 %v5341_v42  ;;  %v5167_v9 = vld [vmem:[#allocation2 + $0x190] sm:$0xff]  ;;  %v5170_v42 = vld [vmem:[#allocation2 + $0x1a8] sm:$0xff] }
 0x5c0   :  { %14662 = vmatpush1.bf16.msra.mxu1 %v17941_v44  ;;  %14782 = vmatpush1.bf16.msra.mxu0 %v17941_v44 }
 0x5c1   :  { %12188 = vmatprep.mubr.msk.f32.mxu1 %vm4356_vm6, %v4992_v15  ;;  %12228 = vmatprep.mubr.msk.f32.mxu0 %vm4356_vm6, %v5656_v3  ;;  %v5169_v15 = vld [vmem:[#allocation2 + $0x1a0] sm:$0xff]  ;;  %v5172_v3 = vld [vmem:[#allocation2 + $0x1b8] sm:$0xff] }
 0x5c2   :  { %14663 = vmatprep.subr.bf16.mxu1 %v19437_v43 }
 0x5c3   :  { %5106 = vmatmul.mubr.f32.vlgmr.msra.gmra.mrb[240].mxu1 %v4991_v5  ;;  %5770 = vmatmul.mubr.f32.vlgmr.msra.gmra.mrb[44].mxu0 %v5655_v33  ;;  %v5171_v5 = vld [vmem:[#allocation2 + $0x1b0] sm:$0xff]  ;;  %v5174_v33 = vld [vmem:[#allocation2 + $0x1c8] sm:$0xff] }
 0x5c4   :  { %14665 = vmatpush1.bf16.msra.mxu1 %v17853_v6  ;;  %12189 = vmatprep.mubr.msk.f32.mxu1 %vm4356_vm6, %v4994_v10  ;;  %v5173_v10 = vld [vmem:[#allocation2 + $0x1c0] sm:$0xff] }
 0x5c5   :  { %12229 = vmatprep.mubr.msk.f32.mxu0 %vm4356_vm6, %v5658_v52  ;;  %14666 = vmatprep.subr.bf16.mxu1 %v19437_v43  ;;  %v5176_v52 = vld [vmem:[#allocation2 + $0x1d8] sm:$0xff] }
 0x5c7   :  { %5111 = vmatmul.mubr.f32.gmra.mrb[242].mxu1 %v4993_v47  ;;  %5775 = vmatmul.mubr.f32.gmra.mrb[46].mxu0 %v5657_v38  ;;  %v5175_v47 = vld [vmem:[#allocation2 + $0x1d0] sm:$0xff]  ;;  %v5490_v38 = vld [vmem:[#allocation2 + $0x288] sm:$0xff] }
 0x5c8   :  { %14668 = vmatpush1.bf16.msra.mxu1 %v17863_v16  ;;  %12190 = vmatprep.mubr.msk.f32.mxu1 %vm4356_vm6, %v4996_v59  ;;  %v5489_v59 = vld [vmem:[#allocation2 + $0x280] sm:$0xff] }
 0x5c9   :  { %12230 = vmatprep.mubr.msk.f32.mxu0 %vm4356_vm6, %v5660_v56  ;;  %14669 = vmatprep.subr.bf16.mxu1 %v19437_v43  ;;  %v5492_v56 = vld [vmem:[#allocation2 + $0x298] sm:$0xff] }
 0x5cb   :  { %5116 = vmatmul.mubr.f32.gmra.mrb[244].mxu1 %v4995_v22  ;;  %5780 = vmatmul.mubr.f32.gmra.mrb[48].mxu0 %v5659_v13  ;;  %v5491_v22 = vld [vmem:[#allocation2 + $0x290] sm:$0xff]  ;;  %v5494_v13 = vld [vmem:[#allocation2 + $0x2a8] sm:$0xff] }
 0x5cc   :  { %14671 = vmatpush1.bf16.msra.mxu1 %v17873_v48  ;;  %12191 = vmatprep.mubr.msk.f32.mxu1 %vm4356_vm6, %v4998_v24  ;;  %v5493_v24 = vld [vmem:[#allocation2 + $0x2a0] sm:$0xff] }
 0x5cd   :  { %12231 = vmatprep.mubr.msk.f32.mxu0 %vm4356_vm6, %v5662_v17  ;;  %14672 = vmatprep.subr.bf16.mxu1 %v19437_v43  ;;  %v5496_v17 = vld [vmem:[#allocation2 + $0x2b8] sm:$0xff] }
 0x5cf   :  { %5121 = vmatmul.mubr.f32.gmra.mrb[246].mxu1 %v4997_v40  ;;  %5785 = vmatmul.mubr.f32.gmra.mrb[50].mxu0 %v5661_v30  ;;  %v5498_v40 = vld [vmem:[#allocation2 + $0x2c8] sm:$0xff]  ;;  %v5500_v30 = vld [vmem:[#allocation2 + $0x2d8] sm:$0xff] }
 0x5d0   :  { %14674 = vmatpush1.bf16.msra.mxu1 %v17883_v37  ;;  %12192 = vmatprep.mubr.msk.f32.mxu1 %vm4356_vm6, %v5000_v51  ;;  %v5502_v51 = vld [vmem:[#allocation2 + $0x2e8] sm:$0xff] }
 0x5d1   :  { %12232 = vmatprep.mubr.msk.f32.mxu0 %vm4356_vm6, %v5664_v7  ;;  %14675 = vmatprep.subr.bf16.mxu1 %v19437_v43  ;;  %v5504_v7 = vld [vmem:[#allocation2 + $0x2f8] sm:$0xff] }
 0x5d3   :  { %5126 = vmatmul.mubr.f32.gmra.mrb[248].mxu1 %v4999_v26  ;;  %5790 = vmatmul.mubr.f32.gmra.mrb[52].mxu0 %v5663_v53  ;;  %v5506_v26 = vld [vmem:[#allocation2 + $0x308] sm:$0xff]  ;;  %v5508_v53 = vld [vmem:[#allocation2 + $0x318] sm:$0xff] }
 0x5d4   :  { %14677 = vmatpush1.bf16.msra.mxu1 %v17893_v8  ;;  %12193 = vmatprep.mubr.msk.f32.mxu1 %vm4356_vm6, %v5002_v63  ;;  %v5822_v63 = vld [vmem:[#allocation2 + $0x3c8] sm:$0xff] }
 0x5d5   :  { %12233 = vmatprep.mubr.msk.f32.mxu0 %vm4356_vm6, %v5666_v4  ;;  %14678 = vmatprep.subr.bf16.mxu1 %v19437_v43  ;;  %v5824_v4 = vld [vmem:[#allocation2 + $0x3d8] sm:$0xff] }
 0x5d7   :  { %5131 = vmatmul.mubr.f32.gmra.mrb[250].mxu1 %v5001_v31  ;;  %5795 = vmatmul.mubr.f32.gmra.mrb[54].mxu0 %v5665_v20  ;;  %v5826_v31 = vld [vmem:[#allocation2 + $0x3e8] sm:$0xff]  ;;  %v5825_v20 = vld [vmem:[#allocation2 + $0x3e0] sm:$0xff] }
 0x5d8   :  { %14680 = vmatpush1.bf16.msra.mxu1 %v17903_v18  ;;  %12194 = vmatprep.mubr.msk.f32.mxu1 %vm4356_vm6, %v5004_v32  ;;  %v5828_v32 = vld [vmem:[#allocation2 + $0x3f8] sm:$0xff] }
 0x5d9   :  { %12234 = vmatprep.mubr.msk.f32.mxu0 %vm4356_vm6, %v5668_v62  ;;  %14681 = vmatprep.subr.bf16.mxu1 %v19437_v43  ;;  %v5830_v62 = vld [vmem:[#allocation2 + $0x408] sm:$0xff] }
 0x5db   :  { %5136 = vmatmul.mubr.f32.gmra.mrb[252].mxu1 %v5003_v39  ;;  %5800 = vmatmul.mubr.f32.gmra.mrb[56].mxu0 %v5667_v0  ;;  %v6168_v39 = vld [vmem:[%s15866_s17 + $0x100] sm:$0xff]  ;;  %v6169_v0 = vld [vmem:[%s15866_s17 + $0x108] sm:$0xff] }
 0x5dc   :  { %14683 = vmatpush1.bf16.msra.mxu1 %v17913_v36  ;;  %12195 = vmatprep.mubr.msk.f32.mxu1 %vm4356_vm6, %v5006_v41  ;;  %v5829_v41 = vld [vmem:[#allocation2 + $0x400] sm:$0xff] }
 0x5dd   :  { %12235 = vmatprep.mubr.msk.f32.mxu0 %vm4356_vm6, %v5670_v12  ;;  %14684 = vmatprep.subr.bf16.mxu1 %v19437_v43  ;;  %v14846_v12 = vpack.c.bf16 %v6169_v0, %v6168_v39 }
 0x5df   :  { %5141 = vmatmul.mubr.f32.gmra.mrb[254].mxu1 %v5005_v34  ;;  %5805 = vmatmul.mubr.f32.gmra.mrb[58].mxu0 %v5669_v46  ;;  %v5832_v34 = vld [vmem:[#allocation2 + $0x418] sm:$0xff]  ;;  %v6170_v46 = vld [vmem:[%s15866_s17 + $0x110] sm:$0xff] }
 0x5e0   :  { %14686 = vmatpush1.bf16.msra.mxu1 %v17923_v28  ;;  %12196 = vmatprep.mubr.msk.f32.mxu1 %vm4356_vm6, %v5008_v58  ;;  %v6171_v58 = vld [vmem:[%s15866_s17 + $0x118] sm:$0xff] }
 0x5e1   :  { %12236 = vmatprep.mubr.msk.f32.mxu0 %vm4356_vm6, %v5672_v54  ;;  %14687 = vmatprep.subr.bf16.mxu1 %v19437_v43  ;;  %v5831_v54 = vld [vmem:[#allocation2 + $0x410] sm:$0xff] }
 0x5e3   :  { %5146 = vmatmul.mubr.f32.gmra.mrb[0].mxu1 %v5007_v35  ;;  %5810 = vmatmul.mubr.f32.gmra.mrb[60].mxu0 %v5671_v27  ;;  %v14849_v35 = vpack.c.bf16 %v6171_v58, %v6170_v46  ;;  %v5834_v27 = vld [vmem:[#allocation2 + $0x428] sm:$0xff] }
 0x5e4   :  { %14689 = vmatpush1.bf16.msra.mxu1 %v17933_v50  ;;  %12197 = vmatprep.mubr.msk.f32.mxu1 %vm4356_vm6, %v5010_v57  ;;  %v6172_v57 = vld [vmem:[%s15866_s17 + $0x120] sm:$0xff] }
 0x5e5   :  { %14690 = vmatprep.subr.bf16.mxu1 %v19437_v43  ;;  %12237 = vmatprep.mubr.msk.f32.mxu0 %vm4356_vm6, %v5674_v14  ;;  %v6173_v14 = vld [vmem:[%s15866_s17 + $0x128] sm:$0xff] }
 0x5e7   :  { %5151 = vmatmul.mubr.f32.gmra.mrb[2].mxu1 %v5009_v19  ;;  %5815 = vmatmul.mubr.f32.gmra.mrb[62].mxu0 %v5673_v55  ;;  %v5833_v19 = vld [vmem:[#allocation2 + $0x420] sm:$0xff]  ;;  %v14852_v55 = vpack.c.bf16 %v6173_v14, %v6172_v57  ;;  %v6185_v14 = vld [vmem:[%s15866_s17 + $0x188] sm:$0xff] }
 0x5e8   :  { %14692 = vmatpush1.bf16.msra.mxu1 %v17941_v44  ;;  %12198 = vmatprep.mubr.msk.f32.mxu1 %vm4356_vm6, %v5158_v1  ;;  %v5836_v1 = vld [vmem:[#allocation2 + $0x438] sm:$0xff] }
 0x5e9   :  { %14723 = vmatprep.subr.bf16.mxu1 %v19437_v43 }
 0x5eb   :  { %5272 = vmatmul.mubr.f32.vlgmr.msra.gmra.mrb[4].mxu1 %v5157_v23  ;;  %v6174_v23 = vld [vmem:[%s15866_s17 + $0x130] sm:$0xff] }
 0x5ec   :  { %14725 = vmatpush1.bf16.msra.mxu1 %v17853_v6  ;;  %12199 = vmatprep.mubr.msk.f32.mxu1 %vm4356_vm6, %v5160_v21  ;;  %v6175_v21 = vld [vmem:[%s15866_s17 + $0x138] sm:$0xff] }
 0x5ed   :  { %14726 = vmatprep.subr.bf16.mxu1 %v19437_v43 }
 0x5ef   :  { %5277 = vmatmul.mubr.f32.gmra.mrb[6].mxu1 %v5159_v61  ;;  %v5835_v61 = vld [vmem:[#allocation2 + $0x430] sm:$0xff] }
 0x5f0   :  { %14728 = vmatpush1.bf16.msra.mxu1 %v17863_v16  ;;  %12200 = vmatprep.mubr.msk.f32.mxu1 %vm4356_vm6, %v5162_v45  ;;  %v14855_v45 = vpack.c.bf16 %v6175_v21, %v6174_v23 }
 0x5f1   :  { %14729 = vmatprep.subr.bf16.mxu1 %v19437_v43 }
 0x5f3   :  { %5282 = vmatmul.mubr.f32.gmra.mrb[8].mxu1 %v5161_v25  ;;  %v5838_v25 = vld [vmem:[#allocation2 + $0x448] sm:$0xff] }
 0x5f4   :  { %14731 = vmatpush1.bf16.msra.mxu1 %v17873_v48  ;;  %12201 = vmatprep.mubr.msk.f32.mxu1 %vm4356_vm6, %v5164_v49  ;;  %v6152_v49 = vld [vmem:[%s15866_s17 + $0x80] sm:$0xff] }
 0x5f5   :  { %14732 = vmatprep.subr.bf16.mxu1 %v19437_v43 }
 0x5f7   :  { %5287 = vmatmul.mubr.f32.gmra.mrb[10].mxu1 %v5163_v2  ;;  %v6153_v2 = vld [vmem:[%s15866_s17 + $0x88] sm:$0xff] }
 0x5f8   :  { %14734 = vmatpush1.bf16.msra.mxu1 %v17883_v37  ;;  %12202 = vmatprep.mubr.msk.f32.mxu1 %vm4356_vm6, %v5166_v60  ;;  %v14813_v60 = vpack.c.bf16 %v6153_v2, %v6152_v49  ;;  %v6163_v49 = vld [vmem:[%s15866_s17 + $0xd8] sm:$0xff] }
 0x5f9   :  { %14735 = vmatprep.subr.bf16.mxu1 %v19437_v43 }
 0x5fa   :  { %14814 = vmatprep.subr.bf16.mxu0 %v14813_v60 }
 0x5fb   :  { %5292 = vmatmul.mubr.f32.gmra.mrb[12].mxu1 %v5165_v29  ;;  %v6136_v29 = vld [vmem:[%s15866_s17] sm:$0xff] }
 0x5fc   :  { %14737 = vmatpush1.bf16.msra.mxu1 %v17893_v8  ;;  %12203 = vmatprep.mubr.msk.f32.mxu1 %vm4356_vm6, %v5168_v11  ;;  %v6137_v11 = vld [vmem:[%s15866_s17 + $0x8] sm:$0xff] }
 0x5fd   :  { %14738 = vmatprep.subr.bf16.mxu1 %v19437_v43 }
 0x5ff   :  { %5297 = vmatmul.mubr.f32.gmra.mrb[14].mxu1 %v5167_v9  ;;  %v6176_v9 = vld [vmem:[%s15866_s17 + $0x140] sm:$0xff] }
 0x600   :  { %14740 = vmatpush1.bf16.msra.mxu1 %v17903_v18  ;;  %12204 = vmatprep.mubr.msk.f32.mxu1 %vm4356_vm6, %v5170_v42  ;;  %v5837_v42 = vld [vmem:[#allocation2 + $0x440] sm:$0xff] }
 0x601   :  { %14741 = vmatprep.subr.bf16.mxu1 %v19437_v43 }
 0x603   :  { %5302 = vmatmul.mubr.f32.gmra.mrb[16].mxu1 %v5169_v15  ;;  %v14815_v15 = vpack.c.bf16 %v6137_v11, %v6136_v29  ;;  %v6146_v11 = vld [vmem:[%s15866_s17 + $0x50] sm:$0xff] }
 0x604   :  { %14743 = vmatpush1.bf16.msra.mxu1 %v17913_v36  ;;  %12205 = vmatprep.mubr.msk.f32.mxu1 %vm4356_vm6, %v5172_v3  ;;  %v6177_v3 = vld [vmem:[%s15866_s17 + $0x148] sm:$0xff] }
 0x605   :  { %14744 = vmatprep.subr.bf16.mxu1 %v19437_v43  ;;  %14816 = vmatpush3.bf16.msra.mxu0 %v14815_v15 }
 0x607   :  { %5307 = vmatmul.mubr.f32.gmra.mrb[18].mxu1 %v5171_v5  ;;  %v5840_v5 = vld [vmem:[#allocation2 + $0x458] sm:$0xff] }
 0x608   :  { %14746 = vmatpush1.bf16.msra.mxu1 %v17923_v28  ;;  %12206 = vmatprep.mubr.msk.f32.mxu1 %vm4356_vm6, %v5174_v33  ;;  %v14858_v33 = vpack.c.bf16 %v6177_v3, %v6176_v9  ;;  %v6147_v9 = vld [vmem:[%s15866_s17 + $0x58] sm:$0xff] }
 0x609   :  { %14747 = vmatprep.subr.bf16.mxu1 %v19437_v43  ;;  %v14835_v15 = vpack.c.bf16 %v6147_v9, %v6146_v11  ;;  %v6187_v3 = vld [vmem:[%s15866_s17 + $0x198] sm:$0xff] }
 0x60b   :  { %5312 = vmatmul.mubr.f32.gmra.mrb[20].mxu1 %v5173_v10  ;;  %v6154_v10 = vld [vmem:[%s15866_s17 + $0x90] sm:$0xff] }
 0x60c   :  { %14749 = vmatpush1.bf16.msra.mxu1 %v17933_v50  ;;  %12207 = vmatprep.mubr.msk.f32.mxu1 %vm4356_vm6, %v5176_v52  ;;  %v6155_v52 = vld [vmem:[%s15866_s17 + $0x98] sm:$0xff] }
 0x60d   :  { %14750 = vmatprep.subr.bf16.mxu1 %v19437_v43 }
 0x60f   :  { %5317 = vmatmul.mubr.f32.gmra.mrb[22].mxu1 %v5175_v47  ;;  %v14817_v47 = vpack.c.bf16 %v6155_v52, %v6154_v10 }
 0x610   :  { %14752 = vmatpush1.bf16.msra.mxu1 %v17941_v44  ;;  %12218 = vmatprep.mubr.msk.f32.mxu1 %vm4356_vm6, %v5490_v38  ;;  %v6138_v38 = vld [vmem:[%s15866_s17 + $0x10] sm:$0xff] }
 0x611   :  { %14783 = vmatprep.subr.bf16.mxu1 %v19437_v43  ;;  %14818 = vmatprep.subr.bf16.mxu0 %v14817_v47 }
 0x613   :  { %5604 = vmatmul.mubr.f32.vlgmr.msra.gmra.mrb[24].mxu1 %v5489_v59  ;;  %v6139_v59 = vld [vmem:[%s15866_s17 + $0x18] sm:$0xff] }
 0x614   :  { %14785 = vmatpush1.bf16.msra.mxu1 %v17853_v6  ;;  %12219 = vmatprep.mubr.msk.f32.mxu1 %vm4356_vm6, %v5492_v56  ;;  %v5495_v6 = vld [vmem:[#allocation2 + $0x2b0] sm:$0xff] }
 0x615   :  { %14786 = vmatprep.subr.bf16.mxu1 %v19437_v43  ;;  %v6178_v56 = vld [vmem:[%s15866_s17 + $0x150] sm:$0xff] }
 0x617   :  { %5609 = vmatmul.mubr.f32.gmra.mrb[26].mxu1 %v5491_v22  ;;  %v5839_v22 = vld [vmem:[#allocation2 + $0x450] sm:$0xff] }
 0x618   :  { %14788 = vmatpush1.bf16.msra.mxu1 %v17863_v16  ;;  %12220 = vmatprep.mubr.msk.f32.mxu1 %vm4356_vm6, %v5494_v13  ;;  %v5497_v16 = vld [vmem:[#allocation2 + $0x2c0] sm:$0xff]  ;;  %v14819_v13 = vpack.c.bf16 %v6139_v59, %v6138_v38 }
 0x619   :  { %14789 = vmatprep.subr.bf16.mxu1 %v19437_v43 }
 0x61a   :  { %14820 = vmatpush3.bf16.msra.mxu0 %v14819_v13 }
 0x61b   :  { %5614 = vmatmul.mubr.f32.gmra.mrb[28].mxu1 %v5493_v24  ;;  %v6179_v24 = vld [vmem:[%s15866_s17 + $0x158] sm:$0xff] }
 0x61c   :  { %14791 = vmatpush1.bf16.msra.mxu1 %v17873_v48  ;;  %12221 = vmatprep.mubr.msk.f32.mxu1 %vm4356_vm6, %v5496_v17  ;;  %v5499_v48 = vld [vmem:[#allocation2 + $0x2d0] sm:$0xff]  ;;  %v14861_v17 = vpack.c.bf16 %v6179_v24, %v6178_v56  ;;  %v6164_v56 = vld [vmem:[%s15866_s17 + $0xe0] sm:$0xff] }
 0x61d   :  { %14792 = vmatprep.subr.bf16.mxu1 %v19437_v43 }
 0x61f   :  { %5619 = vmatmul.mubr.f32.gmra.mrb[30].mxu1 %v5495_v6  ;;  %v6156_v6 = vld [vmem:[%s15866_s17 + $0xa0] sm:$0xff] }
 0x620   :  { %14794 = vmatpush1.bf16.msra.mxu1 %v17883_v37  ;;  %12222 = vmatprep.mubr.msk.f32.mxu1 %vm4356_vm6, %v5498_v40  ;;  %v5501_v37 = vld [vmem:[#allocation2 + $0x2e0] sm:$0xff]  ;;  %v6157_v40 = vld [vmem:[%s15866_s17 + $0xa8] sm:$0xff] }
 0x621   :  { %14795 = vmatprep.subr.bf16.mxu1 %v19437_v43 }
 0x623   :  { %5624 = vmatmul.mubr.f32.gmra.mrb[32].mxu1 %v5497_v16  ;;  %v14821_v16 = vpack.c.bf16 %v6157_v40, %v6156_v6  ;;  %v6148_v6 = vld [vmem:[%s15866_s17 + $0x60] sm:$0xff]  ;;  %v6149_v40 = vld [vmem:[%s15866_s17 + $0x68] sm:$0xff] }
 0x624   :  { %14797 = vmatpush1.bf16.msra.mxu1 %v17893_v8  ;;  %12223 = vmatprep.mubr.msk.f32.mxu1 %vm4356_vm6, %v5500_v30  ;;  %v5503_v8 = vld [vmem:[#allocation2 + $0x2f0] sm:$0xff]  ;;  %v6140_v30 = vld [vmem:[%s15866_s17 + $0x20] sm:$0xff] }
 0x625   :  { %14798 = vmatprep.subr.bf16.mxu1 %v19437_v43  ;;  %14822 = vmatprep.subr.bf16.mxu0 %v14821_v16  ;;  %v6188_v16 = vld [vmem:[%s15866_s17 + $0x1a0] sm:$0xff] }
 0x627   :  { %5629 = vmatmul.mubr.f32.gmra.mrb[34].mxu1 %v5499_v48  ;;  %v6141_v48 = vld [vmem:[%s15866_s17 + $0x28] sm:$0xff] }
 0x628   :  { %14800 = vmatpush1.bf16.msra.mxu1 %v17903_v18  ;;  %12224 = vmatprep.mubr.msk.f32.mxu1 %vm4356_vm6, %v5502_v51  ;;  %v5505_v18 = vld [vmem:[#allocation2 + $0x300] sm:$0xff] }
 0x629   :  { %14801 = vmatprep.subr.bf16.mxu1 %v19437_v43  ;;  %v6180_v51 = vld [vmem:[%s15866_s17 + $0x160] sm:$0xff] }
 0x62b   :  { %5634 = vmatmul.mubr.f32.gmra.mrb[36].mxu1 %v5501_v37  ;;  %v14823_v37 = vpack.c.bf16 %v6141_v48, %v6140_v30  ;;  %v14839_v30 = vpack.c.bf16 %v6149_v40, %v6148_v6  ;;  %v6189_v48 = vld [vmem:[%s15866_s17 + $0x1a8] sm:$0xff] }
 0x62c   :  { %14803 = vmatpush1.bf16.msra.mxu1 %v17913_v36  ;;  %12225 = vmatprep.mubr.msk.f32.mxu1 %vm4356_vm6, %v5504_v7  ;;  %v5507_v36 = vld [vmem:[#allocation2 + $0x310] sm:$0xff]  ;;  %v6181_v7 = vld [vmem:[%s15866_s17 + $0x168] sm:$0xff] }
 0x62d   :  { %14804 = vmatprep.subr.bf16.mxu1 %v19437_v43  ;;  %14824 = vmatpush3.bf16.msra.mxu0 %v14823_v37 }
 0x62f   :  { %5639 = vmatmul.mubr.f32.gmra.mrb[38].mxu1 %v5503_v8  ;;  %v14864_v8 = vpack.c.bf16 %v6181_v7, %v6180_v51  ;;  %v14876_v51 = vpack.c.bf16 %v6189_v48, %v6188_v16 }
 0x630   :  { %14806 = vmatpush1.bf16.msra.mxu1 %v17923_v28  ;;  %12226 = vmatprep.mubr.msk.f32.mxu1 %vm4356_vm6, %v5506_v26  ;;  %v5821_v28 = vld [vmem:[#allocation2 + $0x3c0] sm:$0xff]  ;;  %v6158_v26 = vld [vmem:[%s15866_s17 + $0xb0] sm:$0xff] }
 0x631   :  { %14807 = vmatprep.subr.bf16.mxu1 %v19437_v43 }
 0x633   :  { %5644 = vmatmul.mubr.f32.gmra.mrb[40].mxu1 %v5505_v18  ;;  %v6159_v18 = vld [vmem:[%s15866_s17 + $0xb8] sm:$0xff] }
 0x634   :  { %14809 = vmatpush1.bf16.msra.mxu1 %v17933_v50  ;;  %12227 = vmatprep.mubr.msk.f32.mxu1 %vm4356_vm6, %v5508_v53  ;;  %v5823_v50 = vld [vmem:[#allocation2 + $0x3d0] sm:$0xff]  ;;  %v14825_v53 = vpack.c.bf16 %v6159_v18, %v6158_v26 }
 0x635   :  { %14810 = vmatprep.subr.bf16.mxu1 %v19437_v43 }
 0x636   :  { %14826 = vmatprep.subr.bf16.mxu0 %v14825_v53 }
 0x637   :  { %5649 = vmatmul.mubr.f32.gmra.mrb[42].mxu1 %v5507_v36  ;;  %v6142_v36 = vld [vmem:[%s15866_s17 + $0x30] sm:$0xff] }
 0x638   :  { %14812 = vmatpush1.bf16.msra.mxu1 %v17941_v44  ;;  %12238 = vmatprep.mubr.msk.f32.mxu1 %vm4356_vm6, %v5822_v63  ;;  %v5827_v44 = vld [vmem:[#allocation2 + $0x3f0] sm:$0xff]  ;;  %v6143_v63 = vld [vmem:[%s15866_s17 + $0x38] sm:$0xff] }
 0x639   :  { %14845 = vmatprep.subr.bf16.mxu1 %v19437_v43 }
 0x63b   :  { %5936 = vmatmul.mubr.f32.vlgmr.msra.gmra.mrb[44].mxu1 %v5821_v28  ;;  %v6182_v28 = vld [vmem:[%s15866_s17 + $0x170] sm:$0xff] }
 0x63c   :  { %12239 = vmatprep.mubr.msk.f32.mxu1 %vm4356_vm6, %v5824_v4  ;;  %14847 = vmatpush1.bf16.msra.mxu1 %v14846_v12  ;;  %v14827_v4 = vpack.c.bf16 %v6143_v63, %v6142_v36  ;;  %v6161_v12 = vld [vmem:[%s15866_s17 + $0xc8] sm:$0xff]  ;;  %v6166_v36 = vld [vmem:[%s15866_s17 + $0xf0] sm:$0xff]  ;;  %v6167_v63 = vld [vmem:[%s15866_s17 + $0xf8] sm:$0xff] }
 0x63d   :  { %14848 = vmatprep.subr.bf16.mxu1 %v19437_v43 }
 0x63e   :  { %14828 = vmatpush3.bf16.msra.mxu0 %v14827_v4 }
 0x63f   :  { %5941 = vmatmul.mubr.f32.gmra.mrb[46].mxu1 %v5823_v50  ;;  %v6183_v50 = vld [vmem:[%s15866_s17 + $0x178] sm:$0xff] }
 0x640   :  { %12240 = vmatprep.mubr.msk.f32.mxu1 %vm4356_vm6, %v5826_v31  ;;  %14850 = vmatpush1.bf16.msra.mxu1 %v14849_v35  ;;  %v14867_v31 = vpack.c.bf16 %v6183_v50, %v6182_v28  ;;  %v6145_v35 = vld [vmem:[%s15866_s17 + $0x48] sm:$0xff]  ;;  %v14841_v50 = vpack.c.bf16 %v6167_v63, %v6166_v36 }
 0x641   :  { %14851 = vmatprep.subr.bf16.mxu1 %v19437_v43 }
 0x643   :  { %5946 = vmatmul.mubr.f32.gmra.mrb[48].mxu1 %v5825_v20 }
 0x644   :  { %12241 = vmatprep.mubr.msk.f32.mxu1 %vm4356_vm6, %v5828_v32  ;;  %14853 = vmatpush1.bf16.msra.mxu1 %v14852_v55 }
 0x645   :  { %14854 = vmatprep.subr.bf16.mxu1 %v19437_v43 }
 0x647   :  { %5951 = vmatmul.mubr.f32.gmra.mrb[50].mxu1 %v5827_v44 }
 0x648   :  { %12242 = vmatprep.mubr.msk.f32.mxu1 %vm4356_vm6, %v5830_v62  ;;  %14856 = vmatpush1.bf16.msra.mxu1 %v14855_v45 }
 0x649   :  { %14857 = vmatprep.subr.bf16.mxu1 %v19437_v43 }
 0x64b   :  { %5956 = vmatmul.mubr.f32.gmra.mrb[52].mxu1 %v5829_v41  ;;  %v6160_v41 = vld [vmem:[%s15866_s17 + $0xc0] sm:$0xff] }
 0x64c   :  { %12243 = vmatprep.mubr.msk.f32.mxu1 %vm4356_vm6, %v5832_v34  ;;  %14859 = vmatpush1.bf16.msra.mxu1 %v14858_v33  ;;  %v14829_v58 = vpack.c.bf16 %v6161_v12, %v6160_v41  ;;  %v6191_v12 = vld [vmem:[%s15866_s17 + $0x1b8] sm:$0xff] }
 0x64d   :  { %14860 = vmatprep.subr.bf16.mxu1 %v19437_v43 }
 0x64e   :  { %14830 = vmatprep.subr.bf16.mxu0 %v14829_v58 }
 0x64f   :  { %5961 = vmatmul.mubr.f32.gmra.mrb[54].mxu1 %v5831_v54  ;;  %v6144_v54 = vld [vmem:[%s15866_s17 + $0x40] sm:$0xff] }
 0x650   :  { %12244 = vmatprep.mubr.msk.f32.mxu1 %vm4356_vm6, %v5834_v27  ;;  %14862 = vmatpush1.bf16.msra.mxu1 %v14861_v17  ;;  %v6184_v27 = vld [vmem:[%s15866_s17 + $0x180] sm:$0xff]  ;;  %v14831_v57 = vpack.c.bf16 %v6145_v35, %v6144_v54 }
 0x651   :  { %14863 = vmatprep.subr.bf16.mxu1 %v19437_v43 }
 0x652   :  { %14832 = vmatpush3.bf16.msra.mxu0 %v14831_v57 }
 0x653   :  { %5966 = vmatmul.mubr.f32.gmra.mrb[56].mxu1 %v5833_v19  ;;  %v14870_v19 = vpack.c.bf16 %v6185_v14, %v6184_v27 }
 0x654   :  { %12245 = vmatprep.mubr.msk.f32.mxu1 %vm4356_vm6, %v5836_v1  ;;  %14865 = vmatpush1.bf16.msra.mxu1 %v14864_v8 }
 0x655   :  { %14866 = vmatprep.subr.bf16.mxu1 %v19437_v43 }
 0x657   :  { %5971 = vmatmul.mubr.f32.gmra.mrb[58].mxu1 %v5835_v61 }
 0x658   :  { %12246 = vmatprep.mubr.msk.f32.mxu1 %vm4356_vm6, %v5838_v25  ;;  %14868 = vmatpush1.bf16.msra.mxu1 %v14867_v31  ;;  %v6162_v25 = vld [vmem:[%s15866_s17 + $0xd0] sm:$0xff] }
 0x659   :  { %14869 = vmatprep.subr.bf16.mxu1 %v19437_v43  ;;  %v14833_v29 = vpack.c.bf16 %v6163_v49, %v6162_v25  ;;  %v6150_v31 = vld [vmem:[%s15866_s17 + $0x70] sm:$0xff] }
 0x65b   :  { %5976 = vmatmul.mubr.f32.gmra.mrb[60].mxu1 %v5837_v42  ;;  %v6186_v42 = vld [vmem:[%s15866_s17 + $0x190] sm:$0xff]  ;;  %14834 = vmatprep.subr.bf16.mxu0 %v14833_v29 }
 0x65c   :  { %12247 = vmatprep.mubr.msk.f32.mxu1 %vm4356_vm6, %v5840_v5  ;;  %14871 = vmatpush1.bf16.msra.mxu1 %v14870_v19  ;;  %v14873_v5 = vpack.c.bf16 %v6187_v3, %v6186_v42 }
 0x65d   :  { %14872 = vmatprep.subr.bf16.mxu1 %v19437_v43  ;;  %14836 = vmatpush3.bf16.msra.mxu0 %v14835_v15 }
 0x65f   :  { %5981 = vmatmul.mubr.f32.gmra.mrb[62].mxu1 %v5839_v22  ;;  %v6165_v22 = vld [vmem:[%s15866_s17 + $0xe8] sm:$0xff] }
 0x660   :  { %14874 = vmatpush1.bf16.msra.mxu1 %v14873_v5  ;;  %v14837_v17 = vpack.c.bf16 %v6165_v22, %v6164_v56 }
 0x661   :  { %14875 = vmatprep.subr.bf16.mxu1 %v19437_v43 }
 0x662   :  { %14838 = vmatprep.subr.bf16.mxu0 %v14837_v17 }
 0x663   :  { %14840 = vmatpush3.bf16.msra.mxu0 %v14839_v30 }
 0x664   :  { %14877 = vmatpush1.bf16.msra.mxu1 %v14876_v51  ;;  %14842 = vmatprep.subr.bf16.mxu0 %v14841_v50 }
 0x665   :  { %14878 = vmatprep.subr.bf16.mxu1 %v19437_v43 }
 0x66e   :  { %v18153_v20 = vpop.f32.mrb[220].mxu1  ;;  %v18155_v32 = vpop.f32.mrb[24].mxu0 }
 0x66f   :  { %v4943_v44 = vpop.f32.mrb[221].mxu1  ;;  %v5441_v62 = vpop.f32.mrb[25].mxu0 }
 0x670   :  { %v6151_v44 = vld [vmem:[%s15866_s17 + $0x78] sm:$0xff]  ;;  %v6190_v62 = vld [vmem:[%s15866_s17 + $0x1b0] sm:$0xff]  ;;  %s19439_s17 = sld [smem:[#allocation16_spill]] }
 0x671   :  { %v14843_v41 = vpack.c.bf16 %v6151_v44, %v6150_v31 }
 0x672   :  { %v18158_v39 = vpop.f32.mrb[222].mxu1  ;;  %v18160_v0 = vpop.f32.mrb[26].mxu0 }
 0x673   :  { %v4948_v34 = vpop.f32.mrb[223].mxu1  ;;  %v5446_v46 = vpop.f32.mrb[27].mxu0  ;;  %14844 = vmatpush3.bf16.msra.mxu0 %v14843_v41 }
 0x674   :  { %v14879_v34 = vpack.c.bf16 %v6191_v12, %v6190_v62  ;;  %14881 = vmatprep.subr.bf16.mxu0 %v19437_v43 }
 0x676   :  { %v18168_v55 = vpop.f32.mrb[224].mxu1  ;;  %v18170_v1 = vpop.f32.mrb[28].mxu0  ;;  %14880 = vmatpush1.bf16.msra.mxu1 %v14879_v34 }
 0x677   :  { %v4953_v23 = vpop.f32.mrb[225].mxu1  ;;  %v5451_v21 = vpop.f32.mrb[29].mxu0  ;;  %14926 = vmatprep.subr.bf16.mxu1 %v19437_v43 }
 0x67a   :  { %v18173_v61 = vpop.f32.mrb[226].mxu1  ;;  %v18175_v45 = vpop.f32.mrb[30].mxu0 }
 0x67b   :  { %v4958_v2 = vpop.f32.mrb[227].mxu1  ;;  %v5456_v60 = vpop.f32.mrb[31].mxu0 }
 0x67e   :  { %v18183_v33 = vpop.f32.mrb[228].mxu1  ;;  %v18185_v10 = vpop.f32.mrb[32].mxu0 }
 0x67f   :  { %v4963_v52 = vpop.f32.mrb[229].mxu1  ;;  %v5461_v47 = vpop.f32.mrb[33].mxu0 }
 0x682   :  { %v18188_v38 = vpop.f32.mrb[230].mxu1  ;;  %v18190_v59 = vpop.f32.mrb[34].mxu0 }
 0x683   :  { %v4968_v13 = vpop.f32.mrb[231].mxu1  ;;  %v5466_v24 = vpop.f32.mrb[35].mxu0 }
 0x686   :  { %v18198_v37 = vpop.f32.mrb[232].mxu1  ;;  %v18200_v7 = vpop.f32.mrb[36].mxu0 }
 0x687   :  { %v4973_v8 = vpop.f32.mrb[233].mxu1  ;;  %v5471_v26 = vpop.f32.mrb[37].mxu0 }
 0x68a   :  { %v18203_v18 = vpop.f32.mrb[234].mxu1  ;;  %v18205_v53 = vpop.f32.mrb[38].mxu0 }
 0x68b   :  { %v4978_v28 = vpop.f32.mrb[235].mxu1  ;;  %v5476_v4 = vpop.f32.mrb[39].mxu0 }
 0x68e   :  { %v18213_v46 = vpop.f32.mrb[236].mxu1  ;;  %v18215_v58 = vpop.f32.mrb[40].mxu0 }
 0x68f   :  { %v4983_v54 = vpop.f32.mrb[237].mxu1  ;;  %v5481_v35 = vpop.f32.mrb[41].mxu0 }
 0x692   :  { %v18219_v27 = vpop.f32.mrb[238].mxu1  ;;  %v18221_v57 = vpop.f32.mrb[42].mxu0 }
 0x693   :  { %v4988_v14 = vpop.f32.mrb[239].mxu1  ;;  %v5486_v19 = vpop.f32.mrb[43].mxu0 }
 0x696   :  { %v5107_v23 = vpop.f32.mrb[240].mxu1  ;;  %v5771_v21 = vpop.f32.mrb[44].mxu0 }
 0x697   :  { %v15631_v25 = vpack.i.bf16 %v5107_v23, %v18155_v32  ;;  %v15636_v49 = vpack.i.bf16 %v5771_v21, %v18160_v0  ;;  %v5109_v2 = vpop.f32.mrb[241].mxu1  ;;  %v5773_v60 = vpop.f32.mrb[45].mxu0 }
 0x699   :  { %15632 = vrot.lane.b32.xlu1 %v15631_v25, %s15836_s9  ;;  %15637 = vrot.lane.b32.xlu0 %v15636_v49, %s15836_s9 }
 0x69a   :  { %v5112_v29 = vpop.f32.mrb[242].mxu1  ;;  %v5776_v11 = vpop.f32.mrb[46].mxu0 }
 0x69b   :  { %v15641_v9 = vpack.i.bf16 %v18170_v1, %v5112_v29  ;;  %v5114_v42 = vpop.f32.mrb[243].mxu1  ;;  %v5778_v15 = vpop.f32.mrb[47].mxu0 }
 0x69d   :  { %15642 = vrot.lane.b32.xlu1 %v15641_v9, %s15836_s9 }
 0x69e   :  { %v5117_v3 = vpop.f32.mrb[244].mxu1  ;;  %v5781_v5 = vpop.f32.mrb[48].mxu0 }
 0x69f   :  { %v15646_v52 = vpack.i.bf16 %v5117_v3, %v5776_v11  ;;  %v15651_v32 = vpack.i.bf16 %v5781_v5, %v18175_v45  ;;  %v5119_v0 = vpop.f32.mrb[245].mxu1  ;;  %v5783_v47 = vpop.f32.mrb[49].mxu0 }
 0x6a1   :  { %15647 = vrot.lane.b32.xlu0 %v15646_v52, %s15836_s9  ;;  %15652 = vrot.lane.b32.xlu1 %v15651_v32, %s15836_s9 }
 0x6a2   :  { %v5122_v56 = vpop.f32.mrb[246].mxu1  ;;  %v5786_v22 = vpop.f32.mrb[50].mxu0 }
 0x6a3   :  { %v15656_v13 = vpack.i.bf16 %v18185_v10, %v5122_v56  ;;  %v5124_v1 = vpop.f32.mrb[247].mxu1  ;;  %v5788_v24 = vpop.f32.mrb[51].mxu0 }
 0x6a5   :  { %15657 = vrot.lane.b32.xlu0 %v15656_v13, %s15836_s9 }
 0x6a6   :  { %v5127_v17 = vpop.f32.mrb[248].mxu1  ;;  %v5791_v6 = vpop.f32.mrb[52].mxu0 }
 0x6a7   :  { %v15661_v40 = vpack.i.bf16 %v5127_v17, %v5786_v22  ;;  %v15666_v16 = vpack.i.bf16 %v5791_v6, %v18190_v59  ;;  %v5129_v45 = vpop.f32.mrb[249].mxu1  ;;  %v5793_v30 = vpop.f32.mrb[53].mxu0 }
 0x6a9   :  { %15662 = vrot.lane.b32.xlu1 %v15661_v40, %s15836_s9  ;;  %15667 = vrot.lane.b32.xlu0 %v15666_v16, %s15836_s9 }
 0x6aa   :  { %v5132_v48 = vpop.f32.mrb[250].mxu1  ;;  %v5796_v51 = vpop.f32.mrb[54].mxu0 }
 0x6ab   :  { %v15671_v8 = vpack.i.bf16 %v18200_v7, %v5132_v48  ;;  %v5134_v10 = vpop.f32.mrb[251].mxu1  ;;  %v5798_v26 = vpop.f32.mrb[55].mxu0 }
 0x6ad   :  { %15672 = vrot.lane.b32.xlu1 %v15671_v8, %s15836_s9 }
 0x6ae   :  { %v5137_v36 = vpop.f32.mrb[252].mxu1  ;;  %v5801_v63 = vpop.f32.mrb[56].mxu0 }
 0x6af   :  { %v15676_v28 = vpack.i.bf16 %v5137_v36, %v5796_v51  ;;  %v15681_v4 = vpack.i.bf16 %v5801_v63, %v18205_v53  ;;  %v5139_v59 = vpop.f32.mrb[253].mxu1  ;;  %v5803_v50 = vpop.f32.mrb[57].mxu0 }
 0x6b1   :  { %15677 = vrot.lane.b32.xlu0 %v15676_v28, %s15836_s9  ;;  %15682 = vrot.lane.b32.xlu1 %v15681_v4, %s15836_s9 }
 0x6b2   :  { %v5142_v31 = vpop.f32.mrb[254].mxu1  ;;  %v5806_v44 = vpop.f32.mrb[58].mxu0 }
 0x6b3   :  { %v15686_v62 = vpack.i.bf16 %v18215_v58, %v5142_v31  ;;  %v5144_v7 = vpop.f32.mrb[255].mxu1  ;;  %v5808_v41 = vpop.f32.mrb[59].mxu0 }
 0x6b5   :  { %15687 = vrot.lane.b32.xlu0 %v15686_v62, %s15836_s9 }
 0x6b6   :  { %v5147_v12 = vpop.f32.mrb[0].mxu1  ;;  %v5811_v34 = vpop.f32.mrb[60].mxu0 }
 0x6b7   :  { %v15691_v54 = vpack.i.bf16 %v5147_v12, %v5806_v44  ;;  %v15696_v35 = vpack.i.bf16 %v5811_v34, %v18221_v57  ;;  %v5149_v53 = vpop.f32.mrb[1].mxu1  ;;  %v5813_v14 = vpop.f32.mrb[61].mxu0 }
 0x6b9   :  { %15692 = vrot.lane.b32.xlu1 %v15691_v54, %s15836_s9  ;;  %15697 = vrot.lane.b32.xlu0 %v15696_v35, %s15836_s9 }
 0x6ba   :  { %v5152_v19 = vpop.f32.mrb[2].mxu1  ;;  %v5816_v23 = vpop.f32.mrb[62].mxu0 }
 0x6bb   :  { %v5154_v21 = vpop.f32.mrb[3].mxu1  ;;  %v5818_v25 = vpop.f32.mrb[63].mxu0 }
 0x6bd   :  { %6014 = vrot.lane.b32.xlu1 %v5152_v19, %s15836_s9  ;;  %6094 = vrot.lane.b32.xlu0 %v5816_v23, %s15836_s9 }
 0x6be   :  { %v5273_v58 = vpop.f32.mrb[4].mxu1 }
 0x6bf   :  { %v5275_v49 = vpop.f32.mrb[5].mxu1 }
 0x6c2   :  { %v5278_v2 = vpop.f32.mrb[6].mxu1 }
 0x6c3   :  { %v5280_v60 = vpop.f32.mrb[7].mxu1 }
 0x6c6   :  { %v18249_v29 = vpop.f32.mrb[8].mxu1 }
 0x6c7   :  { %v5285_v57 = vpop.f32.mrb[9].mxu1 }
 0x6ca   :  { %v18251_v11 = vpop.f32.mrb[10].mxu1 }
 0x6cb   :  { %v5290_v9 = vpop.f32.mrb[11].mxu1 }
 0x6ce   :  { %v18253_v42 = vpop.f32.mrb[12].mxu1 }
 0x6cf   :  { %v5295_v15 = vpop.f32.mrb[13].mxu1 }
 0x6d2   :  { %v18255_v3 = vpop.f32.mrb[14].mxu1 }
 0x6d3   :  { %v5300_v5 = vpop.f32.mrb[15].mxu1 }
 0x6d6   :  { %v18257_v52 = vpop.f32.mrb[16].mxu1 }
 0x6d7   :  { %v5305_v32 = vpop.f32.mrb[17].mxu1 }
 0x6da   :  { %v18259_v0 = vpop.f32.mrb[18].mxu1 }
 0x6db   :  { %v5310_v47 = vpop.f32.mrb[19].mxu1 }
 0x6de   :  { %v18261_v56 = vpop.f32.mrb[20].mxu1 }
 0x6df   :  { %v5315_v22 = vpop.f32.mrb[21].mxu1 }
 0x6e2   :  { %v18263_v13 = vpop.f32.mrb[22].mxu1 }
 0x6e3   :  { %v5320_v1 = vpop.f32.mrb[23].mxu1 }
 0x6e6   :  { %v5605_v24 = vpop.f32.mrb[24].mxu1 }
 0x6e7   :  { %v5607_v17 = vpop.f32.mrb[25].mxu1 }
 0x6ea   :  { %v5610_v6 = vpop.f32.mrb[26].mxu1 }
 0x6eb   :  { %v5612_v40 = vpop.f32.mrb[27].mxu1 }
 0x6ee   :  { %v5615_v16 = vpop.f32.mrb[28].mxu1 }
 0x6ef   :  { %v5617_v45 = vpop.f32.mrb[29].mxu1 }
 0x6f2   :  { %v18265_v30 = vpop.f32.mrb[30].mxu1 }
 0x6f3   :  { %v5622_v48 = vpop.f32.mrb[31].mxu1 }
 0x6f6   :  { %v18267_v51 = vpop.f32.mrb[32].mxu1 }
 0x6f7   :  { %v5627_v8 = vpop.f32.mrb[33].mxu1 }
 0x6fa   :  { %v18269_v10 = vpop.f32.mrb[34].mxu1 }
 0x6fb   :  { %v5632_v26 = vpop.f32.mrb[35].mxu1 }
 0x6fe   :  { %v18271_v36 = vpop.f32.mrb[36].mxu1 }
 0x6ff   :  { %v5637_v63 = vpop.f32.mrb[37].mxu1 }
 0x702   :  { %v18273_v28 = vpop.f32.mrb[38].mxu1 }
 0x703   :  { %v5642_v4 = vpop.f32.mrb[39].mxu1 }
 0x706   :  { %v18275_v59 = vpop.f32.mrb[40].mxu1 }
 0x707   :  { %v5647_v50 = vpop.f32.mrb[41].mxu1 }
 0x70a   :  { %v18277_v31 = vpop.f32.mrb[42].mxu1 }
 0x70b   :  { %v15633_v44 = vpop.permute.xlu1 %15632  ;;  %v15638_v62 = vpop.permute.xlu0 %15637 }
 0x70c   :  { %v15635_v7 = vunpack.i.h.bf16 %v15633_v44  ;;  %v15634_v41 = vunpack.i.l.bf16 %v15633_v44  ;;  %v15640_v12 = vunpack.i.h.bf16 %v15638_v62  ;;  %v15639_v34 = vunpack.i.l.bf16 %v15638_v62  ;;  %v5652_v54 = vpop.f32.mrb[43].mxu1 }
 0x70e   :  { %v6106_v35 = vsel %vm859_vm4, %v18153_v20, %v15635_v7  ;;  %v6126_v53 = vsel %vm859_vm4, %v5605_v24, %v15640_v12  ;;  %v5937_v14 = vpop.f32.mrb[44].mxu1  ;;  %v6116_v19 = vsel %vm859_vm4, %v5273_v58, %v15634_v41  ;;  %v6117_v60 = vsel %vm859_vm4, %v5278_v2, %v15639_v34 }
 0x70f   :  { %6286 = vmatprep.mubr.f32.mxu0 %v6116_v19  ;;  %12248 = vmatprep.mubr.msk.f32.mxu1 %vm859_vm4, %v5937_v14  ;;  %v15643_v23 = vpop.permute.xlu1 %15642  ;;  %v5939_v21 = vpop.f32.mrb[45].mxu1 }
 0x710   :  { %v15645_v25 = vunpack.i.h.bf16 %v15643_v23  ;;  %v15644_v49 = vunpack.i.l.bf16 %v15643_v23  ;;  %6287 = vmatmul.mubr.f32.vlgmr.msra.gmra.mrb[64].mxu0 %v6106_v35  ;;  %6402 = vmatmul.mubr.f32.vlgmr.msra.gmra.mrb[64].mxu1 %v6126_v53 }
 0x711   :  { %6291 = vmatprep.mubr.f32.mxu0 %v6117_v60 }
 0x712   :  { %v6107_v20 = vsel %vm859_vm4, %v18158_v39, %v15644_v49  ;;  %v5942_v57 = vpop.f32.mrb[46].mxu1  ;;  %v6118_v47 = vsel %vm859_vm4, %v18249_v29, %v15645_v25 }
 0x713   :  { %v15648_v9 = vpop.permute.xlu0 %15647  ;;  %v15653_v15 = vpop.permute.xlu1 %15652  ;;  %12249 = vmatprep.mubr.msk.f32.mxu1 %vm859_vm4, %v5942_v57 }
 0x714   :  { %v15650_v58 = vunpack.i.h.bf16 %v15648_v9  ;;  %v15649_v5 = vunpack.i.l.bf16 %v15648_v9  ;;  %v15654_v32 = vunpack.i.l.bf16 %v15653_v15  ;;  %6292 = vmatmul.mubr.f32.gmra.mrb[66].mxu0 %v6107_v20  ;;  %v5944_v22 = vpop.f32.mrb[47].mxu1  ;;  %v15655_v1 = vunpack.i.h.bf16 %v15653_v15 }
 0x715   :  { %6296 = vmatprep.mubr.f32.mxu0 %v6118_v47 }
 0x716   :  { %v6127_v2 = vsel %vm859_vm4, %v5610_v6, %v15649_v5  ;;  %v6108_v39 = vsel %vm859_vm4, %v18168_v55, %v15650_v58  ;;  %v5947_v24 = vpop.f32.mrb[48].mxu1  ;;  %v6119_v8 = vsel %vm859_vm4, %v18251_v11, %v15654_v32  ;;  %v6128_v29 = vsel %vm859_vm4, %v5615_v16, %v15655_v1 }
 0x717   :  { %v15658_v17 = vpop.permute.xlu0 %15657  ;;  %6407 = vmatmul.mubr.f32.gmra.mrb[66].mxu1 %v6127_v2  ;;  %v5949_v40 = vpop.f32.mrb[49].mxu1 }
 0x718   :  { %v15660_v45 = vunpack.i.h.bf16 %v15658_v17  ;;  %v15659_v48 = vunpack.i.l.bf16 %v15658_v17  ;;  %6297 = vmatmul.mubr.f32.gmra.mrb[68].mxu0 %v6108_v39  ;;  %12250 = vmatprep.mubr.msk.f32.mxu1 %vm859_vm4, %v5947_v24 }
 0x719   :  { %6301 = vmatprep.mubr.f32.mxu0 %v6119_v8 }
 0x71a   :  { %v6109_v6 = vsel %vm859_vm4, %v18173_v61, %v15659_v48  ;;  %v5952_v26 = vpop.f32.mrb[50].mxu1  ;;  %v6120_v62 = vsel %vm859_vm4, %v18253_v42, %v15660_v45 }
 0x71b   :  { %6412 = vmatmul.mubr.f32.gmra.mrb[68].mxu1 %v6128_v29  ;;  %v15663_v55 = vpop.permute.xlu1 %15662  ;;  %v15668_v63 = vpop.permute.xlu0 %15667 }
 0x71c   :  { %v15665_v4 = vunpack.i.h.bf16 %v15663_v55  ;;  %v15664_v50 = vunpack.i.l.bf16 %v15663_v55  ;;  %v15669_v44 = vunpack.i.l.bf16 %v15668_v63  ;;  %6302 = vmatmul.mubr.f32.gmra.mrb[70].mxu0 %v6109_v6  ;;  %12251 = vmatprep.mubr.msk.f32.mxu1 %vm859_vm4, %v5952_v26  ;;  %v5954_v11 = vpop.f32.mrb[51].mxu1  ;;  %v15670_v7 = vunpack.i.h.bf16 %v15668_v63 }
 0x71d   :  { %6306 = vmatprep.mubr.f32.mxu0 %v6120_v62  ;;  %v15839_v6 = vmov 0.0   ;;  %v18352_v62 = vld [vmem:[%s15926_s20] ss:$0 sm:$0xff]  ;;  %s19448_s20 = sld [smem:[#allocation21_spill]] }
 0x71e   :  { %v6129_v16 = vsel %vm859_vm4, %v18265_v30, %v15664_v50  ;;  %v6110_v61 = vsel %vm859_vm4, %v18183_v33, %v15665_v4  ;;  %v5957_v41 = vpop.f32.mrb[52].mxu1  ;;  %v6121_v42 = vsel %vm859_vm4, %v18255_v3, %v15669_v44  ;;  %v6130_v53 = vsel %vm859_vm4, %v18267_v51, %v15670_v7  ;;  %v18349_v4 = vld [vmem:[%s15896_s14] ss:$0 sm:$0xff]  ;;  %s19444_s14 = sld [smem:[#allocation17_spill]] }
 0x71f   :  { %v15673_v12 = vpop.permute.xlu1 %15672  ;;  %6417 = vmatmul.mubr.f32.gmra.mrb[70].mxu1 %v6129_v16  ;;  %v5959_v34 = vpop.f32.mrb[53].mxu1 }
 0x720   :  { %v15675_v54 = vunpack.i.h.bf16 %v15673_v12  ;;  %v15674_v35 = vunpack.i.l.bf16 %v15673_v12  ;;  %6307 = vmatmul.mubr.f32.gmra.mrb[72].mxu0 %v6110_v61  ;;  %12252 = vmatprep.mubr.msk.f32.mxu1 %vm859_vm4, %v5957_v41 }
 0x721   :  { %6311 = vmatprep.mubr.f32.mxu0 %v6121_v42 }
 0x722   :  { %v6111_v30 = vsel %vm859_vm4, %v18188_v38, %v15674_v35  ;;  %v5962_v33 = vpop.f32.mrb[54].mxu1  ;;  %v6122_v3 = vsel %vm859_vm4, %v18257_v52, %v15675_v54 }
 0x723   :  { %6422 = vmatmul.mubr.f32.gmra.mrb[72].mxu1 %v6130_v53  ;;  %v15678_v14 = vpop.permute.xlu0 %15677  ;;  %v15683_v19 = vpop.permute.xlu1 %15682 }
 0x724   :  { %v15680_v23 = vunpack.i.h.bf16 %v15678_v14  ;;  %v15679_v21 = vunpack.i.l.bf16 %v15678_v14  ;;  %v15684_v25 = vunpack.i.l.bf16 %v15683_v19  ;;  %6312 = vmatmul.mubr.f32.gmra.mrb[74].mxu0 %v6111_v30  ;;  %12253 = vmatprep.mubr.msk.f32.mxu1 %vm859_vm4, %v5962_v33  ;;  %v5964_v49 = vpop.f32.mrb[55].mxu1  ;;  %v15685_v60 = vunpack.i.h.bf16 %v15683_v19 }
 0x725   :  { %6316 = vmatprep.mubr.f32.mxu0 %v6122_v3 }
 0x726   :  { %v6131_v51 = vsel %vm859_vm4, %v18269_v10, %v15679_v21  ;;  %v6112_v38 = vsel %vm859_vm4, %v18198_v37, %v15680_v23  ;;  %v5967_v20 = vpop.f32.mrb[56].mxu1  ;;  %v6123_v52 = vsel %vm859_vm4, %v18259_v0, %v15684_v25  ;;  %v6132_v5 = vsel %vm859_vm4, %v18271_v36, %v15685_v60 }
 0x727   :  { %v15688_v57 = vpop.permute.xlu0 %15687  ;;  %6427 = vmatmul.mubr.f32.gmra.mrb[74].mxu1 %v6131_v51  ;;  %v5969_v9 = vpop.f32.mrb[57].mxu1 }
 0x728   :  { %v15690_v15 = vunpack.i.h.bf16 %v15688_v57  ;;  %v15689_v58 = vunpack.i.l.bf16 %v15688_v57  ;;  %6317 = vmatmul.mubr.f32.gmra.mrb[76].mxu0 %v6112_v38  ;;  %12254 = vmatprep.mubr.msk.f32.mxu1 %vm859_vm4, %v5967_v20 }
 0x729   :  { %6321 = vmatprep.mubr.f32.mxu0 %v6123_v52 }
 0x72a   :  { %v6113_v10 = vsel %vm859_vm4, %v18203_v18, %v15689_v58  ;;  %v5972_v37 = vpop.f32.mrb[58].mxu1  ;;  %v6124_v0 = vsel %vm859_vm4, %v18261_v56, %v15690_v15 }
 0x72b   :  { %6432 = vmatmul.mubr.f32.gmra.mrb[76].mxu1 %v6132_v5  ;;  %v15693_v32 = vpop.permute.xlu1 %15692  ;;  %v15698_v47 = vpop.permute.xlu0 %15697 }
 0x72c   :  { %v15695_v22 = vunpack.i.h.bf16 %v15693_v32  ;;  %v15694_v1 = vunpack.i.l.bf16 %v15693_v32  ;;  %v15699_v2 = vunpack.i.l.bf16 %v15698_v47  ;;  %6322 = vmatmul.mubr.f32.gmra.mrb[78].mxu0 %v6113_v10  ;;  %12255 = vmatprep.mubr.msk.f32.mxu1 %vm859_vm4, %v5972_v37  ;;  %v5974_v39 = vpop.f32.mrb[59].mxu1  ;;  %v15700_v24 = vunpack.i.h.bf16 %v15698_v47 }
 0x72d   :  { %6326 = vmatprep.mubr.f32.mxu0 %v6124_v0 }
 0x72e   :  { %v6133_v36 = vsel %vm859_vm4, %v18273_v28, %v15694_v1  ;;  %v6114_v18 = vsel %vm859_vm4, %v18213_v46, %v15695_v22  ;;  %v5977_v17 = vpop.f32.mrb[60].mxu1  ;;  %v6125_v45 = vsel %vm859_vm4, %v18263_v13, %v15699_v2  ;;  %v6134_v48 = vsel %vm859_vm4, %v18275_v59, %v15700_v24 }
 0x72f   :  { %6437 = vmatmul.mubr.f32.gmra.mrb[78].mxu1 %v6133_v36  ;;  %v6015_v40 = vpop.permute.xlu1 %6014  ;;  %v5979_v56 = vpop.f32.mrb[61].mxu1 }
 0x730   :  { %6327 = vmatmul.mubr.f32.gmra.mrb[80].mxu0 %v6114_v18  ;;  %12256 = vmatprep.mubr.msk.f32.mxu1 %vm859_vm4, %v5977_v17  ;;  %v6115_v28 = vsel %vm859_vm4, %v18219_v27, %v6015_v40  ;;  %v6095_v29 = vpop.permute.xlu0 %6094 }
 0x731   :  { %6331 = vmatprep.mubr.f32.mxu0 %v6125_v45  ;;  %v6135_v13 = vsel %vm859_vm4, %v18277_v31, %v6095_v29 }
 0x732   :  { %v5982_v8 = vpop.f32.mrb[62].mxu1 }
 0x733   :  { %6442 = vmatmul.mubr.f32.gmra.mrb[80].mxu1 %v6134_v48  ;;  %v5984_v46 = vpop.f32.mrb[63].mxu1 }
 0x734   :  { %6332 = vmatmul.mubr.f32.gmra.mrb[82].mxu0 %v6115_v28  ;;  %12257 = vmatprep.mubr.msk.f32.mxu1 %vm859_vm4, %v5982_v8 }
 0x735   :  { %13577 = vmatprep.mubr.msk.f32.mxu0 %vm15838_vm3, %v15839_v6 }
 0x737   :  { %6447 = vmatmul.mubr.f32.gmra.mrb[82].mxu1 %v6135_v13 }
 0x738   :  { %13682 = vmatprep.mubr.msk.f32.mxu1 %vm15838_vm3, %v15839_v6 }
 0x7e3   :  { %v12712_v27 = vpop.f32.mrb[64].mxu0  ;;  %v6403_v59 = vpop.f32.mrb[64].mxu1 }
 0x7e4   :  { %v12713_v26 = vpop.f32.mrb[65].mxu0  ;;  %v6405_v55 = vpop.f32.mrb[65].mxu1 }
 0x7e5   :  { %v12714_v63 = vadd.f32 %v12713_v26, %v12712_v27 }
 0x7e7   :  { %v6404_v50 = vadd.f32 %v12714_v63, %v6403_v59  ;;  %v12715_v44 = vpop.f32.mrb[66].mxu0 }
 0x7e8   :  { %v12716_v31 = vpop.f32.mrb[67].mxu0 }
 0x7e9   :  { %v6459_v11 = vmul.f32 %v18349_v4, %v6404_v50  ;;  %v12717_v7 = vadd.f32 %v12716_v31, %v12715_v44 }
 0x7ea   :  { %v6408_v16 = vpop.f32.mrb[66].mxu1 }
 0x7eb   :  { %v6476_v61 = vadd.f32 %v18352_v62, %v6459_v11  ;;  %v6409_v41 = vadd.f32 %v12717_v7, %v6408_v16  ;;  %v12718_v12 = vpop.f32.mrb[68].mxu0  ;;  %v6410_v34 = vpop.f32.mrb[67].mxu1 }
 0x7ec   :  { %v12719_v54 = vpop.f32.mrb[69].mxu0 }
 0x7ed   :  { %v6460_v35 = vmul.f32 %v18349_v4, %v6409_v41  ;;  %v12720_v42 = vadd.f32 %v12719_v54, %v12718_v12  ;;  %v6496_v30 = vmul.f32 0.01, %v6476_v61  ;;  %vm6486_vm5 = vcmp.gt.f32.partialorder %v6476_v61, 0.0 }
 0x7ee   :  { %v6413_v53 = vpop.f32.mrb[68].mxu1 }
 0x7ef   :  { %v6477_v33 = vadd.f32 %v18352_v62, %v6460_v35  ;;  %v6414_v14 = vadd.f32 %v12720_v42, %v6413_v53  ;;  %v12721_v19 = vpop.f32.mrb[70].mxu0  ;;  %v6415_v23 = vpop.f32.mrb[69].mxu1  ;;  %v6506_v51 = vsel %vm6486_vm5, %v6476_v61, %v6496_v30  ;;  %vm6521_vm5 = vcmask 654336  }
 0x7f0   :  { %v12722_v21 = vpop.f32.mrb[71].mxu0 }
 0x7f1   :  { %vm6487_vm8 = vcmp.gt.f32.partialorder %v6477_v33, 0.0  ;;  %v6497_v25 = vmul.f32 0.01, %v6477_v33  ;;  %v6461_v3 = vmul.f32 %v18349_v4, %v6414_v14  ;;  %v12723_v49 = vadd.f32 %v12722_v21, %v12721_v19 }
 0x7f2   :  { %v6418_v60 = vpop.f32.mrb[70].mxu1 }
 0x7f3   :  { %v6507_v38 = vsel %vm6487_vm8, %v6477_v33, %v6497_v25  ;;  %v6478_v20 = vadd.f32 %v18352_v62, %v6461_v3  ;;  %v6419_v57 = vadd.f32 %v12723_v49, %v6418_v60  ;;  %v12724_v9 = vpop.f32.mrb[72].mxu0  ;;  %v6420_v15 = vpop.f32.mrb[71].mxu1 }
 0x7f4   :  { %v18360_v58 = vpack.c.bf16 %v6507_v38, %v6506_v51  ;;  %v12725_v52 = vpop.f32.mrb[73].mxu0 }
 0x7f5   :  { %v6462_v5 = vmul.f32 %v18349_v4, %v6419_v57  ;;  %v12726_v10 = vadd.f32 %v12725_v52, %v12724_v9  ;;  %v6498_v32 = vmul.f32 0.01, %v6478_v20  ;;  %vm6488_vm9 = vcmp.gt.f32.partialorder %v6478_v20, 0.0 }
 0x7f6   :  { %v6423_v37 = vpop.f32.mrb[72].mxu1  ;;  %14883 = vmatpush3.bf16.msra.mxu0 %v18360_v58  ;;  %14928 = vmatpush3.bf16.msra.mxu1 %v18360_v58 }
 0x7f7   :  { %v6479_v47 = vadd.f32 %v18352_v62, %v6462_v5  ;;  %v6424_v22 = vadd.f32 %v12726_v10, %v6423_v37  ;;  %v12727_v1 = vpop.f32.mrb[74].mxu0  ;;  %v6425_v2 = vpop.f32.mrb[73].mxu1  ;;  %14884 = vmatprep.subr.bf16.mxu0 %v19437_v43  ;;  %14929 = vmatprep.subr.bf16.mxu1 %v19437_v43  ;;  %v6508_v17 = vsel %vm6488_vm9, %v6478_v20, %v6498_v32 }
 0x7f8   :  { %v12728_v0 = vpop.f32.mrb[75].mxu0 }
 0x7f9   :  { %vm6489_vm10 = vcmp.gt.f32.partialorder %v6479_v47, 0.0  ;;  %v6499_v39 = vmul.f32 0.01, %v6479_v47  ;;  %v6463_v24 = vmul.f32 %v18349_v4, %v6424_v22  ;;  %v12729_v36 = vadd.f32 %v12728_v0, %v12727_v1  ;;  %v6516_v0 = vld [vmem:[%s15956_s4] sm:$0xff] }
 0x7fa   :  { %v6428_v18 = vpop.f32.mrb[74].mxu1 }
 0x7fb   :  { %v6509_v40 = vsel %vm6489_vm10, %v6479_v47, %v6499_v39  ;;  %v6480_v45 = vadd.f32 %v18352_v62, %v6463_v24  ;;  %v6429_v56 = vadd.f32 %v12729_v36, %v6428_v18  ;;  %v12730_v48 = vpop.f32.mrb[76].mxu0  ;;  %v6430_v8 = vpop.f32.mrb[75].mxu1  ;;  %v6517_v39 = vld [vmem:[%s15956_s4 + $0x8] sm:$0xff]  ;;  %v12286_v24 = vld [vmem:[%s15956_s4 + $0x80] sm:$0xff]  ;;  %v6518_v36 = vld [vmem:[%s15956_s4 + $0x10] sm:$0xff] }
 0x7fc   :  { %v18370_v28 = vpack.c.bf16 %v6509_v40, %v6508_v17  ;;  %v12731_v29 = vpop.f32.mrb[77].mxu0  ;;  %v12287_v18 = vld [vmem:[%s15956_s4 + $0x88] sm:$0xff]  ;;  %v6519_v17 = vld [vmem:[%s15956_s4 + $0x18] sm:$0xff]  ;;  %v12288_v40 = vld [vmem:[%s15956_s4 + $0x90] sm:$0xff] }
 0x7fd   :  { %v6464_v46 = vmul.f32 %v18349_v4, %v6429_v56  ;;  %v12732_v13 = vadd.f32 %v12731_v29, %v12730_v48  ;;  %v6500_v59 = vmul.f32 0.01, %v6480_v45  ;;  %vm6490_vm11 = vcmp.gt.f32.partialorder %v6480_v45, 0.0  ;;  %v7310_v56 = vld [vmem:[%s15871_s21 + $0x88] sm:$0xff]  ;;  %v6520_v48 = vld [vmem:[%s15956_s4 + $0x20] sm:$0xff]  ;;  %v12289_v8 = vld [vmem:[%s15956_s4 + $0x98] sm:$0xff] }
 0x7fe   :  { %v6433_v27 = vpop.f32.mrb[76].mxu1  ;;  %14886 = vmatpush3.bf16.msra.mxu0 %v18370_v28  ;;  %14931 = vmatpush3.bf16.msra.mxu1 %v18370_v28 }
 0x7ff   :  { %v6481_v26 = vadd.f32 %v18352_v62, %v6464_v46  ;;  %v6434_v55 = vadd.f32 %v12732_v13, %v6433_v27  ;;  %v12733_v63 = vpop.f32.mrb[78].mxu0  ;;  %v6435_v50 = vpop.f32.mrb[77].mxu1  ;;  %14887 = vmatprep.subr.bf16.mxu0 %v19437_v43  ;;  %14932 = vmatprep.subr.bf16.mxu1 %v19437_v43  ;;  %v6510_v61 = vsel %vm6490_vm11, %v6480_v45, %v6500_v59  ;;  %v7309_v45 = vld [vmem:[%s15871_s21 + $0x80] sm:$0xff]  ;;  %v7294_v13 = vld [vmem:[%s15871_s21 + $0x8] sm:$0xff] }
 0x800   :  { %v12734_v44 = vpop.f32.mrb[79].mxu0  ;;  %v14986_v29 = vpack.c.bf16 %v7310_v56, %v7309_v45  ;;  %v7293_v46 = vld [vmem:[%s15871_s21] sm:$0xff]  ;;  %v12265_v27 = vld [vmem:[%s15956_s4 + $0x28] sm:$0xff]  ;;  %v12266_v50 = vld [vmem:[%s15956_s4 + $0x30] sm:$0xff] }
 0x801   :  { %vm6491_vm12 = vcmp.gt.f32.partialorder %v6481_v26, 0.0  ;;  %v6501_v31 = vmul.f32 0.01, %v6481_v26  ;;  %v6465_v11 = vmul.f32 %v18349_v4, %v6434_v55  ;;  %v12735_v7 = vadd.f32 %v12734_v44, %v12733_v63  ;;  %v12305_v59 = vld [vmem:[%s15956_s4 + $0xc8] sm:$0xff]  ;;  %v7311_v55 = vld [vmem:[%s15871_s21 + $0x90] sm:$0xff]  ;;  %v7312_v63 = vld [vmem:[%s15871_s21 + $0x98] sm:$0xff] }
 0x802   :  { %v6438_v16 = vpop.f32.mrb[78].mxu1  ;;  %v12306_v44 = vld [vmem:[%s15956_s4 + $0xd0] sm:$0xff]  ;;  %v7320_v45 = vld [vmem:[%s15871_s21 + $0xd8] sm:$0xff] }
 0x803   :  { %v6511_v41 = vsel %vm6491_vm12, %v6481_v26, %v6501_v31  ;;  %v6482_v12 = vadd.f32 %v18352_v62, %v6465_v11  ;;  %v6439_v34 = vadd.f32 %v12735_v7, %v6438_v16  ;;  %v12736_v54 = vpop.f32.mrb[80].mxu0  ;;  %v6440_v35 = vpop.f32.mrb[79].mxu1  ;;  %v14988_v26 = vpack.c.bf16 %v7294_v13, %v7293_v46  ;;  %v7295_v11 = vld [vmem:[%s15871_s21 + $0x10] sm:$0xff]  ;;  %v7296_v7 = vld [vmem:[%s15871_s21 + $0x18] sm:$0xff] }
 0x804   :  { %v18380_v42 = vpack.c.bf16 %v6511_v41, %v6510_v61  ;;  %v12737_v53 = vpop.f32.mrb[81].mxu0  ;;  %v14990_v31 = vpack.c.bf16 %v7312_v63, %v7311_v55  ;;  %v12267_v16 = vld [vmem:[%s15956_s4 + $0x38] sm:$0xff]  ;;  %v14992_v41 = vpack.c.bf16 %v7296_v7, %v7295_v11  ;;  %v12308_v35 = vld [vmem:[%s15956_s4 + $0xe0] sm:$0xff]  ;;  %v7303_v56 = vld [vmem:[%s15871_s21 + $0x50] sm:$0xff] }
 0x805   :  { %v6466_v30 = vmul.f32 %v18349_v4, %v6439_v34  ;;  %v12738_v33 = vadd.f32 %v12737_v53, %v12736_v54  ;;  %v6502_v19 = vmul.f32 0.01, %v6482_v12  ;;  %vm6492_vm13 = vcmp.gt.f32.partialorder %v6482_v12, 0.0  ;;  %v12307_v61 = vld [vmem:[%s15956_s4 + $0xd8] sm:$0xff]  ;;  %v7314_v34 = vld [vmem:[%s15871_s21 + $0xa8] sm:$0xff]  ;;  %v12268_v54 = vld [vmem:[%s15956_s4 + $0x40] sm:$0xff] }
 0x806   :  { %v6443_v14 = vpop.f32.mrb[80].mxu1  ;;  %14889 = vmatpush3.bf16.msra.mxu0 %v18380_v42  ;;  %14934 = vmatpush3.bf16.msra.mxu1 %v18380_v42  ;;  %v7344_v13 = vld [vmem:[%s15871_s21 + $0x198] sm:$0xff]  ;;  %v12318_v63 = vld [vmem:[%s15956_s4 + $0x108] sm:$0xff]  ;;  %v7305_v11 = vld [vmem:[%s15871_s21 + $0x60] sm:$0xff] }
 0x807   :  { %v6483_v23 = vadd.f32 %v18352_v62, %v6466_v30  ;;  %v6444_v21 = vadd.f32 %v12738_v33, %v6443_v14  ;;  %v12739_v25 = vpop.f32.mrb[82].mxu0  ;;  %v6445_v3 = vpop.f32.mrb[81].mxu1  ;;  %14890 = vmatprep.subr.bf16.mxu0 %v19437_v43  ;;  %14935 = vmatprep.subr.bf16.mxu1 %v19437_v43  ;;  %v6512_v57 = vsel %vm6492_vm13, %v6482_v12, %v6502_v19  ;;  %v7313_v12 = vld [vmem:[%s15871_s21 + $0xa0] sm:$0xff]  ;;  %v7298_v33 = vld [vmem:[%s15871_s21 + $0x28] sm:$0xff]  ;;  %v7315_v14 = vld [vmem:[%s15871_s21 + $0xb0] sm:$0xff]  ;;  %vm7807_vm13 = vcmask 326656  }
 0x808   :  { %v12740_v49 = vpop.f32.mrb[83].mxu0  ;;  %v14994_v53 = vpack.c.bf16 %v7314_v34, %v7313_v12  ;;  %v7297_v30 = vld [vmem:[%s15871_s21 + $0x20] sm:$0xff]  ;;  %v7316_v19 = vld [vmem:[%s15871_s21 + $0xb8] sm:$0xff]  ;;  %v7306_v7 = vld [vmem:[%s15871_s21 + $0x68] sm:$0xff] }
 0x809   :  { %vm6493_vm14 = vcmp.gt.f32.partialorder %v6483_v23, 0.0  ;;  %v6503_v60 = vmul.f32 0.01, %v6483_v23  ;;  %v6467_v51 = vmul.f32 %v18349_v4, %v6444_v21  ;;  %v12741_v38 = vadd.f32 %v12740_v49, %v12739_v25  ;;  %v12309_v21 = vld [vmem:[%s15956_s4 + $0xe8] sm:$0xff]  ;;  %v7299_v49 = vld [vmem:[%s15871_s21 + $0x30] sm:$0xff] }
 0x80a   :  { %v6448_v20 = vpop.f32.mrb[82].mxu1  ;;  %v14996_v25 = vpack.c.bf16 %v7298_v33, %v7297_v30  ;;  %v14998_v3 = vpack.c.bf16 %v7316_v19, %v7315_v14  ;;  %v7346_v12 = vld [vmem:[%s15871_s21 + $0x1a8] sm:$0xff]  ;;  %v7323_v30 = vld [vmem:[%s15871_s21 + $0xf0] sm:$0xff]  ;;  %v7324_v33 = vld [vmem:[%s15871_s21 + $0xf8] sm:$0xff] }
 0x80b   :  { %v6513_v9 = vsel %vm6493_vm14, %v6483_v23, %v6503_v60  ;;  %v6484_v15 = vadd.f32 %v18352_v62, %v6467_v51  ;;  %v6449_v52 = vadd.f32 %v12741_v38, %v6448_v20  ;;  %v6450_v5 = vpop.f32.mrb[83].mxu1  ;;  %v12269_v23 = vld [vmem:[%s15956_s4 + $0x48] sm:$0xff]  ;;  %v7300_v60 = vld [vmem:[%s15871_s21 + $0x38] sm:$0xff]  ;;  %v7317_v51 = vld [vmem:[%s15871_s21 + $0xc0] sm:$0xff]  ;;  %v15014_v14 = vpack.c.bf16 %v7324_v33, %v7323_v30 }
 0x80c   :  { %v18390_v10 = vpack.c.bf16 %v6513_v9, %v6512_v57  ;;  %v7318_v38 = vld [vmem:[%s15871_s21 + $0xc8] sm:$0xff]  ;;  %v12275_v20 = vld [vmem:[%s15956_s4 + $0x50] sm:$0xff]  ;;  %v15000_v57 = vpack.c.bf16 %v7300_v60, %v7299_v49  ;;  %v12276_v5 = vld [vmem:[%s15956_s4 + $0x58] sm:$0xff]  ;;  %vm8756_vm14 = vcmask 162816  }
 0x80d   :  { %v6468_v37 = vmul.f32 %v18349_v4, %v6449_v52  ;;  %v6504_v32 = vmul.f32 0.01, %v6484_v15  ;;  %vm6494_vm15 = vcmp.gt.f32.partialorder %v6484_v15, 0.0  ;;  %v15002_v9 = vpack.c.bf16 %v7318_v38, %v7317_v51  ;;  %v7302_v52 = vld [vmem:[%s15871_s21 + $0x48] sm:$0xff]  ;;  %v7307_v19 = vld [vmem:[%s15871_s21 + $0x70] sm:$0xff]  ;;  %v7332_v51 = vld [vmem:[%s15871_s21 + $0x138] sm:$0xff] }
 0x80e   :  { %14892 = vmatpush3.bf16.msra.mxu0 %v18390_v10  ;;  %14937 = vmatpush3.bf16.msra.mxu1 %v18390_v10  ;;  %v7331_v60 = vld [vmem:[%s15871_s21 + $0x130] sm:$0xff] }
 0x80f   :  { %v6485_v47 = vadd.f32 %v18352_v62, %v6468_v37  ;;  %14893 = vmatprep.subr.bf16.mxu0 %v19437_v43  ;;  %14938 = vmatprep.subr.bf16.mxu1 %v19437_v43  ;;  %v6514_v1 = vsel %vm6494_vm15, %v6484_v15, %v6504_v32  ;;  %v12285_v62 = vld [vmem:[%s15956_s4 + $0x78] sm:$0xff]  ;;  %v7301_v15 = vld [vmem:[%s15871_s21 + $0x40] sm:$0xff]  ;;  %v15032_v38 = vpack.c.bf16 %v7332_v51, %v7331_v60  ;;  %v7378_v60 = vld [vmem:[%s15871_s21 + $0x2a8] sm:$0xff] }
 0x810   :  { %v15004_v37 = vpack.c.bf16 %v7302_v52, %v7301_v15  ;;  %v12277_v32 = vld [vmem:[%s15956_s4 + $0x60] sm:$0xff]  ;;  %v7334_v52 = vld [vmem:[%s15871_s21 + $0x148] sm:$0xff] }
 0x811   :  { %vm6495_vm1 = vcmp.gt.f32.partialorder %v6485_v47, 0.0  ;;  %v6505_v22 = vmul.f32 0.01, %v6485_v47  ;;  %v7333_v15 = vld [vmem:[%s15871_s21 + $0x140] sm:$0xff] }
 0x813   :  { %v6515_v2 = vsel %vm6495_vm1, %v6485_v47, %v6505_v22  ;;  %v12278_v47 = vld [vmem:[%s15956_s4 + $0x68] sm:$0xff]  ;;  %v12279_v22 = vld [vmem:[%s15956_s4 + $0x70] sm:$0xff] }
 0x814   :  { %v18398_v4 = vpack.c.bf16 %v6515_v2, %v6514_v1  ;;  %v12295_v1 = vld [vmem:[%s15956_s4 + $0xa0] sm:$0xff]  ;;  %v12296_v2 = vld [vmem:[%s15956_s4 + $0xa8] sm:$0xff] }
 0x816   :  { %14895 = vmatpush3.bf16.msra.mxu0 %v18398_v4  ;;  %14940 = vmatpush3.bf16.msra.mxu1 %v18398_v4 }
 0x817   :  { %14896 = vmatprep.subr.bf16.mxu0 %v19437_v43  ;;  %14956 = vmatprep.subr.bf16.mxu1 %v19437_v43 }
 0x819   :  { %13578 = vmatmul.mubr.msk.f32.vlgmr.msra.gmra.mrb[84].mxu0 %vm6521_vm5, %v6516_v0  ;;  %13683 = vmatmul.mubr.msk.f32.vlgmr.msra.gmra.mrb[84].mxu1 %vm6521_vm5, %v12285_v62  ;;  %v12297_v0 = vld [vmem:[%s15956_s4 + $0xb0] sm:$0xff]  ;;  %v7342_v62 = vld [vmem:[%s15871_s21 + $0x188] sm:$0xff] }
 0x81a   :  { %14898 = vmatpush3.bf16.msra.mxu0 %v18360_v58  ;;  %14958 = vmatpush3.bf16.msra.mxu1 %v18360_v58 }
 0x81b   :  { %13580 = vmatprep.mubr.msk.f32.mxu0 %vm15838_vm3, %v15839_v6  ;;  %14899 = vmatprep.subr.bf16.mxu0 %v19437_v43 }
 0x81c   :  { %14959 = vmatprep.subr.bf16.mxu1 %v19437_v43  ;;  %13685 = vmatprep.mubr.msk.f32.mxu1 %vm15838_vm3, %v15839_v6 }
 0x81d   :  { %13581 = vmatmul.mubr.msk.f32.gmra.mrb[86].mxu0 %vm6521_vm5, %v6517_v39  ;;  %13686 = vmatmul.mubr.msk.f32.gmra.mrb[86].mxu1 %vm6521_vm5, %v12286_v24  ;;  %v12299_v39 = vld [vmem:[%s15956_s4 + $0xc0] sm:$0xff] }
 0x81e   :  { %14901 = vmatpush3.bf16.msra.mxu0 %v18370_v28  ;;  %14961 = vmatpush3.bf16.msra.mxu1 %v18370_v28  ;;  %v7325_v24 = vld [vmem:[%s15871_s21 + $0x100] sm:$0xff] }
 0x81f   :  { %13583 = vmatprep.mubr.msk.f32.mxu0 %vm15838_vm3, %v15839_v6  ;;  %14902 = vmatprep.subr.bf16.mxu0 %v19437_v43 }
 0x820   :  { %14962 = vmatprep.subr.bf16.mxu1 %v19437_v43  ;;  %13688 = vmatprep.mubr.msk.f32.mxu1 %vm15838_vm3, %v15839_v6 }
 0x821   :  { %13584 = vmatmul.mubr.msk.f32.gmra.mrb[88].mxu0 %vm6521_vm5, %v6518_v36  ;;  %13689 = vmatmul.mubr.msk.f32.gmra.mrb[88].mxu1 %vm6521_vm5, %v12287_v18  ;;  %v7326_v36 = vld [vmem:[%s15871_s21 + $0x108] sm:$0xff] }
 0x822   :  { %14904 = vmatpush3.bf16.msra.mxu0 %v18380_v42  ;;  %14964 = vmatpush3.bf16.msra.mxu1 %v18380_v42  ;;  %v15020_v18 = vpack.c.bf16 %v7326_v36, %v7325_v24  ;;  %v7337_v24 = vld [vmem:[%s15871_s21 + $0x160] sm:$0xff]  ;;  %v7338_v36 = vld [vmem:[%s15871_s21 + $0x168] sm:$0xff] }
 0x823   :  { %13586 = vmatprep.mubr.msk.f32.mxu0 %vm15838_vm3, %v15839_v6  ;;  %14905 = vmatprep.subr.bf16.mxu0 %v19437_v43 }
 0x824   :  { %14965 = vmatprep.subr.bf16.mxu1 %v19437_v43  ;;  %13691 = vmatprep.mubr.msk.f32.mxu1 %vm15838_vm3, %v15839_v6 }
 0x825   :  { %13587 = vmatmul.mubr.msk.f32.gmra.mrb[90].mxu0 %vm6521_vm5, %v6519_v17  ;;  %13692 = vmatmul.mubr.msk.f32.gmra.mrb[90].mxu1 %vm6521_vm5, %v12288_v40  ;;  %v12316_v17 = vld [vmem:[%s15956_s4 + $0xf8] sm:$0xff]  ;;  %v7319_v40 = vld [vmem:[%s15871_s21 + $0xd0] sm:$0xff] }
 0x826   :  { %14907 = vmatpush3.bf16.msra.mxu0 %v18390_v10  ;;  %14967 = vmatpush3.bf16.msra.mxu1 %v18390_v10 }
 0x827   :  { %13589 = vmatprep.mubr.msk.f32.mxu0 %vm15838_vm3, %v15839_v6  ;;  %14908 = vmatprep.subr.bf16.mxu0 %v19437_v43 }
 0x828   :  { %14968 = vmatprep.subr.bf16.mxu1 %v19437_v43  ;;  %13694 = vmatprep.mubr.msk.f32.mxu1 %vm15838_vm3, %v15839_v6 }
 0x829   :  { %13590 = vmatmul.mubr.msk.f32.gmra.mrb[92].mxu0 %vm6521_vm5, %v6520_v48  ;;  %13695 = vmatmul.mubr.msk.f32.gmra.mrb[92].mxu1 %vm6521_vm5, %v12289_v8  ;;  %v7304_v48 = vld [vmem:[%s15871_s21 + $0x58] sm:$0xff]  ;;  %v7343_v8 = vld [vmem:[%s15871_s21 + $0x190] sm:$0xff] }
 0x82a   :  { %14910 = vmatpush3.bf16.msra.mxu0 %v18398_v4  ;;  %14970 = vmatpush3.bf16.msra.mxu1 %v18398_v4  ;;  %v15008_v46 = vpack.c.bf16 %v7304_v48, %v7303_v56 }
 0x82b   :  { %13612 = vmatprep.mubr.msk.f32.mxu0 %vm15838_vm3, %v15839_v6  ;;  %14911 = vmatprep.subr.bf16.mxu0 %v19437_v43 }
 0x82c   :  { %13752 = vmatprep.mubr.msk.f32.mxu1 %vm15838_vm3, %v15839_v6  ;;  %14987 = vmatprep.subr.bf16.mxu1 %v14986_v29  ;;  %v12317_v29 = vld [vmem:[%s15956_s4 + $0x100] sm:$0xff] }
 0x82d   :  { %13613 = vmatmul.mubr.msk.f32.vlgmr.msra.gmra.mrb[94].mxu0 %vm6521_vm5, %v12265_v27  ;;  %13753 = vmatmul.mubr.msk.f32.vlgmr.msra.gmra.mrb[94].mxu1 %vm6521_vm5, %v12305_v59  ;;  %v15022_v27 = vpack.c.bf16 %v7344_v13, %v7343_v8  ;;  %v7327_v59 = vld [vmem:[%s15871_s21 + $0x110] sm:$0xff] }
 0x82e   :  { %14913 = vmatpush3.bf16.msra.mxu0 %v18360_v58  ;;  %13615 = vmatprep.mubr.msk.f32.mxu0 %vm15838_vm3, %v15839_v6 }
 0x82f   :  { %14914 = vmatprep.subr.bf16.mxu0 %v19437_v43  ;;  %13755 = vmatprep.mubr.msk.f32.mxu1 %vm15838_vm3, %v15839_v6 }
 0x830   :  { %14989 = vmatpush3.bf16.msra.mxu1 %v14988_v26  ;;  %v7328_v26 = vld [vmem:[%s15871_s21 + $0x118] sm:$0xff] }
 0x831   :  { %13616 = vmatmul.mubr.msk.f32.gmra.mrb[96].mxu0 %vm6521_vm5, %v12266_v50  ;;  %13756 = vmatmul.mubr.msk.f32.gmra.mrb[96].mxu1 %vm6521_vm5, %v12306_v44  ;;  %v15024_v55 = vpack.c.bf16 %v7328_v26, %v7327_v59  ;;  %v7321_v50 = vld [vmem:[%s15871_s21 + $0xe0] sm:$0xff]  ;;  %v7322_v44 = vld [vmem:[%s15871_s21 + $0xe8] sm:$0xff] }
 0x832   :  { %14916 = vmatpush3.bf16.msra.mxu0 %v18370_v28  ;;  %13618 = vmatprep.mubr.msk.f32.mxu0 %vm15838_vm3, %v15839_v6 }
 0x833   :  { %14917 = vmatprep.subr.bf16.mxu0 %v19437_v43  ;;  %13758 = vmatprep.mubr.msk.f32.mxu1 %vm15838_vm3, %v15839_v6 }
 0x834   :  { %14991 = vmatprep.subr.bf16.mxu1 %v14990_v31  ;;  %v15010_v31 = vpack.c.bf16 %v7322_v44, %v7321_v50 }
 0x835   :  { %13619 = vmatmul.mubr.msk.f32.gmra.mrb[98].mxu0 %vm6521_vm5, %v12267_v16  ;;  %13759 = vmatmul.mubr.msk.f32.gmra.mrb[98].mxu1 %vm6521_vm5, %v12307_v61  ;;  %v7345_v16 = vld [vmem:[%s15871_s21 + $0x1a0] sm:$0xff]  ;;  %v12319_v61 = vld [vmem:[%s15956_s4 + $0x110] sm:$0xff] }
 0x836   :  { %14919 = vmatpush3.bf16.msra.mxu0 %v18380_v42  ;;  %13621 = vmatprep.mubr.msk.f32.mxu0 %vm15838_vm3, %v15839_v6  ;;  %v15026_v34 = vpack.c.bf16 %v7346_v12, %v7345_v16  ;;  %v7358_v12 = vld [vmem:[%s15871_s21 + $0x208] sm:$0xff] }
 0x837   :  { %14920 = vmatprep.subr.bf16.mxu0 %v19437_v43  ;;  %13761 = vmatprep.mubr.msk.f32.mxu1 %vm15838_vm3, %v15839_v6 }
 0x838   :  { %14993 = vmatpush3.bf16.msra.mxu1 %v14992_v41  ;;  %v15012_v41 = vpack.c.bf16 %v7306_v7, %v7305_v11 }
 0x839   :  { %13622 = vmatmul.mubr.msk.f32.gmra.mrb[100].mxu0 %vm6521_vm5, %v12268_v54  ;;  %13762 = vmatmul.mubr.msk.f32.gmra.mrb[100].mxu1 %vm6521_vm5, %v12308_v35  ;;  %v7329_v54 = vld [vmem:[%s15871_s21 + $0x120] sm:$0xff]  ;;  %v7330_v35 = vld [vmem:[%s15871_s21 + $0x128] sm:$0xff] }
 0x83a   :  { %14922 = vmatpush3.bf16.msra.mxu0 %v18390_v10  ;;  %13624 = vmatprep.mubr.msk.f32.mxu0 %vm15838_vm3, %v15839_v6 }
 0x83b   :  { %14923 = vmatprep.subr.bf16.mxu0 %v19437_v43  ;;  %13764 = vmatprep.mubr.msk.f32.mxu1 %vm15838_vm3, %v15839_v6 }
 0x83c   :  { %14995 = vmatprep.subr.bf16.mxu1 %v14994_v53  ;;  %v15028_v53 = vpack.c.bf16 %v7330_v35, %v7329_v54  ;;  %v7375_v35 = vld [vmem:[%s15871_s21 + $0x290] sm:$0xff] }
 0x83d   :  { %13625 = vmatmul.mubr.msk.f32.gmra.mrb[102].mxu0 %vm6521_vm5, %v12269_v23  ;;  %13765 = vmatmul.mubr.msk.f32.gmra.mrb[102].mxu1 %vm6521_vm5, %v12309_v21  ;;  %v7308_v23 = vld [vmem:[%s15871_s21 + $0x78] sm:$0xff]  ;;  %v7347_v21 = vld [vmem:[%s15871_s21 + $0x1b0] sm:$0xff] }
 0x83e   :  { %14925 = vmatpush3.bf16.msra.mxu0 %v18398_v4  ;;  %13647 = vmatprep.mubr.msk.f32.mxu0 %vm15838_vm3, %v15839_v6 }
 0x83f   :  { %14941 = vmatprep.subr.bf16.mxu0 %v19437_v43  ;;  %14997 = vmatpush3.bf16.msra.mxu1 %v14996_v25  ;;  %v15016_v25 = vpack.c.bf16 %v7308_v23, %v7307_v19  ;;  %v7359_v23 = vld [vmem:[%s15871_s21 + $0x210] sm:$0xff] }
 0x840   :  { %14999 = vmatprep.subr.bf16.mxu1 %v14998_v3  ;;  %v7348_v3 = vld [vmem:[%s15871_s21 + $0x1b8] sm:$0xff] }
 0x841   :  { %13648 = vmatmul.mubr.msk.f32.vlgmr.msra.gmra.mrb[104].mxu0 %vm6521_vm5, %v12275_v20  ;;  %v15030_v49 = vpack.c.bf16 %v7348_v3, %v7347_v21  ;;  %v7349_v20 = vld [vmem:[%s15871_s21 + $0x1c0] sm:$0xff]  ;;  %v7360_v21 = vld [vmem:[%s15871_s21 + $0x218] sm:$0xff] }
 0x842   :  { %14943 = vmatpush3.bf16.msra.mxu0 %v18360_v58  ;;  %13650 = vmatprep.mubr.msk.f32.mxu0 %vm15838_vm3, %v15839_v6 }
 0x843   :  { %14944 = vmatprep.subr.bf16.mxu0 %v19437_v43  ;;  %15001 = vmatpush3.bf16.msra.mxu1 %v15000_v57  ;;  %v7350_v57 = vld [vmem:[%s15871_s21 + $0x1c8] sm:$0xff] }
 0x844   :  { %15003 = vmatprep.subr.bf16.mxu1 %v15002_v9  ;;  %v15034_v9 = vpack.c.bf16 %v7350_v57, %v7349_v20 }
 0x845   :  { %13651 = vmatmul.mubr.msk.f32.gmra.mrb[106].mxu0 %vm6521_vm5, %v12276_v5  ;;  %v15036_v5 = vpack.c.bf16 %v7334_v52, %v7333_v15  ;;  %v7362_v15 = vld [vmem:[%s15871_s21 + $0x228] sm:$0xff] }
 0x846   :  { %14946 = vmatpush3.bf16.msra.mxu0 %v18370_v28  ;;  %13653 = vmatprep.mubr.msk.f32.mxu0 %vm15838_vm3, %v15839_v6 }
 0x847   :  { %14947 = vmatprep.subr.bf16.mxu0 %v19437_v43  ;;  %15005 = vmatpush3.bf16.msra.mxu1 %v15004_v37  ;;  %v7351_v37 = vld [vmem:[%s15871_s21 + $0x1d0] sm:$0xff] }
 0x849   :  { %13654 = vmatmul.mubr.msk.f32.gmra.mrb[108].mxu0 %vm6521_vm5, %v12277_v32  ;;  %v7352_v32 = vld [vmem:[%s15871_s21 + $0x1d8] sm:$0xff] }
 0x84a   :  { %14949 = vmatpush3.bf16.msra.mxu0 %v18380_v42  ;;  %13656 = vmatprep.mubr.msk.f32.mxu0 %vm15838_vm3, %v15839_v6 }
 0x84b   :  { %14950 = vmatprep.subr.bf16.mxu0 %v19437_v43 }
 0x84d   :  { %13657 = vmatmul.mubr.msk.f32.gmra.mrb[110].mxu0 %vm6521_vm5, %v12278_v47  ;;  %v7373_v47 = vld [vmem:[%s15871_s21 + $0x280] sm:$0xff] }
 0x84e   :  { %14952 = vmatpush3.bf16.msra.mxu0 %v18390_v10  ;;  %13659 = vmatprep.mubr.msk.f32.mxu0 %vm15838_vm3, %v15839_v6 }
 0x84f   :  { %14953 = vmatprep.subr.bf16.mxu0 %v19437_v43 }
 0x851   :  { %13660 = vmatmul.mubr.msk.f32.gmra.mrb[112].mxu0 %vm6521_vm5, %v12279_v22  ;;  %v15038_v22 = vpack.c.bf16 %v7352_v32, %v7351_v37  ;;  %v7379_v37 = vld [vmem:[%s15871_s21 + $0x2b0] sm:$0xff]  ;;  %v7380_v32 = vld [vmem:[%s15871_s21 + $0x2b8] sm:$0xff] }
 0x852   :  { %14955 = vmatpush3.bf16.msra.mxu0 %v18398_v4  ;;  %13717 = vmatprep.mubr.msk.f32.mxu0 %vm15838_vm3, %v15839_v6 }
 0x853   :  { %14971 = vmatprep.subr.bf16.mxu0 %v19437_v43 }
 0x855   :  { %13718 = vmatmul.mubr.msk.f32.vlgmr.msra.gmra.mrb[114].mxu0 %vm6521_vm5, %v12295_v1  ;;  %v7374_v1 = vld [vmem:[%s15871_s21 + $0x288] sm:$0xff] }
 0x856   :  { %14973 = vmatpush3.bf16.msra.mxu0 %v18360_v58  ;;  %13720 = vmatprep.mubr.msk.f32.mxu0 %vm15838_vm3, %v15839_v6  ;;  %v12298_v58 = vld [vmem:[%s15956_s4 + $0xb8] sm:$0xff] }
 0x857   :  { %14974 = vmatprep.subr.bf16.mxu0 %v19437_v43 }
 0x859   :  { %13721 = vmatmul.mubr.msk.f32.gmra.mrb[116].mxu0 %vm6521_vm5, %v12296_v2  ;;  %v15050_v2 = vpack.c.bf16 %v7374_v1, %v7373_v47 }
 0x85a   :  { %14976 = vmatpush3.bf16.msra.mxu0 %v18370_v28  ;;  %13723 = vmatprep.mubr.msk.f32.mxu0 %vm15838_vm3, %v15839_v6  ;;  %v7341_v28 = vld [vmem:[%s15871_s21 + $0x180] sm:$0xff] }
 0x85b   :  { %14977 = vmatprep.subr.bf16.mxu0 %v19437_v43 }
 0x85d   :  { %13724 = vmatmul.mubr.msk.f32.gmra.mrb[118].mxu0 %vm6521_vm5, %v12297_v0  ;;  %v7335_v0 = vld [vmem:[%s15871_s21 + $0x150] sm:$0xff] }
 0x85e   :  { %14979 = vmatpush3.bf16.msra.mxu0 %v18380_v42  ;;  %13726 = vmatprep.mubr.msk.f32.mxu0 %vm15838_vm3, %v15839_v6  ;;  %v15018_v42 = vpack.c.bf16 %v7342_v62, %v7341_v28  ;;  %v7353_v62 = vld [vmem:[%s15871_s21 + $0x1e0] sm:$0xff] }
 0x85f   :  { %14980 = vmatprep.subr.bf16.mxu0 %v19437_v43 }
 0x861   :  { %13727 = vmatmul.mubr.msk.f32.gmra.mrb[120].mxu0 %vm6521_vm5, %v12298_v58  ;;  %v7336_v58 = vld [vmem:[%s15871_s21 + $0x158] sm:$0xff] }
 0x862   :  { %14982 = vmatpush3.bf16.msra.mxu0 %v18390_v10  ;;  %13729 = vmatprep.mubr.msk.f32.mxu0 %vm15838_vm3, %v15839_v6  ;;  %v12315_v10 = vld [vmem:[%s15956_s4 + $0xf0] sm:$0xff]  ;;  %v15040_v28 = vpack.c.bf16 %v7336_v58, %v7335_v0  ;;  %v7364_v58 = vld [vmem:[%s15871_s21 + $0x238] sm:$0xff]  ;;  %s19451_s4 = sld [smem:[#allocation22_spill]] }
 0x863   :  { %14983 = vmatprep.subr.bf16.mxu0 %v19437_v43  ;;  %v7363_v0 = vld [vmem:[%s15871_s21 + $0x230] sm:$0xff] }
 0x865   :  { %13730 = vmatmul.mubr.msk.f32.gmra.mrb[122].mxu0 %vm6521_vm5, %v12299_v39  ;;  %v7354_v39 = vld [vmem:[%s15871_s21 + $0x1e8] sm:$0xff] }
 0x866   :  { %14985 = vmatpush3.bf16.msra.mxu0 %v18398_v4  ;;  %13787 = vmatprep.mubr.msk.f32.mxu0 %vm15838_vm3, %v15839_v6  ;;  %v15006_v4 = vpack.c.bf16 %v7320_v45, %v7319_v40  ;;  %v7339_v45 = vld [vmem:[%s15871_s21 + $0x170] sm:$0xff] }
 0x867   :  { %15019 = vmatprep.subr.bf16.mxu0 %v15018_v42  ;;  %v15042_v42 = vpack.c.bf16 %v7354_v39, %v7353_v62  ;;  %v7381_v39 = vld [vmem:[%s15871_s21 + $0x2c0] sm:$0xff] }
 0x868   :  { %15007 = vmatprep.subr.bf16.mxu1 %v15006_v4  ;;  %v7340_v4 = vld [vmem:[%s15871_s21 + $0x178] sm:$0xff] }
 0x869   :  { %13788 = vmatmul.mubr.msk.f32.vlgmr.msra.gmra.mrb[124].mxu0 %vm6521_vm5, %v12315_v10  ;;  %15009 = vmatpush3.bf16.msra.mxu1 %v15008_v46  ;;  %v15044_v10 = vpack.c.bf16 %v7338_v36, %v7337_v24  ;;  %v15048_v56 = vpack.c.bf16 %v7340_v4, %v7339_v45  ;;  %v15064_v36 = vpack.c.bf16 %v7364_v58, %v7363_v0 }
 0x86a   :  { %13790 = vmatprep.mubr.msk.f32.mxu0 %vm15838_vm3, %v15839_v6  ;;  %15021 = vmatpush3.bf16.msra.mxu0 %v15020_v18  ;;  %v7355_v18 = vld [vmem:[%s15871_s21 + $0x1f0] sm:$0xff] }
 0x86b   :  { %15023 = vmatprep.subr.bf16.mxu0 %v15022_v27  ;;  %15011 = vmatprep.subr.bf16.mxu1 %v15010_v31 }
 0x86d   :  { %13791 = vmatmul.mubr.msk.f32.gmra.mrb[126].mxu0 %vm6521_vm5, %v12316_v17  ;;  %15013 = vmatpush3.bf16.msra.mxu1 %v15012_v41  ;;  %v7356_v17 = vld [vmem:[%s15871_s21 + $0x1f8] sm:$0xff]  ;;  %v7357_v41 = vld [vmem:[%s15871_s21 + $0x200] sm:$0xff] }
 0x86e   :  { %13793 = vmatprep.mubr.msk.f32.mxu0 %vm15838_vm3, %v15839_v6  ;;  %15025 = vmatpush3.bf16.msra.mxu0 %v15024_v55  ;;  %v15046_v40 = vpack.c.bf16 %v7356_v17, %v7355_v18  ;;  %v15052_v33 = vpack.c.bf16 %v7358_v12, %v7357_v41  ;;  %v7365_v17 = vld [vmem:[%s15871_s21 + $0x240] sm:$0xff]  ;;  %v7386_v41 = vld [vmem:[%s15871_s21 + $0x2e8] sm:$0xff] }
 0x86f   :  { %15027 = vmatprep.subr.bf16.mxu0 %v15026_v34  ;;  %15015 = vmatprep.subr.bf16.mxu1 %v15014_v14 }
 0x871   :  { %13794 = vmatmul.mubr.msk.f32.gmra.mrb[128].mxu0 %vm6521_vm5, %v12317_v29  ;;  %15017 = vmatpush3.bf16.msra.mxu1 %v15016_v25 }
 0x872   :  { %13796 = vmatprep.mubr.msk.f32.mxu0 %vm15838_vm3, %v15839_v6  ;;  %15029 = vmatpush3.bf16.msra.mxu0 %v15028_v53  ;;  %v7376_v53 = vld [vmem:[%s15871_s21 + $0x298] sm:$0xff] }
 0x873   :  { %15031 = vmatprep.subr.bf16.mxu0 %v15030_v49  ;;  %15051 = vmatprep.subr.bf16.mxu1 %v15050_v2  ;;  %v15054_v19 = vpack.c.bf16 %v7376_v53, %v7375_v35  ;;  %v7377_v49 = vld [vmem:[%s15871_s21 + $0x2a0] sm:$0xff]  ;;  %v15062_v2 = vpack.c.bf16 %v7380_v32, %v7379_v37  ;;  %v7391_v35 = vld [vmem:[%s15871_s21 + $0x310] sm:$0xff]  ;;  %v7392_v53 = vld [vmem:[%s15871_s21 + $0x318] sm:$0xff] }
 0x874   :  { %v15058_v57 = vpack.c.bf16 %v7378_v60, %v7377_v49  ;;  %v7393_v49 = vld [vmem:[%s15871_s21 + $0x320] sm:$0xff]  ;;  %v7394_v60 = vld [vmem:[%s15871_s21 + $0x328] sm:$0xff]  ;;  %v7396_v37 = vld [vmem:[%s15871_s21 + $0x338] sm:$0xff] }
 0x875   :  { %13797 = vmatmul.mubr.msk.f32.gmra.mrb[130].mxu0 %vm6521_vm5, %v12318_v63 }
 0x876   :  { %13799 = vmatprep.mubr.msk.f32.mxu0 %vm15838_vm3, %v15839_v6  ;;  %15033 = vmatpush3.bf16.msra.mxu0 %v15032_v38  ;;  %v15056_v38 = vpack.c.bf16 %v7360_v21, %v7359_v23  ;;  %v7387_v21 = vld [vmem:[%s15871_s21 + $0x2f0] sm:$0xff] }
 0x877   :  { %15035 = vmatprep.subr.bf16.mxu0 %v15034_v9  ;;  %v7361_v9 = vld [vmem:[%s15871_s21 + $0x220] sm:$0xff] }
 0x879   :  { %13800 = vmatmul.mubr.msk.f32.gmra.mrb[132].mxu0 %vm6521_vm5, %v12319_v61 }
 0x87a   :  { %15037 = vmatpush3.bf16.msra.mxu0 %v15036_v5 }
 0x87b   :  { %15039 = vmatprep.subr.bf16.mxu0 %v15038_v22  ;;  %v15060_v22 = vpack.c.bf16 %v7362_v15, %v7361_v9 }
 0x87e   :  { %15041 = vmatpush3.bf16.msra.mxu0 %v15040_v28 }
 0x87f   :  { %15043 = vmatprep.subr.bf16.mxu0 %v15042_v42  ;;  %v7382_v42 = vld [vmem:[%s15871_s21 + $0x2c8] sm:$0xff] }
 0x880   :  { %v15066_v18 = vpack.c.bf16 %v7382_v42, %v7381_v39 }
 0x882   :  { %15045 = vmatpush3.bf16.msra.mxu0 %v15044_v10 }
 0x883   :  { %15047 = vmatprep.subr.bf16.mxu0 %v15046_v40  ;;  %v7366_v40 = vld [vmem:[%s15871_s21 + $0x248] sm:$0xff] }
 0x886   :  { %15049 = vmatpush3.bf16.msra.mxu0 %v15048_v56  ;;  %v7383_v56 = vld [vmem:[%s15871_s21 + $0x2d0] sm:$0xff] }
 0x887   :  { %15082 = vmatprep.subr.bf16.mxu0 %v19437_v43 }
 0x8ec   :  { %v6603_v48 = vpop.f32.mrb[84].mxu0  ;;  %v6936_v8 = vpop.f32.mrb[84].mxu1 }
 0x8ed   :  { %v13579_v29 = vpop.f32.mrb[85].mxu0  ;;  %7559 = vmatprep.mubr.f32.mxu0 %v6936_v8  ;;  %v13684_v46 = vpop.f32.mrb[85].mxu1 }
 0x8ee   :  { %v15068_v29 = vpack.c.bf16 %v7366_v40, %v7365_v17  ;;  %v7389_v46 = vld [vmem:[%s15871_s21 + $0x300] sm:$0xff]  ;;  %v7403_v40 = vld [vmem:[%s15871_s21 + $0x370] sm:$0xff] }
 0x8f0   :  { %v6608_v13 = vpop.f32.mrb[86].mxu0  ;;  %v18655_v27 = vpop.f32.mrb[86].mxu1 }
 0x8f1   :  { %v13582_v59 = vpop.f32.mrb[87].mxu0  ;;  %v13687_v26 = vpop.f32.mrb[87].mxu1 }
 0x8f4   :  { %v6613_v55 = vpop.f32.mrb[88].mxu0  ;;  %v18657_v63 = vpop.f32.mrb[88].mxu1 }
 0x8f5   :  { %v13585_v50 = vpop.f32.mrb[89].mxu0  ;;  %v13690_v44 = vpop.f32.mrb[89].mxu1 }
 0x8f6   :  { %v7368_v50 = vld [vmem:[%s15871_s21 + $0x258] sm:$0xff] }
 0x8f8   :  { %v18659_v31 = vpop.f32.mrb[90].mxu0  ;;  %v18661_v11 = vpop.f32.mrb[90].mxu1 }
 0x8f9   :  { %v13588_v7 = vpop.f32.mrb[91].mxu0  ;;  %v13693_v16 = vpop.f32.mrb[91].mxu1 }
 0x8fa   :  { %v7385_v16 = vld [vmem:[%s15871_s21 + $0x2e0] sm:$0xff] }
 0x8fc   :  { %v18663_v61 = vpop.f32.mrb[92].mxu0  ;;  %v18667_v34 = vpop.f32.mrb[92].mxu1 }
 0x8fd   :  { %v13591_v54 = vpop.f32.mrb[93].mxu0  ;;  %v13696_v30 = vpop.f32.mrb[93].mxu1 }
 0x900   :  { %v6714_v14 = vpop.f32.mrb[94].mxu0  ;;  %v18673_v25 = vpop.f32.mrb[94].mxu1 }
 0x901   :  { %7469 = vmatprep.mubr.f32.mxu1 %v6714_v14  ;;  %v13614_v3 = vpop.f32.mrb[95].mxu0  ;;  %v13754_v51 = vpop.f32.mrb[95].mxu1  ;;  %v7369_v14 = vld [vmem:[%s15871_s21 + $0x260] sm:$0xff] }
 0x902   :  { %7470 = vmatmul.mubr.f32.vlgmr.msra.gmra.mrb[104].mxu1 %v6603_v48  ;;  %v7384_v48 = vld [vmem:[%s15871_s21 + $0x2d8] sm:$0xff]  ;;  %v15086_v3 = vpack.c.bf16 %v7392_v53, %v7391_v35 }
 0x903   :  { %15053 = vmatpush3.bf16.msra.mxu1 %v15052_v33  ;;  %v15070_v26 = vpack.c.bf16 %v7384_v48, %v7383_v56  ;;  %v15074_v33 = vpack.c.bf16 %v7386_v41, %v7385_v16 }
 0x904   :  { %v6719_v20 = vpop.f32.mrb[96].mxu0  ;;  %15055 = vmatprep.subr.bf16.mxu1 %v15054_v19  ;;  %v18679_v52 = vpop.f32.mrb[96].mxu1  ;;  %v7370_v19 = vld [vmem:[%s15871_s21 + $0x268] sm:$0xff] }
 0x905   :  { %7474 = vmatprep.mubr.f32.mxu1 %v6719_v20  ;;  %v13617_v5 = vpop.f32.mrb[97].mxu0  ;;  %v13757_v47 = vpop.f32.mrb[97].mxu1  ;;  %v7371_v20 = vld [vmem:[%s15871_s21 + $0x270] sm:$0xff] }
 0x906   :  { %7475 = vmatmul.mubr.f32.gmra.mrb[106].mxu1 %v6608_v13  ;;  %v7390_v13 = vld [vmem:[%s15871_s21 + $0x308] sm:$0xff]  ;;  %v7395_v5 = vld [vmem:[%s15871_s21 + $0x330] sm:$0xff] }
 0x907   :  { %15057 = vmatpush3.bf16.msra.mxu1 %v15056_v38  ;;  %v15083_v12 = vpack.c.bf16 %v7390_v13, %v7389_v46 }
 0x908   :  { %v6724_v1 = vpop.f32.mrb[98].mxu0  ;;  %15059 = vmatprep.subr.bf16.mxu1 %v15058_v57  ;;  %v18685_v28 = vpop.f32.mrb[98].mxu1  ;;  %v7372_v57 = vld [vmem:[%s15871_s21 + $0x278] sm:$0xff] }
 0x909   :  { %7479 = vmatprep.mubr.f32.mxu1 %v6724_v1  ;;  %v13620_v62 = vpop.f32.mrb[99].mxu0  ;;  %v13760_v24 = vpop.f32.mrb[99].mxu1  ;;  %v15080_v15 = vpack.c.bf16 %v7372_v57, %v7371_v20  ;;  %v7398_v1 = vld [vmem:[%s15871_s21 + $0x348] sm:$0xff] }
 0x90a   :  { %7480 = vmatmul.mubr.f32.gmra.mrb[108].mxu1 %v6613_v55  ;;  %v7367_v55 = vld [vmem:[%s15871_s21 + $0x250] sm:$0xff]  ;;  %v7400_v62 = vld [vmem:[%s15871_s21 + $0x358] sm:$0xff] }
 0x90b   :  { %15061 = vmatpush3.bf16.msra.mxu1 %v15060_v22  ;;  %v15072_v54 = vpack.c.bf16 %v7368_v50, %v7367_v55  ;;  %v7397_v22 = vld [vmem:[%s15871_s21 + $0x340] sm:$0xff] }
 0x90c   :  { %v6729_v10 = vpop.f32.mrb[100].mxu0  ;;  %15063 = vmatprep.subr.bf16.mxu1 %v15062_v2  ;;  %v18691_v45 = vpop.f32.mrb[100].mxu1  ;;  %v15095_v58 = vpack.c.bf16 %v7398_v1, %v7397_v22 }
 0x90d   :  { %7484 = vmatprep.mubr.f32.mxu1 %v6729_v10  ;;  %v13623_v4 = vpop.f32.mrb[101].mxu0  ;;  %v13763_v8 = vpop.f32.mrb[101].mxu1 }
 0x90e   :  { %7485 = vmatmul.mubr.f32.gmra.mrb[110].mxu1 %v18659_v31  ;;  %v7404_v4 = vld [vmem:[%s15871_s21 + $0x378] sm:$0xff] }
 0x90f   :  { %15065 = vmatpush3.bf16.msra.mxu1 %v15064_v36  ;;  %v7401_v36 = vld [vmem:[%s15871_s21 + $0x360] sm:$0xff]  ;;  %v15104_v8 = vpack.c.bf16 %v7404_v4, %v7403_v40 }
 0x910   :  { %v6734_v59 = vpop.f32.mrb[102].mxu0  ;;  %15067 = vmatprep.subr.bf16.mxu1 %v15066_v18  ;;  %v18700_v44 = vpop.f32.mrb[102].mxu1 }
 0x911   :  { %v13626_v7 = vpop.f32.mrb[103].mxu0  ;;  %7489 = vmatprep.mubr.f32.mxu1 %v6734_v59  ;;  %v13766_v31 = vpop.f32.mrb[103].mxu1 }
 0x912   :  { %7490 = vmatmul.mubr.f32.gmra.mrb[112].mxu1 %v18663_v61  ;;  %v7388_v61 = vld [vmem:[%s15871_s21 + $0x2f8] sm:$0xff] }
 0x913   :  { %15069 = vmatpush3.bf16.msra.mxu1 %v15068_v29  ;;  %7649 = vmatprep.mubr.f32.mxu1 %v18673_v25  ;;  %v15076_v25 = vpack.c.bf16 %v7370_v19, %v7369_v14  ;;  %v15078_v38 = vpack.c.bf16 %v7388_v61, %v7387_v21 }
 0x914   :  { %v6825_v30 = vpop.f32.mrb[104].mxu0  ;;  %15071 = vmatprep.subr.bf16.mxu1 %v15070_v26 }
 0x915   :  { %7560 = vmatmul.mubr.f32.vlgmr.msra.gmra.mrb[134].mxu0 %v6825_v30  ;;  %v13649_v23 = vpop.f32.mrb[105].mxu0 }
 0x916   :  { %7564 = vmatprep.mubr.f32.mxu0 %v18655_v27  ;;  %15084 = vmatpush3.bf16.msra.mxu0 %v15083_v12  ;;  %v15089_v27 = vpack.c.bf16 %v7394_v60, %v7393_v49 }
 0x917   :  { %15073 = vmatpush3.bf16.msra.mxu1 %v15072_v54  ;;  %15085 = vmatprep.subr.bf16.mxu0 %v19437_v43 }
 0x918   :  { %v6830_v51 = vpop.f32.mrb[106].mxu0  ;;  %15075 = vmatprep.subr.bf16.mxu1 %v15074_v33 }
 0x919   :  { %7565 = vmatmul.mubr.f32.gmra.mrb[136].mxu0 %v6830_v51  ;;  %v13652_v9 = vpop.f32.mrb[107].mxu0 }
 0x91a   :  { %7569 = vmatprep.mubr.f32.mxu0 %v18657_v63  ;;  %15087 = vmatpush3.bf16.msra.mxu0 %v15086_v3  ;;  %v15092_v63 = vpack.c.bf16 %v7396_v37, %v7395_v5 }
 0x91b   :  { %15077 = vmatpush3.bf16.msra.mxu1 %v15076_v25  ;;  %15088 = vmatprep.subr.bf16.mxu0 %v19437_v43 }
 0x91c   :  { %v6835_v32 = vpop.f32.mrb[108].mxu0  ;;  %15079 = vmatprep.subr.bf16.mxu1 %v15078_v38 }
 0x91d   :  { %7570 = vmatmul.mubr.f32.gmra.mrb[138].mxu0 %v6835_v32  ;;  %v13655_v47 = vpop.f32.mrb[109].mxu0 }
 0x91e   :  { %7574 = vmatprep.mubr.f32.mxu0 %v18661_v11  ;;  %15090 = vmatpush3.bf16.msra.mxu0 %v15089_v27  ;;  %v7399_v11 = vld [vmem:[%s15871_s21 + $0x350] sm:$0xff] }
 0x91f   :  { %15081 = vmatpush3.bf16.msra.mxu1 %v15080_v15  ;;  %15091 = vmatprep.subr.bf16.mxu0 %v19437_v43  ;;  %v15098_v24 = vpack.c.bf16 %v7400_v62, %v7399_v11 }
 0x920   :  { %v6840_v2 = vpop.f32.mrb[110].mxu0  ;;  %15106 = vmatprep.subr.bf16.mxu1 %v19437_v43 }
 0x921   :  { %7575 = vmatmul.mubr.f32.gmra.mrb[140].mxu0 %v6840_v2  ;;  %v13658_v0 = vpop.f32.mrb[111].mxu0 }
 0x922   :  { %7579 = vmatprep.mubr.f32.mxu0 %v18667_v34  ;;  %15093 = vmatpush3.bf16.msra.mxu0 %v15092_v63  ;;  %v7402_v34 = vld [vmem:[%s15871_s21 + $0x368] sm:$0xff]  ;;  %s19440_s21 = sld [smem:[#allocation19_spill]] }
 0x923   :  { %15094 = vmatprep.subr.bf16.mxu0 %v19437_v43  ;;  %v15101_v17 = vpack.c.bf16 %v7402_v34, %v7401_v36 }
 0x924   :  { %v6845_v39 = vpop.f32.mrb[112].mxu0 }
 0x925   :  { %7580 = vmatmul.mubr.f32.gmra.mrb[142].mxu0 %v6845_v39  ;;  %v13661_v42 = vpop.f32.mrb[113].mxu0 }
 0x926   :  { %15096 = vmatpush3.bf16.msra.mxu0 %v15095_v58  ;;  %13834 = vmatprep.mubr.msk.f32.mxu0 %vm15838_vm3, %v15839_v6 }
 0x927   :  { %15097 = vmatprep.subr.bf16.mxu0 %v19437_v43 }
 0x928   :  { %v7047_v10 = vpop.f32.mrb[114].mxu0 }
 0x929   :  { %7650 = vmatmul.mubr.f32.vlgmr.msra.gmra.mrb[114].mxu1 %v7047_v10  ;;  %v13719_v18 = vpop.f32.mrb[115].mxu0 }
 0x92a   :  { %7654 = vmatprep.mubr.f32.mxu1 %v18679_v52  ;;  %15099 = vmatpush3.bf16.msra.mxu0 %v15098_v24 }
 0x92b   :  { %15100 = vmatprep.subr.bf16.mxu0 %v19437_v43 }
 0x92c   :  { %v7052_v56 = vpop.f32.mrb[116].mxu0 }
 0x92d   :  { %7655 = vmatmul.mubr.f32.gmra.mrb[116].mxu1 %v7052_v56  ;;  %v13722_v48 = vpop.f32.mrb[117].mxu0 }
 0x92e   :  { %7659 = vmatprep.mubr.f32.mxu1 %v18685_v28  ;;  %15102 = vmatpush3.bf16.msra.mxu0 %v15101_v17 }
 0x92f   :  { %15103 = vmatprep.subr.bf16.mxu0 %v19437_v43 }
 0x930   :  { %v7057_v29 = vpop.f32.mrb[118].mxu0 }
 0x931   :  { %7660 = vmatmul.mubr.f32.gmra.mrb[118].mxu1 %v7057_v29  ;;  %v13725_v46 = vpop.f32.mrb[119].mxu0 }
 0x932   :  { %7664 = vmatprep.mubr.f32.mxu1 %v18691_v45  ;;  %15105 = vmatpush3.bf16.msra.mxu0 %v15104_v8 }
 0x933   :  { %15118 = vmatprep.subr.bf16.mxu0 %v19437_v43 }
 0x934   :  { %v7062_v52 = vpop.f32.mrb[120].mxu0 }
 0x935   :  { %7665 = vmatmul.mubr.f32.gmra.mrb[120].mxu1 %v7062_v52  ;;  %v13728_v13 = vpop.f32.mrb[121].mxu0 }
 0x936   :  { %7669 = vmatprep.mubr.f32.mxu1 %v18700_v44 }
 0x938   :  { %v7067_v59 = vpop.f32.mrb[122].mxu0 }
 0x939   :  { %7670 = vmatmul.mubr.f32.gmra.mrb[122].mxu1 %v7067_v59  ;;  %v13731_v28 = vpop.f32.mrb[123].mxu0 }
 0x93a   :  { %13859 = vmatprep.mubr.msk.f32.mxu1 %vm15838_vm3, %v15839_v6 }
 0x93c   :  { %v7269_v26 = vpop.f32.mrb[124].mxu0 }
 0x93d   :  { %13835 = vmatmul.mubr.f32.vlgmr.msra.gmra.mrb[144].mxu0 %v7269_v26  ;;  %v13789_v55 = vpop.f32.mrb[125].mxu0 }
 0x93e   :  { %13837 = vmatprep.mubr.msk.f32.mxu0 %vm15838_vm3, %v15839_v6 }
 0x940   :  { %v7274_v45 = vpop.f32.mrb[126].mxu0 }
 0x941   :  { %13838 = vmatmul.mubr.f32.gmra.mrb[146].mxu0 %v7274_v45  ;;  %v13792_v50 = vpop.f32.mrb[127].mxu0 }
 0x942   :  { %13840 = vmatprep.mubr.msk.f32.mxu0 %vm15838_vm3, %v15839_v6  ;;  %v12325_v50 = vld [vmem:[%s19438_s13] ss:$0 sm:$0xff] }
 0x944   :  { %v7279_v7 = vpop.f32.mrb[128].mxu0 }
 0x945   :  { %13841 = vmatmul.mubr.f32.gmra.mrb[148].mxu0 %v7279_v7  ;;  %v13795_v44 = vpop.f32.mrb[129].mxu0 }
 0x946   :  { %13843 = vmatprep.mubr.msk.f32.mxu0 %vm15838_vm3, %v15839_v6 }
 0x948   :  { %v7284_v16 = vpop.f32.mrb[130].mxu0 }
 0x949   :  { %13844 = vmatmul.mubr.f32.gmra.mrb[150].mxu0 %v7284_v16  ;;  %v13798_v41 = vpop.f32.mrb[131].mxu0 }
 0x94a   :  { %13846 = vmatprep.mubr.msk.f32.mxu0 %vm15838_vm3, %v15839_v6  ;;  %v12326_v41 = vld [vmem:[%s19439_s17] ss:$0 sm:$0xff] }
 0x94c   :  { %v7289_v31 = vpop.f32.mrb[132].mxu0 }
 0x94d   :  { %13847 = vmatmul.mubr.f32.gmra.mrb[152].mxu0 %v7289_v31  ;;  %v13801_v12 = vpop.f32.mrb[133].mxu0 }
 0x94e   :  { %13897 = vmatprep.mubr.msk.f32.mxu0 %vm15838_vm3, %v15839_v6 }
 0x9d5   :  { %v12879_v54 = vpop.f32.mrb[104].mxu1 }
 0x9d6   :  { %v12880_v35 = vpop.f32.mrb[105].mxu1 }
 0x9d7   :  { %v12881_v53 = vadd.f32 %v12880_v35, %v12879_v54 }
 0x9d9   :  { %v12882_v30 = vpop.f32.mrb[106].mxu1 }
 0x9da   :  { %v12883_v33 = vpop.f32.mrb[107].mxu1 }
 0x9db   :  { %v12884_v14 = vadd.f32 %v12883_v33, %v12882_v30 }
 0x9dd   :  { %v12885_v19 = vpop.f32.mrb[108].mxu1 }
 0x9de   :  { %v12886_v23 = vpop.f32.mrb[109].mxu1 }
 0x9df   :  { %v12887_v21 = vadd.f32 %v12886_v23, %v12885_v19 }
 0x9e1   :  { %v12888_v61 = vpop.f32.mrb[110].mxu1 }
 0x9e2   :  { %v12889_v3 = vpop.f32.mrb[111].mxu1 }
 0x9e3   :  { %v12890_v25 = vadd.f32 %v12889_v3, %v12888_v61 }
 0x9e5   :  { %v12891_v49 = vpop.f32.mrb[112].mxu1 }
 0x9e6   :  { %v12892_v60 = vpop.f32.mrb[113].mxu1 }
 0x9e7   :  { %v12893_v51 = vadd.f32 %v12892_v60, %v12891_v49 }
 0x9e8   :  { %v12926_v38 = vpop.f32.mrb[134].mxu0 }
 0x9e9   :  { %v12927_v20 = vpop.f32.mrb[135].mxu0 }
 0x9ea   :  { %v12928_v57 = vadd.f32 %v12927_v20, %v12926_v38 }
 0x9ec   :  { %v7562_v9 = vadd.f32 %v12928_v57, %v12881_v53  ;;  %v12929_v27 = vpop.f32.mrb[136].mxu0 }
 0x9ed   :  { %v12930_v15 = vpop.f32.mrb[137].mxu0 }
 0x9ee   :  { %v12931_v5 = vadd.f32 %v12930_v15, %v12929_v27 }
 0x9f0   :  { %v7567_v37 = vadd.f32 %v12931_v5, %v12884_v14  ;;  %v12932_v32 = vpop.f32.mrb[138].mxu0 }
 0x9f1   :  { %v12933_v47 = vpop.f32.mrb[139].mxu0 }
 0x9f2   :  { %v12934_v63 = vadd.f32 %v12933_v47, %v12932_v32 }
 0x9f4   :  { %v7572_v22 = vadd.f32 %v12934_v63, %v12887_v21  ;;  %v12935_v1 = vpop.f32.mrb[140].mxu0 }
 0x9f5   :  { %v12936_v2 = vpop.f32.mrb[141].mxu0 }
 0x9f6   :  { %v12937_v0 = vadd.f32 %v12936_v2, %v12935_v1 }
 0x9f8   :  { %v7577_v58 = vadd.f32 %v12937_v0, %v12890_v25  ;;  %v12938_v11 = vpop.f32.mrb[142].mxu0 }
 0x9f9   :  { %v12939_v62 = vpop.f32.mrb[143].mxu0 }
 0x9fa   :  { %v12940_v39 = vadd.f32 %v12939_v62, %v12938_v11  ;;  %v7804_v11 = vld [vmem:[%s19440_s21] sm:$0xff] }
 0x9fc   :  { %v7582_v42 = vadd.f32 %v12940_v39, %v12893_v51  ;;  %v12973_v24 = vpop.f32.mrb[114].mxu1  ;;  %v12336_v39 = vld [vmem:[%s19440_s21 + $0x30] sm:$0xff] }
 0x9fd   :  { %v12974_v36 = vpop.f32.mrb[115].mxu1 }
 0x9fe   :  { %v12975_v34 = vadd.f32 %v12974_v36, %v12973_v24  ;;  %v12337_v24 = vld [vmem:[%s19440_s21 + $0x38] sm:$0xff]  ;;  %v7806_v36 = vld [vmem:[%s19440_s21 + $0x10] sm:$0xf] }
 0xa00   :  { %v12976_v10 = vpop.f32.mrb[116].mxu1  ;;  %v7652_v18 = vadd.f32 %v12975_v34, %v7562_v9  ;;  %v12338_v34 = vld [vmem:[%s19440_s21 + $0x40] sm:$0xf] }
 0xa01   :  { %v12977_v17 = vpop.f32.mrb[117].mxu1 }
 0xa02   :  { %v12978_v40 = vadd.f32 %v12977_v17, %v12976_v10  ;;  %v12330_v10 = vld [vmem:[%s19440_s21 + $0x18] sm:$0xff]  ;;  %v12331_v17 = vld [vmem:[%s19440_s21 + $0x20] sm:$0xff] }
 0xa04   :  { %v12979_v4 = vpop.f32.mrb[118].mxu1  ;;  %v7657_v56 = vadd.f32 %v12978_v40, %v7567_v37  ;;  %v12349_v40 = vld [vmem:[%s19440_s21 + $0x68] sm:$0xff] }
 0xa05   :  { %v12980_v48 = vpop.f32.mrb[119].mxu1 }
 0xa06   :  { %v12981_v8 = vadd.f32 %v12980_v48, %v12979_v4  ;;  %v12332_v4 = vld [vmem:[%s19440_s21 + $0x28] sm:$0xf] }
 0xa07   :  { %v12342_v48 = vld [vmem:[%s19440_s21 + $0x48] sm:$0xff] }
 0xa08   :  { %v12982_v29 = vpop.f32.mrb[120].mxu1  ;;  %v7662_v46 = vadd.f32 %v12981_v8, %v7572_v22  ;;  %v12360_v8 = vld [vmem:[%s19440_s21 + $0x90] sm:$0xff] }
 0xa09   :  { %v12983_v52 = vpop.f32.mrb[121].mxu1 }
 0xa0a   :  { %v12984_v13 = vadd.f32 %v12983_v52, %v12982_v29  ;;  %v12343_v29 = vld [vmem:[%s19440_s21 + $0x50] sm:$0xff]  ;;  %v12344_v52 = vld [vmem:[%s19440_s21 + $0x58] sm:$0xf] }
 0xa0c   :  { %v12985_v59 = vpop.f32.mrb[122].mxu1  ;;  %v7667_v28 = vadd.f32 %v12984_v13, %v7577_v58  ;;  %v12362_v13 = vld [vmem:[%s19440_s21 + $0xa0] sm:$0xf] }
 0xa0d   :  { %v12986_v26 = vpop.f32.mrb[123].mxu1 }
 0xa0e   :  { %v12987_v55 = vadd.f32 %v12986_v26, %v12985_v59  ;;  %v12354_v59 = vld [vmem:[%s19440_s21 + $0x78] sm:$0xff]  ;;  %v12356_v26 = vld [vmem:[%s19440_s21 + $0x88] sm:$0xf] }
 0xa10   :  { %v7741_v45 = vpop.f32.mrb[144].mxu0  ;;  %v7672_v7 = vadd.f32 %v12987_v55, %v7582_v42  ;;  %v7805_v42 = vld [vmem:[%s19440_s21 + $0x8] sm:$0xff]  ;;  %v8532_v55 = vld [vmem:[%s19441_s29 + $0x100] sm:$0xff] }
 0xa11   :  { %v7742_v44 = vadd.f32 %v7741_v45, %v7652_v18  ;;  %v13836_v16 = vpop.f32.mrb[145].mxu0  ;;  %v12348_v18 = vld [vmem:[%s19440_s21 + $0x60] sm:$0xff]  ;;  %v8533_v45 = vld [vmem:[%s19441_s29 + $0x108] sm:$0xff] }
 0xa12   :  { %v8534_v16 = vld [vmem:[%s19441_s29 + $0x110] sm:$0xff] }
 0xa13   :  { %v7772_v31 = vmul.f32 %v12325_v50, %v7742_v44  ;;  %v8517_v44 = vld [vmem:[%s19441_s29 + $0x88] sm:$0xff] }
 0xa14   :  { %v7746_v12 = vpop.f32.mrb[146].mxu0 }
 0xa15   :  { %v7784_v54 = vadd.f32 %v12326_v41, %v7772_v31  ;;  %v7747_v35 = vadd.f32 %v7746_v12, %v7657_v56  ;;  %v13839_v53 = vpop.f32.mrb[147].mxu0  ;;  %v12350_v56 = vld [vmem:[%s19440_s21 + $0x70] sm:$0xf]  ;;  %v8500_v12 = vld [vmem:[%s19441_s29] sm:$0xff] }
 0xa17   :  { %v7773_v30 = vmul.f32 %v12325_v50, %v7747_v35  ;;  %v7794_v14 = vmul.f32 0.01, %v7784_v54  ;;  %vm7789_vm8 = vcmp.gt.f32.partialorder %v7784_v54, 0.0  ;;  %v8518_v35 = vld [vmem:[%s19441_s29 + $0x90] sm:$0xff] }
 0xa18   :  { %v7751_v33 = vpop.f32.mrb[148].mxu0 }
 0xa19   :  { %v7785_v19 = vadd.f32 %v12326_v41, %v7773_v30  ;;  %v7752_v23 = vadd.f32 %v7751_v33, %v7662_v46  ;;  %v13842_v21 = vpop.f32.mrb[149].mxu0  ;;  %v7799_v49 = vsel %vm7789_vm8, %v7784_v54, %v7794_v14  ;;  %v12361_v46 = vld [vmem:[%s19440_s21 + $0x98] sm:$0xff]  ;;  %v8501_v54 = vld [vmem:[%s19441_s29 + $0x8] sm:$0xff]  ;;  %v8536_v14 = vld [vmem:[%s19441_s29 + $0x120] sm:$0xff] }
 0xa1a   :  { %v15150_v30 = vpack.c.bf16 %v8501_v54, %v8500_v12  ;;  %v8519_v33 = vld [vmem:[%s19441_s29 + $0x98] sm:$0xff]  ;;  %v8502_v21 = vld [vmem:[%s19441_s29 + $0x10] sm:$0xff] }
 0xa1b   :  { %vm7790_vm9 = vcmp.gt.f32.partialorder %v7785_v19, 0.0  ;;  %v7795_v61 = vmul.f32 0.01, %v7785_v19  ;;  %v7774_v3 = vmul.f32 %v12325_v50, %v7752_v23  ;;  %v15152_v23 = vpack.c.bf16 %v8519_v33, %v8518_v35 }
 0xa1c   :  { %v7756_v25 = vpop.f32.mrb[150].mxu0 }
 0xa1d   :  { %v7800_v60 = vsel %vm7790_vm9, %v7785_v19, %v7795_v61  ;;  %v7786_v51 = vadd.f32 %v12326_v41, %v7774_v3  ;;  %v7757_v38 = vadd.f32 %v7756_v25, %v7667_v28  ;;  %v13845_v20 = vpop.f32.mrb[151].mxu0  ;;  %v12355_v28 = vld [vmem:[%s19440_s21 + $0x80] sm:$0xff]  ;;  %v8537_v19 = vld [vmem:[%s19441_s29 + $0x128] sm:$0xff]  ;;  %v8503_v61 = vld [vmem:[%s19441_s29 + $0x18] sm:$0xff] }
 0xa1e   :  { %v18759_v57 = vpack.c.bf16 %v7800_v60, %v7799_v49  ;;  %v8520_v3 = vld [vmem:[%s19441_s29 + $0xa0] sm:$0xff]  ;;  %v15154_v25 = vpack.c.bf16 %v8503_v61, %v8502_v21  ;;  %v8521_v49 = vld [vmem:[%s19441_s29 + $0xa8] sm:$0xff]  ;;  %v15187_v20 = vpack.c.bf16 %v8537_v19, %v8536_v14  ;;  %v8531_v21 = vld [vmem:[%s19441_s29 + $0xf8] sm:$0xff] }
 0xa1f   :  { %v7775_v9 = vmul.f32 %v12325_v50, %v7757_v38  ;;  %v7796_v15 = vmul.f32 0.01, %v7786_v51  ;;  %vm7791_vm10 = vcmp.gt.f32.partialorder %v7786_v51, 0.0  ;;  %v15156_v60 = vpack.c.bf16 %v8521_v49, %v8520_v3  ;;  %v8505_v38 = vld [vmem:[%s19441_s29 + $0x28] sm:$0xff]  ;;  %v8548_v61 = vld [vmem:[%s19441_s29 + $0x180] sm:$0xff] }
 0xa20   :  { %v7761_v27 = vpop.f32.mrb[152].mxu0  ;;  %15108 = vmatpush3.bf16.msra.mxu1 %v18759_v57  ;;  %15120 = vmatpush3.bf16.msra.mxu0 %v18759_v57 }
 0xa21   :  { %v7787_v5 = vadd.f32 %v12326_v41, %v7775_v9  ;;  %v7762_v37 = vadd.f32 %v7761_v27, %v7672_v7  ;;  %15109 = vmatprep.subr.bf16.mxu1 %v19437_v43  ;;  %15121 = vmatprep.subr.bf16.mxu0 %v19437_v43  ;;  %v13848_v32 = vpop.f32.mrb[153].mxu0  ;;  %v7801_v22 = vsel %vm7791_vm10, %v7786_v51, %v7796_v15  ;;  %v8504_v51 = vld [vmem:[%s19441_s29 + $0x20] sm:$0xff]  ;;  %v8523_v9 = vld [vmem:[%s19441_s29 + $0xb8] sm:$0xff]  ;;  %v8538_v27 = vld [vmem:[%s19441_s29 + $0x130] sm:$0xff] }
 0xa22   :  { %v15181_v7 = vpack.c.bf16 %v8533_v45, %v8532_v55  ;;  %v8539_v15 = vld [vmem:[%s19441_s29 + $0x138] sm:$0xff]  ;;  %v8506_v32 = vld [vmem:[%s19441_s29 + $0x30] sm:$0xff] }
 0xa23   :  { %vm7792_vm11 = vcmp.gt.f32.partialorder %v7787_v5, 0.0  ;;  %v7797_v47 = vmul.f32 0.01, %v7787_v5  ;;  %v7776_v63 = vmul.f32 %v12325_v50, %v7762_v37  ;;  %v8516_v50 = vld [vmem:[%s19441_s29 + $0x80] sm:$0xff]  ;;  %v8546_v55 = vld [vmem:[%s19441_s29 + $0x170] sm:$0xff]  ;;  %v8547_v45 = vld [vmem:[%s19441_s29 + $0x178] sm:$0xff] }
 0xa24   :  { %v15148_v31 = vpack.c.bf16 %v8517_v44, %v8516_v50 }
 0xa25   :  { %v7802_v1 = vsel %vm7792_vm11, %v7787_v5, %v7797_v47  ;;  %v7788_v2 = vadd.f32 %v12326_v41, %v7776_v63  ;;  %v8535_v41 = vld [vmem:[%s19441_s29 + $0x118] sm:$0xff]  ;;  %v15158_v5 = vpack.c.bf16 %v8505_v38, %v8504_v51  ;;  %v15190_v63 = vpack.c.bf16 %v8539_v15, %v8538_v27  ;;  %v8514_v51 = vld [vmem:[%s19441_s29 + $0x70] sm:$0xff] }
 0xa26   :  { %v18765_v0 = vpack.c.bf16 %v7802_v1, %v7801_v22  ;;  %v15184_v53 = vpack.c.bf16 %v8535_v41, %v8534_v16  ;;  %v8507_v47 = vld [vmem:[%s19441_s29 + $0x38] sm:$0xff]  ;;  %v8524_v22 = vld [vmem:[%s19441_s29 + $0xc0] sm:$0xff]  ;;  %v8525_v1 = vld [vmem:[%s19441_s29 + $0xc8] sm:$0xff]  ;;  %vm9529_vm11 = vcmask 80896  }
 0xa27   :  { %v7798_v58 = vmul.f32 0.01, %v7788_v2  ;;  %vm7793_vm12 = vcmp.gt.f32.partialorder %v7788_v2, 0.0  ;;  %v8515_v38 = vld [vmem:[%s19441_s29 + $0x78] sm:$0xff]  ;;  %v8550_v15 = vld [vmem:[%s19441_s29 + $0x190] sm:$0xff] }
 0xa28   :  { %15111 = vmatpush3.bf16.msra.mxu1 %v18765_v0  ;;  %15123 = vmatpush3.bf16.msra.mxu0 %v18765_v0 }
 0xa29   :  { %13857 = vmatprep.subr.mxu1 %v15839_v6  ;;  %13895 = vmatprep.subr.mxu0 %v15839_v6  ;;  %v18772_v62 = vsel %vm7793_vm12, %v7788_v2, %v7798_v58  ;;  %v8540_v2 = vld [vmem:[%s19441_s29 + $0x140] sm:$0xff]  ;;  %v15162_v58 = vpack.c.bf16 %v8507_v47, %v8506_v32 }
 0xa2c   :  { %13858 = vmatpush3.msra.mxu1 %v18772_v62  ;;  %13896 = vmatpush3.msra.mxu0 %v18772_v62 }
 0xa2d   :  { %13860 = vmatmul.mubr.msk.f32.vlgmr.msra.gmra.mrb[124].mxu1 %vm7807_vm13, %v7804_v11  ;;  %15112 = vmatprep.subr.bf16.mxu1 %v19437_v43  ;;  %v15164_v11 = vpack.c.bf16 %v8525_v1, %v8524_v22  ;;  %v8552_v1 = vld [vmem:[%s19441_s29 + $0x1a0] sm:$0xff] }
 0xa2e   :  { %13898 = vmatmul.mubr.msk.f32.vlgmr.msra.gmra.mrb[154].mxu0 %vm7807_vm13, %v12336_v39  ;;  %15130 = vmatprep.subr.bf16.mxu0 %v19437_v43  ;;  %v8509_v39 = vld [vmem:[%s19441_s29 + $0x48] sm:$0xff] }
 0xa2f   :  { %15114 = vmatpush3.bf16.msra.mxu1 %v18759_v57  ;;  %15132 = vmatpush3.bf16.msra.mxu0 %v18759_v57 }
 0xa30   :  { %13862 = vmatprep.mubr.msk.f32.mxu1 %vm15838_vm3, %v15839_v6  ;;  %13900 = vmatprep.mubr.msk.f32.mxu0 %vm15838_vm3, %v15839_v6 }
 0xa31   :  { %13863 = vmatmul.mubr.msk.f32.gmra.mrb[126].mxu1 %vm7807_vm13, %v7805_v42  ;;  %15115 = vmatprep.subr.bf16.mxu1 %v19437_v43 }
 0xa32   :  { %13901 = vmatmul.mubr.msk.f32.gmra.mrb[156].mxu0 %vm7807_vm13, %v12337_v24  ;;  %15133 = vmatprep.subr.bf16.mxu0 %v19437_v43  ;;  %v8526_v24 = vld [vmem:[%s19441_s29 + $0xd0] sm:$0xff] }
 0xa33   :  { %15117 = vmatpush3.bf16.msra.mxu1 %v18765_v0  ;;  %15135 = vmatpush3.bf16.msra.mxu0 %v18765_v0 }
 0xa34   :  { %13865 = vmatprep.mubr.msk.f32.mxu1 %vm15838_vm3, %v15839_v6  ;;  %13903 = vmatprep.mubr.msk.f32.mxu0 %vm15838_vm3, %v15839_v6 }
 0xa35   :  { %13866 = vmatmul.mubr.msk.f32.gmra.mrb[128].mxu1 %vm7807_vm13, %v7806_v36  ;;  %13876 = vmatprep.subr.mxu1 %v15839_v6  ;;  %v8527_v36 = vld [vmem:[%s19441_s29 + $0xd8] sm:$0xff] }
 0xa36   :  { %13904 = vmatmul.mubr.msk.f32.gmra.mrb[158].mxu0 %vm7807_vm13, %v12338_v34  ;;  %13933 = vmatprep.subr.mxu0 %v15839_v6  ;;  %v8542_v34 = vld [vmem:[%s19441_s29 + $0x150] sm:$0xff] }
 0xa37   :  { %13877 = vmatpush3.msra.mxu1 %v18772_v62  ;;  %13934 = vmatpush3.msra.mxu0 %v18772_v62 }
 0xa38   :  { %13878 = vmatprep.mubr.msk.f32.mxu1 %vm15838_vm3, %v15839_v6  ;;  %15124 = vmatprep.subr.bf16.mxu1 %v19437_v43 }
 0xa39   :  { %13935 = vmatprep.mubr.msk.f32.mxu0 %vm15838_vm3, %v15839_v6  ;;  %15142 = vmatprep.subr.bf16.mxu0 %v19437_v43 }
 0xa3a   :  { %13879 = vmatmul.mubr.msk.f32.vlgmr.msra.gmra.mrb[130].mxu1 %vm7807_vm13, %v12330_v10  ;;  %13936 = vmatmul.mubr.msk.f32.vlgmr.msra.gmra.mrb[160].mxu0 %vm7807_vm13, %v12348_v18  ;;  %v8543_v10 = vld [vmem:[%s19441_s29 + $0x158] sm:$0xff] }
 0xa3b   :  { %15126 = vmatpush3.bf16.msra.mxu1 %v18759_v57  ;;  %15144 = vmatpush3.bf16.msra.mxu0 %v18759_v57 }
 0xa3c   :  { %13881 = vmatprep.mubr.msk.f32.mxu1 %vm15838_vm3, %v15839_v6  ;;  %15127 = vmatprep.subr.bf16.mxu1 %v19437_v43 }
 0xa3d   :  { %15145 = vmatprep.subr.bf16.mxu0 %v19437_v43  ;;  %13938 = vmatprep.mubr.msk.f32.mxu0 %vm15838_vm3, %v15839_v6 }
 0xa3e   :  { %13882 = vmatmul.mubr.msk.f32.gmra.mrb[132].mxu1 %vm7807_vm13, %v12331_v17  ;;  %13939 = vmatmul.mubr.msk.f32.gmra.mrb[162].mxu0 %vm7807_vm13, %v12349_v40  ;;  %v15168_v17 = vpack.c.bf16 %v8527_v36, %v8526_v24  ;;  %v8510_v40 = vld [vmem:[%s19441_s29 + $0x50] sm:$0xff]  ;;  %v8555_v36 = vld [vmem:[%s19441_s29 + $0x1b8] sm:$0xff] }
 0xa3f   :  { %15129 = vmatpush3.bf16.msra.mxu1 %v18765_v0  ;;  %15147 = vmatpush3.bf16.msra.mxu0 %v18765_v0  ;;  %v8554_v24 = vld [vmem:[%s19441_s29 + $0x1b0] sm:$0xff] }
 0xa40   :  { %13884 = vmatprep.mubr.msk.f32.mxu1 %vm15838_vm3, %v15839_v6  ;;  %13914 = vmatprep.subr.mxu1 %v15839_v6 }
 0xa41   :  { %13971 = vmatprep.subr.mxu0 %v15839_v6  ;;  %13941 = vmatprep.mubr.msk.f32.mxu0 %vm15838_vm3, %v15839_v6 }
 0xa42   :  { %13885 = vmatmul.mubr.msk.f32.gmra.mrb[134].mxu1 %vm7807_vm13, %v12332_v4  ;;  %13942 = vmatmul.mubr.msk.f32.gmra.mrb[164].mxu0 %vm7807_vm13, %v12350_v56  ;;  %v8511_v4 = vld [vmem:[%s19441_s29 + $0x58] sm:$0xff]  ;;  %v15196_v56 = vpack.c.bf16 %v8543_v10, %v8542_v34 }
 0xa43   :  { %13915 = vmatpush3.msra.mxu1 %v18772_v62  ;;  %13972 = vmatpush3.msra.mxu0 %v18772_v62 }
 0xa44   :  { %13916 = vmatprep.mubr.msk.f32.mxu1 %vm15838_vm3, %v15839_v6  ;;  %15136 = vmatprep.subr.bf16.mxu1 %v19437_v43 }
 0xa45   :  { %13973 = vmatprep.mubr.msk.f32.mxu0 %vm15838_vm3, %v15839_v6  ;;  %15180 = vmatprep.subr.bf16.mxu0 %v19437_v43 }
 0xa46   :  { %13917 = vmatmul.mubr.msk.f32.vlgmr.msra.gmra.mrb[136].mxu1 %vm7807_vm13, %v12342_v48  ;;  %13974 = vmatmul.mubr.msk.f32.vlgmr.msra.gmra.mrb[166].mxu0 %vm7807_vm13, %v12360_v8  ;;  %v8528_v48 = vld [vmem:[%s19441_s29 + $0xe0] sm:$0xff]  ;;  %v8529_v8 = vld [vmem:[%s19441_s29 + $0xe8] sm:$0xff] }
 0xa47   :  { %15138 = vmatpush3.bf16.msra.mxu1 %v18759_v57  ;;  %13919 = vmatprep.mubr.msk.f32.mxu1 %vm15838_vm3, %v15839_v6  ;;  %v8522_v57 = vld [vmem:[%s19441_s29 + $0xb0] sm:$0xff] }
 0xa48   :  { %15139 = vmatprep.subr.bf16.mxu1 %v19437_v43  ;;  %13976 = vmatprep.mubr.msk.f32.mxu0 %vm15838_vm3, %v15839_v6  ;;  %v15160_v37 = vpack.c.bf16 %v8523_v9, %v8522_v57  ;;  %v15178_v57 = vpack.c.bf16 %v8515_v38, %v8514_v51 }
 0xa49   :  { %15182 = vmatpush1.bf16.msra.mxu0 %v15181_v7  ;;  %v15202_v7 = vpack.c.bf16 %v8547_v45, %v8546_v55 }
 0xa4a   :  { %13920 = vmatmul.mubr.msk.f32.gmra.mrb[138].mxu1 %vm7807_vm13, %v12343_v29  ;;  %13977 = vmatmul.mubr.msk.f32.gmra.mrb[168].mxu0 %vm7807_vm13, %v12361_v46  ;;  %v8544_v29 = vld [vmem:[%s19441_s29 + $0x160] sm:$0xff]  ;;  %v8545_v46 = vld [vmem:[%s19441_s29 + $0x168] sm:$0xff] }
 0xa4b   :  { %15141 = vmatpush3.bf16.msra.mxu1 %v18765_v0  ;;  %13922 = vmatprep.mubr.msk.f32.mxu1 %vm15838_vm3, %v15839_v6  ;;  %v8541_v0 = vld [vmem:[%s19441_s29 + $0x148] sm:$0xff] }
 0xa4c   :  { %13952 = vmatprep.subr.mxu1 %v15839_v6  ;;  %13979 = vmatprep.mubr.msk.f32.mxu0 %vm15838_vm3, %v15839_v6  ;;  %v15193_v42 = vpack.c.bf16 %v8541_v0, %v8540_v2  ;;  %v8553_v2 = vld [vmem:[%s19441_s29 + $0x1a8] sm:$0xff] }
 0xa4d   :  { %15183 = vmatprep.subr.bf16.mxu0 %v19437_v43 }
 0xa4e   :  { %13923 = vmatmul.mubr.msk.f32.gmra.mrb[140].mxu1 %vm7807_vm13, %v12344_v52  ;;  %13980 = vmatmul.mubr.msk.f32.gmra.mrb[170].mxu0 %vm7807_vm13, %v12362_v13  ;;  %v15170_v52 = vpack.c.bf16 %v8511_v4, %v8510_v40  ;;  %v15172_v13 = vpack.c.bf16 %v8529_v8, %v8528_v48 }
 0xa4f   :  { %13953 = vmatpush3.msra.mxu1 %v18772_v62  ;;  %13954 = vmatprep.mubr.msk.f32.mxu1 %vm15838_vm3, %v15839_v6  ;;  %v8508_v62 = vld [vmem:[%s19441_s29 + $0x40] sm:$0xff] }
 0xa50   :  { %15149 = vmatprep.subr.bf16.mxu1 %v15148_v31  ;;  %15185 = vmatpush1.bf16.msra.mxu0 %v15184_v53  ;;  %v15166_v18 = vpack.c.bf16 %v8509_v39, %v8508_v62 }
 0xa51   :  { %15186 = vmatprep.subr.bf16.mxu0 %v19437_v43 }
 0xa52   :  { %13955 = vmatmul.mubr.msk.f32.vlgmr.msra.gmra.mrb[142].mxu1 %vm7807_vm13, %v12354_v59  ;;  %v8512_v59 = vld [vmem:[%s19441_s29 + $0x60] sm:$0xff] }
 0xa53   :  { %13957 = vmatprep.mubr.msk.f32.mxu1 %vm15838_vm3, %v15839_v6  ;;  %15151 = vmatpush3.bf16.msra.mxu1 %v15150_v30 }
 0xa54   :  { %15153 = vmatprep.subr.bf16.mxu1 %v15152_v23  ;;  %15188 = vmatpush1.bf16.msra.mxu0 %v15187_v20  ;;  %v8530_v23 = vld [vmem:[%s19441_s29 + $0xf0] sm:$0xff] }
 0xa55   :  { %15189 = vmatprep.subr.bf16.mxu0 %v19437_v43  ;;  %v15176_v49 = vpack.c.bf16 %v8531_v21, %v8530_v23 }
 0xa56   :  { %13958 = vmatmul.mubr.msk.f32.gmra.mrb[144].mxu1 %vm7807_vm13, %v12355_v28  ;;  %v8513_v28 = vld [vmem:[%s19441_s29 + $0x68] sm:$0xff] }
 0xa57   :  { %13960 = vmatprep.mubr.msk.f32.mxu1 %vm15838_vm3, %v15839_v6  ;;  %15155 = vmatpush3.bf16.msra.mxu1 %v15154_v25  ;;  %v15174_v50 = vpack.c.bf16 %v8513_v28, %v8512_v59 }
 0xa58   :  { %15157 = vmatprep.subr.bf16.mxu1 %v15156_v60  ;;  %15191 = vmatpush1.bf16.msra.mxu0 %v15190_v63  ;;  %v8549_v60 = vld [vmem:[%s19441_s29 + $0x188] sm:$0xff] }
 0xa59   :  { %15192 = vmatprep.subr.bf16.mxu0 %v19437_v43  ;;  %v15205_v20 = vpack.c.bf16 %v8549_v60, %v8548_v61 }
 0xa5a   :  { %13961 = vmatmul.mubr.msk.f32.gmra.mrb[146].mxu1 %vm7807_vm13, %v12356_v26  ;;  %v15199_v26 = vpack.c.bf16 %v8545_v46, %v8544_v29 }
 0xa5b   :  { %15159 = vmatpush3.bf16.msra.mxu1 %v15158_v5  ;;  %v8551_v5 = vld [vmem:[%s19441_s29 + $0x198] sm:$0xff] }
 0xa5c   :  { %15161 = vmatprep.subr.bf16.mxu1 %v15160_v37  ;;  %15194 = vmatpush1.bf16.msra.mxu0 %v15193_v42  ;;  %v15208_v47 = vpack.c.bf16 %v8551_v5, %v8550_v15 }
 0xa5d   :  { %15195 = vmatprep.subr.bf16.mxu0 %v19437_v43 }
 0xa5f   :  { %15163 = vmatpush3.bf16.msra.mxu1 %v15162_v58 }
 0xa60   :  { %15165 = vmatprep.subr.bf16.mxu1 %v15164_v11  ;;  %15197 = vmatpush1.bf16.msra.mxu0 %v15196_v56  ;;  %v15211_v11 = vpack.c.bf16 %v8553_v2, %v8552_v1  ;;  %v12370_v1 = vld [vmem:[%s19444_s14] ss:$0 sm:$0xff] }
 0xa61   :  { %15198 = vmatprep.subr.bf16.mxu0 %v19437_v43 }
 0xa63   :  { %15167 = vmatpush3.bf16.msra.mxu1 %v15166_v18  ;;  %v15214_v18 = vpack.c.bf16 %v8555_v36, %v8554_v24 }
 0xa64   :  { %15169 = vmatprep.subr.bf16.mxu1 %v15168_v17  ;;  %15200 = vmatpush1.bf16.msra.mxu0 %v15199_v26 }
 0xa65   :  { %15201 = vmatprep.subr.bf16.mxu0 %v19437_v43 }
 0xa67   :  { %15171 = vmatpush3.bf16.msra.mxu1 %v15170_v52 }
 0xa68   :  { %15173 = vmatprep.subr.bf16.mxu1 %v15172_v13  ;;  %15203 = vmatpush1.bf16.msra.mxu0 %v15202_v7 }
 0xa69   :  { %15204 = vmatprep.subr.bf16.mxu0 %v19437_v43 }
 0xa6b   :  { %15175 = vmatpush3.bf16.msra.mxu1 %v15174_v50 }
 0xa6c   :  { %15177 = vmatprep.subr.bf16.mxu1 %v15176_v49  ;;  %15206 = vmatpush1.bf16.msra.mxu0 %v15205_v20 }
 0xa6d   :  { %15207 = vmatprep.subr.bf16.mxu0 %v19437_v43 }
 0xa6f   :  { %15179 = vmatpush3.bf16.msra.mxu1 %v15178_v57 }
 0xa70   :  { %15209 = vmatpush1.bf16.msra.mxu0 %v15208_v47 }
 0xa71   :  { %15210 = vmatprep.subr.bf16.mxu0 %v19437_v43 }
 0xa74   :  { %15212 = vmatpush1.bf16.msra.mxu0 %v15211_v11 }
 0xa75   :  { %15213 = vmatprep.subr.bf16.mxu0 %v19437_v43 }
 0xa78   :  { %15215 = vmatpush1.bf16.msra.mxu0 %v15214_v18 }
 0xb00   :  { %v18938_v44 = vpop.f32.mrb[124].mxu1 }
 0xb01   :  { %v13861_v16 = vpop.f32.mrb[125].mxu1  ;;  %v18942_v31 = vpop.f32.mrb[154].mxu0 }
 0xb02   :  { %v13899_v54 = vpop.f32.mrb[155].mxu0 }
 0xb04   :  { %v18940_v41 = vpop.f32.mrb[126].mxu1 }
 0xb05   :  { %v13864_v12 = vpop.f32.mrb[127].mxu1  ;;  %v18946_v53 = vpop.f32.mrb[156].mxu0 }
 0xb06   :  { %v13902_v33 = vpop.f32.mrb[157].mxu0 }
 0xb08   :  { %v18944_v35 = vpop.f32.mrb[128].mxu1 }
 0xb09   :  { %v13867_v30 = vpop.f32.mrb[129].mxu1  ;;  %v18948_v14 = vpop.f32.mrb[158].mxu0 }
 0xb0a   :  { %v13905_v3 = vpop.f32.mrb[159].mxu0 }
 0xb0d   :  { %v7976_v19 = vpop.f32.mrb[130].mxu1  ;;  %v18956_v9 = vpop.f32.mrb[160].mxu0 }
 0xb0e   :  { %v13880_v25 = vpop.f32.mrb[131].mxu1  ;;  %v13937_v37 = vpop.f32.mrb[161].mxu0 }
 0xb11   :  { %v7981_v27 = vpop.f32.mrb[132].mxu1  ;;  %v18961_v63 = vpop.f32.mrb[162].mxu0 }
 0xb12   :  { %v13883_v32 = vpop.f32.mrb[133].mxu1  ;;  %v13940_v0 = vpop.f32.mrb[163].mxu0 }
 0xb13   :  { %v12369_v32 = vld [vmem:[%s19443_s8] ss:$0 sm:$0xff] }
 0xb15   :  { %v7986_v22 = vpop.f32.mrb[134].mxu1  ;;  %v18966_v62 = vpop.f32.mrb[164].mxu0 }
 0xb16   :  { %v13886_v58 = vpop.f32.mrb[135].mxu1  ;;  %v13943_v39 = vpop.f32.mrb[165].mxu0 }
 0xb19   :  { %v8162_v42 = vpop.f32.mrb[136].mxu1  ;;  %v8441_v17 = vpop.f32.mrb[166].mxu0 }
 0xb1a   :  { %v15701_v34 = vpack.i.bf16 %v7976_v19, %v8162_v42  ;;  %v13918_v10 = vpop.f32.mrb[137].mxu1  ;;  %12366 = vmatprep.mubr.msk.f32.mxu0 %vm859_vm4, %v8441_v17  ;;  %v13975_v4 = vpop.f32.mrb[167].mxu0 }
 0xb1c   :  { %15702 = vrot.lane.b32.xlu1 %v15701_v34, %s15836_s9 }
 0xb1d   :  { %v8167_v40 = vpop.f32.mrb[138].mxu1  ;;  %v8446_v48 = vpop.f32.mrb[168].mxu0 }
 0xb1e   :  { %v13921_v56 = vpop.f32.mrb[139].mxu1  ;;  %v13978_v8 = vpop.f32.mrb[169].mxu0 }
 0xb20   :  { %8460 = vrot.lane.b32.xlu1 %v7981_v27, %s15836_s9  ;;  %v8754_v27 = vld [vmem:[%s19442_s3] sm:$0xff] }
 0xb21   :  { %v8172_v29 = vpop.f32.mrb[140].mxu1  ;;  %v8451_v52 = vpop.f32.mrb[170].mxu0 }
 0xb22   :  { %v13924_v46 = vpop.f32.mrb[141].mxu1  ;;  %v13981_v13 = vpop.f32.mrb[171].mxu0 }
 0xb24   :  { %8462 = vrot.lane.b32.xlu1 %v7986_v22, %s15836_s9 }
 0xb25   :  { %v8348_v59 = vpop.f32.mrb[142].mxu1 }
 0xb26   :  { %v15706_v28 = vpack.i.bf16 %v8348_v59, %v8167_v40  ;;  %v13956_v26 = vpop.f32.mrb[143].mxu1 }
 0xb27   :  { %v8755_v26 = vld [vmem:[%s19442_s3 + $0x8] sm:$0x3] }
 0xb28   :  { %15707 = vrot.lane.b32.xlu0 %v15706_v28, %s15836_s9 }
 0xb29   :  { %v8353_v55 = vpop.f32.mrb[144].mxu1 }
 0xb2a   :  { %v15711_v45 = vpack.i.bf16 %v8172_v29, %v8353_v55  ;;  %v13959_v50 = vpop.f32.mrb[145].mxu1  ;;  %v12390_v55 = vld [vmem:[%s19442_s3 + $0x48] sm:$0x3] }
 0xb2b   :  { %v12399_v50 = vld [vmem:[%s19442_s3 + $0x60] sm:$0xff] }
 0xb2c   :  { %15712 = vrot.lane.b32.xlu0 %v15711_v45, %s15836_s9  ;;  %v12374_v45 = vld [vmem:[%s19442_s3 + $0x10] sm:$0xff] }
 0xb2d   :  { %v8358_v7 = vpop.f32.mrb[146].mxu1 }
 0xb2e   :  { %v13962_v16 = vpop.f32.mrb[147].mxu1 }
 0xb2f   :  { %v12379_v16 = vld [vmem:[%s19442_s3 + $0x20] sm:$0xff] }
 0xb30   :  { %8486 = vrot.lane.b32.xlu0 %v8358_v7, %s15836_s9  ;;  %v12375_v7 = vld [vmem:[%s19442_s3 + $0x18] sm:$0x3] }
 0xb8e   :  { %v15703_v12 = vpop.permute.xlu1 %15702 }
 0xb8f   :  { %v15705_v54 = vunpack.i.h.bf16 %v15703_v12  ;;  %v15704_v30 = vunpack.i.l.bf16 %v15703_v12  ;;  %v12400_v12 = vld [vmem:[%s19442_s3 + $0x68] sm:$0x3] }
 0xb91   :  { %v8491_v33 = vsel %vm859_vm4, %v18938_v44, %v15705_v54  ;;  %v8494_v19 = vsel %vm859_vm4, %v18942_v31, %v15704_v30  ;;  %v12380_v54 = vld [vmem:[%s19442_s3 + $0x28] sm:$0x3]  ;;  %v12384_v30 = vld [vmem:[%s19442_s3 + $0x30] sm:$0xff] }
 0xb92   :  { %8629 = vmatprep.mubr.f32.mxu1 %v8494_v19  ;;  %v8461_v23 = vpop.permute.xlu1 %8460  ;;  %v12394_v19 = vld [vmem:[%s19442_s3 + $0x50] sm:$0xff] }
 0xb93   :  { %8630 = vmatmul.mubr.f32.vlgmr.msra.gmra.mrb[148].mxu1 %v8491_v33  ;;  %v8492_v60 = vsel %vm859_vm4, %v18940_v41, %v8461_v23  ;;  %v12385_v33 = vld [vmem:[%s19442_s3 + $0x38] sm:$0x3] }
 0xb94   :  { %v12395_v23 = vld [vmem:[%s19442_s3 + $0x58] sm:$0x3] }
 0xb96   :  { %v8463_v31 = vpop.permute.xlu1 %8462 }
 0xb97   :  { %v8493_v41 = vsel %vm859_vm4, %v18944_v35, %v8463_v31  ;;  %v9400_v31 = vld [vmem:[%s19445_s24 + $0x28] sm:$0xff] }
 0xb9a   :  { %v15708_v21 = vpop.permute.xlu0 %15707 }
 0xb9b   :  { %v15710_v61 = vunpack.i.h.bf16 %v15708_v21  ;;  %v15709_v3 = vunpack.i.l.bf16 %v15708_v21  ;;  %v9395_v21 = vld [vmem:[%s19445_s24] sm:$0xff] }
 0xb9d   :  { %v8497_v25 = vsel %vm859_vm4, %v18956_v9, %v15710_v61  ;;  %v8495_v49 = vsel %vm859_vm4, %v18946_v53, %v15709_v3  ;;  %v9396_v61 = vld [vmem:[%s19445_s24 + $0x8] sm:$0xff]  ;;  %v9397_v3 = vld [vmem:[%s19445_s24 + $0x10] sm:$0xff] }
 0xb9e   :  { %8634 = vmatprep.mubr.f32.mxu1 %v8495_v49  ;;  %8710 = vmatmul.mubr.f32.vlgmr.msra.gmra.mrb[172].mxu0 %v8497_v25  ;;  %v15713_v44 = vpop.permute.xlu0 %15712  ;;  %v15245_v25 = vpack.c.bf16 %v9396_v61, %v9395_v21  ;;  %v9398_v49 = vld [vmem:[%s19445_s24 + $0x18] sm:$0xff] }
 0xb9f   :  { %v15715_v51 = vunpack.i.h.bf16 %v15713_v44  ;;  %v15714_v38 = vunpack.i.l.bf16 %v15713_v44  ;;  %8635 = vmatmul.mubr.f32.gmra.mrb[150].mxu1 %v8492_v60  ;;  %12367 = vmatprep.mubr.msk.f32.mxu0 %vm859_vm4, %v8446_v48  ;;  %v15248_v60 = vpack.c.bf16 %v9398_v49, %v9397_v3  ;;  %v9399_v44 = vld [vmem:[%s19445_s24 + $0x20] sm:$0xff] }
 0xba1   :  { %v8496_v20 = vsel %vm859_vm4, %v18948_v14, %v15715_v51  ;;  %v8498_v53 = vsel %vm859_vm4, %v18961_v63, %v15714_v38  ;;  %v12389_v14 = vld [vmem:[%s19442_s3 + $0x40] sm:$0xff]  ;;  %v15251_v51 = vpack.c.bf16 %v9400_v31, %v9399_v44  ;;  %v9401_v38 = vld [vmem:[%s19445_s24 + $0x30] sm:$0xff] }
 0xba2   :  { %8639 = vmatprep.mubr.f32.mxu1 %v8496_v20  ;;  %8715 = vmatmul.mubr.f32.gmra.mrb[174].mxu0 %v8498_v53  ;;  %v8487_v57 = vpop.permute.xlu0 %8486  ;;  %v9402_v20 = vld [vmem:[%s19445_s24 + $0x38] sm:$0xff] }
 0xba3   :  { %8640 = vmatmul.mubr.f32.gmra.mrb[152].mxu1 %v8493_v41  ;;  %12368 = vmatprep.mubr.msk.f32.mxu0 %vm859_vm4, %v8451_v52  ;;  %v8499_v9 = vsel %vm859_vm4, %v18966_v62, %v8487_v57  ;;  %v15254_v53 = vpack.c.bf16 %v9402_v20, %v9401_v38  ;;  %v9403_v41 = vld [vmem:[%s19445_s24 + $0x40] sm:$0xff]  ;;  %v9404_v57 = vld [vmem:[%s19445_s24 + $0x48] sm:$0xff] }
 0xba4   :  { %13988 = vmatprep.mubr.msk.f32.mxu1 %vm8756_vm14, %v8754_v27  ;;  %v9405_v27 = vld [vmem:[%s19445_s24 + $0x50] sm:$0xff] }
 0xba6   :  { %8720 = vmatmul.mubr.f32.gmra.mrb[176].mxu0 %v8499_v9  ;;  %v15257_v9 = vpack.c.bf16 %v9404_v57, %v9403_v41 }
 0xba7   :  { %14024 = vmatprep.mubr.msk.f32.mxu0 %vm8756_vm14, %v12389_v14  ;;  %v9406_v14 = vld [vmem:[%s19445_s24 + $0x58] sm:$0xff] }
 0xc66   :  { %v13097_v35 = vpop.f32.mrb[148].mxu1 }
 0xc67   :  { %v13098_v15 = vpop.f32.mrb[149].mxu1 }
 0xc68   :  { %v13099_v5 = vadd.f32 %v13098_v15, %v13097_v35  ;;  %v15260_v35 = vpack.c.bf16 %v9406_v14, %v9405_v27  ;;  %v9407_v15 = vld [vmem:[%s19445_s24 + $0x60] sm:$0xff] }
 0xc71   :  { %v8711_v37 = vpop.f32.mrb[172].mxu0 }
 0xc72   :  { %v8712_v47 = vadd.f32 %v13099_v5, %v8711_v37  ;;  %v13100_v63 = vpop.f32.mrb[150].mxu1  ;;  %v8713_v22 = vpop.f32.mrb[173].mxu0  ;;  %v9408_v5 = vld [vmem:[%s19445_s24 + $0x68] sm:$0xff] }
 0xc73   :  { %v13101_v2 = vpop.f32.mrb[151].mxu1  ;;  %v15263_v37 = vpack.c.bf16 %v9408_v5, %v9407_v15  ;;  %v9411_v22 = vld [vmem:[%s19445_s24 + $0x80] sm:$0xff] }
 0xc74   :  { %v8732_v0 = vmul.f32 %v12369_v32, %v8712_v47  ;;  %v13102_v58 = vadd.f32 %v13101_v2, %v13100_v63  ;;  %v9410_v47 = vld [vmem:[%s19445_s24 + $0x78] sm:$0xff]  ;;  %v12406_v15 = vld [vmem:[%s19446_s6] ss:$0 sm:$0xff] }
 0xc75   :  { %v8716_v11 = vpop.f32.mrb[174].mxu0 }
 0xc76   :  { %v8742_v62 = vadd.f32 %v12370_v1, %v8732_v0  ;;  %v8717_v39 = vadd.f32 %v13102_v58, %v8716_v11  ;;  %v13103_v42 = vpop.f32.mrb[152].mxu1  ;;  %v8718_v24 = vpop.f32.mrb[175].mxu0  ;;  %v9413_v0 = vld [vmem:[%s19445_s24 + $0x90] sm:$0xff]  ;;  %v9414_v58 = vld [vmem:[%s19445_s24 + $0x98] sm:$0xff] }
 0xc77   :  { %v13104_v36 = vpop.f32.mrb[153].mxu1  ;;  %v15272_v11 = vpack.c.bf16 %v9414_v58, %v9413_v0 }
 0xc78   :  { %v8733_v34 = vmul.f32 %v12369_v32, %v8717_v39  ;;  %v13105_v10 = vadd.f32 %v13104_v36, %v13103_v42  ;;  %v8748_v17 = vmul.f32 0.01, %v8742_v62  ;;  %vm8745_vm15 = vcmp.gt.f32.partialorder %v8742_v62, 0.0  ;;  %v9416_v39 = vld [vmem:[%s19445_s24 + $0xa8] sm:$0xff] }
 0xc79   :  { %v8721_v18 = vpop.f32.mrb[176].mxu0 }
 0xc7a   :  { %v8743_v40 = vadd.f32 %v12370_v1, %v8733_v34  ;;  %v8722_v4 = vadd.f32 %v13105_v10, %v8721_v18  ;;  %v8723_v56 = vpop.f32.mrb[177].mxu0  ;;  %v8751_v29 = vsel %vm8745_vm15, %v8742_v62, %v8748_v17  ;;  %v9415_v62 = vld [vmem:[%s19445_s24 + $0xa0] sm:$0xff]  ;;  %v9417_v18 = vld [vmem:[%s19445_s24 + $0xb0] sm:$0xff]  ;;  %v9418_v17 = vld [vmem:[%s19445_s24 + $0xb8] sm:$0xff] }
 0xc7b   :  { %v15275_v42 = vpack.c.bf16 %v9416_v39, %v9415_v62  ;;  %v9419_v56 = vld [vmem:[%s19445_s24 + $0xc0] sm:$0xff]  ;;  %v10109_v62 = vld [vmem:[#allocation5 + $0x2d0] sm:$0xff] }
 0xc7c   :  { %vm8746_vm1 = vcmp.gt.f32.partialorder %v8743_v40, 0.0  ;;  %v8749_v48 = vmul.f32 0.01, %v8743_v40  ;;  %v8734_v8 = vmul.f32 %v12369_v32, %v8722_v4  ;;  %v9409_v32 = vld [vmem:[%s19445_s24 + $0x70] sm:$0xff] }
 0xc7d   :  { %v15266_v63 = vpack.c.bf16 %v9410_v47, %v9409_v32  ;;  %v12407_v47 = vld [vmem:[%s19447_s12] ss:$0 sm:$0xff] }
 0xc7e   :  { %v8752_v46 = vsel %vm8746_vm1, %v8743_v40, %v8749_v48  ;;  %v8744_v52 = vadd.f32 %v12370_v1, %v8734_v8  ;;  %v9412_v1 = vld [vmem:[%s19445_s24 + $0x88] sm:$0xff]  ;;  %v15278_v40 = vpack.c.bf16 %v9418_v17, %v9417_v18  ;;  %v12416_v18 = vld [vmem:[%s19448_s20 + $0x6] sm:$0x3] }
 0xc7f   :  { %v15216_v13 = vpack.c.bf16 %v8752_v46, %v8751_v29  ;;  %v15269_v2 = vpack.c.bf16 %v9412_v1, %v9411_v22  ;;  %v9420_v48 = vld [vmem:[%s19445_s24 + $0xc8] sm:$0xff] }
 0xc80   :  { %vm8747_vm8 = vcmp.gt.f32.partialorder %v8744_v52, 0.0  ;;  %v8750_v59 = vmul.f32 0.01, %v8744_v52  ;;  %v15281_v29 = vpack.c.bf16 %v9420_v48, %v9419_v56  ;;  %v12419_v17 = vld [vmem:[%s19448_s20 + $0x8] sm:$0x3]  ;;  %v9931_v56 = vld [vmem:[%s19451_s4 + $0x10] sm:$0xff] }
 0xc81   :  { %15217 = vmatprep.subr.bf16.mxu1 %v15216_v13  ;;  %15233 = vmatprep.subr.bf16.mxu0 %v15216_v13 }
 0xc82   :  { %v8753_v28 = vsel %vm8747_vm8, %v8744_v52, %v8750_v59  ;;  %15219 = vmatpush3.bf16.msra.mxu1 %v15216_v13  ;;  %15235 = vmatpush3.bf16.msra.mxu0 %v15216_v13  ;;  %v9421_v59 = vld [vmem:[%s19445_s24 + $0xd0] sm:$0xff] }
 0xc83   :  { %13986 = vmatprep.subr.msk.mxu1 %vm316_vm0, %v8753_v28  ;;  %14022 = vmatprep.subr.msk.mxu0 %vm316_vm0, %v8753_v28 }
 0xc86   :  { %13987 = vmatpush3.msk.msra.mxu1 %vm316_vm0, %v8753_v28  ;;  %14023 = vmatpush3.msk.msra.mxu0 %vm316_vm0, %v8753_v28 }
 0xc87   :  { %15221 = vmatprep.subr.bf16.mxu1 %v15216_v13  ;;  %15241 = vmatprep.subr.bf16.mxu0 %v15216_v13 }
 0xc88   :  { %13989 = vmatmul.mubr.msk.f32.vlgmr.msra.gmra.mrb[154].mxu1 %vm8756_vm14, %v8755_v26  ;;  %14025 = vmatmul.mubr.msk.f32.vlgmr.msra.gmra.mrb[178].mxu0 %vm8756_vm14, %v12390_v55 }
 0xc89   :  { %15223 = vmatpush3.bf16.msra.mxu1 %v15216_v13  ;;  %15243 = vmatpush3.bf16.msra.mxu0 %v15216_v13 }
 0xc8a   :  { %13995 = vmatprep.subr.msk.mxu1 %vm316_vm0, %v8753_v28  ;;  %14040 = vmatprep.subr.msk.mxu0 %vm316_vm0, %v8753_v28 }
 0xc8b   :  { %13997 = vmatprep.mubr.msk.f32.mxu1 %vm8756_vm14, %v12374_v45  ;;  %14042 = vmatprep.mubr.msk.f32.mxu0 %vm8756_vm14, %v12399_v50 }
 0xc8d   :  { %13996 = vmatpush3.msk.msra.mxu1 %vm316_vm0, %v8753_v28  ;;  %14041 = vmatpush3.msk.msra.mxu0 %vm316_vm0, %v8753_v28 }
 0xc8e   :  { %13998 = vmatmul.mubr.msk.f32.vlgmr.msra.gmra.mrb[156].mxu1 %vm8756_vm14, %v12375_v7  ;;  %15225 = vmatprep.subr.bf16.mxu1 %v15216_v13 }
 0xc8f   :  { %15227 = vmatpush3.bf16.msra.mxu1 %v15216_v13  ;;  %14006 = vmatprep.mubr.msk.f32.mxu1 %vm8756_vm14, %v12379_v16 }
 0xc90   :  { %14004 = vmatprep.subr.msk.mxu1 %vm316_vm0, %v8753_v28  ;;  %14043 = vmatmul.mubr.msk.f32.vlgmr.msra.gmra.mrb[180].mxu0 %vm8756_vm14, %v12400_v12 }
 0xc91   :  { %15286 = vmatprep.subr.bf16.mxu0 %v19437_v43  ;;  %14049 = vmatprep.mubr.msk.f32.mxu0 %vm15838_vm3, %v15839_v6 }
 0xc93   :  { %14005 = vmatpush3.msk.msra.mxu1 %vm316_vm0, %v8753_v28 }
 0xc94   :  { %14007 = vmatmul.mubr.msk.f32.vlgmr.msra.gmra.mrb[158].mxu1 %vm8756_vm14, %v12380_v54  ;;  %15229 = vmatprep.subr.bf16.mxu1 %v15216_v13 }
 0xc95   :  { %15231 = vmatpush3.bf16.msra.mxu1 %v15216_v13  ;;  %14015 = vmatprep.mubr.msk.f32.mxu1 %vm8756_vm14, %v12384_v30 }
 0xc96   :  { %14013 = vmatprep.subr.msk.mxu1 %vm316_vm0, %v8753_v28 }
 0xc99   :  { %14014 = vmatpush3.msk.msra.mxu1 %vm316_vm0, %v8753_v28 }
 0xc9a   :  { %14016 = vmatmul.mubr.msk.f32.vlgmr.msra.gmra.mrb[160].mxu1 %vm8756_vm14, %v12385_v33  ;;  %15237 = vmatprep.subr.bf16.mxu1 %v15216_v13 }
 0xc9b   :  { %15239 = vmatpush3.bf16.msra.mxu1 %v15216_v13  ;;  %14033 = vmatprep.mubr.msk.f32.mxu1 %vm8756_vm14, %v12394_v19 }
 0xc9c   :  { %14031 = vmatprep.subr.msk.mxu1 %vm316_vm0, %v8753_v28 }
 0xc9f   :  { %14032 = vmatpush3.msk.msra.mxu1 %vm316_vm0, %v8753_v28  ;;  %v9422_v28 = vld [vmem:[%s19445_s24 + $0xd8] sm:$0xff]  ;;  %vm9533_vm0 = vcmask 1041408  }
 0xca0   :  { %14034 = vmatmul.mubr.msk.f32.vlgmr.msra.gmra.mrb[162].mxu1 %vm8756_vm14, %v12395_v23  ;;  %15244 = vmatprep.subr.bf16.mxu1 %v19437_v43  ;;  %v15284_v26 = vpack.c.bf16 %v9422_v28, %v9421_v59  ;;  %v9935_v59 = vld [vmem:[%s19451_s4 + $0x30] sm:$0xff]  ;;  %v9936_v28 = vld [vmem:[%s19451_s4 + $0x38] sm:$0xff] }
 0xca1   :  { %15246 = vmatpush1.bf16.msra.mxu1 %v15245_v25 }
 0xca2   :  { %15247 = vmatprep.subr.bf16.mxu1 %v19437_v43 }
 0xca5   :  { %15249 = vmatpush1.bf16.msra.mxu1 %v15248_v60 }
 0xca6   :  { %15250 = vmatprep.subr.bf16.mxu1 %v19437_v43 }
 0xca9   :  { %15252 = vmatpush1.bf16.msra.mxu1 %v15251_v51 }
 0xcaa   :  { %15253 = vmatprep.subr.bf16.mxu1 %v19437_v43 }
 0xcad   :  { %15255 = vmatpush1.bf16.msra.mxu1 %v15254_v53 }
 0xcae   :  { %15256 = vmatprep.subr.bf16.mxu1 %v19437_v43 }
 0xcb1   :  { %15258 = vmatpush1.bf16.msra.mxu1 %v15257_v9 }
 0xcb2   :  { %15259 = vmatprep.subr.bf16.mxu1 %v19437_v43 }
 0xcb5   :  { %15261 = vmatpush1.bf16.msra.mxu1 %v15260_v35 }
 0xcb6   :  { %15262 = vmatprep.subr.bf16.mxu1 %v19437_v43 }
 0xcb9   :  { %15264 = vmatpush1.bf16.msra.mxu1 %v15263_v37 }
 0xcba   :  { %15265 = vmatprep.subr.bf16.mxu1 %v19437_v43 }
 0xcbd   :  { %15267 = vmatpush1.bf16.msra.mxu1 %v15266_v63 }
 0xcbe   :  { %15268 = vmatprep.subr.bf16.mxu1 %v19437_v43 }
 0xcc1   :  { %15270 = vmatpush1.bf16.msra.mxu1 %v15269_v2 }
 0xcc2   :  { %15271 = vmatprep.subr.bf16.mxu1 %v19437_v43 }
 0xcc5   :  { %15273 = vmatpush1.bf16.msra.mxu1 %v15272_v11 }
 0xcc6   :  { %15274 = vmatprep.subr.bf16.mxu1 %v19437_v43 }
 0xcc9   :  { %15276 = vmatpush1.bf16.msra.mxu1 %v15275_v42 }
 0xcca   :  { %15277 = vmatprep.subr.bf16.mxu1 %v19437_v43 }
 0xccd   :  { %15279 = vmatpush1.bf16.msra.mxu1 %v15278_v40  ;;  %v9929_v40 = vld [vmem:[%s19451_s4] sm:$0xff] }
 0xcce   :  { %15280 = vmatprep.subr.bf16.mxu1 %v19437_v43 }
 0xcd1   :  { %15282 = vmatpush1.bf16.msra.mxu1 %v15281_v29 }
 0xcd2   :  { %15283 = vmatprep.subr.bf16.mxu1 %v19437_v43 }
 0xcd5   :  { %15285 = vmatpush1.bf16.msra.mxu1 %v15284_v26  ;;  %v15316_v26 = vpack.c.bf16 %v9936_v28, %v9935_v59  ;;  %v10082_v59 = vld [vmem:[#allocation5 + $0x1f8] sm:$0xff]  ;;  %v10112_v28 = vld [vmem:[#allocation5 + $0x2e8] sm:$0xff] }
 0xd5b   :  { %v13990_v24 = vpop.f32.mrb[154].mxu1  ;;  %v14026_v36 = vpop.f32.mrb[178].mxu0 }
 0xd5c   :  { %v8832_v34 = vpop.f32.mrb[155].mxu1  ;;  %v9168_v10 = vpop.f32.mrb[179].mxu0 }
 0xd61   :  { %v13999_v4 = vpop.f32.mrb[156].mxu1 }
 0xd62   :  { %v8916_v8 = vpop.f32.mrb[157].mxu1 }
 0xd63   :  { %v15716_v46 = vpack.i.bf16 %v13999_v4, %v8916_v8  ;;  %v14044_v52 = vpop.f32.mrb[180].mxu0  ;;  %v9930_v4 = vld [vmem:[%s19451_s4 + $0x8] sm:$0xff]  ;;  %v9932_v8 = vld [vmem:[%s19451_s4 + $0x18] sm:$0xff] }
 0xd64   :  { %v9336_v13 = vpop.f32.mrb[181].mxu0  ;;  %v15307_v48 = vpack.c.bf16 %v9930_v4, %v9929_v40  ;;  %v15310_v29 = vpack.c.bf16 %v9932_v8, %v9931_v56  ;;  %v10028_v4 = vld [vmem:[#allocation5 + $0x48] sm:$0xff]  ;;  %v10058_v56 = vld [vmem:[#allocation5 + $0x138] sm:$0xff]  ;;  %v12422_v8 = vld [vmem:[%s15981_s30] ss:$0 sm:$0xff]  ;;  %s15842_s30 = smov [#allocation7]  }
 0xd65   :  { %15717 = vrot.lane.b32.xlu1 %v15716_v46, %s15835_s5  ;;  %9379 = vrot.lane.b32.xlu0 %v9336_v13, %s15836_s9  ;;  %v9933_v46 = vld [vmem:[%s19451_s4 + $0x20] sm:$0xff] }
 0xd67   :  { %v14008_v55 = vpop.f32.mrb[158].mxu1 }
 0xd68   :  { %v9000_v45 = vpop.f32.mrb[159].mxu1 }
 0xd69   :  { %v15721_v50 = vpack.i.bf16 %v14008_v55, %v9000_v45  ;;  %v9937_v55 = vld [vmem:[%s19451_s4 + $0x40] sm:$0xff]  ;;  %v9938_v45 = vld [vmem:[%s19451_s4 + $0x48] sm:$0xff] }
 0xd6b   :  { %15722 = vrot.lane.b32.xlu1 %v15721_v50, %s15836_s9 }
 0xd6d   :  { %v14017_v7 = vpop.f32.mrb[160].mxu1 }
 0xd6e   :  { %v9084_v16 = vpop.f32.mrb[161].mxu1 }
 0xd6f   :  { %9363 = vrot.lane.b32.xlu1 %v9084_v16, %s15837_s25 }
 0xd73   :  { %v14035_v12 = vpop.f32.mrb[162].mxu1  ;;  %9381 = vrot.lane.b32.xlu1 %v14044_v52, %s15836_s9  ;;  %v9934_v52 = vld [vmem:[%s19451_s4 + $0x28] sm:$0xff] }
 0xd74   :  { %v9252_v54 = vpop.f32.mrb[163].mxu1  ;;  %v15313_v13 = vpack.c.bf16 %v9934_v52, %v9933_v46  ;;  %v10051_v46 = vld [vmem:[#allocation5 + $0x100] sm:$0xff] }
 0xd75   :  { %9371 = vrot.lane.b32.xlu0 %v9252_v54, %s15835_s5  ;;  %v10027_v52 = vld [vmem:[#allocation5 + $0x40] sm:$0xff] }
 0xd79   :  { %9373 = vrot.lane.b32.xlu0 %v14035_v12, %s15835_s5 }
 0xd7d   :  { %9365 = vrot.lane.b32.xlu0 %v14017_v7, %s15837_s25  ;;  %v15319_v7 = vpack.c.bf16 %v9938_v45, %v9937_v55  ;;  %v10118_v55 = vld [vmem:[#allocation5 + $0x318] sm:$0xff] }
 0xdd7   :  { %v15718_v30 = vpop.permute.xlu1 %15717  ;;  %v9380_v19 = vpop.permute.xlu0 %9379 }
 0xdd8   :  { %v15719_v23 = vunpack.i.l.bf16 %v15718_v30  ;;  %v15720_v31 = vunpack.i.h.bf16 %v15718_v30  ;;  %v10020_v30 = vld [vmem:[#allocation5 + $0x8] sm:$0xff] }
 0xdda   :  { %v9385_v61 = vsel %vm4356_vm6, %v8832_v34, %v15719_v23  ;;  %v9386_v9 = vsel %vm4356_vm6, %v13990_v24, %v15720_v31  ;;  %v12410_v34 = vld [vmem:[%s19448_s20 + $0x2] sm:$0x3] }
 0xddd   :  { %v15723_v33 = vpop.permute.xlu1 %15722 }
 0xdde   :  { %v15724_v21 = vunpack.i.l.bf16 %v15723_v33  ;;  %v15725_v38 = vunpack.i.h.bf16 %v15723_v33  ;;  %v10050_v33 = vld [vmem:[#allocation5 + $0xf8] sm:$0xff] }
 0xddf   :  { %v15321_v23 = vpack.c.bf16 %v10050_v33, %v10020_v30  ;;  %v15333_v30 = vpack.c.bf16 %v10112_v28, %v10082_v59 }
 0xde0   :  { %v9387_v25 = vsel %vm859_vm4, %v9385_v61, %v15724_v21  ;;  %v9388_v27 = vsel %vm859_vm4, %v9386_v9, %v15725_v38  ;;  %v10054_v21 = vld [vmem:[#allocation5 + $0x118] sm:$0xff]  ;;  %v10083_v38 = vld [vmem:[#allocation5 + $0x200] sm:$0xff] }
 0xde1   :  { %v9364_v3 = vpop.permute.xlu1 %9363 }
 0xde2   :  { %v9389_v51 = vsel %vm4397_vm7, %v9387_v25, %v9364_v3  ;;  %v10023_v3 = vld [vmem:[#allocation5 + $0x20] sm:$0xff]  ;;  %v10053_v25 = vld [vmem:[#allocation5 + $0x110] sm:$0xff] }
 0xde5   :  { %v9382_v41 = vpop.permute.xlu1 %9381 }
 0xde7   :  { %v9372_v49 = vpop.permute.xlu0 %9371 }
 0xde8   :  { %v9391_v60 = vsel %vm4356_vm6, %v9168_v10, %v9372_v49  ;;  %v12413_v10 = vld [vmem:[%s19448_s20 + $0x4] sm:$0x3] }
 0xde9   :  { %v9393_v44 = vsel %vm859_vm4, %v9391_v60, %v9380_v19  ;;  %v10024_v19 = vld [vmem:[#allocation5 + $0x28] sm:$0xff] }
 0xdea   :  { %12404 = vmatprep.mubr.msk.f32.mxu1 %vm4397_vm7, %v9393_v44  ;;  %v15337_v61 = vpack.c.bf16 %v10054_v21, %v10024_v19  ;;  %v10084_v60 = vld [vmem:[#allocation5 + $0x208] sm:$0xff]  ;;  %v10114_v44 = vld [vmem:[#allocation5 + $0x2f8] sm:$0xff]  ;;  %v10111_v19 = vld [vmem:[#allocation5 + $0x2e0] sm:$0xff] }
 0xdeb   :  { %9494 = vmatmul.mubr.f32.vlgmr.msra.gmra.mrb[164].mxu1 %v9389_v51  ;;  %v9374_v20 = vpop.permute.xlu0 %9373  ;;  %v15341_v51 = vpack.c.bf16 %v10114_v44, %v10084_v60  ;;  %v10117_v21 = vld [vmem:[#allocation5 + $0x310] sm:$0xff]  ;;  %v10056_v60 = vld [vmem:[#allocation5 + $0x128] sm:$0xff] }
 0xdec   :  { %v9392_v53 = vsel %vm4356_vm6, %v14026_v36, %v9374_v20  ;;  %v9528_v36 = vld [vmem:[%s19448_s20] sm:$0x3]  ;;  %15338 = vmatprep.subr.bf16.mxu1 %v15337_v61  ;;  %v10113_v20 = vld [vmem:[#allocation5 + $0x2f0] sm:$0xff]  ;;  %v10032_v44 = vld [vmem:[#allocation5 + $0x68] sm:$0xff] }
 0xded   :  { %v9394_v57 = vsel %vm859_vm4, %v9392_v53, %v9382_v41  ;;  %v15343_v53 = vpack.c.bf16 %v10113_v20, %v10083_v38  ;;  %v10062_v38 = vld [vmem:[#allocation5 + $0x158] sm:$0xff]  ;;  %v10025_v20 = vld [vmem:[#allocation5 + $0x30] sm:$0xff] }
 0xdee   :  { %12405 = vmatprep.mubr.msk.f32.mxu1 %vm4397_vm7, %v9394_v57 }
 0xdef   :  { %v9366_v14 = vpop.permute.xlu0 %9365 }
 0xdf0   :  { %v9390_v35 = vsel %vm4397_vm7, %v9388_v27, %v9366_v14  ;;  %vm19111_vm7 = vmpackc.low %vm9533_vm0, %vm15833_vm2  ;;  %vm9923_vm2 = vcmask 130048  }
 0xdf1   :  { %9499 = vmatmul.mubr.f32.gmra.mrb[166].mxu1 %v9390_v35 }
 0xdf2   :  { %10536 = vmatprep.mubr.f32.mxu1 %v15839_v6 }
 0xebe   :  { %v9495_v5 = vpop.f32.mrb[164].mxu1 }
 0xebf   :  { %v9511_v37 = vmul.f32 %v12406_v15, %v9495_v5  ;;  %v9497_v32 = vpop.f32.mrb[165].mxu1  ;;  %v10049_v5 = vld [vmem:[#allocation5 + $0xf0] sm:$0xff] }
 0xec0   :  { %v10080_v32 = vld [vmem:[#allocation5 + $0x1e8] sm:$0xff] }
 0xec1   :  { %v9520_v63 = vadd.f32 %v12407_v47, %v9511_v37 }
 0xec3   :  { %v9524_v0 = vmul.f32 0.01, %v9520_v63  ;;  %vm9522_vm9 = vcmp.gt.f32.partialorder %v9520_v63, 0.0 }
 0xec4   :  { %v9500_v22 = vpop.f32.mrb[166].mxu1 }
 0xec5   :  { %v9512_v1 = vmul.f32 %v12406_v15, %v9500_v22  ;;  %v9502_v2 = vpop.f32.mrb[167].mxu1  ;;  %v9526_v39 = vsel %vm9522_vm9, %v9520_v63, %v9524_v0  ;;  %v10019_v15 = vld [vmem:[#allocation5] sm:$0xff] }
 0xec7   :  { %v9521_v58 = vadd.f32 %v12407_v47, %v9512_v1  ;;  %v10110_v47 = vld [vmem:[#allocation5 + $0x2d8] sm:$0xff]  ;;  %v15323_v1 = vpack.c.bf16 %v10049_v5, %v10019_v15  ;;  %v15369_v5 = vpack.c.bf16 %v10062_v38, %v10032_v44  ;;  %v10039_v44 = vld [vmem:[#allocation5 + $0xa0] sm:$0xff] }
 0xec8   :  { %v10122_v15 = vld [vmem:[#allocation5 + $0x338] sm:$0xff] }
 0xec9   :  { %vm9523_vm10 = vcmp.gt.f32.partialorder %v9521_v58, 0.0  ;;  %v9525_v11 = vmul.f32 0.01, %v9521_v58 }
 0xecb   :  { %v9527_v42 = vsel %vm9523_vm10, %v9521_v58, %v9525_v11  ;;  %v15325_v58 = vpack.c.bf16 %v10110_v47, %v10080_v32  ;;  %v10079_v11 = vld [vmem:[#allocation5 + $0x1e0] sm:$0xff]  ;;  %v10085_v47 = vld [vmem:[#allocation5 + $0x210] sm:$0xff] }
 0xecc   :  { %v15287_v24 = vpack.c.bf16 %v9527_v42, %v9526_v39  ;;  %v15327_v42 = vpack.c.bf16 %v10109_v62, %v10079_v11  ;;  %v10146_v62 = vld [vmem:[#allocation5 + $0x3f8] sm:$0xff] }
 0xece   :  { %15289 = vmatpush3.bf16.msk.msra.mxu0 %vm19111_vm7, %v15287_v24 }
 0xecf   :  { %15290 = vmatprep.subr.bf16.mxu0 %v19437_v43 }
 0xed1   :  { %14050 = vmatmul.mubr.msk.f32.vlgmr.msra.gmra.mrb[182].mxu0 %vm9529_vm11, %v9528_v36  ;;  %v10144_v36 = vld [vmem:[#allocation5 + $0x3e8] sm:$0xff] }
 0xed2   :  { %15293 = vmatpush3.bf16.msk.msra.mxu0 %vm19111_vm7, %v15287_v24  ;;  %14056 = vmatprep.mubr.msk.f32.mxu0 %vm15838_vm3, %v15839_v6 }
 0xed3   :  { %15294 = vmatprep.subr.bf16.mxu0 %v19437_v43 }
 0xed5   :  { %14057 = vmatmul.mubr.msk.f32.vlgmr.msra.gmra.mrb[184].mxu0 %vm9529_vm11, %v12410_v34  ;;  %v10022_v34 = vld [vmem:[#allocation5 + $0x18] sm:$0xff] }
 0xed6   :  { %15297 = vmatpush3.bf16.msk.msra.mxu0 %vm19111_vm7, %v15287_v24  ;;  %14063 = vmatprep.mubr.msk.f32.mxu0 %vm15838_vm3, %v15839_v6 }
 0xed7   :  { %15298 = vmatprep.subr.bf16.mxu0 %v19437_v43 }
 0xed9   :  { %14064 = vmatmul.mubr.msk.f32.vlgmr.msra.gmra.mrb[186].mxu0 %vm9529_vm11, %v12413_v10  ;;  %v10139_v10 = vld [vmem:[#allocation5 + $0x3c0] sm:$0xff] }
 0xeda   :  { %15301 = vmatpush3.bf16.msk.msra.mxu0 %vm19111_vm7, %v15287_v24  ;;  %14070 = vmatprep.mubr.msk.f32.mxu0 %vm15838_vm3, %v15839_v6 }
 0xedb   :  { %15302 = vmatprep.subr.bf16.mxu0 %v19437_v43 }
 0xedd   :  { %14071 = vmatmul.mubr.msk.f32.vlgmr.msra.gmra.mrb[188].mxu0 %vm9529_vm11, %v12416_v18  ;;  %v10143_v18 = vld [vmem:[#allocation5 + $0x3e0] sm:$0xff] }
 0xede   :  { %15305 = vmatpush3.bf16.msk.msra.mxu0 %vm19111_vm7, %v15287_v24  ;;  %14077 = vmatprep.mubr.msk.f32.mxu0 %vm15838_vm3, %v15839_v6  ;;  %v10140_v24 = vld [vmem:[#allocation5 + $0x3c8] sm:$0xff] }
 0xedf   :  { %15306 = vmatprep.subr.bf16.mxu0 %v19437_v43 }
 0xee1   :  { %14078 = vmatmul.mubr.msk.f32.vlgmr.msra.gmra.mrb[190].mxu0 %vm9529_vm11, %v12419_v17  ;;  %v10052_v17 = vld [vmem:[#allocation5 + $0x108] sm:$0xff] }
 0xee2   :  { %14100 = vmatprep.mubr.msk.f32.mxu0 %vm15838_vm3, %v15839_v6  ;;  %15308 = vmatpush3.bf16.msra.mxu0 %v15307_v48  ;;  %vm9926_vm3 = vcmask 392192   ;;  %v15329_v40 = vpack.c.bf16 %v10052_v17, %v10022_v34  ;;  %v15353_v48 = vpack.c.bf16 %v10058_v56, %v10028_v4  ;;  %v10145_v34 = vld [vmem:[#allocation5 + $0x3f0] sm:$0xff]  ;;  %v10035_v4 = vld [vmem:[#allocation5 + $0x80] sm:$0xff] }
 0xee3   :  { %15309 = vmatprep.subr.bf16.mxu0 %v19437_v43  ;;  %v10029_v17 = vld [vmem:[#allocation5 + $0x50] sm:$0xff] }
 0xee4   :  { %v10065_v56 = vld [vmem:[#allocation5 + $0x170] sm:$0xff] }
 0xee5   :  { %v15387_v28 = vpack.c.bf16 %v10065_v56, %v10035_v4  ;;  %v10134_v4 = vld [vmem:[#allocation5 + $0x398] sm:$0xff] }
 0xee6   :  { %15311 = vmatpush3.bf16.msra.mxu0 %v15310_v29  ;;  %v10021_v29 = vld [vmem:[#allocation5 + $0x10] sm:$0xff] }
 0xee7   :  { %15312 = vmatprep.subr.bf16.mxu0 %v19437_v43 }
 0xeea   :  { %15314 = vmatpush3.bf16.msra.mxu0 %v15313_v13  ;;  %v10057_v13 = vld [vmem:[#allocation5 + $0x130] sm:$0xff] }
 0xeeb   :  { %15315 = vmatprep.subr.bf16.mxu0 %v19437_v43 }
 0xeee   :  { %15317 = vmatpush3.bf16.msra.mxu0 %v15316_v26  ;;  %v10088_v26 = vld [vmem:[#allocation5 + $0x228] sm:$0xff] }
 0xeef   :  { %15318 = vmatprep.subr.bf16.mxu0 %v19437_v43  ;;  %v15339_v43 = vpack.c.bf16 %v10053_v25, %v10023_v3  ;;  %v15357_v33 = vpack.c.bf16 %v10118_v55, %v10088_v26  ;;  %v10142_v25 = vld [vmem:[#allocation5 + $0x3d8] sm:$0xff]  ;;  %v10089_v26 = vld [vmem:[#allocation5 + $0x230] sm:$0xff] }
 0xef1   :  { %15340 = vmatpush1.bf16.msra.mxu1 %v15339_v43  ;;  %v10026_v43 = vld [vmem:[#allocation5 + $0x38] sm:$0xff] }
 0xef2   :  { %15320 = vmatpush3.bf16.msra.mxu0 %v15319_v7  ;;  %15342 = vmatprep.subr.bf16.mxu1 %v15341_v51  ;;  %v15355_v7 = vpack.c.bf16 %v10057_v13, %v10027_v52  ;;  %v10147_v51 = vld [vmem:[#allocation5 + $0x400] sm:$0xff]  ;;  %v10126_v52 = vld [vmem:[#allocation5 + $0x358] sm:$0xff] }
 0xef3   :  { %15322 = vmatprep.subr.bf16.mxu0 %v15321_v23  ;;  %v10087_v23 = vld [vmem:[#allocation5 + $0x220] sm:$0xff] }
 0xef4   :  { %v15359_v3 = vpack.c.bf16 %v10117_v21, %v10087_v23  ;;  %v10034_v23 = vld [vmem:[#allocation5 + $0x78] sm:$0xff]  ;;  %v10064_v21 = vld [vmem:[#allocation5 + $0x168] sm:$0xff] }
 0xef5   :  { %15344 = vmatpush1.bf16.msra.mxu1 %v15343_v53  ;;  %v10055_v53 = vld [vmem:[#allocation5 + $0x120] sm:$0xff]  ;;  %v15377_v38 = vpack.c.bf16 %v10064_v21, %v10034_v23  ;;  %v10041_v23 = vld [vmem:[#allocation5 + $0xb0] sm:$0xff] }
 0xef6   :  { %10480 = vmatprep.subr.mxu1 %v10144_v36  ;;  %v10036_v36 = vld [vmem:[#allocation5 + $0x88] sm:$0xff]  ;;  %v10071_v21 = vld [vmem:[#allocation5 + $0x1a0] sm:$0xff] }
 0xef9   :  { %10481 = vmatpush1.msra.mxu1 %v10143_v18  ;;  %v10066_v18 = vld [vmem:[#allocation5 + $0x178] sm:$0xff] }
 0xefa   :  { %15354 = vmatprep.subr.bf16.mxu1 %v15353_v48  ;;  %v10090_v48 = vld [vmem:[#allocation5 + $0x238] sm:$0xff]  ;;  %v15385_v13 = vpack.c.bf16 %v10066_v18, %v10036_v36  ;;  %v10043_v36 = vld [vmem:[#allocation5 + $0xc0] sm:$0xff] }
 0xfa4   :  { %v9603_v50 = vpop.f32.mrb[182].mxu0 }
 0xfa5   :  { %v14051_v16 = vpop.f32.mrb[183].mxu0 }
 0xfa6   :  { %v10081_v16 = vld [vmem:[#allocation5 + $0x1f0] sm:$0xff] }
 0xfa7   :  { %v15335_v61 = vpack.c.bf16 %v10111_v19, %v10081_v16  ;;  %v10125_v16 = vld [vmem:[#allocation5 + $0x350] sm:$0xff]  ;;  %v10156_v19 = vld [vmem:[#allocation5 + $0x448] sm:$0xff] }
 0xfa8   :  { %v9678_v12 = vpop.f32.mrb[184].mxu0 }
 0xfa9   :  { %9908 = vrot.lane.b32.xlu1 %v9678_v12, %s15829_s16  ;;  %v14058_v54 = vpop.f32.mrb[185].mxu0 }
 0xfac   :  { %v9753_v49 = vpop.f32.mrb[186].mxu0 }
 0xfad   :  { %9912 = vrot.lane.b32.xlu0 %v9753_v49, %s15835_s5  ;;  %v14065_v31 = vpop.f32.mrb[187].mxu0  ;;  %v10148_v49 = vld [vmem:[#allocation5 + $0x408] sm:$0xff] }
 0xfae   :  { %v10141_v31 = vld [vmem:[#allocation5 + $0x3d0] sm:$0xff] }
 0xfb0   :  { %v9828_v41 = vpop.f32.mrb[188].mxu0 }
 0xfb1   :  { %9916 = vrot.lane.b32.xlu1 %v9828_v41, %s15840_s2  ;;  %v14072_v57 = vpop.f32.mrb[189].mxu0  ;;  %v10031_v41 = vld [vmem:[#allocation5 + $0x60] sm:$0xff] }
 0xfb2   :  { %v10061_v57 = vld [vmem:[#allocation5 + $0x150] sm:$0xff] }
 0xfb3   :  { %v15371_v32 = vpack.c.bf16 %v10061_v57, %v10031_v41  ;;  %v10130_v41 = vld [vmem:[#allocation5 + $0x378] sm:$0xff] }
 0xfb4   :  { %v9903_v9 = vpop.f32.mrb[190].mxu0 }
 0xfb5   :  { %9920 = vrot.lane.b32.xlu0 %v9903_v9, %s15836_s9  ;;  %v14079_v27 = vpop.f32.mrb[191].mxu0  ;;  %v10086_v9 = vld [vmem:[#allocation5 + $0x218] sm:$0xff] }
 0xfb6   :  { %v15345_v27 = vpack.c.bf16 %v10056_v60, %v10026_v43  ;;  %v10033_v43 = vld [vmem:[#allocation5 + $0x70] sm:$0xff]  ;;  %v10063_v60 = vld [vmem:[#allocation5 + $0x160] sm:$0xff] }
0x101b   :  { %v9909_v14 = vpop.permute.xlu1 %9908 }
0x101c   :  { %v9924_v63 = vsel %vm9923_vm2, %v9603_v50, %v9909_v14  ;;  %v15331_v50 = vpack.c.bf16 %v10051_v46, %v10021_v29  ;;  %v10116_v14 = vld [vmem:[#allocation5 + $0x308] sm:$0xff] }
0x101d   :  { %v10120_v29 = vld [vmem:[#allocation5 + $0x328] sm:$0xff] }
0x101e   :  { %v10096_v46 = vld [vmem:[#allocation5 + $0x268] sm:$0xff]  ;;  %v15365_v55 = vpack.c.bf16 %v10120_v29, %v10090_v48  ;;  %v10097_v29 = vld [vmem:[#allocation5 + $0x270] sm:$0xff] }
0x101f   :  { %v9913_v35 = vpop.permute.xlu0 %9912 }
0x1020   :  { %v9925_v22 = vsel %vm4356_vm6, %v9924_v63, %v9913_v35  ;;  %v10092_v35 = vld [vmem:[#allocation5 + $0x248] sm:$0xff]  ;;  %v15349_v63 = vpack.c.bf16 %v10116_v14, %v10086_v9  ;;  %v15379_v9 = vpack.c.bf16 %v10063_v60, %v10033_v43  ;;  %v10093_v14 = vld [vmem:[#allocation5 + $0x250] sm:$0xff] }
0x1021   :  { %v10132_v43 = vld [vmem:[#allocation5 + $0x388] sm:$0xff] }
0x1022   :  { %v10108_v60 = vld [vmem:[#allocation5 + $0x2c8] sm:$0xff] }
0x1023   :  { %v9917_v37 = vpop.permute.xlu1 %9916 }
0x1024   :  { %v9927_v2 = vsel %vm9926_vm3, %v9925_v22, %v9917_v37  ;;  %v15347_v37 = vpack.c.bf16 %v10055_v53, %v10025_v20  ;;  %v15373_v22 = vpack.c.bf16 %v10122_v15, %v10092_v35  ;;  %v10124_v20 = vld [vmem:[#allocation5 + $0x348] sm:$0xff] }
0x1025   :  { %v10100_v53 = vld [vmem:[#allocation5 + $0x288] sm:$0xff] }
0x1026   :  { %v15405_v15 = vpack.c.bf16 %v10130_v41, %v10100_v53 }
0x1027   :  { %v9921_v0 = vpop.permute.xlu0 %9920 }
0x1028   :  { %v9928_v39 = vsel %vm859_vm4, %v9927_v2, %v9921_v0  ;;  %v10091_v2 = vld [vmem:[#allocation5 + $0x240] sm:$0xff]  ;;  %v10121_v0 = vld [vmem:[#allocation5 + $0x330] sm:$0xff] }
0x1029   :  { %14101 = vmatmul.mubr.msk.f32.vlgmr.msra.gmra.mrb[192].mxu0 %vm6521_vm5, %v9928_v39  ;;  %v15375_v11 = vpack.c.bf16 %v10121_v0, %v10091_v2  ;;  %v10152_v39 = vld [vmem:[#allocation5 + $0x428] sm:$0xff]  ;;  %v10038_v2 = vld [vmem:[#allocation5 + $0x98] sm:$0xff] }
0x102a   :  { %15324 = vmatpush1.bf16.msra.mxu0 %v15323_v1  ;;  %10394 = vmatprep.mubr.f32.mxu0 %v15839_v6  ;;  %v10115_v1 = vld [vmem:[#allocation5 + $0x300] sm:$0xff]  ;;  %v10068_v0 = vld [vmem:[#allocation5 + $0x188] sm:$0xff] }
0x102b   :  { %15326 = vmatprep.subr.bf16.mxu0 %v15325_v58  ;;  %v15351_v58 = vpack.c.bf16 %v10115_v1, %v10085_v47  ;;  %v10160_v1 = vld [vmem:[#allocation5 + $0x468] sm:$0xff]  ;;  %v15393_v18 = vpack.c.bf16 %v10068_v0, %v10038_v2  ;;  %v10161_v2 = vld [vmem:[#allocation5 + $0x470] sm:$0xff]  ;;  %v10167_v0 = vld [vmem:[#allocation5 + $0x4a0] sm:$0xff] }
0x102e   :  { %15328 = vmatpush1.bf16.msra.mxu0 %v15327_v42  ;;  %v10030_v42 = vld [vmem:[#allocation5 + $0x58] sm:$0xff] }
0x102f   :  { %10338 = vmatprep.subr.mxu0 %v10140_v24  ;;  %v10060_v24 = vld [vmem:[#allocation5 + $0x148] sm:$0xff] }
0x1032   :  { %10339 = vmatpush1.msra.mxu0 %v10139_v10  ;;  %v10151_v10 = vld [vmem:[#allocation5 + $0x420] sm:$0xff] }
0x1033   :  { %15330 = vmatprep.subr.bf16.mxu0 %v15329_v40  ;;  %v10059_v40 = vld [vmem:[#allocation5 + $0x140] sm:$0xff] }
0x1034   :  { %v15363_v59 = vpack.c.bf16 %v10059_v40, %v10029_v17  ;;  %v10128_v17 = vld [vmem:[#allocation5 + $0x368] sm:$0xff] }
0x1035   :  { %v10104_v40 = vld [vmem:[#allocation5 + $0x2a8] sm:$0xff] }
0x10fc   :  { %v10015_v45 = vpop.f32.mrb[192].mxu0 }
0x10fd   :  { %v19172_v12 = vadd.f32 %v12422_v8, %v10015_v45  ;;  %v14102_v54 = vpop.f32.mrb[193].mxu0  ;;  %v15361_v8 = vpack.c.bf16 %v10060_v24, %v10030_v42  ;;  %v15389_v45 = vpack.c.bf16 %v10126_v52, %v10096_v46  ;;  %v10037_v42 = vld [vmem:[#allocation5 + $0x90] sm:$0xff]  ;;  %v10067_v24 = vld [vmem:[#allocation5 + $0x180] sm:$0xff]  ;;  %v15421_v52 = vpack.c.bf16 %v10134_v4, %v10104_v40 }
0x10fe   :  { %v15395_v48 = vpack.c.bf16 %v10067_v24, %v10037_v42  ;;  %v10135_v42 = vld [vmem:[#allocation5 + $0x3a0] sm:$0xff] }
0x10ff   :  { %12424 = vmatmul.mubr.msk.f32.vlgmr.msra.gmra.mrb[194].mxu0 %vm7807_vm13, %v19172_v12  ;;  %12426 = vmatmul.mubr.msk.f32.vlgmr.msra.gmra.mrb[168].mxu1 %vm7807_vm13, %v19172_v12  ;;  %v10169_v4 = vld [vmem:[%s15991_s27] sm:$0xff] }
0x1100   :  { %15332 = vmatpush1.bf16.msra.mxu0 %v15331_v50  ;;  %15356 = vmatpush1.bf16.msra.mxu1 %v15355_v7  ;;  %v10119_v50 = vld [vmem:[#allocation5 + $0x320] sm:$0xff] }
0x1101   :  { %15334 = vmatprep.subr.bf16.mxu0 %v15333_v30  ;;  %15358 = vmatprep.subr.bf16.mxu1 %v15357_v33  ;;  %v10095_v7 = vld [vmem:[#allocation5 + $0x260] sm:$0xff]  ;;  %v15367_v54 = vpack.c.bf16 %v10119_v50, %v10089_v26  ;;  %v10150_v33 = vld [vmem:[#allocation5 + $0x418] sm:$0xff]  ;;  %v10164_v50 = vld [vmem:[#allocation5 + $0x488] sm:$0xff] }
0x1102   :  { %10465 = vmatprep.mubr.f32.mxu0 %v15839_v6  ;;  %10678 = vmatprep.mubr.f32.mxu1 %v15839_v6  ;;  %v15391_v30 = vpack.c.bf16 %v10125_v16, %v10095_v7  ;;  %v10042_v7 = vld [vmem:[#allocation5 + $0xb8] sm:$0xff]  ;;  %v10072_v16 = vld [vmem:[#allocation5 + $0x1a8] sm:$0xff] }
0x1104   :  { %15336 = vmatpush1.bf16.msra.mxu0 %v15335_v61  ;;  %15360 = vmatpush1.bf16.msra.mxu1 %v15359_v3  ;;  %v10040_v61 = vld [vmem:[#allocation5 + $0xa8] sm:$0xff]  ;;  %v10149_v3 = vld [vmem:[#allocation5 + $0x410] sm:$0xff] }
0x1105   :  { %10409 = vmatprep.subr.mxu0 %v10142_v25  ;;  %10622 = vmatprep.subr.mxu1 %v10148_v49  ;;  %v10155_v25 = vld [vmem:[#allocation5 + $0x440] sm:$0xff]  ;;  %v10070_v49 = vld [vmem:[#allocation5 + $0x198] sm:$0xff] }
0x1106   :  { %v15401_v57 = vpack.c.bf16 %v10070_v49, %v10040_v61  ;;  %v10047_v61 = vld [vmem:[#allocation5 + $0xe0] sm:$0xff]  ;;  %v15409_v49 = vpack.c.bf16 %v10072_v16, %v10042_v7  ;;  %v15841_v16 = vmov 1983009808  }
0x1108   :  { %10410 = vmatpush1.msra.mxu0 %v10141_v31  ;;  %10623 = vmatpush1.msra.mxu1 %v10147_v51  ;;  %v10069_v31 = vld [vmem:[#allocation5 + $0x190] sm:$0xff]  ;;  %v10094_v51 = vld [vmem:[#allocation5 + $0x258] sm:$0xff] }
0x1109   :  { %12425 = vmatmul.mubr.msk.f32.vlgmr.msra.gmra.mrb[196].mxu0 %vm7807_vm13, %v19172_v12  ;;  %15346 = vmatprep.subr.bf16.mxu0 %v15345_v27  ;;  %v15403_v27 = vpack.c.bf16 %v10069_v31, %v10039_v44  ;;  %v15381_v35 = vpack.c.bf16 %v10124_v20, %v10094_v51  ;;  %v10138_v44 = vld [vmem:[#allocation5 + $0x3b8] sm:$0xff]  ;;  %v15411_v51 = vpack.c.bf16 %v10071_v21, %v10041_v23  ;;  %v10101_v20 = vld [vmem:[#allocation5 + $0x290] sm:$0xff] }
0x110a   :  { %12428 = vmatmul.mubr.msk.f32.vlgmr.msra.gmra.mrb[170].mxu1 %vm7807_vm13, %v19172_v12  ;;  %15370 = vmatprep.subr.bf16.mxu1 %v15369_v5  ;;  %v10123_v5 = vld [vmem:[#allocation5 + $0x340] sm:$0xff]  ;;  %v15437_v41 = vpack.c.bf16 %v10138_v44, %v10108_v60 }
0x110b   :  { %15348 = vmatpush1.bf16.msra.mxu0 %v15347_v37  ;;  %15372 = vmatpush1.bf16.msra.mxu1 %v15371_v32  ;;  %v10099_v37 = vld [vmem:[#allocation5 + $0x280] sm:$0xff]  ;;  %v10129_v32 = vld [vmem:[#allocation5 + $0x370] sm:$0xff]  ;;  %v15383_v47 = vpack.c.bf16 %v10123_v5, %v10093_v14  ;;  %v10168_v5 = vld [vmem:[#allocation5 + $0x4a8] sm:$0xff] }
0x110c   :  { %15350 = vmatprep.subr.bf16.mxu0 %v15349_v63  ;;  %15374 = vmatprep.subr.bf16.mxu1 %v15373_v22  ;;  %v15407_v63 = vpack.c.bf16 %v10129_v32, %v10099_v37  ;;  %v10154_v22 = vld [vmem:[#allocation5 + $0x438] sm:$0xff]  ;;  %v10076_v32 = vld [vmem:[#allocation5 + $0x1c8] sm:$0xff] }
0x110d   :  { %10607 = vmatprep.mubr.f32.mxu0 %v15839_v6  ;;  %10820 = vmatprep.mubr.f32.mxu1 %v15839_v6  ;;  %v10046_v37 = vld [vmem:[#allocation5 + $0xd8] sm:$0xff] }
0x110f   :  { %15352 = vmatpush1.bf16.msra.mxu0 %v15351_v58  ;;  %15376 = vmatpush1.bf16.msra.mxu1 %v15375_v11  ;;  %v10044_v58 = vld [vmem:[#allocation5 + $0xc8] sm:$0xff]  ;;  %v10153_v11 = vld [vmem:[#allocation5 + $0x430] sm:$0xff] }
0x1110   :  { %10551 = vmatprep.subr.mxu0 %v10146_v62  ;;  %10764 = vmatprep.subr.mxu1 %v10152_v39  ;;  %v10159_v62 = vld [vmem:[#allocation5 + $0x460] sm:$0xff]  ;;  %v10074_v39 = vld [vmem:[#allocation5 + $0x1b8] sm:$0xff] }
0x1111   :  { %v15417_v56 = vpack.c.bf16 %v10074_v39, %v10044_v58  ;;  %v15425_v58 = vpack.c.bf16 %v10076_v32, %v10046_v37  ;;  %v10105_v39 = vld [vmem:[#allocation5 + $0x2b0] sm:$0xff] }
0x1112   :  { %v15431_v24 = vpack.c.bf16 %v10135_v42, %v10105_v39 }
0x1113   :  { %10552 = vmatpush1.msra.mxu0 %v10145_v34  ;;  %10765 = vmatpush1.msra.mxu1 %v10151_v10  ;;  %v10073_v34 = vld [vmem:[#allocation5 + $0x1b0] sm:$0xff]  ;;  %v10098_v10 = vld [vmem:[#allocation5 + $0x278] sm:$0xff] }
0x1114   :  { %12427 = vmatmul.mubr.msk.f32.vlgmr.msra.gmra.mrb[198].mxu0 %vm7807_vm13, %v19172_v12  ;;  %15362 = vmatprep.subr.bf16.mxu0 %v15361_v8  ;;  %v15419_v8 = vpack.c.bf16 %v10073_v34, %v10043_v36  ;;  %v15397_v46 = vpack.c.bf16 %v10128_v17, %v10098_v10  ;;  %v10166_v36 = vld [vmem:[#allocation5 + $0x498] sm:$0xff]  ;;  %v10165_v34 = vld [vmem:[#allocation5 + $0x490] sm:$0xff]  ;;  %v10177_v10 = vlaneseq }
0x1115   :  { %12430 = vmatmul.mubr.msk.f32.vlgmr.msra.gmra.mrb[172].mxu1 %vm7807_vm13, %v19172_v12  ;;  %15386 = vmatprep.subr.bf16.mxu1 %v15385_v13  ;;  %v10127_v13 = vld [vmem:[#allocation5 + $0x360] sm:$0xff] }
0x1116   :  { %15364 = vmatpush1.bf16.msra.mxu0 %v15363_v59  ;;  %15388 = vmatpush1.bf16.msra.mxu1 %v15387_v28  ;;  %v10103_v59 = vld [vmem:[#allocation5 + $0x2a0] sm:$0xff]  ;;  %v10133_v28 = vld [vmem:[#allocation5 + $0x390] sm:$0xff]  ;;  %v15399_v26 = vpack.c.bf16 %v10127_v13, %v10097_v29 }
0x1117   :  { %15366 = vmatprep.subr.bf16.mxu0 %v15365_v55  ;;  %15390 = vmatprep.subr.bf16.mxu1 %v15389_v45  ;;  %v15423_v55 = vpack.c.bf16 %v10133_v28, %v10103_v59  ;;  %v10158_v45 = vld [vmem:[#allocation5 + $0x458] sm:$0xff] }
0x1118   :  { %10749 = vmatprep.mubr.f32.mxu0 %v15839_v6  ;;  %10962 = vmatprep.mubr.f32.mxu1 %v15839_v6 }
0x111a   :  { %15368 = vmatpush1.bf16.msra.mxu0 %v15367_v54  ;;  %15392 = vmatpush1.bf16.msra.mxu1 %v15391_v30  ;;  %v10048_v54 = vld [vmem:[#allocation5 + $0xe8] sm:$0xff]  ;;  %v10157_v30 = vld [vmem:[#allocation5 + $0x450] sm:$0xff] }
0x111b   :  { %10693 = vmatprep.subr.mxu0 %v10150_v33  ;;  %10906 = vmatprep.subr.mxu1 %v10156_v19  ;;  %v10163_v33 = vld [vmem:[#allocation5 + $0x480] sm:$0xff]  ;;  %v10078_v19 = vld [vmem:[#allocation5 + $0x1d8] sm:$0xff] }
0x111c   :  { %v15433_v31 = vpack.c.bf16 %v10078_v19, %v10048_v54  ;;  %v11428_v54 = vunpack.c.l.s4 %v15841_v16  ;;  %v19235_v19 = vld [vmem:[%s15991_s27 + $0x8] sm:$0xff] }
0x111e   :  { %10694 = vmatpush1.msra.mxu0 %v10149_v3  ;;  %10907 = vmatpush1.msra.mxu1 %v10155_v25  ;;  %v10077_v3 = vld [vmem:[#allocation5 + $0x1d0] sm:$0xff]  ;;  %v10102_v25 = vld [vmem:[#allocation5 + $0x298] sm:$0xff]  ;;  %v11429_v21 = vunpack.c.0.s8 %v11428_v54 }
0x111f   :  { %12429 = vmatmul.mubr.msk.f32.vlgmr.msra.gmra.mrb[200].mxu0 %vm7807_vm13, %v19172_v12  ;;  %15378 = vmatprep.subr.bf16.mxu0 %v15377_v38  ;;  %v15435_v38 = vpack.c.bf16 %v10077_v3, %v10047_v61  ;;  %v15413_v53 = vpack.c.bf16 %v10132_v43, %v10102_v25 }
0x1120   :  { %12432 = vmatmul.mubr.msk.f32.vlgmr.msra.gmra.mrb[174].mxu1 %vm7807_vm13, %v19172_v12  ;;  %15402 = vmatprep.subr.bf16.mxu1 %v15401_v57  ;;  %v10131_v57 = vld [vmem:[#allocation5 + $0x380] sm:$0xff] }
0x1121   :  { %15380 = vmatpush1.bf16.msra.mxu0 %v15379_v9  ;;  %15404 = vmatpush1.bf16.msra.mxu1 %v15403_v27  ;;  %v10107_v9 = vld [vmem:[#allocation5 + $0x2c0] sm:$0xff]  ;;  %v10137_v27 = vld [vmem:[#allocation5 + $0x3b0] sm:$0xff]  ;;  %v15415_v14 = vpack.c.bf16 %v10131_v57, %v10101_v20 }
0x1122   :  { %15382 = vmatprep.subr.bf16.mxu0 %v15381_v35  ;;  %15406 = vmatprep.subr.bf16.mxu1 %v15405_v15  ;;  %v15439_v35 = vpack.c.bf16 %v10137_v27, %v10107_v9  ;;  %v10162_v15 = vld [vmem:[#allocation5 + $0x478] sm:$0xff] }
0x1123   :  { %10891 = vmatprep.mubr.f32.mxu0 %v15839_v6  ;;  %11104 = vmatprep.mubr.f32.mxu1 %v15839_v6 }
0x1125   :  { %15384 = vmatpush1.bf16.msra.mxu0 %v15383_v47  ;;  %15408 = vmatpush1.bf16.msra.mxu1 %v15407_v63  ;;  %v10045_v47 = vld [vmem:[#allocation5 + $0xd0] sm:$0xff]  ;;  %v10075_v63 = vld [vmem:[#allocation5 + $0x1c0] sm:$0xff] }
0x1126   :  { %10835 = vmatprep.subr.mxu0 %v10154_v22  ;;  %11048 = vmatprep.subr.mxu1 %v10160_v1  ;;  %v10106_v22 = vld [vmem:[#allocation5 + $0x2b8] sm:$0xff]  ;;  %v10136_v1 = vld [vmem:[#allocation5 + $0x3a8] sm:$0xff] }
0x1129   :  { %10836 = vmatpush1.msra.mxu0 %v10153_v11  ;;  %11049 = vmatpush1.msra.mxu1 %v10159_v62  ;;  %v15427_v11 = vpack.c.bf16 %v10075_v63, %v10045_v47  ;;  %v15429_v62 = vpack.c.bf16 %v10136_v1, %v10106_v22 }
0x112a   :  { %12431 = vmatmul.mubr.msk.f32.vlgmr.msra.gmra.mrb[202].mxu0 %vm7807_vm13, %v19172_v12  ;;  %15394 = vmatprep.subr.bf16.mxu0 %v15393_v18  ;;  %v10178_v18 = vshrl.u32 %v10177_v10, 7 }
0x112b   :  { %12434 = vmatmul.mubr.msk.f32.vlgmr.msra.gmra.mrb[176].mxu1 %vm7807_vm13, %v19172_v12  ;;  %15418 = vmatprep.subr.bf16.mxu1 %v15417_v56 }
0x112c   :  { %15396 = vmatpush1.bf16.msra.mxu0 %v15395_v48  ;;  %15420 = vmatpush1.bf16.msra.mxu1 %v15419_v8  ;;  %v19217_v17 = vsub.s32 0, %v10178_v18  ;;  %v19219_v40 = vsub.s32 4, %v10178_v18  ;;  %v19222_v56 = vsub.s32 1, %v10178_v18  ;;  %v19224_v48 = vsub.s32 5, %v10178_v18 }
0x112d   :  { %15398 = vmatprep.subr.bf16.mxu0 %v15397_v46  ;;  %15422 = vmatprep.subr.bf16.mxu1 %v15421_v52  ;;  %v19245_v57 = vsub.s32 6, %v10178_v18  ;;  %v19247_v27 = vsub.s32 7, %v10178_v18 }
0x112e   :  { %11033 = vmatprep.mubr.f32.mxu0 %v15839_v6  ;;  %11246 = vmatprep.mubr.f32.mxu1 %v15839_v6  ;;  %v10196_v8 = vrot.slane %v10169_v4, %v19219_v40  ;;  %v10184_v29 = vrot.slane %v10169_v4, %v19222_v56  ;;  %v10212_v61 = vrot.slane %v19235_v19, %v19217_v17 }
0x112f   :  { %v10216_v25 = vrot.slane %v19235_v19, %v19222_v56  ;;  %v10228_v37 = vrot.slane %v19235_v19, %v19219_v40  ;;  %v10208_v32 = vrot.slane %v10169_v4, %v19247_v27  ;;  %v10232_v47 = vrot.slane %v19235_v19, %v19224_v48 }
0x1130   :  { %15400 = vmatpush1.bf16.msra.mxu0 %v15399_v26  ;;  %15424 = vmatpush1.bf16.msra.mxu1 %v15423_v55 }
0x1131   :  { %10977 = vmatprep.subr.mxu0 %v10158_v45  ;;  %11190 = vmatprep.subr.mxu1 %v10164_v50  ;;  %v19230_v50 = vsub.s32 2, %v10178_v18 }
0x1133   :  { %v10188_v23 = vrot.slane %v10169_v4, %v19230_v50 }
0x1134   :  { %10978 = vmatpush1.msra.mxu0 %v10157_v30  ;;  %11191 = vmatpush1.msra.mxu1 %v10163_v33  ;;  %v19232_v33 = vsub.s32 3, %v10178_v18 }
0x1135   :  { %12433 = vmatmul.mubr.msk.f32.vlgmr.msra.gmra.mrb[204].mxu0 %vm7807_vm13, %v19172_v12  ;;  %15410 = vmatprep.subr.bf16.mxu0 %v15409_v49 }
0x1136   :  { %12436 = vmatmul.mubr.msk.f32.vlgmr.msra.gmra.mrb[178].mxu1 %vm7807_vm13, %v19172_v12  ;;  %15434 = vmatprep.subr.bf16.mxu1 %v15433_v31  ;;  %v10192_v3 = vrot.slane %v10169_v4, %v19232_v33  ;;  %v19243_v31 = vsub.s32 %v11429_v21, %v10178_v18  ;;  %v10220_v18 = vrot.slane %v19235_v19, %v19230_v50 }
0x1137   :  { %15412 = vmatpush1.bf16.msra.mxu0 %v15411_v51  ;;  %15436 = vmatpush1.bf16.msra.mxu1 %v15435_v38  ;;  %v10240_v21 = vrot.slane %v19235_v19, %v19247_v27 }
0x1138   :  { %15414 = vmatprep.subr.bf16.mxu0 %v15413_v53  ;;  %15438 = vmatprep.subr.bf16.mxu1 %v15437_v41 }
0x1139   :  { %11175 = vmatprep.mubr.f32.mxu0 %v15839_v6  ;;  %11388 = vmatprep.mubr.f32.mxu1 %v15839_v6 }
0x113b   :  { %15416 = vmatpush1.bf16.msra.mxu0 %v15415_v14  ;;  %15440 = vmatpush1.bf16.msra.mxu1 %v15439_v35 }
0x113c   :  { %11119 = vmatprep.subr.mxu0 %v10162_v15  ;;  %11332 = vmatprep.subr.mxu1 %v10168_v5  ;;  %v10204_v5 = vrot.slane %v10169_v4, %v19245_v57 }
0x113f   :  { %11120 = vmatpush1.msra.mxu0 %v10161_v2  ;;  %11333 = vmatpush1.msra.mxu1 %v10167_v0 }
0x1140   :  { %12435 = vmatmul.mubr.msk.f32.vlgmr.msra.gmra.mrb[206].mxu0 %vm7807_vm13, %v19172_v12  ;;  %15426 = vmatprep.subr.bf16.mxu0 %v15425_v58 }
0x1141   :  { %12438 = vmatmul.mubr.msk.f32.vlgmr.msra.gmra.mrb[180].mxu1 %vm7807_vm13, %v19172_v12  ;;  %15428 = vmatpush1.bf16.msra.mxu0 %v15427_v11 }
0x1142   :  { %15430 = vmatprep.subr.bf16.mxu0 %v15429_v62  ;;  %11317 = vmatprep.mubr.f32.mxu0 %v15839_v6  ;;  %v10180_v6 = vrot.slane %v10169_v4, %v19217_v17 }
0x1145   :  { %15432 = vmatpush1.bf16.msra.mxu0 %v15431_v24 }
0x1146   :  { %11261 = vmatprep.subr.mxu0 %v10166_v36 }
0x1149   :  { %11262 = vmatpush1.msra.mxu0 %v10165_v34  ;;  %v19260_v34 = vld [vmem:[%s15991_s27 + $0x10] sm:$0xff] }
0x114a   :  { %12437 = vmatmul.mubr.msk.f32.vlgmr.msra.gmra.mrb[208].mxu0 %vm7807_vm13, %v19172_v12  ;;  %v10200_v12 = vrot.slane %v10169_v4, %v19224_v48  ;;  %v10244_v4 = vrot.slane %v19260_v34, %v19217_v17 }
0x11d2   :  { %v10396_v46 = vpop.f32.mrb[194].mxu0  ;;  %v10538_v52 = vpop.f32.mrb[168].mxu1 }
0x11d3   :  { %v10397_v13 = vadd.f32 %v10396_v46, %v10180_v6  ;;  %v10539_v59 = vadd.f32 %v10538_v52, %v10196_v8  ;;  %v10398_v28 = vpop.f32.mrb[195].mxu0  ;;  %v10540_v26 = vpop.f32.mrb[169].mxu1  ;;  %v10224_v6 = vrot.slane %v19235_v19, %v19232_v33  ;;  %v10248_v8 = vrot.slane %v19260_v34, %v19222_v56 }
0x11d4   :  { %v10399_v55 = vadd.f32 %v10398_v28, %v10184_v29  ;;  %v10541_v45 = vadd.f32 %v10540_v26, %v10200_v12 }
0x11d6   :  { %v11425_v7 = vcombine.low %v10397_v13, %v10399_v55  ;;  %v11442_v30 = vcombine.low %v10539_v59, %v10541_v45 }
0x11d8   :  { %v11433_v14 = vrot.slane %v11425_v7, %v19243_v31  ;;  %v11450_v24 = vrot.slane %v11442_v30, %v19243_v31  ;;  %v10236_v30 = vrot.slane %v19235_v19, %v19245_v57 }
0x11dc   :  { %v10467_v49 = vpop.f32.mrb[196].mxu0 }
0x11dd   :  { %v10468_v43 = vadd.f32 %v10467_v49, %v10188_v23  ;;  %v10680_v60 = vpop.f32.mrb[170].mxu1  ;;  %v10469_v44 = vpop.f32.mrb[197].mxu0  ;;  %v10260_v23 = vrot.slane %v19260_v34, %v19219_v40 }
0x11de   :  { %v10681_v51 = vadd.f32 %v10680_v60, %v10212_v61  ;;  %v10470_v38 = vadd.f32 %v10469_v44, %v10192_v3  ;;  %v10682_v20 = vpop.f32.mrb[171].mxu1  ;;  %v10264_v61 = vrot.slane %v19260_v34, %v19224_v48 }
0x11df   :  { %v10683_v53 = vadd.f32 %v10682_v20, %v10216_v25 }
0x11e0   :  { %v11426_v41 = vcombine.low %v10468_v43, %v10470_v38 }
0x11e1   :  { %v11459_v9 = vcombine.low %v10681_v51, %v10683_v53 }
0x11e2   :  { %v11440_v35 = vrot.slane %v11426_v41, %v19243_v31 }
0x11e3   :  { %v11467_v7 = vrot.slane %v11459_v9, %v19243_v31 }
0x11e4   :  { %v11441_v15 = vcombine.low %v11433_v14, %v11440_v35  ;;  %v10172_v14 = vld [vmem:[%s15991_s27 + $0x18] sm:$0x3f]  ;;  %v10252_v35 = vrot.slane %v19260_v34, %v19230_v50  ;;  %s11574_s27 = sshll.u32 %s15842_s30, 4  ;;  %s11575_s27 = int_to_ptr.vmem [resolvable:$true] %s11574_s27 }
0x11e5   :  { %s15770_s7 = scalar_lea.vmem %s11575_s27, 960  ;;  %p15775_p3 = scmp.lt.s32.totalorder %s11575_s27, %s11575_s27 }
0x11e6   :  { %11560 = vst [vmem:[#allocation7] sm:$0xff] %v11441_v15  ;;  %v10276_v15 = vrot.slane %v10172_v14, %v19217_v17  ;;  %p15771_p2 = scmp.ne.s32.totalorder %s11575_s27, %s15770_s7  ;;  %p15776_p4 = scmp.lt.s32.totalorder %s15770_s7, %s15770_s7 }
0x11e7   :  { %v10609_v63 = vpop.f32.mrb[198].mxu0 }
0x11e8   :  { %v10610_v22 = vadd.f32 %v10609_v63, %v10204_v5  ;;  %v10822_v1 = vpop.f32.mrb[172].mxu1  ;;  %v10611_v2 = vpop.f32.mrb[199].mxu0  ;;  %v10256_v5 = vrot.slane %v19260_v34, %v19232_v33  ;;  %p15777_p5 = por %p15776_p4, %p15775_p3 }
0x11e9   :  { %v10823_v0 = vadd.f32 %v10822_v1, %v10228_v37  ;;  %v10612_v58 = vadd.f32 %v10611_v2, %v10208_v32  ;;  %v10824_v11 = vpop.f32.mrb[173].mxu1  ;;  %v10280_v37 = vrot.slane %v10172_v14, %v19222_v56  ;;  %v10292_v56 = vrot.slane %v10172_v14, %v19219_v40 }
0x11ea   :  { %v10825_v62 = vadd.f32 %v10824_v11, %v10232_v47  ;;  %p15778_p6 = pnand %p15777_p5, %p15771_p2 }
0x11eb   :  { %v11443_v39 = vcombine.low %v10610_v22, %v10612_v58 }
0x11ec   :  { %v11476_v42 = vcombine.low %v10823_v0, %v10825_v62 }
0x11ed   :  { %v11457_v36 = vrot.slane %v11443_v39, %v19243_v31 }
0x11ee   :  { %v11484_v41 = vrot.slane %v11476_v42, %v19243_v31 }
0x11ef   :  { %v11458_v10 = vcombine.low %v11450_v24, %v11457_v36  ;;  %v10268_v24 = vrot.slane %v19260_v34, %v19245_v57  ;;  %v10272_v36 = vrot.slane %v19260_v34, %v19247_v27  ;;  %v10284_v27 = vrot.slane %v10172_v14, %v19230_v50 }
0x11f1   :  { %11561 = vst [vmem:[#allocation7 + $0x8] sm:$0xff] %v11458_v10  ;;  %v10296_v10 = vrot.slane %v10172_v14, %v19224_v48  ;;  %v10288_v48 = vrot.slane %v10172_v14, %v19232_v33 }
0x11f2   :  { %v10751_v29 = vpop.f32.mrb[200].mxu0 }
0x11f3   :  { %v10752_v12 = vadd.f32 %v10751_v29, %v10220_v18  ;;  %v10964_v46 = vpop.f32.mrb[174].mxu1  ;;  %v10753_v52 = vpop.f32.mrb[201].mxu0 }
0x11f4   :  { %v10965_v13 = vadd.f32 %v10964_v46, %v10244_v4  ;;  %v10754_v59 = vadd.f32 %v10753_v52, %v10224_v6  ;;  %v10966_v28 = vpop.f32.mrb[175].mxu1 }
0x11f5   :  { %v10967_v26 = vadd.f32 %v10966_v28, %v10248_v8 }
0x11f6   :  { %v11460_v55 = vcombine.low %v10752_v12, %v10754_v59 }
0x11f7   :  { %v11493_v45 = vcombine.low %v10965_v13, %v10967_v26 }
0x11f8   :  { %v11474_v16 = vrot.slane %v11460_v55, %v19243_v31 }
0x11f9   :  { %v11501_v39 = vrot.slane %v11493_v45, %v19243_v31 }
0x11fa   :  { %v11475_v54 = vcombine.low %v11467_v7, %v11474_v16 }
0x11fc   :  { %11562 = vst [vmem:[#allocation7 + $0x10] sm:$0xff] %v11475_v54 }
0x11fd   :  { %v10893_v3 = vpop.f32.mrb[202].mxu0 }
0x11fe   :  { %v10894_v25 = vadd.f32 %v10893_v3, %v10236_v30  ;;  %v11106_v49 = vpop.f32.mrb[176].mxu1  ;;  %v10895_v43 = vpop.f32.mrb[203].mxu0 }
0x11ff   :  { %v11107_v60 = vadd.f32 %v11106_v49, %v10260_v23  ;;  %v10896_v44 = vadd.f32 %v10895_v43, %v10240_v21  ;;  %v11108_v51 = vpop.f32.mrb[177].mxu1 }
0x1200   :  { %v11109_v38 = vadd.f32 %v11108_v51, %v10264_v61 }
0x1201   :  { %v11477_v20 = vcombine.low %v10894_v25, %v10896_v44 }
0x1202   :  { %v11510_v53 = vcombine.low %v11107_v60, %v11109_v38 }
0x1203   :  { %v11491_v9 = vrot.slane %v11477_v20, %v19243_v31 }
0x1204   :  { %v11518_v57 = vrot.slane %v11510_v53, %v19243_v31 }
0x1205   :  { %v11492_v19 = vcombine.low %v11484_v41, %v11491_v9 }
0x1207   :  { %11563 = vst [vmem:[#allocation7 + $0x18] sm:$0xff] %v11492_v19 }
0x1208   :  { %v11035_v32 = vpop.f32.mrb[204].mxu0 }
0x1209   :  { %v11036_v47 = vadd.f32 %v11035_v32, %v10252_v35  ;;  %v11248_v63 = vpop.f32.mrb[178].mxu1  ;;  %v11037_v22 = vpop.f32.mrb[205].mxu0 }
0x120a   :  { %v11249_v1 = vadd.f32 %v11248_v63, %v10276_v15  ;;  %v11038_v2 = vadd.f32 %v11037_v22, %v10256_v5  ;;  %v11250_v0 = vpop.f32.mrb[179].mxu1 }
0x120b   :  { %v11251_v58 = vadd.f32 %v11250_v0, %v10280_v37 }
0x120c   :  { %v11494_v11 = vcombine.low %v11036_v47, %v11038_v2 }
0x120d   :  { %v11527_v62 = vcombine.low %v11249_v1, %v11251_v58 }
0x120e   :  { %v11508_v17 = vrot.slane %v11494_v11, %v19243_v31 }
0x120f   :  { %v11535_v16 = vrot.slane %v11527_v62, %v19243_v31 }
0x1210   :  { %v11509_v42 = vcombine.low %v11501_v39, %v11508_v17 }
0x1212   :  { %11564 = vst [vmem:[#allocation7 + $0x20] sm:$0xff] %v11509_v42 }
0x1213   :  { %v11177_v18 = vpop.f32.mrb[206].mxu0 }
0x1214   :  { %v11178_v4 = vadd.f32 %v11177_v18, %v10268_v24  ;;  %v11390_v6 = vpop.f32.mrb[180].mxu1  ;;  %v11179_v8 = vpop.f32.mrb[207].mxu0 }
0x1215   :  { %v11391_v29 = vadd.f32 %v11390_v6, %v10292_v56  ;;  %v11180_v12 = vadd.f32 %v11179_v8, %v10272_v36  ;;  %v11392_v46 = vpop.f32.mrb[181].mxu1 }
0x1216   :  { %v11393_v52 = vadd.f32 %v11392_v46, %v10296_v10 }
0x1217   :  { %v11511_v13 = vcombine.low %v11178_v4, %v11180_v12 }
0x1218   :  { %v11544_v59 = vcombine.low %v11391_v29, %v11393_v52 }
0x1219   :  { %v11525_v40 = vrot.slane %v11511_v13, %v19243_v31 }
0x121a   :  { %12439 = vst.sshfl [vmem:[#allocation7 + $0x38] sm:$0x33 pattern:$0x76325410] %v11544_v59 }
0x121b   :  { %v11526_v34 = vcombine.low %v11518_v57, %v11525_v40 }
0x121d   :  { %11565 = vst [vmem:[#allocation7 + $0x28] sm:$0xff] %v11526_v34  ;;  %v11319_v28 = vpop.f32.mrb[208].mxu0 }
0x121e   :  { %v11320_v26 = vadd.f32 %v11319_v28, %v10284_v27  ;;  %v11321_v55 = vpop.f32.mrb[209].mxu0 }
0x121f   :  { %v11322_v45 = vadd.f32 %v11321_v55, %v10288_v48 }
0x1221   :  { %v11528_v7 = vcombine.low %v11320_v26, %v11322_v45 }
0x1223   :  { %v11542_v54 = vrot.slane %v11528_v7, %v19243_v31 }
0x1225   :  { %v11543_v30 = vcombine.low %v11535_v16, %v11542_v54 }
0x1227   :  { %11566 = vst [vmem:[#allocation7 + $0x30] sm:$0xff] %v11543_v30 }
0x1228   :  { %15781 = shalt.err (!%p15778_p6)
}
0x1229   :  { %s15782_s10 = scalar_lea.hbm %s15996_s19, 960 }
0x122a   :  { %p15783_p7 = scmp.ne.s32.totalorder %s15996_s19, %s15782_s10  ;;  %p15786_p8 = scmp.lt.u32.totalorder %s15782_s10, %s15996_s19 }
0x122c   :  { %p15788_p9 = pnand %p15786_p8, %p15783_p7 }
0x122e   :  { %15791 = shalt.err (!%p15788_p9)
}
0x122f   :  { %11577 = dma.vmem_to_hbm [thread:$0]  %s11575_s27, 960, %s15996_s19, [#allocation4]  }
0x1230   :  { %15796 = dma.done.wait [#allocation4], 960  }
0x1231   :  { %15797 = vsyncadd [#allocation4], 4294966336 }
0x1232   :  { %11581 = vsyncpa [#allocation3], 1 }
0x1233   :  { %11582 = vsyncpa [#allocation6], 1 }
0x1234   :  { %11583 = vsyncpa [#allocation4], 1 }

</bundles_post_ra>
